<compile_context>
chip_gen: v5e
topology: v5e:2x2
jax: 0.10.0
libtpu: 0.0.40
codegen_flags: <defaults>
</compile_context>

<pallas_src>
import math

import jax
import jax.numpy as jnp
from jax.experimental import pallas as pl
from jax.experimental.pallas import tpu as pltpu


def _fma_kernel(g_ref, h_ref, x_ref, o_ref):
    # g_ref, h_ref : (CF, 1)  float32 gate / bias terms (broadcast over lanes = time)
    # x_ref, o_ref : (CF, tT) one time tile of the input / output
    x = x_ref[...].astype(jnp.float32)
    o_ref[...] = (g_ref[...] * x + h_ref[...]).astype(o_ref.dtype)


def band_filter_gate(x, filters, bias, alpha, beta, *, time_tile=512):
    """Forward pass of BandFilterGate.

    x: (B, C, F, T); filters/bias: (B, C, F, 1); alpha/beta: (1, C, F, 1).
    Returns (B, C, F, T) with out = sigmoid(alpha*filters)*x + tanh(beta*bias).
    """
    B, C, Fr, T = x.shape
    CF = C * Fr

    # Tiny per-(B, C, F) gate terms, computed once in f32 (review: keep gates in
    # f32 regardless of x dtype; avoid any per-tile transcendental recompute).
    g = jax.nn.sigmoid(alpha.astype(jnp.float32) * filters.astype(jnp.float32))
    h = jnp.tanh(beta.astype(jnp.float32) * bias.astype(jnp.float32))

    if T < 128:
        # Lane axis too narrow for an efficient Pallas kernel (masked partial
        # stores + per-call overhead dominate); let XLA fuse the FMA instead.
        return (g * x.astype(jnp.float32) + h).astype(x.dtype)

    # Merge C and F: removes the 65 -> 72 sublane padding (CF is a multiple of
    # 8 for the module defaults) and gives clean (8,128)-aligned DMA tiles.
    g2 = g.reshape(B, CF, 1)
    h2 = h.reshape(B, CF, 1)
    x3 = x.reshape(B, CF, T)

    # Lane-dense time tiling: full T if it fits in one block, otherwise a
    # 128-aligned tile (guards a caller-supplied time_tile that is not a
    # multiple of 128 from violating the (8,128) rule / forcing masked stores).
    if T <= time_tile:
        tT = T
    else:
        tT = max(128, (time_tile // 128) * 128)

    num_t = -(-T // tT)
    # v7x has 2 TensorCores: make sure the parallel grid has >= 2 steps.
    if B * num_t < 2 and T >= 256:
        tT = max(128, ((T // 2) // 128) * 128)
        num_t = -(-T // tT)
    grid = (B, num_t)

    out3 = pl.pallas_call(
        _fma_kernel,
        out_shape=jax.ShapeDtypeStruct((B, CF, T), x.dtype),
        grid_spec=pltpu.PrefetchScalarGridSpec(
            num_scalar_prefetch=0,
            grid=grid,
            in_specs=[
                # Gate / bias terms: constant along the inner t axis -> stay
                # VMEM-resident across time tiles (re-DMA only when b changes).
                pl.BlockSpec((None, CF, 1), lambda b, t: (b, 0, 0)),
                pl.BlockSpec((None, CF, 1), lambda b, t: (b, 0, 0)),
                # Input: one (CF, tT) time tile per grid step.
                pl.BlockSpec((None, CF, tT), lambda b, t: (b, 0, t)),
            ],
            out_specs=pl.BlockSpec((None, CF, tT), lambda b, t: (b, 0, t)),
        ),
        compiler_params=pltpu.CompilerParams(
            dimension_semantics=("parallel", "parallel"),
            vmem_limit_bytes=48 << 20,
        ),
    )(g2, h2, x3)

    return out3.reshape(B, C, Fr, T)


def init_params(key, emb_dim=48, n_freqs=65):
    """Deterministic init matching nn.init.xavier_normal_ std for (1,C,F,1)."""
    # PyTorch fan calc for shape (1, emb_dim, n_freqs, 1):
    #   fan_in  = emb_dim * n_freqs * 1, fan_out = 1 * n_freqs * 1
    fan_in = emb_dim * n_freqs
    fan_out = 1 * n_freqs
    std = math.sqrt(2.0 / (fan_in + fan_out))
    k_a, k_b = jax.random.split(key)
    alpha = std * jax.random.normal(k_a, (1, emb_dim, n_freqs, 1), jnp.float32)
    beta = std * jax.random.normal(k_b, (1, emb_dim, n_freqs, 1), jnp.float32)
    return alpha, beta


if __name__ == "__main__":
    # Small shapes consistent with the module defaults (emb_dim=48, n_freqs=65);
    # T=256 so the main lane-dense Pallas path is exercised (~6.4 MB of data).
    B, C, Fr, T = 2, 48, 65, 256
    key = jax.random.PRNGKey(0)
    k_p, k_x, k_f, k_b = jax.random.split(key, 4)

    alpha, beta = init_params(k_p, emb_dim=C, n_freqs=Fr)
    x = jax.random.normal(k_x, (B, C, Fr, T), jnp.float32)
    filters = jax.random.normal(k_f, (B, C, Fr, 1), jnp.float32)
    bias = jax.random.normal(k_b, (B, C, Fr, 1), jnp.float32)

    out = jax.block_until_ready(band_filter_gate(x, filters, bias, alpha, beta))

    # Pure-JAX reference for correctness.
    ref = jax.nn.sigmoid(alpha * filters) * x + jnp.tanh(beta * bias)
    assert out.shape == ref.shape == (B, C, Fr, T), (out.shape, ref.shape)
    assert jnp.allclose(out, ref, atol=1e-5, rtol=1e-5), "mismatch vs reference"

    print("KERNEL_OK")
</pallas_src>

<mosaic_0001>
module attributes {stable_mosaic.version = 11 : i64} {
  func.func @_fma_kernel(%arg0: i32, %arg1: i32, %arg2: memref<1x3120x1xf32, #tpu.memory_space<vmem>>, %arg3: memref<1x3120x1xf32, #tpu.memory_space<vmem>>, %arg4: memref<1x3120x256xf32, #tpu.memory_space<vmem>>, %arg5: memref<1x3120x256xf32, #tpu.memory_space<vmem>>) attributes {dimension_semantics = [#tpu.dimension_semantics<parallel>, #tpu.dimension_semantics<parallel>], iteration_bounds = array<i64: 2, 1>, scalar_prefetch = 0 : i64, scratch_operands = 0 : i64, tpu.core_type = #tpu.core_type<tc>, window_params = [{transform_indices = @transform_0, window_bounds = array<i64: 1, 3120, 1>}, {transform_indices = @transform_1, window_bounds = array<i64: 1, 3120, 1>}, {transform_indices = @transform_2, window_bounds = array<i64: 1, 3120, 256>}, {transform_indices = @transform_3, window_bounds = array<i64: 1, 3120, 256>}]} {
    %c0 = arith.constant 0 : index
    %c0_0 = arith.constant 0 : index
    %c0_1 = arith.constant 0 : index
    %0 = vector.load %arg4[%c0, %c0_0, %c0_1] : memref<1x3120x256xf32, #tpu.memory_space<vmem>>, vector<1x3120x256xf32>
    %1 = vector.shape_cast %0 : vector<1x3120x256xf32> to vector<3120x256xf32>
    %c0_2 = arith.constant 0 : index
    %c0_3 = arith.constant 0 : index
    %c0_4 = arith.constant 0 : index
    %2 = vector.load %arg2[%c0_2, %c0_3, %c0_4] : memref<1x3120x1xf32, #tpu.memory_space<vmem>>, vector<1x3120x1xf32>
    %3 = vector.shape_cast %2 : vector<1x3120x1xf32> to vector<3120x1xf32>
    %4 = vector.broadcast %3 : vector<3120x1xf32> to vector<3120x256xf32>
    %5 = arith.mulf %4, %1 : vector<3120x256xf32>
    %c0_5 = arith.constant 0 : index
    %c0_6 = arith.constant 0 : index
    %c0_7 = arith.constant 0 : index
    %6 = vector.load %arg3[%c0_5, %c0_6, %c0_7] : memref<1x3120x1xf32, #tpu.memory_space<vmem>>, vector<1x3120x1xf32>
    %7 = vector.shape_cast %6 : vector<1x3120x1xf32> to vector<3120x1xf32>
    %8 = vector.broadcast %7 : vector<3120x1xf32> to vector<3120x256xf32>
    %9 = arith.addf %5, %8 : vector<3120x256xf32>
    %c0_8 = arith.constant 0 : index
    %c0_9 = arith.constant 0 : index
    %c0_10 = arith.constant 0 : index
    %10 = vector.load %arg5[%c0_8, %c0_9, %c0_10] : memref<1x3120x256xf32, #tpu.memory_space<vmem>>, vector<1x3120x256xf32>
    %11 = vector.shape_cast %10 : vector<1x3120x256xf32> to vector<3120x256xf32>
    %12 = vector.shape_cast %9 : vector<3120x256xf32> to vector<1x3120x256xf32>
    tpu.vector_store %arg5[%c0_8, %c0_9, %c0_10], %12 {strides = array<i32>} : memref<1x3120x256xf32, #tpu.memory_space<vmem>>, vector<1x3120x256xf32>,
    return
  }
  func.func @transform_0(%arg0: i32, %arg1: i32) -> (i32, i32, i32) {
    %c0_i32 = arith.constant 0 : i32
    %c0_i32_0 = arith.constant 0 : i32
    %c0_i32_1 = arith.constant 0 : i32
    return %arg0, %c0_i32, %c0_i32_0 : i32, i32, i32
  }
  func.func @transform_1(%arg0: i32, %arg1: i32) -> (i32, i32, i32) {
    %c0_i32 = arith.constant 0 : i32
    %c0_i32_0 = arith.constant 0 : i32
    %c0_i32_1 = arith.constant 0 : i32
    return %arg0, %c0_i32, %c0_i32_0 : i32, i32, i32
  }
  func.func @transform_2(%arg0: i32, %arg1: i32) -> (i32, i32, i32) {
    %c0_i32 = arith.constant 0 : i32
    %c0_i32_0 = arith.constant 0 : i32
    return %arg0, %c0_i32, %arg1 : i32, i32, i32
  }
  func.func @transform_3(%arg0: i32, %arg1: i32) -> (i32, i32, i32) {
    %c0_i32 = arith.constant 0 : i32
    %c0_i32_0 = arith.constant 0 : i32
    return %arg0, %c0_i32, %arg1 : i32, i32, i32
  }
}

</mosaic_0001>

<bundles_post_ra>
// kernel: tpu_custom_call.1
= control target key start
LH: loop header
LB: loop body
LE: loop exit
PB: predicated region body
PF: predicated region fallthrough
CT: control target
= control target key end

     0   :  { %8 = vsyncpa [#allocation3], 0  ;;  %s12364_s0 = inlined_call_operand.vmem [shape: f32[2,3120,1], index: 0, kind: input, shape index: {}]   ;;  %s12365_s1 = inlined_call_operand.vmem [shape: f32[2,3120,1], index: 1, kind: input, shape index: {}]   ;;  %s12366_s2 = inlined_call_operand.vmem [shape: f32[2,3120,256], index: 2, kind: input, shape index: {}]   ;;  %s12367_s3 = inlined_call_operand.hbm [shape: f32[2,3120,256], index: 3, kind: output, shape index: {}]  }
   0x1   :  { %10 = vsyncpa [#allocation3 + $0x1], 0  ;;  %s8340_s12 = smov 0   ;;  %s8342_s13 = smov 0  }
   0x2   :  { %s8344_s14 = smov 0   ;;  %s8346_s15 = smov 0  }
   0x3   :  { %s8348_s16 = smov 0   ;;  %s8350_s17 = smov 0  }
   0x4 LB: > { %s8161_s18 = sadd.s32 4294967295, %s8315_s17   ;;  %s8162_s19 = sadd.s32 4294967294, %s8315_s17   ;;  %s8315_s17 = sphi %s8350_s17, %s16_s17   ;;  %s8311_s16 = sphi %s8348_s16, %s13397_s16   ;;  %s8307_s15 = sphi %s8346_s15, %s13396_s15   ;;  %s8303_s14 = sphi %s8344_s14, %s13395_s14   ;;  %s8299_s13 = sphi %s8342_s13, %s13394_s13   ;;  %s8295_s12 = sphi %s8340_s12, %s13393_s12  }
   0x5   : > { %s28_s20 = sadd.s32 1, %s8311_s16  ;;  %s117_s21 = sadd.s32 1, %s8303_s14 }
   0x6   : > { %p30_p0 = scmp.ge.s32.totalorder %s28_s20, 2  ;;  %p127_p1 = scmp.ne.s32.totalorder %s8303_s14, %s8299_s13 }
   0x7   : > { %p128_p2 = scmp.eq.s32.totalorder %s8161_s18, 1  ;;  %p133_p3 = scmp.ne.s32.totalorder %s8299_s13, %s8295_s12 }
   0x8   : > { %s13399_s20 = smov (%p30_p0, %s28_s20), 0  ;;  %p134_p5 = scmp.eq.s32.totalorder %s8162_s19, 1 }
   0x9   : > { %p8380_p4 = por %p128_p2, %p127_p1  ;;  %s112_s23 = ssub.s32 %s8311_s16, %s13399_s20 }
   0xa   : > { %p8165_p6 = scmp.ge.s32.totalorder %s8315_s17, 1  ;;  %p115_p7 = scmp.eq.s32.totalorder %s112_s23, 0 }
   0xb   : > { %p8387_p8 = por %p134_p5, %p133_p3  ;;  %p181_p9 = scmp.lt.s32.totalorder %s8315_s17, 3 }
   0xc   : > { %s8393_s25 = scalar_select %p115_p7, %s8303_s14, %s117_s21  }
   0xd   : > { %p182_p10 = pnand %p8165_p6, %p181_p9 }
   0xf   : > { %185 = sbr.rel (%p182_p10) target bundleno = 2224 (0x8b0), region = 32 }
  0x14   : > { %p219_p11 = scmp.lt.s32.totalorder %s8307_s15, 1  ;;  %v8317_v0 = vmov 0   ;;  %s216_s11 = sand.u32 1, %s8299_s13  }
  0x15   : > { %8236 = vset.pattern.permute.xlu2 %v8317_v0  ;;  %8235 = vset.pattern.permute.xlu1 %v8317_v0  ;;  %s8172_s18 = smul.u32 6240, %s216_s11  ;;  %s8041_s29 = scalar_lea.sflag [#allocation3], %s216_s11 }
  0x16   : > { %8234 = vset.pattern.permute.xlu0 %v8317_v0  ;;  %s8397_s26 = scalar_select %p219_p11, %s8307_s15, 1 }
  0x17   : > { %s9625_s19 = scalar_lea.vmem [#allocation2], %s8172_s18  ;;  %s8175_s21 = smul.u32 6240, %s8307_s15 }
  0x18   : > { %s8173_s27 = smul.u32 3120, %s8397_s26  ;;  %s8055_s15 = sshll.u32 %s9625_s19, 4  ;;  %s8056_s15 = int_to_ptr.vmem [resolvable:$true] %s8055_s15 }
  0x19   : > { %s8174_s7 = smul.u32 6240, %s8397_s26 }
  0x1a   : > { %s8405_s30 = scalar_lea.vmem %s12364_s0, %s8173_s27  ;;  %s9502_s6 = scalar_lea.vmem %s12365_s1, %s8173_s27 }
  0x1b   : > { %v1024_v1 = vld [vmem:[%s8405_s30 + $0x20] sm:$0xff]  ;;  %v1022_v2 = vld [vmem:[%s8405_s30 + $0x10] sm:$0xff]  ;;  %v1025_v4 = vld [vmem:[%s8405_s30 + $0x28] sm:$0xff]  ;;  %s9607_s10 = scalar_lea.vmem %s12366_s2, %s8174_s7  ;;  %s8054_s27 = scalar_lea.hbm %s12367_s3, %s8175_s21 }
  0x1c   : > { %v1020_v3 = vld [vmem:[%s8405_s30] sm:$0xff]  ;;  %1432 = vperm.xlu2 %8236, %v1024_v1   ;;  %1422 = vperm.xlu1 %8235, %v1022_v2   ;;  %v1023_v5 = vld [vmem:[%s8405_s30 + $0x18] sm:$0xff]  ;;  %v1021_v6 = vld [vmem:[%s8405_s30 + $0x8] sm:$0xff]  ;;  %s8057_s28 = sshll.u32 %s8054_s27, 4  ;;  %s8257_s7 = scalar_lea.hbm %s12367_s3, 12480  ;;  %s8058_s28 = int_to_ptr.hbm [resolvable:$true] %s8057_s28 }
  0x1d   : > { %1412 = vperm.xlu0 %8234, %v1020_v3   ;;  %v1028_v7 = vld [vmem:[%s8405_s30 + $0x40] sm:$0xff]  ;;  %v1027_v8 = vld [vmem:[%s8405_s30 + $0x38] sm:$0xff]  ;;  %v1026_v9 = vld [vmem:[%s8405_s30 + $0x30] sm:$0xff] }
  0x1e   : > { %v1031_v10 = vld [vmem:[%s8405_s30 + $0x58] sm:$0xff]  ;;  %v1030_v11 = vld [vmem:[%s8405_s30 + $0x50] sm:$0xff]  ;;  %v1029_v12 = vld [vmem:[%s8405_s30 + $0x48] sm:$0xff] }
  0x1f   : > { %v1034_v13 = vld [vmem:[%s8405_s30 + $0x70] sm:$0xff]  ;;  %v1033_v14 = vld [vmem:[%s8405_s30 + $0x68] sm:$0xff]  ;;  %v1032_v15 = vld [vmem:[%s8405_s30 + $0x60] sm:$0xff] }
  0x20   : > { %v1037_v16 = vld [vmem:[%s8405_s30 + $0x88] sm:$0xff]  ;;  %v1036_v17 = vld [vmem:[%s8405_s30 + $0x80] sm:$0xff]  ;;  %v1035_v18 = vld [vmem:[%s8405_s30 + $0x78] sm:$0xff] }
  0x21   : > { %v1040_v19 = vld [vmem:[%s8405_s30 + $0xa0] sm:$0xff]  ;;  %v1039_v20 = vld [vmem:[%s8405_s30 + $0x98] sm:$0xff]  ;;  %v1038_v21 = vld [vmem:[%s8405_s30 + $0x90] sm:$0xff] }
  0x22   : > { %v1043_v22 = vld [vmem:[%s8405_s30 + $0xb8] sm:$0xff]  ;;  %v1042_v23 = vld [vmem:[%s8405_s30 + $0xb0] sm:$0xff]  ;;  %v1041_v24 = vld [vmem:[%s8405_s30 + $0xa8] sm:$0xff] }
  0x23   : > { %v1046_v25 = vld [vmem:[%s8405_s30 + $0xd0] sm:$0xff]  ;;  %v1045_v26 = vld [vmem:[%s8405_s30 + $0xc8] sm:$0xff]  ;;  %v1044_v27 = vld [vmem:[%s8405_s30 + $0xc0] sm:$0xff] }
  0x24   : > { %1437 = vperm.xlu2 %8236, %v1025_v4   ;;  %1427 = vperm.xlu1 %8235, %v1023_v5   ;;  %v1049_v28 = vld [vmem:[%s8405_s30 + $0xe8] sm:$0xff]  ;;  %v1048_v29 = vld [vmem:[%s8405_s30 + $0xe0] sm:$0xff]  ;;  %v1047_v30 = vld [vmem:[%s8405_s30 + $0xd8] sm:$0xff] }
  0x25   : > { %1417 = vperm.xlu0 %8234, %v1021_v6   ;;  %v1052_v31 = vld [vmem:[%s8405_s30 + $0x100] sm:$0xff]  ;;  %v1051_v32 = vld [vmem:[%s8405_s30 + $0xf8] sm:$0xff]  ;;  %v1050_v33 = vld [vmem:[%s8405_s30 + $0xf0] sm:$0xff] }
  0x26   : > { %v1055_v34 = vld [vmem:[%s8405_s30 + $0x118] sm:$0xff]  ;;  %v1054_v35 = vld [vmem:[%s8405_s30 + $0x110] sm:$0xff]  ;;  %v1053_v36 = vld [vmem:[%s8405_s30 + $0x108] sm:$0xff] }
  0x27   : > { %v1058_v38 = vld [vmem:[%s8405_s30 + $0x130] sm:$0xff]  ;;  %v1057_v39 = vld [vmem:[%s8405_s30 + $0x128] sm:$0xff]  ;;  %v1056_v40 = vld [vmem:[%s8405_s30 + $0x120] sm:$0xff] }
  0x28   : > { %v1061_v42 = vld [vmem:[%s8405_s30 + $0x148] sm:$0xff]  ;;  %v1060_v43 = vld [vmem:[%s8405_s30 + $0x140] sm:$0xff]  ;;  %v1059_v44 = vld [vmem:[%s8405_s30 + $0x138] sm:$0xff] }
  0x29   : > { %v1064_v46 = vld [vmem:[%s8405_s30 + $0x160] sm:$0xff]  ;;  %v1063_v47 = vld [vmem:[%s8405_s30 + $0x158] sm:$0xff]  ;;  %v1062_v48 = vld [vmem:[%s8405_s30 + $0x150] sm:$0xff] }
  0x2a   : > { %v1067_v52 = vld [vmem:[%s8405_s30 + $0x178] sm:$0xff]  ;;  %v1066_v53 = vld [vmem:[%s8405_s30 + $0x170] sm:$0xff]  ;;  %v1065_v54 = vld [vmem:[%s8405_s30 + $0x168] sm:$0xff] }
  0x2b   : > { %v1070_v58 = vld [vmem:[%s8405_s30 + $0x190] sm:$0xff]  ;;  %v1069_v59 = vld [vmem:[%s8405_s30 + $0x188] sm:$0xff]  ;;  %v1068_v60 = vld [vmem:[%s8405_s30 + $0x180] sm:$0xff] }
  0x2c   : > { %1452 = vperm.xlu2 %8236, %v1028_v7   ;;  %1447 = vperm.xlu1 %8235, %v1027_v8   ;;  %v1073_v0 = vld [vmem:[%s8405_s30 + $0x1a8] sm:$0xff]  ;;  %v1072_v1 = vld [vmem:[%s8405_s30 + $0x1a0] sm:$0xff]  ;;  %v1071_v2 = vld [vmem:[%s8405_s30 + $0x198] sm:$0xff] }
  0x2d   : > { %1442 = vperm.xlu0 %8234, %v1026_v9   ;;  %v1076_v6 = vld [vmem:[%s8405_s30 + $0x1c0] sm:$0xff]  ;;  %v1075_v7 = vld [vmem:[%s8405_s30 + $0x1b8] sm:$0xff]  ;;  %v1074_v8 = vld [vmem:[%s8405_s30 + $0x1b0] sm:$0xff] }
  0x34   : > { %1467 = vperm.xlu2 %8236, %v1031_v10   ;;  %1462 = vperm.xlu1 %8235, %v1030_v11  }
  0x35   : > { %1457 = vperm.xlu0 %8234, %v1029_v12   ;;  %v1079_v12 = vld [vmem:[%s8405_s30 + $0x1d8] sm:$0xff] }
  0x3c   : > { %1482 = vperm.xlu2 %8236, %v1034_v13   ;;  %1477 = vperm.xlu1 %8235, %v1033_v14   ;;  %v1078_v13 = vld [vmem:[%s8405_s30 + $0x1d0] sm:$0xff]  ;;  %v1077_v14 = vld [vmem:[%s8405_s30 + $0x1c8] sm:$0xff] }
  0x3d   : > { %1472 = vperm.xlu0 %8234, %v1032_v15  }
  0x44   : > { %1497 = vperm.xlu2 %8236, %v1037_v16   ;;  %1492 = vperm.xlu1 %8235, %v1036_v17  }
  0x45   : > { %1487 = vperm.xlu0 %8234, %v1035_v18   ;;  %v1082_v18 = vld [vmem:[%s8405_s30 + $0x1f0] sm:$0xff] }
  0x4c   : > { %1512 = vperm.xlu2 %8236, %v1040_v19   ;;  %1507 = vperm.xlu1 %8235, %v1039_v20   ;;  %v1081_v19 = vld [vmem:[%s8405_s30 + $0x1e8] sm:$0xff]  ;;  %v1080_v20 = vld [vmem:[%s8405_s30 + $0x1e0] sm:$0xff] }
  0x4d   : > { %1502 = vperm.xlu0 %8234, %v1038_v21  }
  0x54   : > { %1527 = vperm.xlu2 %8236, %v1043_v22   ;;  %1522 = vperm.xlu1 %8235, %v1042_v23  }
  0x55   : > { %1517 = vperm.xlu0 %8234, %v1041_v24   ;;  %v1085_v24 = vld [vmem:[%s8405_s30 + $0x208] sm:$0xff] }
  0x5c   : > { %1542 = vperm.xlu2 %8236, %v1046_v25   ;;  %1537 = vperm.xlu1 %8235, %v1045_v26   ;;  %v1084_v25 = vld [vmem:[%s8405_s30 + $0x200] sm:$0xff]  ;;  %v1083_v26 = vld [vmem:[%s8405_s30 + $0x1f8] sm:$0xff] }
  0x5d   : > { %1532 = vperm.xlu0 %8234, %v1044_v27  }
  0x64   : > { %1557 = vperm.xlu2 %8236, %v1049_v28   ;;  %1552 = vperm.xlu1 %8235, %v1048_v29  }
  0x65   : > { %1547 = vperm.xlu0 %8234, %v1047_v30   ;;  %v1088_v30 = vld [vmem:[%s8405_s30 + $0x220] sm:$0xff] }
  0x6c   : > { %1572 = vperm.xlu2 %8236, %v1052_v31   ;;  %1567 = vperm.xlu1 %8235, %v1051_v32   ;;  %v1087_v31 = vld [vmem:[%s8405_s30 + $0x218] sm:$0xff]  ;;  %v1086_v32 = vld [vmem:[%s8405_s30 + $0x210] sm:$0xff] }
  0x6d   : > { %1562 = vperm.xlu0 %8234, %v1050_v33  }
  0x74   : > { %1587 = vperm.xlu2 %8236, %v1055_v34   ;;  %1582 = vperm.xlu1 %8235, %v1054_v35  }
  0x75   : > { %1577 = vperm.xlu0 %8234, %v1053_v36   ;;  %v1091_v36 = vld [vmem:[%s8405_s30 + $0x238] sm:$0xff] }
  0x76   : > { %v8443_v37 = vpop.permute.xlu2 %1432 }
  0x7c   : > { %1602 = vperm.xlu2 %8236, %v1058_v38   ;;  %1597 = vperm.xlu1 %8235, %v1057_v39   ;;  %v1090_v38 = vld [vmem:[%s8405_s30 + $0x230] sm:$0xff]  ;;  %v1089_v39 = vld [vmem:[%s8405_s30 + $0x228] sm:$0xff] }
  0x7d   : > { %1592 = vperm.xlu0 %8234, %v1056_v40  }
  0x7e   : > { %v8448_v41 = vpop.permute.xlu2 %1437 }
  0x84   : > { %1617 = vperm.xlu2 %8236, %v1061_v42   ;;  %1612 = vperm.xlu1 %8235, %v1060_v43  }
  0x85   : > { %1607 = vperm.xlu0 %8234, %v1059_v44   ;;  %v1094_v44 = vld [vmem:[%s8405_s30 + $0x250] sm:$0xff] }
  0x86   : > { %v8453_v45 = vpop.permute.xlu2 %1452 }
  0x8c   : > { %1632 = vperm.xlu2 %8236, %v1064_v46   ;;  %1627 = vperm.xlu1 %8235, %v1063_v47   ;;  %v1093_v46 = vld [vmem:[%s8405_s30 + $0x248] sm:$0xff]  ;;  %v1092_v47 = vld [vmem:[%s8405_s30 + $0x240] sm:$0xff] }
  0x8d   : > { %1622 = vperm.xlu0 %8234, %v1062_v48  }
  0x8e   : > { %v8458_v49 = vpop.permute.xlu2 %1467  ;;  %v8460_v50 = vpop.permute.xlu1 %1422 }
  0x8f   : > { %v8462_v51 = vpop.permute.xlu0 %1412 }
  0x94   : > { %1647 = vperm.xlu2 %8236, %v1067_v52   ;;  %1642 = vperm.xlu1 %8235, %v1066_v53  }
  0x95   : > { %1637 = vperm.xlu0 %8234, %v1065_v54   ;;  %v1097_v54 = vld [vmem:[%s8405_s30 + $0x268] sm:$0xff] }
  0x96   : > { %v8467_v55 = vpop.permute.xlu2 %1482  ;;  %v8469_v56 = vpop.permute.xlu1 %1427 }
  0x97   : > { %v8471_v57 = vpop.permute.xlu0 %1417 }
  0x9c   : > { %1662 = vperm.xlu2 %8236, %v1070_v58   ;;  %1657 = vperm.xlu1 %8235, %v1069_v59   ;;  %v1096_v58 = vld [vmem:[%s8405_s30 + $0x260] sm:$0xff]  ;;  %v1095_v59 = vld [vmem:[%s8405_s30 + $0x258] sm:$0xff] }
  0x9d   : > { %1652 = vperm.xlu0 %8234, %v1068_v60  }
  0x9e   : > { %v8476_v61 = vpop.permute.xlu2 %1497  ;;  %v8478_v62 = vpop.permute.xlu1 %1447 }
  0x9f   : > { %v8480_v63 = vpop.permute.xlu0 %1442 }
  0xa4   : > { %1677 = vperm.xlu2 %8236, %v1073_v0   ;;  %1672 = vperm.xlu1 %8235, %v1072_v1  }
  0xa5   : > { %1667 = vperm.xlu0 %8234, %v1071_v2   ;;  %v1100_v2 = vld [vmem:[%s8405_s30 + $0x280] sm:$0xff] }
  0xa6   : > { %v8485_v3 = vpop.permute.xlu2 %1512  ;;  %v8487_v4 = vpop.permute.xlu1 %1462 }
  0xa7   : > { %v8489_v5 = vpop.permute.xlu0 %1457 }
  0xac   : > { %1692 = vperm.xlu2 %8236, %v1076_v6   ;;  %1687 = vperm.xlu1 %8235, %v1075_v7   ;;  %v1099_v6 = vld [vmem:[%s8405_s30 + $0x278] sm:$0xff]  ;;  %v1098_v7 = vld [vmem:[%s8405_s30 + $0x270] sm:$0xff] }
  0xad   : > { %1682 = vperm.xlu0 %8234, %v1074_v8  }
  0xae   : > { %v8494_v9 = vpop.permute.xlu2 %1527  ;;  %v8496_v10 = vpop.permute.xlu1 %1477 }
  0xaf   : > { %v8498_v11 = vpop.permute.xlu0 %1472 }
  0xb4   : > { %1707 = vperm.xlu2 %8236, %v1079_v12   ;;  %1702 = vperm.xlu1 %8235, %v1078_v13  }
  0xb5   : > { %1697 = vperm.xlu0 %8234, %v1077_v14   ;;  %v1103_v14 = vld [vmem:[%s8405_s30 + $0x298] sm:$0xff] }
  0xb6   : > { %v8503_v15 = vpop.permute.xlu2 %1542  ;;  %v8505_v16 = vpop.permute.xlu1 %1492 }
  0xb7   : > { %v8507_v17 = vpop.permute.xlu0 %1487 }
  0xbc   : > { %1722 = vperm.xlu2 %8236, %v1082_v18   ;;  %1717 = vperm.xlu1 %8235, %v1081_v19   ;;  %v1102_v18 = vld [vmem:[%s8405_s30 + $0x290] sm:$0xff]  ;;  %v1101_v19 = vld [vmem:[%s8405_s30 + $0x288] sm:$0xff] }
  0xbd   : > { %1712 = vperm.xlu0 %8234, %v1080_v20  }
  0xbe   : > { %v8512_v21 = vpop.permute.xlu2 %1557  ;;  %v8514_v22 = vpop.permute.xlu1 %1507 }
  0xbf   : > { %v8516_v23 = vpop.permute.xlu0 %1502 }
  0xc4   : > { %1737 = vperm.xlu2 %8236, %v1085_v24   ;;  %1732 = vperm.xlu1 %8235, %v1084_v25  }
  0xc5   : > { %1727 = vperm.xlu0 %8234, %v1083_v26   ;;  %v1106_v26 = vld [vmem:[%s8405_s30 + $0x2b0] sm:$0xff] }
  0xc6   : > { %v8521_v27 = vpop.permute.xlu2 %1572  ;;  %v8523_v28 = vpop.permute.xlu1 %1522 }
  0xc7   : > { %v8525_v29 = vpop.permute.xlu0 %1517 }
  0xcc   : > { %1752 = vperm.xlu2 %8236, %v1088_v30   ;;  %1747 = vperm.xlu1 %8235, %v1087_v31   ;;  %v1105_v30 = vld [vmem:[%s8405_s30 + $0x2a8] sm:$0xff]  ;;  %v1104_v31 = vld [vmem:[%s8405_s30 + $0x2a0] sm:$0xff] }
  0xcd   : > { %1742 = vperm.xlu0 %8234, %v1086_v32  }
  0xce   : > { %v8530_v33 = vpop.permute.xlu2 %1587  ;;  %v8532_v34 = vpop.permute.xlu1 %1537 }
  0xcf   : > { %v8534_v35 = vpop.permute.xlu0 %1532 }
  0xd4   : > { %1767 = vperm.xlu2 %8236, %v1091_v36   ;;  %1762 = vperm.xlu1 %8235, %v1090_v38  }
  0xd5   : > { %1757 = vperm.xlu0 %8234, %v1089_v39   ;;  %v1109_v39 = vld [vmem:[%s8405_s30 + $0x2c8] sm:$0xff] }
  0xd6   : > { %v8539_v40 = vpop.permute.xlu2 %1602  ;;  %v8541_v42 = vpop.permute.xlu1 %1552 }
  0xd7   : > { %v8543_v43 = vpop.permute.xlu0 %1547 }
  0xdc   : > { %1782 = vperm.xlu2 %8236, %v1094_v44   ;;  %1777 = vperm.xlu1 %8235, %v1093_v46   ;;  %v1108_v44 = vld [vmem:[%s8405_s30 + $0x2c0] sm:$0xff]  ;;  %v1107_v46 = vld [vmem:[%s8405_s30 + $0x2b8] sm:$0xff] }
  0xdd   : > { %1772 = vperm.xlu0 %8234, %v1092_v47  }
  0xde   : > { %v8548_v48 = vpop.permute.xlu2 %1617  ;;  %v8550_v52 = vpop.permute.xlu1 %1567 }
  0xdf   : > { %v8552_v53 = vpop.permute.xlu0 %1562 }
  0xe4   : > { %1797 = vperm.xlu2 %8236, %v1097_v54   ;;  %1792 = vperm.xlu1 %8235, %v1096_v58  }
  0xe5   : > { %1787 = vperm.xlu0 %8234, %v1095_v59   ;;  %v1112_v59 = vld [vmem:[%s8405_s30 + $0x2e0] sm:$0xff] }
  0xe6   : > { %v8557_v60 = vpop.permute.xlu2 %1632  ;;  %v8559_v0 = vpop.permute.xlu1 %1582 }
  0xe7   : > { %v8561_v1 = vpop.permute.xlu0 %1577 }
  0xec   : > { %1812 = vperm.xlu2 %8236, %v1100_v2   ;;  %1807 = vperm.xlu1 %8235, %v1099_v6   ;;  %v1111_v2 = vld [vmem:[%s8405_s30 + $0x2d8] sm:$0xff]  ;;  %v1110_v6 = vld [vmem:[%s8405_s30 + $0x2d0] sm:$0xff] }
  0xed   : > { %1802 = vperm.xlu0 %8234, %v1098_v7  }
  0xee   : > { %v8566_v8 = vpop.permute.xlu2 %1647  ;;  %v8568_v12 = vpop.permute.xlu1 %1597 }
  0xef   : > { %v8570_v13 = vpop.permute.xlu0 %1592 }
  0xf4   : > { %1827 = vperm.xlu2 %8236, %v1103_v14   ;;  %1822 = vperm.xlu1 %8235, %v1102_v18  }
  0xf5   : > { %1817 = vperm.xlu0 %8234, %v1101_v19   ;;  %v1115_v19 = vld [vmem:[%s8405_s30 + $0x2f8] sm:$0xff] }
  0xf6   : > { %v8575_v20 = vpop.permute.xlu2 %1662  ;;  %v8577_v24 = vpop.permute.xlu1 %1612 }
  0xf7   : > { %v8579_v25 = vpop.permute.xlu0 %1607 }
  0xfc   : > { %1842 = vperm.xlu2 %8236, %v1106_v26   ;;  %1837 = vperm.xlu1 %8235, %v1105_v30   ;;  %v1114_v26 = vld [vmem:[%s8405_s30 + $0x2f0] sm:$0xff]  ;;  %v1113_v30 = vld [vmem:[%s8405_s30 + $0x2e8] sm:$0xff] }
  0xfd   : > { %1832 = vperm.xlu0 %8234, %v1104_v31  }
  0xfe   : > { %v8584_v32 = vpop.permute.xlu2 %1677  ;;  %v8586_v36 = vpop.permute.xlu1 %1627 }
  0xff   : > { %v8588_v38 = vpop.permute.xlu0 %1622 }
 0x104   : > { %1857 = vperm.xlu2 %8236, %v1109_v39   ;;  %1852 = vperm.xlu1 %8235, %v1108_v44  }
 0x105   : > { %1847 = vperm.xlu0 %8234, %v1107_v46   ;;  %v1118_v46 = vld [vmem:[%s8405_s30 + $0x310] sm:$0xff] }
 0x106   : > { %v8593_v47 = vpop.permute.xlu2 %1692  ;;  %v8595_v54 = vpop.permute.xlu1 %1642 }
 0x107   : > { %12711 = vst [vmem:[#allocation5_spill] sm:$0xff] %v8595_v54  ;;  %v8597_v58 = vpop.permute.xlu0 %1637  ;;  %v269_v54 = vld [vmem:[%s9607_s10 + $0xe8] sm:$0xff] }
 0x108   : > { %12712 = vst [vmem:[#allocation6_spill] sm:$0xff] %v8597_v58  ;;  %v243_v58 = vld [vmem:[%s9607_s10 + $0x18] sm:$0xff] }
 0x10c   : > { %1872 = vperm.xlu2 %8236, %v1112_v59   ;;  %1867 = vperm.xlu1 %8235, %v1111_v2   ;;  %v1117_v59 = vld [vmem:[%s8405_s30 + $0x308] sm:$0xff]  ;;  %v1116_v2 = vld [vmem:[%s8405_s30 + $0x300] sm:$0xff] }
 0x10d   : > { %1862 = vperm.xlu0 %8234, %v1110_v6  }
 0x10e   : > { %v8602_v7 = vpop.permute.xlu2 %1707  ;;  %v8604_v14 = vpop.permute.xlu1 %1657 }
 0x10f   : > { %12713 = vst [vmem:[#allocation7_spill] sm:$0xff] %v8602_v7  ;;  %v8606_v18 = vpop.permute.xlu0 %1652  ;;  %v4180_v7 = vld [vmem:[%s9502_s6 + $0x140] sm:$0xff] }
 0x110   : > { %12714 = vst [vmem:[#allocation8_spill] sm:$0xff] %v8604_v14 }
 0x111   : > { %12715 = vst [vmem:[#allocation9_spill] sm:$0xff] %v8606_v18  ;;  %v1408_v18 = vld [vmem:[%s8405_s30 + $0xc20] sm:$0xff] }
 0x114   : > { %1887 = vperm.xlu2 %8236, %v1115_v19   ;;  %1882 = vperm.xlu1 %8235, %v1114_v26  }
 0x115   : > { %1877 = vperm.xlu0 %8234, %v1113_v30   ;;  %v1121_v30 = vld [vmem:[%s8405_s30 + $0x328] sm:$0xff] }
 0x116   : > { %v8611_v31 = vpop.permute.xlu2 %1722  ;;  %v8613_v39 = vpop.permute.xlu1 %1672 }
 0x117   : > { %12716 = vst [vmem:[#allocation10_spill] sm:$0xff] %v8611_v31  ;;  %v8615_v44 = vpop.permute.xlu0 %1667  ;;  %v1120_v31 = vld [vmem:[%s8405_s30 + $0x320] sm:$0xff] }
 0x118   : > { %12717 = vst [vmem:[#allocation11_spill] sm:$0xff] %v8613_v39  ;;  %v1119_v39 = vld [vmem:[%s8405_s30 + $0x318] sm:$0xff] }
 0x119   : > { %12718 = vst [vmem:[#allocation12_spill] sm:$0xff] %v8615_v44  ;;  %v1123_v44 = vld [vmem:[%s8405_s30 + $0x338] sm:$0xff] }
 0x11c   : > { %1902 = vperm.xlu2 %8236, %v1118_v46   ;;  %1897 = vperm.xlu1 %8235, %v1117_v59  }
 0x11d   : > { %1892 = vperm.xlu0 %8234, %v1116_v2  }
 0x11e   : > { %v8620_v6 = vpop.permute.xlu2 %1737  ;;  %v8622_v19 = vpop.permute.xlu1 %1687 }
 0x11f   : > { %12719 = vst [vmem:[#allocation13_spill] sm:$0xff] %v8620_v6  ;;  %v8624_v26 = vpop.permute.xlu0 %1682  ;;  %v1124_v6 = vld [vmem:[%s8405_s30 + $0x340] sm:$0xff] }
 0x120   : > { %12720 = vst [vmem:[#allocation14_spill] sm:$0xff] %v8622_v19  ;;  %v1122_v19 = vld [vmem:[%s8405_s30 + $0x330] sm:$0xff] }
 0x121   : > { %12721 = vst [vmem:[#allocation15_spill] sm:$0xff] %v8624_v26  ;;  %v1126_v26 = vld [vmem:[%s8405_s30 + $0x350] sm:$0xff] }
 0x124   : > { %1917 = vperm.xlu2 %8236, %v1121_v30   ;;  %1912 = vperm.xlu1 %8235, %v1120_v31  }
 0x125   : > { %1907 = vperm.xlu0 %8234, %v1119_v39  }
 0x126   : > { %v8629_v46 = vpop.permute.xlu2 %1752  ;;  %v8631_v59 = vpop.permute.xlu1 %1702 }
 0x127   : > { %12722 = vst [vmem:[#allocation16_spill] sm:$0xff] %v8629_v46  ;;  %v8633_v2 = vpop.permute.xlu0 %1697  ;;  %v1127_v46 = vld [vmem:[%s8405_s30 + $0x358] sm:$0xff] }
 0x128   : > { %12723 = vst [vmem:[#allocation17_spill] sm:$0xff] %v8631_v59  ;;  %v1125_v59 = vld [vmem:[%s8405_s30 + $0x348] sm:$0xff] }
 0x129   : > { %12724 = vst [vmem:[#allocation18_spill] sm:$0xff] %v8633_v2  ;;  %v1129_v2 = vld [vmem:[%s8405_s30 + $0x368] sm:$0xff] }
 0x12c   : > { %1932 = vperm.xlu2 %8236, %v1124_v6   ;;  %1927 = vperm.xlu1 %8235, %v1123_v44  }
 0x12d   : > { %1922 = vperm.xlu0 %8234, %v1122_v19  }
 0x12e   : > { %v8638_v30 = vpop.permute.xlu2 %1767  ;;  %v8640_v31 = vpop.permute.xlu1 %1717 }
 0x12f   : > { %12725 = vst [vmem:[#allocation19_spill] sm:$0xff] %v8638_v30  ;;  %v8642_v39 = vpop.permute.xlu0 %1712  ;;  %v1130_v30 = vld [vmem:[%s8405_s30 + $0x370] sm:$0xff] }
 0x130   : > { %12726 = vst [vmem:[#allocation20_spill] sm:$0xff] %v8640_v31  ;;  %v1128_v31 = vld [vmem:[%s8405_s30 + $0x360] sm:$0xff] }
 0x131   : > { %12727 = vst [vmem:[#allocation21_spill] sm:$0xff] %v8642_v39  ;;  %v1132_v39 = vld [vmem:[%s8405_s30 + $0x380] sm:$0xff] }
 0x134   : > { %1947 = vperm.xlu2 %8236, %v1127_v46   ;;  %1942 = vperm.xlu1 %8235, %v1126_v26  }
 0x135   : > { %1937 = vperm.xlu0 %8234, %v1125_v59  }
 0x136   : > { %v8647_v6 = vpop.permute.xlu2 %1782  ;;  %v8649_v44 = vpop.permute.xlu1 %1732 }
 0x137   : > { %12728 = vst [vmem:[#allocation22_spill] sm:$0xff] %v8647_v6  ;;  %v8651_v19 = vpop.permute.xlu0 %1727  ;;  %v1133_v6 = vld [vmem:[%s8405_s30 + $0x388] sm:$0xff] }
 0x138   : > { %12729 = vst [vmem:[#allocation23_spill] sm:$0xff] %v8649_v44  ;;  %v1131_v44 = vld [vmem:[%s8405_s30 + $0x378] sm:$0xff] }
 0x139   : > { %12730 = vst [vmem:[#allocation24_spill] sm:$0xff] %v8651_v19  ;;  %v1135_v19 = vld [vmem:[%s8405_s30 + $0x398] sm:$0xff] }
 0x13c   : > { %1962 = vperm.xlu2 %8236, %v1130_v30   ;;  %1957 = vperm.xlu1 %8235, %v1129_v2  }
 0x13d   : > { %1952 = vperm.xlu0 %8234, %v1128_v31  }
 0x13e   : > { %v8656_v46 = vpop.permute.xlu2 %1797  ;;  %v8658_v26 = vpop.permute.xlu1 %1747 }
 0x13f   : > { %12731 = vst [vmem:[#allocation25_spill] sm:$0xff] %v8656_v46  ;;  %v8660_v59 = vpop.permute.xlu0 %1742  ;;  %v1136_v46 = vld [vmem:[%s8405_s30 + $0x3a0] sm:$0xff] }
 0x140   : > { %12732 = vst [vmem:[#allocation26_spill] sm:$0xff] %v8658_v26  ;;  %v1134_v26 = vld [vmem:[%s8405_s30 + $0x390] sm:$0xff] }
 0x141   : > { %12733 = vst [vmem:[#allocation27_spill] sm:$0xff] %v8660_v59  ;;  %v1138_v59 = vld [vmem:[%s8405_s30 + $0x3b0] sm:$0xff] }
 0x144   : > { %1977 = vperm.xlu2 %8236, %v1133_v6   ;;  %1972 = vperm.xlu1 %8235, %v1132_v39  }
 0x145   : > { %1967 = vperm.xlu0 %8234, %v1131_v44  }
 0x146   : > { %v8665_v30 = vpop.permute.xlu2 %1812  ;;  %v8667_v2 = vpop.permute.xlu1 %1762 }
 0x147   : > { %12734 = vst [vmem:[#allocation28_spill] sm:$0xff] %v8665_v30  ;;  %v8669_v31 = vpop.permute.xlu0 %1757  ;;  %v1139_v30 = vld [vmem:[%s8405_s30 + $0x3b8] sm:$0xff] }
 0x148   : > { %12735 = vst [vmem:[#allocation29_spill] sm:$0xff] %v8667_v2  ;;  %v1137_v2 = vld [vmem:[%s8405_s30 + $0x3a8] sm:$0xff] }
 0x149   : > { %12736 = vst [vmem:[#allocation30_spill] sm:$0xff] %v8669_v31  ;;  %v1141_v31 = vld [vmem:[%s8405_s30 + $0x3c8] sm:$0xff] }
 0x14c   : > { %1992 = vperm.xlu2 %8236, %v1136_v46   ;;  %1987 = vperm.xlu1 %8235, %v1135_v19  }
 0x14d   : > { %1982 = vperm.xlu0 %8234, %v1134_v26  }
 0x14e   : > { %v8674_v6 = vpop.permute.xlu2 %1827  ;;  %v8676_v39 = vpop.permute.xlu1 %1777 }
 0x14f   : > { %12737 = vst [vmem:[#allocation31_spill] sm:$0xff] %v8674_v6  ;;  %v8678_v44 = vpop.permute.xlu0 %1772  ;;  %v1142_v6 = vld [vmem:[%s8405_s30 + $0x3d0] sm:$0xff] }
 0x150   : > { %12738 = vst [vmem:[#allocation32_spill] sm:$0xff] %v8676_v39  ;;  %v1140_v39 = vld [vmem:[%s8405_s30 + $0x3c0] sm:$0xff] }
 0x151   : > { %12739 = vst [vmem:[#allocation33_spill] sm:$0xff] %v8678_v44  ;;  %v1144_v44 = vld [vmem:[%s8405_s30 + $0x3e0] sm:$0xff] }
 0x154   : > { %2007 = vperm.xlu2 %8236, %v1139_v30   ;;  %2002 = vperm.xlu1 %8235, %v1138_v59  }
 0x155   : > { %1997 = vperm.xlu0 %8234, %v1137_v2  }
 0x156   : > { %v8683_v46 = vpop.permute.xlu2 %1842  ;;  %v8685_v19 = vpop.permute.xlu1 %1792 }
 0x157   : > { %12740 = vst [vmem:[#allocation34_spill] sm:$0xff] %v8683_v46  ;;  %v8687_v26 = vpop.permute.xlu0 %1787  ;;  %v1145_v46 = vld [vmem:[%s8405_s30 + $0x3e8] sm:$0xff] }
 0x158   : > { %12741 = vst [vmem:[#allocation35_spill] sm:$0xff] %v8685_v19  ;;  %v1143_v19 = vld [vmem:[%s8405_s30 + $0x3d8] sm:$0xff] }
 0x159   : > { %12742 = vst [vmem:[#allocation36_spill] sm:$0xff] %v8687_v26  ;;  %v1147_v26 = vld [vmem:[%s8405_s30 + $0x3f8] sm:$0xff] }
 0x15c   : > { %2022 = vperm.xlu2 %8236, %v1142_v6   ;;  %2017 = vperm.xlu1 %8235, %v1141_v31  }
 0x15d   : > { %2012 = vperm.xlu0 %8234, %v1140_v39  }
 0x15e   : > { %v8692_v30 = vpop.permute.xlu2 %1857  ;;  %v8694_v59 = vpop.permute.xlu1 %1807 }
 0x15f   : > { %12743 = vst [vmem:[#allocation37_spill] sm:$0xff] %v8692_v30  ;;  %v8696_v2 = vpop.permute.xlu0 %1802  ;;  %v1148_v30 = vld [vmem:[%s8405_s30 + $0x400] sm:$0xff] }
 0x160   : > { %12744 = vst [vmem:[#allocation38_spill] sm:$0xff] %v8694_v59  ;;  %v1146_v59 = vld [vmem:[%s8405_s30 + $0x3f0] sm:$0xff] }
 0x161   : > { %12745 = vst [vmem:[#allocation39_spill] sm:$0xff] %v8696_v2  ;;  %v1150_v2 = vld [vmem:[%s8405_s30 + $0x410] sm:$0xff] }
 0x164   : > { %2037 = vperm.xlu2 %8236, %v1145_v46   ;;  %2032 = vperm.xlu1 %8235, %v1144_v44  }
 0x165   : > { %2027 = vperm.xlu0 %8234, %v1143_v19  }
 0x166   : > { %v8701_v6 = vpop.permute.xlu2 %1872  ;;  %v8703_v31 = vpop.permute.xlu1 %1822 }
 0x167   : > { %12746 = vst [vmem:[#allocation40_spill] sm:$0xff] %v8701_v6  ;;  %v8705_v39 = vpop.permute.xlu0 %1817  ;;  %v1151_v6 = vld [vmem:[%s8405_s30 + $0x418] sm:$0xff] }
 0x168   : > { %12747 = vst [vmem:[#allocation41_spill] sm:$0xff] %v8703_v31  ;;  %v1149_v31 = vld [vmem:[%s8405_s30 + $0x408] sm:$0xff] }
 0x169   : > { %12748 = vst [vmem:[#allocation42_spill] sm:$0xff] %v8705_v39  ;;  %v1153_v39 = vld [vmem:[%s8405_s30 + $0x428] sm:$0xff] }
 0x16c   : > { %2052 = vperm.xlu2 %8236, %v1148_v30   ;;  %2047 = vperm.xlu1 %8235, %v1147_v26  }
 0x16d   : > { %2042 = vperm.xlu0 %8234, %v1146_v59  }
 0x16e   : > { %v8710_v46 = vpop.permute.xlu2 %1887  ;;  %v8712_v44 = vpop.permute.xlu1 %1837 }
 0x16f   : > { %12749 = vst [vmem:[#allocation43_spill] sm:$0xff] %v8710_v46  ;;  %v8714_v19 = vpop.permute.xlu0 %1832  ;;  %v1154_v46 = vld [vmem:[%s8405_s30 + $0x430] sm:$0xff] }
 0x170   : > { %12750 = vst [vmem:[#allocation44_spill] sm:$0xff] %v8712_v44  ;;  %v1152_v44 = vld [vmem:[%s8405_s30 + $0x420] sm:$0xff] }
 0x171   : > { %12751 = vst [vmem:[#allocation45_spill] sm:$0xff] %v8714_v19  ;;  %v1156_v19 = vld [vmem:[%s8405_s30 + $0x440] sm:$0xff] }
 0x174   : > { %2067 = vperm.xlu2 %8236, %v1151_v6   ;;  %2062 = vperm.xlu1 %8235, %v1150_v2  }
 0x175   : > { %2057 = vperm.xlu0 %8234, %v1149_v31  }
 0x176   : > { %v8719_v30 = vpop.permute.xlu2 %1902  ;;  %v8721_v26 = vpop.permute.xlu1 %1852 }
 0x177   : > { %12752 = vst [vmem:[#allocation46_spill] sm:$0xff] %v8719_v30  ;;  %v8723_v59 = vpop.permute.xlu0 %1847  ;;  %v1157_v30 = vld [vmem:[%s8405_s30 + $0x448] sm:$0xff] }
 0x178   : > { %12753 = vst [vmem:[#allocation47_spill] sm:$0xff] %v8721_v26  ;;  %v1155_v26 = vld [vmem:[%s8405_s30 + $0x438] sm:$0xff] }
 0x179   : > { %12754 = vst [vmem:[#allocation48_spill] sm:$0xff] %v8723_v59  ;;  %v1159_v59 = vld [vmem:[%s8405_s30 + $0x458] sm:$0xff] }
 0x17c   : > { %2082 = vperm.xlu2 %8236, %v1154_v46   ;;  %2077 = vperm.xlu1 %8235, %v1153_v39  }
 0x17d   : > { %2072 = vperm.xlu0 %8234, %v1152_v44  }
 0x17e   : > { %v8728_v6 = vpop.permute.xlu2 %1917  ;;  %v8730_v2 = vpop.permute.xlu1 %1867 }
 0x17f   : > { %12755 = vst [vmem:[#allocation49_spill] sm:$0xff] %v8728_v6  ;;  %v8732_v31 = vpop.permute.xlu0 %1862  ;;  %v1160_v6 = vld [vmem:[%s8405_s30 + $0x460] sm:$0xff] }
 0x180   : > { %12756 = vst [vmem:[#allocation50_spill] sm:$0xff] %v8730_v2  ;;  %v1158_v2 = vld [vmem:[%s8405_s30 + $0x450] sm:$0xff] }
 0x181   : > { %12757 = vst [vmem:[#allocation51_spill] sm:$0xff] %v8732_v31  ;;  %v1162_v31 = vld [vmem:[%s8405_s30 + $0x470] sm:$0xff] }
 0x184   : > { %2097 = vperm.xlu2 %8236, %v1157_v30   ;;  %2092 = vperm.xlu1 %8235, %v1156_v19  }
 0x185   : > { %2087 = vperm.xlu0 %8234, %v1155_v26  }
 0x186   : > { %v8737_v46 = vpop.permute.xlu2 %1932  ;;  %v8739_v39 = vpop.permute.xlu1 %1882 }
 0x187   : > { %12758 = vst [vmem:[#allocation52_spill] sm:$0xff] %v8737_v46  ;;  %v8741_v44 = vpop.permute.xlu0 %1877  ;;  %v1163_v46 = vld [vmem:[%s8405_s30 + $0x478] sm:$0xff] }
 0x188   : > { %12759 = vst [vmem:[#allocation53_spill] sm:$0xff] %v8739_v39  ;;  %v1161_v39 = vld [vmem:[%s8405_s30 + $0x468] sm:$0xff] }
 0x189   : > { %12760 = vst [vmem:[#allocation54_spill] sm:$0xff] %v8741_v44  ;;  %v1165_v44 = vld [vmem:[%s8405_s30 + $0x488] sm:$0xff] }
 0x18c   : > { %2112 = vperm.xlu2 %8236, %v1160_v6   ;;  %2107 = vperm.xlu1 %8235, %v1159_v59  }
 0x18d   : > { %2102 = vperm.xlu0 %8234, %v1158_v2  }
 0x18e   : > { %v8746_v30 = vpop.permute.xlu2 %1947  ;;  %v8748_v19 = vpop.permute.xlu1 %1897 }
 0x18f   : > { %12761 = vst [vmem:[#allocation55_spill] sm:$0xff] %v8746_v30  ;;  %v8750_v26 = vpop.permute.xlu0 %1892  ;;  %v1166_v30 = vld [vmem:[%s8405_s30 + $0x490] sm:$0xff] }
 0x190   : > { %12762 = vst [vmem:[#allocation56_spill] sm:$0xff] %v8748_v19  ;;  %v1164_v19 = vld [vmem:[%s8405_s30 + $0x480] sm:$0xff] }
 0x191   : > { %12763 = vst [vmem:[#allocation57_spill] sm:$0xff] %v8750_v26  ;;  %v1168_v26 = vld [vmem:[%s8405_s30 + $0x4a0] sm:$0xff] }
 0x194   : > { %2127 = vperm.xlu2 %8236, %v1163_v46   ;;  %2122 = vperm.xlu1 %8235, %v1162_v31  }
 0x195   : > { %2117 = vperm.xlu0 %8234, %v1161_v39  }
 0x196   : > { %v8755_v6 = vpop.permute.xlu2 %1962  ;;  %v8757_v59 = vpop.permute.xlu1 %1912 }
 0x197   : > { %12764 = vst [vmem:[#allocation58_spill] sm:$0xff] %v8755_v6  ;;  %v8759_v2 = vpop.permute.xlu0 %1907  ;;  %v1169_v6 = vld [vmem:[%s8405_s30 + $0x4a8] sm:$0xff] }
 0x198   : > { %12765 = vst [vmem:[#allocation59_spill] sm:$0xff] %v8757_v59  ;;  %v1167_v59 = vld [vmem:[%s8405_s30 + $0x498] sm:$0xff] }
 0x199   : > { %12766 = vst [vmem:[#allocation60_spill] sm:$0xff] %v8759_v2  ;;  %v1171_v2 = vld [vmem:[%s8405_s30 + $0x4b8] sm:$0xff] }
 0x19c   : > { %2142 = vperm.xlu2 %8236, %v1166_v30   ;;  %2137 = vperm.xlu1 %8235, %v1165_v44  }
 0x19d   : > { %2132 = vperm.xlu0 %8234, %v1164_v19  }
 0x19e   : > { %v8764_v46 = vpop.permute.xlu2 %1977  ;;  %v8766_v31 = vpop.permute.xlu1 %1927 }
 0x19f   : > { %12767 = vst [vmem:[#allocation61_spill] sm:$0xff] %v8764_v46  ;;  %v8768_v39 = vpop.permute.xlu0 %1922  ;;  %v1172_v46 = vld [vmem:[%s8405_s30 + $0x4c0] sm:$0xff] }
 0x1a0   : > { %12768 = vst [vmem:[#allocation62_spill] sm:$0xff] %v8766_v31  ;;  %v1170_v31 = vld [vmem:[%s8405_s30 + $0x4b0] sm:$0xff] }
 0x1a1   : > { %12769 = vst [vmem:[#allocation63_spill] sm:$0xff] %v8768_v39  ;;  %v1174_v39 = vld [vmem:[%s8405_s30 + $0x4d0] sm:$0xff] }
 0x1a4   : > { %2157 = vperm.xlu2 %8236, %v1169_v6   ;;  %2152 = vperm.xlu1 %8235, %v1168_v26  }
 0x1a5   : > { %2147 = vperm.xlu0 %8234, %v1167_v59  }
 0x1a6   : > { %v8773_v30 = vpop.permute.xlu2 %1992  ;;  %v8775_v44 = vpop.permute.xlu1 %1942 }
 0x1a7   : > { %12770 = vst [vmem:[#allocation64_spill] sm:$0xff] %v8773_v30  ;;  %v8777_v19 = vpop.permute.xlu0 %1937  ;;  %v1175_v30 = vld [vmem:[%s8405_s30 + $0x4d8] sm:$0xff] }
 0x1a8   : > { %12771 = vst [vmem:[#allocation65_spill] sm:$0xff] %v8775_v44  ;;  %v1173_v44 = vld [vmem:[%s8405_s30 + $0x4c8] sm:$0xff] }
 0x1a9   : > { %12772 = vst [vmem:[#allocation66_spill] sm:$0xff] %v8777_v19  ;;  %v1177_v19 = vld [vmem:[%s8405_s30 + $0x4e8] sm:$0xff] }
 0x1ac   : > { %2172 = vperm.xlu2 %8236, %v1172_v46   ;;  %2167 = vperm.xlu1 %8235, %v1171_v2  }
 0x1ad   : > { %2162 = vperm.xlu0 %8234, %v1170_v31  }
 0x1ae   : > { %v8782_v6 = vpop.permute.xlu2 %2007  ;;  %v8784_v26 = vpop.permute.xlu1 %1957 }
 0x1af   : > { %12773 = vst [vmem:[#allocation67_spill] sm:$0xff] %v8782_v6  ;;  %v8786_v59 = vpop.permute.xlu0 %1952  ;;  %v1178_v6 = vld [vmem:[%s8405_s30 + $0x4f0] sm:$0xff] }
 0x1b0   : > { %12774 = vst [vmem:[#allocation68_spill] sm:$0xff] %v8784_v26  ;;  %v1176_v26 = vld [vmem:[%s8405_s30 + $0x4e0] sm:$0xff] }
 0x1b1   : > { %12775 = vst [vmem:[#allocation69_spill] sm:$0xff] %v8786_v59  ;;  %v1180_v59 = vld [vmem:[%s8405_s30 + $0x500] sm:$0xff] }
 0x1b4   : > { %2187 = vperm.xlu2 %8236, %v1175_v30   ;;  %2182 = vperm.xlu1 %8235, %v1174_v39  }
 0x1b5   : > { %2177 = vperm.xlu0 %8234, %v1173_v44  }
 0x1b6   : > { %v8791_v46 = vpop.permute.xlu2 %2022  ;;  %v8793_v2 = vpop.permute.xlu1 %1972 }
 0x1b7   : > { %12776 = vst [vmem:[#allocation70_spill] sm:$0xff] %v8791_v46  ;;  %v8795_v31 = vpop.permute.xlu0 %1967  ;;  %v1181_v46 = vld [vmem:[%s8405_s30 + $0x508] sm:$0xff] }
 0x1b8   : > { %12777 = vst [vmem:[#allocation71_spill] sm:$0xff] %v8793_v2  ;;  %v1179_v2 = vld [vmem:[%s8405_s30 + $0x4f8] sm:$0xff] }
 0x1b9   : > { %12778 = vst [vmem:[#allocation72_spill] sm:$0xff] %v8795_v31  ;;  %v1183_v31 = vld [vmem:[%s8405_s30 + $0x518] sm:$0xff] }
 0x1bc   : > { %2202 = vperm.xlu2 %8236, %v1178_v6   ;;  %2197 = vperm.xlu1 %8235, %v1177_v19  }
 0x1bd   : > { %2192 = vperm.xlu0 %8234, %v1176_v26  }
 0x1be   : > { %v8800_v30 = vpop.permute.xlu2 %2037  ;;  %v8802_v39 = vpop.permute.xlu1 %1987 }
 0x1bf   : > { %12779 = vst [vmem:[#allocation73_spill] sm:$0xff] %v8800_v30  ;;  %v8804_v44 = vpop.permute.xlu0 %1982  ;;  %v1184_v30 = vld [vmem:[%s8405_s30 + $0x520] sm:$0xff] }
 0x1c0   : > { %12780 = vst [vmem:[#allocation74_spill] sm:$0xff] %v8802_v39  ;;  %v1182_v39 = vld [vmem:[%s8405_s30 + $0x510] sm:$0xff] }
 0x1c1   : > { %12781 = vst [vmem:[#allocation75_spill] sm:$0xff] %v8804_v44  ;;  %v1186_v44 = vld [vmem:[%s8405_s30 + $0x530] sm:$0xff] }
 0x1c4   : > { %2217 = vperm.xlu2 %8236, %v1181_v46   ;;  %2212 = vperm.xlu1 %8235, %v1180_v59  }
 0x1c5   : > { %2207 = vperm.xlu0 %8234, %v1179_v2  }
 0x1c6   : > { %v8809_v6 = vpop.permute.xlu2 %2052  ;;  %v8811_v19 = vpop.permute.xlu1 %2002 }
 0x1c7   : > { %12782 = vst [vmem:[#allocation76_spill] sm:$0xff] %v8809_v6  ;;  %v8813_v26 = vpop.permute.xlu0 %1997  ;;  %v1187_v6 = vld [vmem:[%s8405_s30 + $0x538] sm:$0xff] }
 0x1c8   : > { %12783 = vst [vmem:[#allocation77_spill] sm:$0xff] %v8811_v19  ;;  %v1185_v19 = vld [vmem:[%s8405_s30 + $0x528] sm:$0xff] }
 0x1c9   : > { %12784 = vst [vmem:[#allocation78_spill] sm:$0xff] %v8813_v26  ;;  %v1189_v26 = vld [vmem:[%s8405_s30 + $0x548] sm:$0xff] }
 0x1cc   : > { %2232 = vperm.xlu2 %8236, %v1184_v30   ;;  %2227 = vperm.xlu1 %8235, %v1183_v31  }
 0x1cd   : > { %2222 = vperm.xlu0 %8234, %v1182_v39  }
 0x1ce   : > { %v8818_v46 = vpop.permute.xlu2 %2067  ;;  %v8820_v59 = vpop.permute.xlu1 %2017 }
 0x1cf   : > { %12785 = vst [vmem:[#allocation79_spill] sm:$0xff] %v8818_v46  ;;  %v8822_v2 = vpop.permute.xlu0 %2012  ;;  %v1190_v46 = vld [vmem:[%s8405_s30 + $0x550] sm:$0xff] }
 0x1d0   : > { %12786 = vst [vmem:[#allocation80_spill] sm:$0xff] %v8820_v59  ;;  %v1188_v59 = vld [vmem:[%s8405_s30 + $0x540] sm:$0xff] }
 0x1d1   : > { %12787 = vst [vmem:[#allocation81_spill] sm:$0xff] %v8822_v2  ;;  %v1192_v2 = vld [vmem:[%s8405_s30 + $0x560] sm:$0xff] }
 0x1d4   : > { %2247 = vperm.xlu2 %8236, %v1187_v6   ;;  %2242 = vperm.xlu1 %8235, %v1186_v44  }
 0x1d5   : > { %2237 = vperm.xlu0 %8234, %v1185_v19  }
 0x1d6   : > { %v8827_v30 = vpop.permute.xlu2 %2082  ;;  %v8829_v31 = vpop.permute.xlu1 %2032 }
 0x1d7   : > { %12788 = vst [vmem:[#allocation82_spill] sm:$0xff] %v8827_v30  ;;  %v8831_v39 = vpop.permute.xlu0 %2027  ;;  %v1193_v30 = vld [vmem:[%s8405_s30 + $0x568] sm:$0xff] }
 0x1d8   : > { %12789 = vst [vmem:[#allocation83_spill] sm:$0xff] %v8829_v31  ;;  %v1191_v31 = vld [vmem:[%s8405_s30 + $0x558] sm:$0xff] }
 0x1d9   : > { %12790 = vst [vmem:[#allocation84_spill] sm:$0xff] %v8831_v39  ;;  %v1195_v39 = vld [vmem:[%s8405_s30 + $0x578] sm:$0xff] }
 0x1dc   : > { %2262 = vperm.xlu2 %8236, %v1190_v46   ;;  %2257 = vperm.xlu1 %8235, %v1189_v26  }
 0x1dd   : > { %2252 = vperm.xlu0 %8234, %v1188_v59  }
 0x1de   : > { %v8836_v6 = vpop.permute.xlu2 %2097  ;;  %v8838_v44 = vpop.permute.xlu1 %2047 }
 0x1df   : > { %12791 = vst [vmem:[#allocation85_spill] sm:$0xff] %v8836_v6  ;;  %v8840_v19 = vpop.permute.xlu0 %2042  ;;  %v1196_v6 = vld [vmem:[%s8405_s30 + $0x580] sm:$0xff] }
 0x1e0   : > { %12792 = vst [vmem:[#allocation86_spill] sm:$0xff] %v8838_v44  ;;  %v1194_v44 = vld [vmem:[%s8405_s30 + $0x570] sm:$0xff] }
 0x1e1   : > { %12793 = vst [vmem:[#allocation87_spill] sm:$0xff] %v8840_v19  ;;  %v1198_v19 = vld [vmem:[%s8405_s30 + $0x590] sm:$0xff] }
 0x1e4   : > { %2277 = vperm.xlu2 %8236, %v1193_v30   ;;  %2272 = vperm.xlu1 %8235, %v1192_v2  }
 0x1e5   : > { %2267 = vperm.xlu0 %8234, %v1191_v31  }
 0x1e6   : > { %v8845_v46 = vpop.permute.xlu2 %2112  ;;  %v8847_v26 = vpop.permute.xlu1 %2062 }
 0x1e7   : > { %12794 = vst [vmem:[#allocation88_spill] sm:$0xff] %v8845_v46  ;;  %v8849_v59 = vpop.permute.xlu0 %2057  ;;  %v1199_v46 = vld [vmem:[%s8405_s30 + $0x598] sm:$0xff] }
 0x1e8   : > { %12795 = vst [vmem:[#allocation89_spill] sm:$0xff] %v8847_v26  ;;  %v1197_v26 = vld [vmem:[%s8405_s30 + $0x588] sm:$0xff] }
 0x1e9   : > { %12796 = vst [vmem:[#allocation90_spill] sm:$0xff] %v8849_v59  ;;  %v1201_v59 = vld [vmem:[%s8405_s30 + $0x5a8] sm:$0xff] }
 0x1ec   : > { %2292 = vperm.xlu2 %8236, %v1196_v6   ;;  %2287 = vperm.xlu1 %8235, %v1195_v39  }
 0x1ed   : > { %2282 = vperm.xlu0 %8234, %v1194_v44  }
 0x1ee   : > { %v8854_v30 = vpop.permute.xlu2 %2127  ;;  %v8856_v2 = vpop.permute.xlu1 %2077 }
 0x1ef   : > { %12797 = vst [vmem:[#allocation91_spill] sm:$0xff] %v8854_v30  ;;  %v8858_v31 = vpop.permute.xlu0 %2072  ;;  %v1202_v30 = vld [vmem:[%s8405_s30 + $0x5b0] sm:$0xff] }
 0x1f0   : > { %12798 = vst [vmem:[#allocation92_spill] sm:$0xff] %v8856_v2  ;;  %v1200_v2 = vld [vmem:[%s8405_s30 + $0x5a0] sm:$0xff] }
 0x1f1   : > { %12799 = vst [vmem:[#allocation93_spill] sm:$0xff] %v8858_v31  ;;  %v1204_v31 = vld [vmem:[%s8405_s30 + $0x5c0] sm:$0xff] }
 0x1f4   : > { %2307 = vperm.xlu2 %8236, %v1199_v46   ;;  %2302 = vperm.xlu1 %8235, %v1198_v19  }
 0x1f5   : > { %2297 = vperm.xlu0 %8234, %v1197_v26  }
 0x1f6   : > { %v8863_v6 = vpop.permute.xlu2 %2142  ;;  %v8865_v39 = vpop.permute.xlu1 %2092 }
 0x1f7   : > { %12800 = vst [vmem:[#allocation94_spill] sm:$0xff] %v8863_v6  ;;  %v8867_v44 = vpop.permute.xlu0 %2087  ;;  %v1205_v6 = vld [vmem:[%s8405_s30 + $0x5c8] sm:$0xff] }
 0x1f8   : > { %12801 = vst [vmem:[#allocation95_spill] sm:$0xff] %v8865_v39  ;;  %v1203_v39 = vld [vmem:[%s8405_s30 + $0x5b8] sm:$0xff] }
 0x1f9   : > { %12802 = vst [vmem:[#allocation96_spill] sm:$0xff] %v8867_v44  ;;  %v1207_v44 = vld [vmem:[%s8405_s30 + $0x5d8] sm:$0xff] }
 0x1fc   : > { %2322 = vperm.xlu2 %8236, %v1202_v30   ;;  %2317 = vperm.xlu1 %8235, %v1201_v59  }
 0x1fd   : > { %2312 = vperm.xlu0 %8234, %v1200_v2  }
 0x1fe   : > { %v8872_v46 = vpop.permute.xlu2 %2157  ;;  %v8874_v19 = vpop.permute.xlu1 %2107 }
 0x1ff   : > { %12803 = vst [vmem:[#allocation97_spill] sm:$0xff] %v8872_v46  ;;  %v8876_v26 = vpop.permute.xlu0 %2102  ;;  %v1208_v46 = vld [vmem:[%s8405_s30 + $0x5e0] sm:$0xff] }
 0x200   : > { %12804 = vst [vmem:[#allocation98_spill] sm:$0xff] %v8874_v19  ;;  %v1206_v19 = vld [vmem:[%s8405_s30 + $0x5d0] sm:$0xff] }
 0x201   : > { %12805 = vst [vmem:[#allocation99_spill] sm:$0xff] %v8876_v26  ;;  %v1210_v26 = vld [vmem:[%s8405_s30 + $0x5f0] sm:$0xff] }
 0x204   : > { %2337 = vperm.xlu2 %8236, %v1205_v6   ;;  %2332 = vperm.xlu1 %8235, %v1204_v31  }
 0x205   : > { %2327 = vperm.xlu0 %8234, %v1203_v39  }
 0x206   : > { %v8881_v30 = vpop.permute.xlu2 %2172  ;;  %v8883_v59 = vpop.permute.xlu1 %2122 }
 0x207   : > { %12806 = vst [vmem:[#allocation100_spill] sm:$0xff] %v8881_v30  ;;  %v8885_v2 = vpop.permute.xlu0 %2117  ;;  %v1211_v30 = vld [vmem:[%s8405_s30 + $0x5f8] sm:$0xff] }
 0x208   : > { %12807 = vst [vmem:[#allocation101_spill] sm:$0xff] %v8883_v59  ;;  %v1209_v59 = vld [vmem:[%s8405_s30 + $0x5e8] sm:$0xff] }
 0x209   : > { %12808 = vst [vmem:[#allocation102_spill] sm:$0xff] %v8885_v2  ;;  %v1213_v2 = vld [vmem:[%s8405_s30 + $0x608] sm:$0xff] }
 0x20c   : > { %2352 = vperm.xlu2 %8236, %v1208_v46   ;;  %2347 = vperm.xlu1 %8235, %v1207_v44  }
 0x20d   : > { %2342 = vperm.xlu0 %8234, %v1206_v19  }
 0x20e   : > { %v8890_v6 = vpop.permute.xlu2 %2187  ;;  %v8892_v31 = vpop.permute.xlu1 %2137 }
 0x20f   : > { %12809 = vst [vmem:[#allocation103_spill] sm:$0xff] %v8890_v6  ;;  %v8894_v39 = vpop.permute.xlu0 %2132  ;;  %v1214_v6 = vld [vmem:[%s8405_s30 + $0x610] sm:$0xff] }
 0x210   : > { %12810 = vst [vmem:[#allocation104_spill] sm:$0xff] %v8892_v31  ;;  %v1212_v31 = vld [vmem:[%s8405_s30 + $0x600] sm:$0xff] }
 0x211   : > { %12811 = vst [vmem:[#allocation105_spill] sm:$0xff] %v8894_v39  ;;  %v1216_v39 = vld [vmem:[%s8405_s30 + $0x620] sm:$0xff] }
 0x214   : > { %2367 = vperm.xlu2 %8236, %v1211_v30   ;;  %2362 = vperm.xlu1 %8235, %v1210_v26  }
 0x215   : > { %2357 = vperm.xlu0 %8234, %v1209_v59  }
 0x216   : > { %v8899_v46 = vpop.permute.xlu2 %2202  ;;  %v8901_v44 = vpop.permute.xlu1 %2152 }
 0x217   : > { %12812 = vst [vmem:[#allocation106_spill] sm:$0xff] %v8899_v46  ;;  %v8903_v19 = vpop.permute.xlu0 %2147  ;;  %v1217_v46 = vld [vmem:[%s8405_s30 + $0x628] sm:$0xff] }
 0x218   : > { %12813 = vst [vmem:[#allocation107_spill] sm:$0xff] %v8901_v44  ;;  %v1215_v44 = vld [vmem:[%s8405_s30 + $0x618] sm:$0xff] }
 0x219   : > { %12814 = vst [vmem:[#allocation108_spill] sm:$0xff] %v8903_v19  ;;  %v1219_v19 = vld [vmem:[%s8405_s30 + $0x638] sm:$0xff] }
 0x21c   : > { %2382 = vperm.xlu2 %8236, %v1214_v6   ;;  %2377 = vperm.xlu1 %8235, %v1213_v2  }
 0x21d   : > { %2372 = vperm.xlu0 %8234, %v1212_v31  }
 0x21e   : > { %v8908_v30 = vpop.permute.xlu2 %2217  ;;  %v8910_v26 = vpop.permute.xlu1 %2167 }
 0x21f   : > { %12815 = vst [vmem:[#allocation109_spill] sm:$0xff] %v8908_v30  ;;  %v8912_v59 = vpop.permute.xlu0 %2162  ;;  %v1220_v30 = vld [vmem:[%s8405_s30 + $0x640] sm:$0xff] }
 0x220   : > { %12816 = vst [vmem:[#allocation110_spill] sm:$0xff] %v8910_v26  ;;  %v1218_v26 = vld [vmem:[%s8405_s30 + $0x630] sm:$0xff] }
 0x221   : > { %12817 = vst [vmem:[#allocation111_spill] sm:$0xff] %v8912_v59  ;;  %v1222_v59 = vld [vmem:[%s8405_s30 + $0x650] sm:$0xff] }
 0x224   : > { %2397 = vperm.xlu2 %8236, %v1217_v46   ;;  %2392 = vperm.xlu1 %8235, %v1216_v39  }
 0x225   : > { %2387 = vperm.xlu0 %8234, %v1215_v44  }
 0x226   : > { %v8917_v6 = vpop.permute.xlu2 %2232  ;;  %v8919_v2 = vpop.permute.xlu1 %2182 }
 0x227   : > { %12818 = vst [vmem:[#allocation112_spill] sm:$0xff] %v8917_v6  ;;  %v8921_v31 = vpop.permute.xlu0 %2177  ;;  %v1223_v6 = vld [vmem:[%s8405_s30 + $0x658] sm:$0xff] }
 0x228   : > { %12819 = vst [vmem:[#allocation113_spill] sm:$0xff] %v8919_v2  ;;  %v1221_v2 = vld [vmem:[%s8405_s30 + $0x648] sm:$0xff] }
 0x229   : > { %12820 = vst [vmem:[#allocation114_spill] sm:$0xff] %v8921_v31  ;;  %v1225_v31 = vld [vmem:[%s8405_s30 + $0x668] sm:$0xff] }
 0x22c   : > { %2412 = vperm.xlu2 %8236, %v1220_v30   ;;  %2407 = vperm.xlu1 %8235, %v1219_v19  }
 0x22d   : > { %2402 = vperm.xlu0 %8234, %v1218_v26  }
 0x22e   : > { %v8926_v46 = vpop.permute.xlu2 %2247  ;;  %v8928_v39 = vpop.permute.xlu1 %2197 }
 0x22f   : > { %12821 = vst [vmem:[#allocation115_spill] sm:$0xff] %v8926_v46  ;;  %v8930_v44 = vpop.permute.xlu0 %2192  ;;  %v1226_v46 = vld [vmem:[%s8405_s30 + $0x670] sm:$0xff] }
 0x230   : > { %12822 = vst [vmem:[#allocation116_spill] sm:$0xff] %v8928_v39  ;;  %v1224_v39 = vld [vmem:[%s8405_s30 + $0x660] sm:$0xff] }
 0x231   : > { %12823 = vst [vmem:[#allocation117_spill] sm:$0xff] %v8930_v44  ;;  %v1228_v44 = vld [vmem:[%s8405_s30 + $0x680] sm:$0xff] }
 0x234   : > { %2427 = vperm.xlu2 %8236, %v1223_v6   ;;  %2422 = vperm.xlu1 %8235, %v1222_v59  }
 0x235   : > { %2417 = vperm.xlu0 %8234, %v1221_v2  }
 0x236   : > { %v8935_v30 = vpop.permute.xlu2 %2262  ;;  %v8937_v19 = vpop.permute.xlu1 %2212 }
 0x237   : > { %12824 = vst [vmem:[#allocation118_spill] sm:$0xff] %v8935_v30  ;;  %v8939_v26 = vpop.permute.xlu0 %2207  ;;  %v1229_v30 = vld [vmem:[%s8405_s30 + $0x688] sm:$0xff] }
 0x238   : > { %12825 = vst [vmem:[#allocation119_spill] sm:$0xff] %v8937_v19  ;;  %v1227_v19 = vld [vmem:[%s8405_s30 + $0x678] sm:$0xff] }
 0x239   : > { %12826 = vst [vmem:[#allocation120_spill] sm:$0xff] %v8939_v26  ;;  %v1231_v26 = vld [vmem:[%s8405_s30 + $0x698] sm:$0xff] }
 0x23c   : > { %2442 = vperm.xlu2 %8236, %v1226_v46   ;;  %2437 = vperm.xlu1 %8235, %v1225_v31  }
 0x23d   : > { %2432 = vperm.xlu0 %8234, %v1224_v39  }
 0x23e   : > { %v8944_v6 = vpop.permute.xlu2 %2277  ;;  %v8946_v59 = vpop.permute.xlu1 %2227 }
 0x23f   : > { %12827 = vst [vmem:[#allocation121_spill] sm:$0xff] %v8944_v6  ;;  %v8948_v2 = vpop.permute.xlu0 %2222  ;;  %v1232_v6 = vld [vmem:[%s8405_s30 + $0x6a0] sm:$0xff] }
 0x240   : > { %12828 = vst [vmem:[#allocation122_spill] sm:$0xff] %v8946_v59  ;;  %v1230_v59 = vld [vmem:[%s8405_s30 + $0x690] sm:$0xff] }
 0x241   : > { %12829 = vst [vmem:[#allocation123_spill] sm:$0xff] %v8948_v2  ;;  %v1234_v2 = vld [vmem:[%s8405_s30 + $0x6b0] sm:$0xff] }
 0x244   : > { %2457 = vperm.xlu2 %8236, %v1229_v30   ;;  %2452 = vperm.xlu1 %8235, %v1228_v44  }
 0x245   : > { %2447 = vperm.xlu0 %8234, %v1227_v19  }
 0x246   : > { %v8953_v46 = vpop.permute.xlu2 %2292  ;;  %v8955_v31 = vpop.permute.xlu1 %2242 }
 0x247   : > { %12830 = vst [vmem:[#allocation124_spill] sm:$0xff] %v8953_v46  ;;  %v8957_v39 = vpop.permute.xlu0 %2237  ;;  %v1235_v46 = vld [vmem:[%s8405_s30 + $0x6b8] sm:$0xff] }
 0x248   : > { %12831 = vst [vmem:[#allocation125_spill] sm:$0xff] %v8955_v31  ;;  %v1233_v31 = vld [vmem:[%s8405_s30 + $0x6a8] sm:$0xff] }
 0x249   : > { %12832 = vst [vmem:[#allocation126_spill] sm:$0xff] %v8957_v39  ;;  %v1237_v39 = vld [vmem:[%s8405_s30 + $0x6c8] sm:$0xff] }
 0x24c   : > { %2472 = vperm.xlu2 %8236, %v1232_v6   ;;  %2467 = vperm.xlu1 %8235, %v1231_v26  }
 0x24d   : > { %2462 = vperm.xlu0 %8234, %v1230_v59  }
 0x24e   : > { %v8962_v30 = vpop.permute.xlu2 %2307  ;;  %v8964_v44 = vpop.permute.xlu1 %2257 }
 0x24f   : > { %12833 = vst [vmem:[#allocation127_spill] sm:$0xff] %v8962_v30  ;;  %v8966_v19 = vpop.permute.xlu0 %2252  ;;  %v1238_v30 = vld [vmem:[%s8405_s30 + $0x6d0] sm:$0xff] }
 0x250   : > { %12834 = vst [vmem:[#allocation128_spill] sm:$0xff] %v8964_v44  ;;  %v1236_v44 = vld [vmem:[%s8405_s30 + $0x6c0] sm:$0xff] }
 0x251   : > { %12835 = vst [vmem:[#allocation129_spill] sm:$0xff] %v8966_v19  ;;  %v1240_v19 = vld [vmem:[%s8405_s30 + $0x6e0] sm:$0xff] }
 0x254   : > { %2487 = vperm.xlu2 %8236, %v1235_v46   ;;  %2482 = vperm.xlu1 %8235, %v1234_v2  }
 0x255   : > { %2477 = vperm.xlu0 %8234, %v1233_v31  }
 0x256   : > { %v8971_v6 = vpop.permute.xlu2 %2322  ;;  %v8973_v26 = vpop.permute.xlu1 %2272 }
 0x257   : > { %12836 = vst [vmem:[#allocation130_spill] sm:$0xff] %v8971_v6  ;;  %v8975_v59 = vpop.permute.xlu0 %2267  ;;  %v1241_v6 = vld [vmem:[%s8405_s30 + $0x6e8] sm:$0xff] }
 0x258   : > { %12837 = vst [vmem:[#allocation131_spill] sm:$0xff] %v8973_v26  ;;  %v1239_v26 = vld [vmem:[%s8405_s30 + $0x6d8] sm:$0xff] }
 0x259   : > { %12838 = vst [vmem:[#allocation132_spill] sm:$0xff] %v8975_v59  ;;  %v1243_v59 = vld [vmem:[%s8405_s30 + $0x6f8] sm:$0xff] }
 0x25c   : > { %2502 = vperm.xlu2 %8236, %v1238_v30   ;;  %2497 = vperm.xlu1 %8235, %v1237_v39  }
 0x25d   : > { %2492 = vperm.xlu0 %8234, %v1236_v44  }
 0x25e   : > { %v8980_v46 = vpop.permute.xlu2 %2337  ;;  %v8982_v2 = vpop.permute.xlu1 %2287 }
 0x25f   : > { %12839 = vst [vmem:[#allocation133_spill] sm:$0xff] %v8980_v46  ;;  %v8984_v31 = vpop.permute.xlu0 %2282  ;;  %v1244_v46 = vld [vmem:[%s8405_s30 + $0x700] sm:$0xff] }
 0x260   : > { %12840 = vst [vmem:[#allocation134_spill] sm:$0xff] %v8982_v2  ;;  %v1242_v2 = vld [vmem:[%s8405_s30 + $0x6f0] sm:$0xff] }
 0x261   : > { %12841 = vst [vmem:[#allocation135_spill] sm:$0xff] %v8984_v31  ;;  %v1246_v31 = vld [vmem:[%s8405_s30 + $0x710] sm:$0xff] }
 0x264   : > { %2517 = vperm.xlu2 %8236, %v1241_v6   ;;  %2512 = vperm.xlu1 %8235, %v1240_v19  }
 0x265   : > { %2507 = vperm.xlu0 %8234, %v1239_v26  }
 0x266   : > { %v8989_v30 = vpop.permute.xlu2 %2352  ;;  %v8991_v39 = vpop.permute.xlu1 %2302 }
 0x267   : > { %12842 = vst [vmem:[#allocation136_spill] sm:$0xff] %v8989_v30  ;;  %v8993_v44 = vpop.permute.xlu0 %2297  ;;  %v1247_v30 = vld [vmem:[%s8405_s30 + $0x718] sm:$0xff] }
 0x268   : > { %12843 = vst [vmem:[#allocation137_spill] sm:$0xff] %v8991_v39  ;;  %v1245_v39 = vld [vmem:[%s8405_s30 + $0x708] sm:$0xff] }
 0x269   : > { %12844 = vst [vmem:[#allocation138_spill] sm:$0xff] %v8993_v44  ;;  %v1249_v44 = vld [vmem:[%s8405_s30 + $0x728] sm:$0xff] }
 0x26c   : > { %2532 = vperm.xlu2 %8236, %v1244_v46   ;;  %2527 = vperm.xlu1 %8235, %v1243_v59  }
 0x26d   : > { %2522 = vperm.xlu0 %8234, %v1242_v2  }
 0x26e   : > { %v8998_v6 = vpop.permute.xlu2 %2367  ;;  %v9000_v19 = vpop.permute.xlu1 %2317 }
 0x26f   : > { %12845 = vst [vmem:[#allocation139_spill] sm:$0xff] %v8998_v6  ;;  %v9002_v26 = vpop.permute.xlu0 %2312  ;;  %v1250_v6 = vld [vmem:[%s8405_s30 + $0x730] sm:$0xff] }
 0x270   : > { %12846 = vst [vmem:[#allocation140_spill] sm:$0xff] %v9000_v19  ;;  %v1248_v19 = vld [vmem:[%s8405_s30 + $0x720] sm:$0xff] }
 0x271   : > { %12847 = vst [vmem:[#allocation141_spill] sm:$0xff] %v9002_v26  ;;  %v1252_v26 = vld [vmem:[%s8405_s30 + $0x740] sm:$0xff] }
 0x274   : > { %2547 = vperm.xlu2 %8236, %v1247_v30   ;;  %2542 = vperm.xlu1 %8235, %v1246_v31  }
 0x275   : > { %2537 = vperm.xlu0 %8234, %v1245_v39  }
 0x276   : > { %v9007_v46 = vpop.permute.xlu2 %2382  ;;  %v9009_v59 = vpop.permute.xlu1 %2332 }
 0x277   : > { %12848 = vst [vmem:[#allocation142_spill] sm:$0xff] %v9007_v46  ;;  %v9011_v2 = vpop.permute.xlu0 %2327  ;;  %v1253_v46 = vld [vmem:[%s8405_s30 + $0x748] sm:$0xff] }
 0x278   : > { %12849 = vst [vmem:[#allocation143_spill] sm:$0xff] %v9009_v59  ;;  %v1251_v59 = vld [vmem:[%s8405_s30 + $0x738] sm:$0xff] }
 0x279   : > { %12850 = vst [vmem:[#allocation144_spill] sm:$0xff] %v9011_v2  ;;  %v1255_v2 = vld [vmem:[%s8405_s30 + $0x758] sm:$0xff] }
 0x27c   : > { %2562 = vperm.xlu2 %8236, %v1250_v6   ;;  %2557 = vperm.xlu1 %8235, %v1249_v44  }
 0x27d   : > { %2552 = vperm.xlu0 %8234, %v1248_v19  }
 0x27e   : > { %v9016_v30 = vpop.permute.xlu2 %2397  ;;  %v9018_v31 = vpop.permute.xlu1 %2347 }
 0x27f   : > { %12851 = vst [vmem:[#allocation145_spill] sm:$0xff] %v9016_v30  ;;  %v9020_v39 = vpop.permute.xlu0 %2342  ;;  %v1256_v30 = vld [vmem:[%s8405_s30 + $0x760] sm:$0xff] }
 0x280   : > { %12852 = vst [vmem:[#allocation146_spill] sm:$0xff] %v9018_v31  ;;  %v1254_v31 = vld [vmem:[%s8405_s30 + $0x750] sm:$0xff] }
 0x281   : > { %12853 = vst [vmem:[#allocation147_spill] sm:$0xff] %v9020_v39  ;;  %v1258_v39 = vld [vmem:[%s8405_s30 + $0x770] sm:$0xff] }
 0x284   : > { %2577 = vperm.xlu2 %8236, %v1253_v46   ;;  %2572 = vperm.xlu1 %8235, %v1252_v26  }
 0x285   : > { %2567 = vperm.xlu0 %8234, %v1251_v59  }
 0x286   : > { %v9025_v6 = vpop.permute.xlu2 %2412  ;;  %v9027_v44 = vpop.permute.xlu1 %2362 }
 0x287   : > { %12854 = vst [vmem:[#allocation148_spill] sm:$0xff] %v9025_v6  ;;  %v9029_v19 = vpop.permute.xlu0 %2357  ;;  %v1259_v6 = vld [vmem:[%s8405_s30 + $0x778] sm:$0xff] }
 0x288   : > { %12855 = vst [vmem:[#allocation149_spill] sm:$0xff] %v9027_v44  ;;  %v1257_v44 = vld [vmem:[%s8405_s30 + $0x768] sm:$0xff] }
 0x289   : > { %12856 = vst [vmem:[#allocation150_spill] sm:$0xff] %v9029_v19  ;;  %v1261_v19 = vld [vmem:[%s8405_s30 + $0x788] sm:$0xff] }
 0x28c   : > { %2592 = vperm.xlu2 %8236, %v1256_v30   ;;  %2587 = vperm.xlu1 %8235, %v1255_v2  }
 0x28d   : > { %2582 = vperm.xlu0 %8234, %v1254_v31  }
 0x28e   : > { %v9034_v46 = vpop.permute.xlu2 %2427  ;;  %v9036_v26 = vpop.permute.xlu1 %2377 }
 0x28f   : > { %12857 = vst [vmem:[#allocation151_spill] sm:$0xff] %v9034_v46  ;;  %v9038_v59 = vpop.permute.xlu0 %2372  ;;  %v1262_v46 = vld [vmem:[%s8405_s30 + $0x790] sm:$0xff] }
 0x290   : > { %12858 = vst [vmem:[#allocation152_spill] sm:$0xff] %v9036_v26  ;;  %v1260_v26 = vld [vmem:[%s8405_s30 + $0x780] sm:$0xff] }
 0x291   : > { %12859 = vst [vmem:[#allocation153_spill] sm:$0xff] %v9038_v59  ;;  %v1264_v59 = vld [vmem:[%s8405_s30 + $0x7a0] sm:$0xff] }
 0x294   : > { %2607 = vperm.xlu2 %8236, %v1259_v6   ;;  %2602 = vperm.xlu1 %8235, %v1258_v39  }
 0x295   : > { %2597 = vperm.xlu0 %8234, %v1257_v44  }
 0x296   : > { %v9043_v30 = vpop.permute.xlu2 %2442  ;;  %v9045_v2 = vpop.permute.xlu1 %2392 }
 0x297   : > { %12860 = vst [vmem:[#allocation154_spill] sm:$0xff] %v9043_v30  ;;  %v9047_v31 = vpop.permute.xlu0 %2387  ;;  %v1265_v30 = vld [vmem:[%s8405_s30 + $0x7a8] sm:$0xff] }
 0x298   : > { %12861 = vst [vmem:[#allocation155_spill] sm:$0xff] %v9045_v2  ;;  %v1263_v2 = vld [vmem:[%s8405_s30 + $0x798] sm:$0xff] }
 0x299   : > { %12862 = vst [vmem:[#allocation156_spill] sm:$0xff] %v9047_v31  ;;  %v1267_v31 = vld [vmem:[%s8405_s30 + $0x7b8] sm:$0xff] }
 0x29c   : > { %2622 = vperm.xlu2 %8236, %v1262_v46   ;;  %2617 = vperm.xlu1 %8235, %v1261_v19  }
 0x29d   : > { %2612 = vperm.xlu0 %8234, %v1260_v26  }
 0x29e   : > { %v9052_v6 = vpop.permute.xlu2 %2457  ;;  %v9054_v39 = vpop.permute.xlu1 %2407 }
 0x29f   : > { %12863 = vst [vmem:[#allocation157_spill] sm:$0xff] %v9052_v6  ;;  %v9056_v44 = vpop.permute.xlu0 %2402  ;;  %v1268_v6 = vld [vmem:[%s8405_s30 + $0x7c0] sm:$0xff] }
 0x2a0   : > { %12864 = vst [vmem:[#allocation158_spill] sm:$0xff] %v9054_v39  ;;  %v1266_v39 = vld [vmem:[%s8405_s30 + $0x7b0] sm:$0xff] }
 0x2a1   : > { %12865 = vst [vmem:[#allocation159_spill] sm:$0xff] %v9056_v44  ;;  %v1270_v44 = vld [vmem:[%s8405_s30 + $0x7d0] sm:$0xff] }
 0x2a4   : > { %2637 = vperm.xlu2 %8236, %v1265_v30   ;;  %2632 = vperm.xlu1 %8235, %v1264_v59  }
 0x2a5   : > { %2627 = vperm.xlu0 %8234, %v1263_v2  }
 0x2a6   : > { %v9061_v46 = vpop.permute.xlu2 %2472  ;;  %v9063_v19 = vpop.permute.xlu1 %2422 }
 0x2a7   : > { %12866 = vst [vmem:[#allocation160_spill] sm:$0xff] %v9061_v46  ;;  %v9065_v26 = vpop.permute.xlu0 %2417  ;;  %v1271_v46 = vld [vmem:[%s8405_s30 + $0x7d8] sm:$0xff] }
 0x2a8   : > { %12867 = vst [vmem:[#allocation161_spill] sm:$0xff] %v9063_v19  ;;  %v1269_v19 = vld [vmem:[%s8405_s30 + $0x7c8] sm:$0xff] }
 0x2a9   : > { %12868 = vst [vmem:[#allocation162_spill] sm:$0xff] %v9065_v26  ;;  %v1273_v26 = vld [vmem:[%s8405_s30 + $0x7e8] sm:$0xff] }
 0x2ac   : > { %2652 = vperm.xlu2 %8236, %v1268_v6   ;;  %2647 = vperm.xlu1 %8235, %v1267_v31  }
 0x2ad   : > { %2642 = vperm.xlu0 %8234, %v1266_v39  }
 0x2ae   : > { %v9070_v30 = vpop.permute.xlu2 %2487  ;;  %v9072_v59 = vpop.permute.xlu1 %2437 }
 0x2af   : > { %12869 = vst [vmem:[#allocation163_spill] sm:$0xff] %v9070_v30  ;;  %v9074_v2 = vpop.permute.xlu0 %2432  ;;  %v1274_v30 = vld [vmem:[%s8405_s30 + $0x7f0] sm:$0xff] }
 0x2b0   : > { %12870 = vst [vmem:[#allocation164_spill] sm:$0xff] %v9072_v59  ;;  %v1272_v59 = vld [vmem:[%s8405_s30 + $0x7e0] sm:$0xff] }
 0x2b1   : > { %12871 = vst [vmem:[#allocation165_spill] sm:$0xff] %v9074_v2  ;;  %v1276_v2 = vld [vmem:[%s8405_s30 + $0x800] sm:$0xff] }
 0x2b4   : > { %2667 = vperm.xlu2 %8236, %v1271_v46   ;;  %2662 = vperm.xlu1 %8235, %v1270_v44  }
 0x2b5   : > { %2657 = vperm.xlu0 %8234, %v1269_v19  }
 0x2b6   : > { %v9079_v6 = vpop.permute.xlu2 %2502  ;;  %v9081_v31 = vpop.permute.xlu1 %2452 }
 0x2b7   : > { %12872 = vst [vmem:[#allocation166_spill] sm:$0xff] %v9079_v6  ;;  %v9083_v39 = vpop.permute.xlu0 %2447  ;;  %v1277_v6 = vld [vmem:[%s8405_s30 + $0x808] sm:$0xff] }
 0x2b8   : > { %12873 = vst [vmem:[#allocation167_spill] sm:$0xff] %v9081_v31  ;;  %v1275_v31 = vld [vmem:[%s8405_s30 + $0x7f8] sm:$0xff] }
 0x2b9   : > { %12874 = vst [vmem:[#allocation168_spill] sm:$0xff] %v9083_v39  ;;  %v1279_v39 = vld [vmem:[%s8405_s30 + $0x818] sm:$0xff] }
 0x2bc   : > { %2682 = vperm.xlu2 %8236, %v1274_v30   ;;  %2677 = vperm.xlu1 %8235, %v1273_v26  }
 0x2bd   : > { %2672 = vperm.xlu0 %8234, %v1272_v59  }
 0x2be   : > { %v9088_v46 = vpop.permute.xlu2 %2517  ;;  %v9090_v44 = vpop.permute.xlu1 %2467 }
 0x2bf   : > { %12875 = vst [vmem:[#allocation169_spill] sm:$0xff] %v9088_v46  ;;  %v9092_v19 = vpop.permute.xlu0 %2462  ;;  %v1280_v46 = vld [vmem:[%s8405_s30 + $0x820] sm:$0xff] }
 0x2c0   : > { %12876 = vst [vmem:[#allocation170_spill] sm:$0xff] %v9090_v44  ;;  %v1278_v44 = vld [vmem:[%s8405_s30 + $0x810] sm:$0xff] }
 0x2c1   : > { %12877 = vst [vmem:[#allocation171_spill] sm:$0xff] %v9092_v19  ;;  %v1282_v19 = vld [vmem:[%s8405_s30 + $0x830] sm:$0xff] }
 0x2c4   : > { %2697 = vperm.xlu2 %8236, %v1277_v6   ;;  %2692 = vperm.xlu1 %8235, %v1276_v2  }
 0x2c5   : > { %2687 = vperm.xlu0 %8234, %v1275_v31  }
 0x2c6   : > { %v9097_v30 = vpop.permute.xlu2 %2532  ;;  %v9099_v26 = vpop.permute.xlu1 %2482 }
 0x2c7   : > { %12878 = vst [vmem:[#allocation172_spill] sm:$0xff] %v9097_v30  ;;  %v9101_v59 = vpop.permute.xlu0 %2477  ;;  %v1283_v30 = vld [vmem:[%s8405_s30 + $0x838] sm:$0xff] }
 0x2c8   : > { %12879 = vst [vmem:[#allocation173_spill] sm:$0xff] %v9099_v26  ;;  %v1281_v26 = vld [vmem:[%s8405_s30 + $0x828] sm:$0xff] }
 0x2c9   : > { %12880 = vst [vmem:[#allocation174_spill] sm:$0xff] %v9101_v59  ;;  %v1285_v59 = vld [vmem:[%s8405_s30 + $0x848] sm:$0xff] }
 0x2cc   : > { %2712 = vperm.xlu2 %8236, %v1280_v46   ;;  %2707 = vperm.xlu1 %8235, %v1279_v39  }
 0x2cd   : > { %2702 = vperm.xlu0 %8234, %v1278_v44  }
 0x2ce   : > { %v9106_v6 = vpop.permute.xlu2 %2547  ;;  %v9108_v2 = vpop.permute.xlu1 %2497 }
 0x2cf   : > { %12881 = vst [vmem:[#allocation175_spill] sm:$0xff] %v9106_v6  ;;  %v9110_v31 = vpop.permute.xlu0 %2492  ;;  %v1286_v6 = vld [vmem:[%s8405_s30 + $0x850] sm:$0xff] }
 0x2d0   : > { %12882 = vst [vmem:[#allocation176_spill] sm:$0xff] %v9108_v2  ;;  %v1284_v2 = vld [vmem:[%s8405_s30 + $0x840] sm:$0xff] }
 0x2d1   : > { %12883 = vst [vmem:[#allocation177_spill] sm:$0xff] %v9110_v31  ;;  %v1288_v31 = vld [vmem:[%s8405_s30 + $0x860] sm:$0xff] }
 0x2d4   : > { %2727 = vperm.xlu2 %8236, %v1283_v30   ;;  %2722 = vperm.xlu1 %8235, %v1282_v19  }
 0x2d5   : > { %2717 = vperm.xlu0 %8234, %v1281_v26  }
 0x2d6   : > { %v9115_v46 = vpop.permute.xlu2 %2562  ;;  %v9117_v39 = vpop.permute.xlu1 %2512 }
 0x2d7   : > { %12884 = vst [vmem:[#allocation178_spill] sm:$0xff] %v9115_v46  ;;  %v9119_v44 = vpop.permute.xlu0 %2507  ;;  %v1289_v46 = vld [vmem:[%s8405_s30 + $0x868] sm:$0xff] }
 0x2d8   : > { %12885 = vst [vmem:[#allocation179_spill] sm:$0xff] %v9117_v39  ;;  %v1287_v39 = vld [vmem:[%s8405_s30 + $0x858] sm:$0xff] }
 0x2d9   : > { %12886 = vst [vmem:[#allocation180_spill] sm:$0xff] %v9119_v44  ;;  %v1291_v44 = vld [vmem:[%s8405_s30 + $0x878] sm:$0xff] }
 0x2dc   : > { %2742 = vperm.xlu2 %8236, %v1286_v6   ;;  %2737 = vperm.xlu1 %8235, %v1285_v59  }
 0x2dd   : > { %2732 = vperm.xlu0 %8234, %v1284_v2  }
 0x2de   : > { %v9124_v30 = vpop.permute.xlu2 %2577  ;;  %v9126_v19 = vpop.permute.xlu1 %2527 }
 0x2df   : > { %12887 = vst [vmem:[#allocation181_spill] sm:$0xff] %v9124_v30  ;;  %v9128_v26 = vpop.permute.xlu0 %2522  ;;  %v1292_v30 = vld [vmem:[%s8405_s30 + $0x880] sm:$0xff] }
 0x2e0   : > { %12888 = vst [vmem:[#allocation182_spill] sm:$0xff] %v9126_v19  ;;  %v1290_v19 = vld [vmem:[%s8405_s30 + $0x870] sm:$0xff] }
 0x2e1   : > { %12889 = vst [vmem:[#allocation183_spill] sm:$0xff] %v9128_v26  ;;  %v1294_v26 = vld [vmem:[%s8405_s30 + $0x890] sm:$0xff] }
 0x2e4   : > { %2757 = vperm.xlu2 %8236, %v1289_v46   ;;  %2752 = vperm.xlu1 %8235, %v1288_v31  }
 0x2e5   : > { %2747 = vperm.xlu0 %8234, %v1287_v39  }
 0x2e6   : > { %v9133_v6 = vpop.permute.xlu2 %2592  ;;  %v9135_v59 = vpop.permute.xlu1 %2542 }
 0x2e7   : > { %12890 = vst [vmem:[#allocation184_spill] sm:$0xff] %v9133_v6  ;;  %v9137_v2 = vpop.permute.xlu0 %2537  ;;  %v1295_v6 = vld [vmem:[%s8405_s30 + $0x898] sm:$0xff] }
 0x2e8   : > { %12891 = vst [vmem:[#allocation185_spill] sm:$0xff] %v9135_v59  ;;  %v1293_v59 = vld [vmem:[%s8405_s30 + $0x888] sm:$0xff] }
 0x2e9   : > { %12892 = vst [vmem:[#allocation186_spill] sm:$0xff] %v9137_v2  ;;  %v1297_v2 = vld [vmem:[%s8405_s30 + $0x8a8] sm:$0xff] }
 0x2ec   : > { %2772 = vperm.xlu2 %8236, %v1292_v30   ;;  %2767 = vperm.xlu1 %8235, %v1291_v44  }
 0x2ed   : > { %2762 = vperm.xlu0 %8234, %v1290_v19  }
 0x2ee   : > { %v9142_v46 = vpop.permute.xlu2 %2607  ;;  %v9144_v31 = vpop.permute.xlu1 %2557 }
 0x2ef   : > { %12893 = vst [vmem:[#allocation187_spill] sm:$0xff] %v9142_v46  ;;  %v9146_v39 = vpop.permute.xlu0 %2552  ;;  %v1298_v46 = vld [vmem:[%s8405_s30 + $0x8b0] sm:$0xff] }
 0x2f0   : > { %12894 = vst [vmem:[#allocation188_spill] sm:$0xff] %v9144_v31  ;;  %v1296_v31 = vld [vmem:[%s8405_s30 + $0x8a0] sm:$0xff] }
 0x2f1   : > { %12895 = vst [vmem:[#allocation189_spill] sm:$0xff] %v9146_v39  ;;  %v1300_v39 = vld [vmem:[%s8405_s30 + $0x8c0] sm:$0xff] }
 0x2f4   : > { %2787 = vperm.xlu2 %8236, %v1295_v6   ;;  %2782 = vperm.xlu1 %8235, %v1294_v26  }
 0x2f5   : > { %2777 = vperm.xlu0 %8234, %v1293_v59  }
 0x2f6   : > { %v9151_v30 = vpop.permute.xlu2 %2622  ;;  %v9153_v44 = vpop.permute.xlu1 %2572 }
 0x2f7   : > { %12896 = vst [vmem:[#allocation190_spill] sm:$0xff] %v9151_v30  ;;  %v9155_v19 = vpop.permute.xlu0 %2567  ;;  %v1301_v30 = vld [vmem:[%s8405_s30 + $0x8c8] sm:$0xff] }
 0x2f8   : > { %12897 = vst [vmem:[#allocation191_spill] sm:$0xff] %v9153_v44  ;;  %v1299_v44 = vld [vmem:[%s8405_s30 + $0x8b8] sm:$0xff] }
 0x2f9   : > { %12898 = vst [vmem:[#allocation192_spill] sm:$0xff] %v9155_v19  ;;  %v1303_v19 = vld [vmem:[%s8405_s30 + $0x8d8] sm:$0xff] }
 0x2fc   : > { %2802 = vperm.xlu2 %8236, %v1298_v46   ;;  %2797 = vperm.xlu1 %8235, %v1297_v2  }
 0x2fd   : > { %2792 = vperm.xlu0 %8234, %v1296_v31  }
 0x2fe   : > { %v9160_v6 = vpop.permute.xlu2 %2637  ;;  %v9162_v26 = vpop.permute.xlu1 %2587 }
 0x2ff   : > { %12899 = vst [vmem:[#allocation193_spill] sm:$0xff] %v9160_v6  ;;  %v9164_v59 = vpop.permute.xlu0 %2582  ;;  %v1304_v6 = vld [vmem:[%s8405_s30 + $0x8e0] sm:$0xff] }
 0x300   : > { %12900 = vst [vmem:[#allocation194_spill] sm:$0xff] %v9162_v26  ;;  %v1302_v26 = vld [vmem:[%s8405_s30 + $0x8d0] sm:$0xff] }
 0x301   : > { %12901 = vst [vmem:[#allocation195_spill] sm:$0xff] %v9164_v59  ;;  %v1306_v59 = vld [vmem:[%s8405_s30 + $0x8f0] sm:$0xff] }
 0x304   : > { %2817 = vperm.xlu2 %8236, %v1301_v30   ;;  %2812 = vperm.xlu1 %8235, %v1300_v39  }
 0x305   : > { %2807 = vperm.xlu0 %8234, %v1299_v44  }
 0x306   : > { %v9169_v46 = vpop.permute.xlu2 %2652  ;;  %v9171_v2 = vpop.permute.xlu1 %2602 }
 0x307   : > { %12902 = vst [vmem:[#allocation196_spill] sm:$0xff] %v9169_v46  ;;  %v9173_v31 = vpop.permute.xlu0 %2597  ;;  %v1307_v46 = vld [vmem:[%s8405_s30 + $0x8f8] sm:$0xff] }
 0x308   : > { %12903 = vst [vmem:[#allocation197_spill] sm:$0xff] %v9171_v2  ;;  %v1305_v2 = vld [vmem:[%s8405_s30 + $0x8e8] sm:$0xff] }
 0x309   : > { %12904 = vst [vmem:[#allocation198_spill] sm:$0xff] %v9173_v31  ;;  %v1309_v31 = vld [vmem:[%s8405_s30 + $0x908] sm:$0xff] }
 0x30c   : > { %2832 = vperm.xlu2 %8236, %v1304_v6   ;;  %2827 = vperm.xlu1 %8235, %v1303_v19  }
 0x30d   : > { %2822 = vperm.xlu0 %8234, %v1302_v26  }
 0x30e   : > { %v9178_v30 = vpop.permute.xlu2 %2667  ;;  %v9180_v39 = vpop.permute.xlu1 %2617 }
 0x30f   : > { %12905 = vst [vmem:[#allocation199_spill] sm:$0xff] %v9178_v30  ;;  %v9182_v44 = vpop.permute.xlu0 %2612  ;;  %v1310_v30 = vld [vmem:[%s8405_s30 + $0x910] sm:$0xff] }
 0x310   : > { %12906 = vst [vmem:[#allocation200_spill] sm:$0xff] %v9180_v39  ;;  %v1308_v39 = vld [vmem:[%s8405_s30 + $0x900] sm:$0xff] }
 0x311   : > { %12907 = vst [vmem:[#allocation201_spill] sm:$0xff] %v9182_v44  ;;  %v1312_v44 = vld [vmem:[%s8405_s30 + $0x920] sm:$0xff] }
 0x314   : > { %2847 = vperm.xlu2 %8236, %v1307_v46   ;;  %2842 = vperm.xlu1 %8235, %v1306_v59  }
 0x315   : > { %2837 = vperm.xlu0 %8234, %v1305_v2  }
 0x316   : > { %v9187_v6 = vpop.permute.xlu2 %2682  ;;  %v9189_v19 = vpop.permute.xlu1 %2632 }
 0x317   : > { %12908 = vst [vmem:[#allocation202_spill] sm:$0xff] %v9187_v6  ;;  %v9191_v26 = vpop.permute.xlu0 %2627  ;;  %v1313_v6 = vld [vmem:[%s8405_s30 + $0x928] sm:$0xff] }
 0x318   : > { %12909 = vst [vmem:[#allocation203_spill] sm:$0xff] %v9189_v19  ;;  %v1311_v19 = vld [vmem:[%s8405_s30 + $0x918] sm:$0xff] }
 0x319   : > { %12910 = vst [vmem:[#allocation204_spill] sm:$0xff] %v9191_v26  ;;  %v1315_v26 = vld [vmem:[%s8405_s30 + $0x938] sm:$0xff] }
 0x31c   : > { %2862 = vperm.xlu2 %8236, %v1310_v30   ;;  %2857 = vperm.xlu1 %8235, %v1309_v31  }
 0x31d   : > { %2852 = vperm.xlu0 %8234, %v1308_v39  }
 0x31e   : > { %v9196_v46 = vpop.permute.xlu2 %2697  ;;  %v9198_v59 = vpop.permute.xlu1 %2647 }
 0x31f   : > { %12911 = vst [vmem:[#allocation205_spill] sm:$0xff] %v9196_v46  ;;  %v9200_v2 = vpop.permute.xlu0 %2642  ;;  %v1316_v46 = vld [vmem:[%s8405_s30 + $0x940] sm:$0xff] }
 0x320   : > { %12912 = vst [vmem:[#allocation206_spill] sm:$0xff] %v9198_v59  ;;  %v1314_v59 = vld [vmem:[%s8405_s30 + $0x930] sm:$0xff] }
 0x321   : > { %12913 = vst [vmem:[#allocation207_spill] sm:$0xff] %v9200_v2  ;;  %v1318_v2 = vld [vmem:[%s8405_s30 + $0x950] sm:$0xff] }
 0x324   : > { %2877 = vperm.xlu2 %8236, %v1313_v6   ;;  %2872 = vperm.xlu1 %8235, %v1312_v44  }
 0x325   : > { %2867 = vperm.xlu0 %8234, %v1311_v19  }
 0x326   : > { %v9205_v30 = vpop.permute.xlu2 %2712  ;;  %v9207_v31 = vpop.permute.xlu1 %2662 }
 0x327   : > { %12914 = vst [vmem:[#allocation208_spill] sm:$0xff] %v9205_v30  ;;  %v9209_v39 = vpop.permute.xlu0 %2657  ;;  %v1319_v30 = vld [vmem:[%s8405_s30 + $0x958] sm:$0xff] }
 0x328   : > { %12915 = vst [vmem:[#allocation209_spill] sm:$0xff] %v9207_v31  ;;  %v1317_v31 = vld [vmem:[%s8405_s30 + $0x948] sm:$0xff] }
 0x329   : > { %12916 = vst [vmem:[#allocation210_spill] sm:$0xff] %v9209_v39  ;;  %v1321_v39 = vld [vmem:[%s8405_s30 + $0x968] sm:$0xff] }
 0x32c   : > { %2892 = vperm.xlu2 %8236, %v1316_v46   ;;  %2887 = vperm.xlu1 %8235, %v1315_v26  }
 0x32d   : > { %2882 = vperm.xlu0 %8234, %v1314_v59  }
 0x32e   : > { %v9214_v6 = vpop.permute.xlu2 %2727  ;;  %v9216_v44 = vpop.permute.xlu1 %2677 }
 0x32f   : > { %12917 = vst [vmem:[#allocation211_spill] sm:$0xff] %v9214_v6  ;;  %v9218_v19 = vpop.permute.xlu0 %2672  ;;  %v1322_v6 = vld [vmem:[%s8405_s30 + $0x970] sm:$0xff] }
 0x330   : > { %12918 = vst [vmem:[#allocation212_spill] sm:$0xff] %v9216_v44  ;;  %v1320_v44 = vld [vmem:[%s8405_s30 + $0x960] sm:$0xff] }
 0x331   : > { %12919 = vst [vmem:[#allocation213_spill] sm:$0xff] %v9218_v19  ;;  %v1324_v19 = vld [vmem:[%s8405_s30 + $0x980] sm:$0xff] }
 0x334   : > { %2907 = vperm.xlu2 %8236, %v1319_v30   ;;  %2902 = vperm.xlu1 %8235, %v1318_v2  }
 0x335   : > { %2897 = vperm.xlu0 %8234, %v1317_v31  }
 0x336   : > { %v9223_v46 = vpop.permute.xlu2 %2742  ;;  %v9225_v26 = vpop.permute.xlu1 %2692 }
 0x337   : > { %12920 = vst [vmem:[#allocation214_spill] sm:$0xff] %v9223_v46  ;;  %v9227_v59 = vpop.permute.xlu0 %2687  ;;  %v1325_v46 = vld [vmem:[%s8405_s30 + $0x988] sm:$0xff] }
 0x338   : > { %12921 = vst [vmem:[#allocation215_spill] sm:$0xff] %v9225_v26  ;;  %v1323_v26 = vld [vmem:[%s8405_s30 + $0x978] sm:$0xff] }
 0x339   : > { %12922 = vst [vmem:[#allocation216_spill] sm:$0xff] %v9227_v59  ;;  %v1327_v59 = vld [vmem:[%s8405_s30 + $0x998] sm:$0xff] }
 0x33c   : > { %2922 = vperm.xlu2 %8236, %v1322_v6   ;;  %2917 = vperm.xlu1 %8235, %v1321_v39  }
 0x33d   : > { %2912 = vperm.xlu0 %8234, %v1320_v44  }
 0x33e   : > { %v9232_v30 = vpop.permute.xlu2 %2757  ;;  %v9234_v2 = vpop.permute.xlu1 %2707 }
 0x33f   : > { %12923 = vst [vmem:[#allocation217_spill] sm:$0xff] %v9232_v30  ;;  %v9236_v31 = vpop.permute.xlu0 %2702  ;;  %v1328_v30 = vld [vmem:[%s8405_s30 + $0x9a0] sm:$0xff] }
 0x340   : > { %12924 = vst [vmem:[#allocation218_spill] sm:$0xff] %v9234_v2  ;;  %v1326_v2 = vld [vmem:[%s8405_s30 + $0x990] sm:$0xff] }
 0x341   : > { %12925 = vst [vmem:[#allocation219_spill] sm:$0xff] %v9236_v31  ;;  %v1330_v31 = vld [vmem:[%s8405_s30 + $0x9b0] sm:$0xff] }
 0x344   : > { %2937 = vperm.xlu2 %8236, %v1325_v46   ;;  %2932 = vperm.xlu1 %8235, %v1324_v19  }
 0x345   : > { %2927 = vperm.xlu0 %8234, %v1323_v26  }
 0x346   : > { %v9241_v6 = vpop.permute.xlu2 %2772  ;;  %v9243_v39 = vpop.permute.xlu1 %2722 }
 0x347   : > { %12926 = vst [vmem:[#allocation220_spill] sm:$0xff] %v9241_v6  ;;  %v9245_v44 = vpop.permute.xlu0 %2717  ;;  %v1331_v6 = vld [vmem:[%s8405_s30 + $0x9b8] sm:$0xff] }
 0x348   : > { %12927 = vst [vmem:[#allocation221_spill] sm:$0xff] %v9243_v39  ;;  %v1329_v39 = vld [vmem:[%s8405_s30 + $0x9a8] sm:$0xff] }
 0x349   : > { %12928 = vst [vmem:[#allocation222_spill] sm:$0xff] %v9245_v44  ;;  %v1333_v44 = vld [vmem:[%s8405_s30 + $0x9c8] sm:$0xff] }
 0x34c   : > { %2952 = vperm.xlu2 %8236, %v1328_v30   ;;  %2947 = vperm.xlu1 %8235, %v1327_v59  }
 0x34d   : > { %2942 = vperm.xlu0 %8234, %v1326_v2  }
 0x34e   : > { %v9250_v46 = vpop.permute.xlu2 %2787  ;;  %v9252_v19 = vpop.permute.xlu1 %2737 }
 0x34f   : > { %12929 = vst [vmem:[#allocation223_spill] sm:$0xff] %v9250_v46  ;;  %v9254_v26 = vpop.permute.xlu0 %2732  ;;  %v1334_v46 = vld [vmem:[%s8405_s30 + $0x9d0] sm:$0xff] }
 0x350   : > { %12930 = vst [vmem:[#allocation224_spill] sm:$0xff] %v9252_v19  ;;  %v1332_v19 = vld [vmem:[%s8405_s30 + $0x9c0] sm:$0xff] }
 0x351   : > { %12931 = vst [vmem:[#allocation225_spill] sm:$0xff] %v9254_v26  ;;  %v1336_v26 = vld [vmem:[%s8405_s30 + $0x9e0] sm:$0xff] }
 0x354   : > { %2967 = vperm.xlu2 %8236, %v1331_v6   ;;  %2962 = vperm.xlu1 %8235, %v1330_v31  }
 0x355   : > { %2957 = vperm.xlu0 %8234, %v1329_v39  }
 0x356   : > { %v9259_v30 = vpop.permute.xlu2 %2802  ;;  %v9261_v59 = vpop.permute.xlu1 %2752 }
 0x357   : > { %12932 = vst [vmem:[#allocation226_spill] sm:$0xff] %v9259_v30  ;;  %v9263_v2 = vpop.permute.xlu0 %2747  ;;  %v1337_v30 = vld [vmem:[%s8405_s30 + $0x9e8] sm:$0xff] }
 0x358   : > { %12933 = vst [vmem:[#allocation227_spill] sm:$0xff] %v9261_v59  ;;  %v1335_v59 = vld [vmem:[%s8405_s30 + $0x9d8] sm:$0xff] }
 0x359   : > { %12934 = vst [vmem:[#allocation228_spill] sm:$0xff] %v9263_v2  ;;  %v1339_v2 = vld [vmem:[%s8405_s30 + $0x9f8] sm:$0xff] }
 0x35c   : > { %2982 = vperm.xlu2 %8236, %v1334_v46   ;;  %2977 = vperm.xlu1 %8235, %v1333_v44  }
 0x35d   : > { %2972 = vperm.xlu0 %8234, %v1332_v19  }
 0x35e   : > { %v9268_v6 = vpop.permute.xlu2 %2817  ;;  %v9270_v31 = vpop.permute.xlu1 %2767 }
 0x35f   : > { %12935 = vst [vmem:[#allocation229_spill] sm:$0xff] %v9268_v6  ;;  %v9272_v39 = vpop.permute.xlu0 %2762  ;;  %v1340_v6 = vld [vmem:[%s8405_s30 + $0xa00] sm:$0xff] }
 0x360   : > { %12936 = vst [vmem:[#allocation230_spill] sm:$0xff] %v9270_v31  ;;  %v1338_v31 = vld [vmem:[%s8405_s30 + $0x9f0] sm:$0xff] }
 0x361   : > { %12937 = vst [vmem:[#allocation231_spill] sm:$0xff] %v9272_v39  ;;  %v1342_v39 = vld [vmem:[%s8405_s30 + $0xa10] sm:$0xff] }
 0x364   : > { %2997 = vperm.xlu2 %8236, %v1337_v30   ;;  %2992 = vperm.xlu1 %8235, %v1336_v26  }
 0x365   : > { %2987 = vperm.xlu0 %8234, %v1335_v59  }
 0x366   : > { %v9277_v46 = vpop.permute.xlu2 %2832  ;;  %v9279_v44 = vpop.permute.xlu1 %2782 }
 0x367   : > { %12938 = vst [vmem:[#allocation232_spill] sm:$0xff] %v9277_v46  ;;  %v9281_v19 = vpop.permute.xlu0 %2777  ;;  %v1343_v46 = vld [vmem:[%s8405_s30 + $0xa18] sm:$0xff] }
 0x368   : > { %12939 = vst [vmem:[#allocation233_spill] sm:$0xff] %v9279_v44  ;;  %v1341_v44 = vld [vmem:[%s8405_s30 + $0xa08] sm:$0xff] }
 0x369   : > { %12940 = vst [vmem:[#allocation234_spill] sm:$0xff] %v9281_v19  ;;  %v1345_v19 = vld [vmem:[%s8405_s30 + $0xa28] sm:$0xff] }
 0x36c   : > { %3012 = vperm.xlu2 %8236, %v1340_v6   ;;  %3007 = vperm.xlu1 %8235, %v1339_v2  }
 0x36d   : > { %3002 = vperm.xlu0 %8234, %v1338_v31  }
 0x36e   : > { %v9286_v30 = vpop.permute.xlu2 %2847  ;;  %v9288_v26 = vpop.permute.xlu1 %2797 }
 0x36f   : > { %12941 = vst [vmem:[#allocation235_spill] sm:$0xff] %v9286_v30  ;;  %v9290_v59 = vpop.permute.xlu0 %2792  ;;  %v1346_v30 = vld [vmem:[%s8405_s30 + $0xa30] sm:$0xff] }
 0x370   : > { %12942 = vst [vmem:[#allocation236_spill] sm:$0xff] %v9288_v26  ;;  %v1344_v26 = vld [vmem:[%s8405_s30 + $0xa20] sm:$0xff] }
 0x371   : > { %12943 = vst [vmem:[#allocation237_spill] sm:$0xff] %v9290_v59  ;;  %v1348_v59 = vld [vmem:[%s8405_s30 + $0xa40] sm:$0xff] }
 0x374   : > { %3027 = vperm.xlu2 %8236, %v1343_v46   ;;  %3022 = vperm.xlu1 %8235, %v1342_v39  }
 0x375   : > { %3017 = vperm.xlu0 %8234, %v1341_v44  }
 0x376   : > { %v9295_v6 = vpop.permute.xlu2 %2862  ;;  %v9297_v2 = vpop.permute.xlu1 %2812 }
 0x377   : > { %12944 = vst [vmem:[#allocation238_spill] sm:$0xff] %v9295_v6  ;;  %v9299_v31 = vpop.permute.xlu0 %2807  ;;  %v1349_v6 = vld [vmem:[%s8405_s30 + $0xa48] sm:$0xff] }
 0x378   : > { %12945 = vst [vmem:[#allocation239_spill] sm:$0xff] %v9297_v2  ;;  %v1347_v2 = vld [vmem:[%s8405_s30 + $0xa38] sm:$0xff] }
 0x379   : > { %12946 = vst [vmem:[#allocation240_spill] sm:$0xff] %v9299_v31  ;;  %v1351_v31 = vld [vmem:[%s8405_s30 + $0xa58] sm:$0xff] }
 0x37c   : > { %3042 = vperm.xlu2 %8236, %v1346_v30   ;;  %3037 = vperm.xlu1 %8235, %v1345_v19  }
 0x37d   : > { %3032 = vperm.xlu0 %8234, %v1344_v26  }
 0x37e   : > { %v9304_v46 = vpop.permute.xlu2 %2877  ;;  %v9306_v39 = vpop.permute.xlu1 %2827 }
 0x37f   : > { %12947 = vst [vmem:[#allocation241_spill] sm:$0xff] %v9304_v46  ;;  %v9308_v44 = vpop.permute.xlu0 %2822  ;;  %v1352_v46 = vld [vmem:[%s8405_s30 + $0xa60] sm:$0xff] }
 0x380   : > { %12948 = vst [vmem:[#allocation242_spill] sm:$0xff] %v9306_v39  ;;  %v1350_v39 = vld [vmem:[%s8405_s30 + $0xa50] sm:$0xff] }
 0x381   : > { %12949 = vst [vmem:[#allocation243_spill] sm:$0xff] %v9308_v44  ;;  %v1354_v44 = vld [vmem:[%s8405_s30 + $0xa70] sm:$0xff] }
 0x384   : > { %3057 = vperm.xlu2 %8236, %v1349_v6   ;;  %3052 = vperm.xlu1 %8235, %v1348_v59  }
 0x385   : > { %3047 = vperm.xlu0 %8234, %v1347_v2  }
 0x386   : > { %v9313_v30 = vpop.permute.xlu2 %2892  ;;  %v9315_v19 = vpop.permute.xlu1 %2842 }
 0x387   : > { %12950 = vst [vmem:[#allocation244_spill] sm:$0xff] %v9313_v30  ;;  %v9317_v26 = vpop.permute.xlu0 %2837  ;;  %v1355_v30 = vld [vmem:[%s8405_s30 + $0xa78] sm:$0xff] }
 0x388   : > { %12951 = vst [vmem:[#allocation245_spill] sm:$0xff] %v9315_v19  ;;  %v1353_v19 = vld [vmem:[%s8405_s30 + $0xa68] sm:$0xff] }
 0x389   : > { %12952 = vst [vmem:[#allocation246_spill] sm:$0xff] %v9317_v26  ;;  %v1357_v26 = vld [vmem:[%s8405_s30 + $0xa88] sm:$0xff] }
 0x38c   : > { %3072 = vperm.xlu2 %8236, %v1352_v46   ;;  %3067 = vperm.xlu1 %8235, %v1351_v31  }
 0x38d   : > { %3062 = vperm.xlu0 %8234, %v1350_v39  }
 0x38e   : > { %v9322_v6 = vpop.permute.xlu2 %2907  ;;  %v9324_v59 = vpop.permute.xlu1 %2857 }
 0x38f   : > { %12953 = vst [vmem:[#allocation247_spill] sm:$0xff] %v9322_v6  ;;  %v9326_v2 = vpop.permute.xlu0 %2852  ;;  %v1358_v6 = vld [vmem:[%s8405_s30 + $0xa90] sm:$0xff] }
 0x390   : > { %12954 = vst [vmem:[#allocation248_spill] sm:$0xff] %v9324_v59  ;;  %v1356_v59 = vld [vmem:[%s8405_s30 + $0xa80] sm:$0xff] }
 0x391   : > { %12955 = vst [vmem:[#allocation249_spill] sm:$0xff] %v9326_v2  ;;  %v1360_v2 = vld [vmem:[%s8405_s30 + $0xaa0] sm:$0xff] }
 0x394   : > { %3087 = vperm.xlu2 %8236, %v1355_v30   ;;  %3082 = vperm.xlu1 %8235, %v1354_v44  }
 0x395   : > { %3077 = vperm.xlu0 %8234, %v1353_v19  }
 0x396   : > { %v9331_v46 = vpop.permute.xlu2 %2922  ;;  %v9333_v31 = vpop.permute.xlu1 %2872 }
 0x397   : > { %12956 = vst [vmem:[#allocation250_spill] sm:$0xff] %v9331_v46  ;;  %v9335_v39 = vpop.permute.xlu0 %2867  ;;  %v1361_v46 = vld [vmem:[%s8405_s30 + $0xaa8] sm:$0xff] }
 0x398   : > { %12957 = vst [vmem:[#allocation251_spill] sm:$0xff] %v9333_v31  ;;  %v1359_v31 = vld [vmem:[%s8405_s30 + $0xa98] sm:$0xff] }
 0x399   : > { %12958 = vst [vmem:[#allocation252_spill] sm:$0xff] %v9335_v39  ;;  %v1363_v39 = vld [vmem:[%s8405_s30 + $0xab8] sm:$0xff] }
 0x39c   : > { %3102 = vperm.xlu2 %8236, %v1358_v6   ;;  %3097 = vperm.xlu1 %8235, %v1357_v26  }
 0x39d   : > { %3092 = vperm.xlu0 %8234, %v1356_v59  }
 0x39e   : > { %v9340_v30 = vpop.permute.xlu2 %2937  ;;  %v9342_v44 = vpop.permute.xlu1 %2887 }
 0x39f   : > { %12959 = vst [vmem:[#allocation253_spill] sm:$0xff] %v9340_v30  ;;  %v9344_v19 = vpop.permute.xlu0 %2882  ;;  %v1364_v30 = vld [vmem:[%s8405_s30 + $0xac0] sm:$0xff] }
 0x3a0   : > { %12960 = vst [vmem:[#allocation254_spill] sm:$0xff] %v9342_v44  ;;  %v1362_v44 = vld [vmem:[%s8405_s30 + $0xab0] sm:$0xff] }
 0x3a1   : > { %12961 = vst [vmem:[#allocation255_spill] sm:$0xff] %v9344_v19  ;;  %v1366_v19 = vld [vmem:[%s8405_s30 + $0xad0] sm:$0xff] }
 0x3a4   : > { %3117 = vperm.xlu2 %8236, %v1361_v46   ;;  %3112 = vperm.xlu1 %8235, %v1360_v2  }
 0x3a5   : > { %3107 = vperm.xlu0 %8234, %v1359_v31  }
 0x3a6   : > { %v9349_v6 = vpop.permute.xlu2 %2952  ;;  %v9351_v26 = vpop.permute.xlu1 %2902 }
 0x3a7   : > { %12962 = vst [vmem:[#allocation256_spill] sm:$0xff] %v9349_v6  ;;  %v9353_v59 = vpop.permute.xlu0 %2897  ;;  %v1367_v6 = vld [vmem:[%s8405_s30 + $0xad8] sm:$0xff] }
 0x3a8   : > { %12963 = vst [vmem:[#allocation257_spill] sm:$0xff] %v9351_v26  ;;  %v1365_v26 = vld [vmem:[%s8405_s30 + $0xac8] sm:$0xff] }
 0x3a9   : > { %12964 = vst [vmem:[#allocation258_spill] sm:$0xff] %v9353_v59  ;;  %v1369_v59 = vld [vmem:[%s8405_s30 + $0xae8] sm:$0xff] }
 0x3ac   : > { %3132 = vperm.xlu2 %8236, %v1364_v30   ;;  %3127 = vperm.xlu1 %8235, %v1363_v39  }
 0x3ad   : > { %3122 = vperm.xlu0 %8234, %v1362_v44  }
 0x3ae   : > { %v9358_v46 = vpop.permute.xlu2 %2967  ;;  %v9360_v2 = vpop.permute.xlu1 %2917 }
 0x3af   : > { %12965 = vst [vmem:[#allocation259_spill] sm:$0xff] %v9358_v46  ;;  %v9362_v31 = vpop.permute.xlu0 %2912  ;;  %v1370_v46 = vld [vmem:[%s8405_s30 + $0xaf0] sm:$0xff] }
 0x3b0   : > { %12966 = vst [vmem:[#allocation260_spill] sm:$0xff] %v9360_v2  ;;  %v1368_v2 = vld [vmem:[%s8405_s30 + $0xae0] sm:$0xff] }
 0x3b1   : > { %12967 = vst [vmem:[#allocation261_spill] sm:$0xff] %v9362_v31  ;;  %v1372_v31 = vld [vmem:[%s8405_s30 + $0xb00] sm:$0xff] }
 0x3b4   : > { %3147 = vperm.xlu2 %8236, %v1367_v6   ;;  %3142 = vperm.xlu1 %8235, %v1366_v19  }
 0x3b5   : > { %3137 = vperm.xlu0 %8234, %v1365_v26  }
 0x3b6   : > { %v9367_v30 = vpop.permute.xlu2 %2982  ;;  %v9369_v39 = vpop.permute.xlu1 %2932 }
 0x3b7   : > { %12968 = vst [vmem:[#allocation262_spill] sm:$0xff] %v9367_v30  ;;  %v9371_v44 = vpop.permute.xlu0 %2927  ;;  %v1373_v30 = vld [vmem:[%s8405_s30 + $0xb08] sm:$0xff] }
 0x3b8   : > { %12969 = vst [vmem:[#allocation263_spill] sm:$0xff] %v9369_v39  ;;  %v1371_v39 = vld [vmem:[%s8405_s30 + $0xaf8] sm:$0xff] }
 0x3b9   : > { %12970 = vst [vmem:[#allocation264_spill] sm:$0xff] %v9371_v44  ;;  %v1375_v44 = vld [vmem:[%s8405_s30 + $0xb18] sm:$0xff] }
 0x3bc   : > { %3162 = vperm.xlu2 %8236, %v1370_v46   ;;  %3157 = vperm.xlu1 %8235, %v1369_v59  }
 0x3bd   : > { %3152 = vperm.xlu0 %8234, %v1368_v2  }
 0x3be   : > { %v9376_v6 = vpop.permute.xlu2 %2997  ;;  %v9378_v19 = vpop.permute.xlu1 %2947 }
 0x3bf   : > { %12971 = vst [vmem:[#allocation265_spill] sm:$0xff] %v9376_v6  ;;  %v9380_v26 = vpop.permute.xlu0 %2942  ;;  %v1376_v6 = vld [vmem:[%s8405_s30 + $0xb20] sm:$0xff] }
 0x3c0   : > { %12972 = vst [vmem:[#allocation266_spill] sm:$0xff] %v9378_v19  ;;  %v1374_v19 = vld [vmem:[%s8405_s30 + $0xb10] sm:$0xff] }
 0x3c1   : > { %12973 = vst [vmem:[#allocation267_spill] sm:$0xff] %v9380_v26  ;;  %v1378_v26 = vld [vmem:[%s8405_s30 + $0xb30] sm:$0xff] }
 0x3c4   : > { %3177 = vperm.xlu2 %8236, %v1373_v30   ;;  %3172 = vperm.xlu1 %8235, %v1372_v31  }
 0x3c5   : > { %3167 = vperm.xlu0 %8234, %v1371_v39  }
 0x3c6   : > { %v9385_v46 = vpop.permute.xlu2 %3012  ;;  %v9387_v59 = vpop.permute.xlu1 %2962 }
 0x3c7   : > { %12974 = vst [vmem:[#allocation268_spill] sm:$0xff] %v9385_v46  ;;  %v9389_v2 = vpop.permute.xlu0 %2957  ;;  %v1379_v46 = vld [vmem:[%s8405_s30 + $0xb38] sm:$0xff] }
 0x3c8   : > { %12975 = vst [vmem:[#allocation269_spill] sm:$0xff] %v9387_v59  ;;  %v1377_v59 = vld [vmem:[%s8405_s30 + $0xb28] sm:$0xff] }
 0x3c9   : > { %12976 = vst [vmem:[#allocation270_spill] sm:$0xff] %v9389_v2  ;;  %v1381_v2 = vld [vmem:[%s8405_s30 + $0xb48] sm:$0xff] }
 0x3cc   : > { %3192 = vperm.xlu2 %8236, %v1376_v6   ;;  %3187 = vperm.xlu1 %8235, %v1375_v44  }
 0x3cd   : > { %3182 = vperm.xlu0 %8234, %v1374_v19  }
 0x3ce   : > { %v9394_v30 = vpop.permute.xlu2 %3027  ;;  %v9396_v31 = vpop.permute.xlu1 %2977 }
 0x3cf   : > { %12977 = vst [vmem:[#allocation271_spill] sm:$0xff] %v9394_v30  ;;  %v9398_v39 = vpop.permute.xlu0 %2972  ;;  %v1382_v30 = vld [vmem:[%s8405_s30 + $0xb50] sm:$0xff] }
 0x3d0   : > { %12978 = vst [vmem:[#allocation272_spill] sm:$0xff] %v9396_v31  ;;  %v1380_v31 = vld [vmem:[%s8405_s30 + $0xb40] sm:$0xff] }
 0x3d1   : > { %12979 = vst [vmem:[#allocation273_spill] sm:$0xff] %v9398_v39  ;;  %v1384_v39 = vld [vmem:[%s8405_s30 + $0xb60] sm:$0xff] }
 0x3d4   : > { %3207 = vperm.xlu2 %8236, %v1379_v46   ;;  %3202 = vperm.xlu1 %8235, %v1378_v26  }
 0x3d5   : > { %3197 = vperm.xlu0 %8234, %v1377_v59  }
 0x3d6   : > { %v9403_v6 = vpop.permute.xlu2 %3042  ;;  %v9405_v44 = vpop.permute.xlu1 %2992 }
 0x3d7   : > { %12980 = vst [vmem:[#allocation274_spill] sm:$0xff] %v9403_v6  ;;  %v9407_v19 = vpop.permute.xlu0 %2987  ;;  %v1385_v6 = vld [vmem:[%s8405_s30 + $0xb68] sm:$0xff] }
 0x3d8   : > { %12981 = vst [vmem:[#allocation275_spill] sm:$0xff] %v9405_v44  ;;  %v1383_v44 = vld [vmem:[%s8405_s30 + $0xb58] sm:$0xff] }
 0x3d9   : > { %12982 = vst [vmem:[#allocation276_spill] sm:$0xff] %v9407_v19  ;;  %v1387_v19 = vld [vmem:[%s8405_s30 + $0xb78] sm:$0xff] }
 0x3dc   : > { %3222 = vperm.xlu2 %8236, %v1382_v30   ;;  %3217 = vperm.xlu1 %8235, %v1381_v2  }
 0x3dd   : > { %3212 = vperm.xlu0 %8234, %v1380_v31  }
 0x3de   : > { %v9412_v46 = vpop.permute.xlu2 %3057  ;;  %v9414_v26 = vpop.permute.xlu1 %3007 }
 0x3df   : > { %12983 = vst [vmem:[#allocation277_spill] sm:$0xff] %v9412_v46  ;;  %v9416_v59 = vpop.permute.xlu0 %3002  ;;  %v1388_v46 = vld [vmem:[%s8405_s30 + $0xb80] sm:$0xff] }
 0x3e0   : > { %12984 = vst [vmem:[#allocation278_spill] sm:$0xff] %v9414_v26  ;;  %v1386_v26 = vld [vmem:[%s8405_s30 + $0xb70] sm:$0xff] }
 0x3e1   : > { %12985 = vst [vmem:[#allocation279_spill] sm:$0xff] %v9416_v59  ;;  %v1390_v59 = vld [vmem:[%s8405_s30 + $0xb90] sm:$0xff] }
 0x3e4   : > { %3237 = vperm.xlu2 %8236, %v1385_v6   ;;  %3232 = vperm.xlu1 %8235, %v1384_v39  }
 0x3e5   : > { %3227 = vperm.xlu0 %8234, %v1383_v44  }
 0x3e6   : > { %v9421_v30 = vpop.permute.xlu2 %3072  ;;  %v9423_v2 = vpop.permute.xlu1 %3022 }
 0x3e7   : > { %12986 = vst [vmem:[#allocation280_spill] sm:$0xff] %v9421_v30  ;;  %v9425_v31 = vpop.permute.xlu0 %3017  ;;  %v1391_v30 = vld [vmem:[%s8405_s30 + $0xb98] sm:$0xff] }
 0x3e8   : > { %12987 = vst [vmem:[#allocation281_spill] sm:$0xff] %v9423_v2  ;;  %v1389_v2 = vld [vmem:[%s8405_s30 + $0xb88] sm:$0xff] }
 0x3e9   : > { %12988 = vst [vmem:[#allocation282_spill] sm:$0xff] %v9425_v31  ;;  %v1393_v31 = vld [vmem:[%s8405_s30 + $0xba8] sm:$0xff] }
 0x3ec   : > { %3252 = vperm.xlu2 %8236, %v1388_v46   ;;  %3247 = vperm.xlu1 %8235, %v1387_v19  }
 0x3ed   : > { %3242 = vperm.xlu0 %8234, %v1386_v26  }
 0x3ee   : > { %v9430_v6 = vpop.permute.xlu2 %3087  ;;  %v9432_v39 = vpop.permute.xlu1 %3037 }
 0x3ef   : > { %12989 = vst [vmem:[#allocation283_spill] sm:$0xff] %v9430_v6  ;;  %v9434_v44 = vpop.permute.xlu0 %3032  ;;  %v1394_v6 = vld [vmem:[%s8405_s30 + $0xbb0] sm:$0xff] }
 0x3f0   : > { %12990 = vst [vmem:[#allocation284_spill] sm:$0xff] %v9432_v39  ;;  %v1392_v39 = vld [vmem:[%s8405_s30 + $0xba0] sm:$0xff] }
 0x3f1   : > { %12991 = vst [vmem:[#allocation285_spill] sm:$0xff] %v9434_v44  ;;  %v1396_v44 = vld [vmem:[%s8405_s30 + $0xbc0] sm:$0xff] }
 0x3f4   : > { %3267 = vperm.xlu2 %8236, %v1391_v30   ;;  %3262 = vperm.xlu1 %8235, %v1390_v59  }
 0x3f5   : > { %3257 = vperm.xlu0 %8234, %v1389_v2  }
 0x3f6   : > { %v9439_v46 = vpop.permute.xlu2 %3102  ;;  %v9441_v19 = vpop.permute.xlu1 %3052 }
 0x3f7   : > { %12992 = vst [vmem:[#allocation286_spill] sm:$0xff] %v9439_v46  ;;  %v9443_v26 = vpop.permute.xlu0 %3047  ;;  %v1397_v46 = vld [vmem:[%s8405_s30 + $0xbc8] sm:$0xff] }
 0x3f8   : > { %12993 = vst [vmem:[#allocation287_spill] sm:$0xff] %v9441_v19  ;;  %v1395_v19 = vld [vmem:[%s8405_s30 + $0xbb8] sm:$0xff] }
 0x3f9   : > { %12994 = vst [vmem:[#allocation288_spill] sm:$0xff] %v9443_v26  ;;  %v1399_v26 = vld [vmem:[%s8405_s30 + $0xbd8] sm:$0xff] }
 0x3fc   : > { %3282 = vperm.xlu2 %8236, %v1394_v6   ;;  %3277 = vperm.xlu1 %8235, %v1393_v31  }
 0x3fd   : > { %3272 = vperm.xlu0 %8234, %v1392_v39  }
 0x3fe   : > { %v9448_v30 = vpop.permute.xlu2 %3117  ;;  %v9450_v59 = vpop.permute.xlu1 %3067 }
 0x3ff   : > { %12995 = vst [vmem:[#allocation289_spill] sm:$0xff] %v9448_v30  ;;  %v9452_v2 = vpop.permute.xlu0 %3062  ;;  %v1400_v30 = vld [vmem:[%s8405_s30 + $0xbe0] sm:$0xff] }
 0x400   : > { %12996 = vst [vmem:[#allocation290_spill] sm:$0xff] %v9450_v59  ;;  %v1398_v59 = vld [vmem:[%s8405_s30 + $0xbd0] sm:$0xff] }
 0x401   : > { %12997 = vst [vmem:[#allocation291_spill] sm:$0xff] %v9452_v2  ;;  %v1402_v2 = vld [vmem:[%s8405_s30 + $0xbf0] sm:$0xff] }
 0x404   : > { %3297 = vperm.xlu2 %8236, %v1397_v46   ;;  %3292 = vperm.xlu1 %8235, %v1396_v44  }
 0x405   : > { %3287 = vperm.xlu0 %8234, %v1395_v19  }
 0x406   : > { %v9457_v6 = vpop.permute.xlu2 %3132  ;;  %v9459_v31 = vpop.permute.xlu1 %3082 }
 0x407   : > { %12998 = vst [vmem:[#allocation292_spill] sm:$0xff] %v9457_v6  ;;  %v9461_v39 = vpop.permute.xlu0 %3077  ;;  %v1403_v6 = vld [vmem:[%s8405_s30 + $0xbf8] sm:$0xff] }
 0x408   : > { %12999 = vst [vmem:[#allocation293_spill] sm:$0xff] %v9459_v31  ;;  %v1401_v31 = vld [vmem:[%s8405_s30 + $0xbe8] sm:$0xff] }
 0x409   : > { %13000 = vst [vmem:[#allocation294_spill] sm:$0xff] %v9461_v39  ;;  %v1405_v39 = vld [vmem:[%s8405_s30 + $0xc08] sm:$0xff] }
 0x40c   : > { %3312 = vperm.xlu2 %8236, %v1400_v30   ;;  %3307 = vperm.xlu1 %8235, %v1399_v26  }
 0x40d   : > { %3302 = vperm.xlu0 %8234, %v1398_v59  }
 0x40e   : > { %v9466_v46 = vpop.permute.xlu2 %3147  ;;  %v9468_v44 = vpop.permute.xlu1 %3097 }
 0x40f   : > { %13001 = vst [vmem:[#allocation295_spill] sm:$0xff] %v9466_v46  ;;  %v9470_v19 = vpop.permute.xlu0 %3092  ;;  %v1406_v46 = vld [vmem:[%s8405_s30 + $0xc10] sm:$0xff] }
 0x410   : > { %13002 = vst [vmem:[#allocation296_spill] sm:$0xff] %v9468_v44  ;;  %v1404_v44 = vld [vmem:[%s8405_s30 + $0xc00] sm:$0xff] }
 0x411   : > { %13003 = vst [vmem:[#allocation297_spill] sm:$0xff] %v9470_v19 }
 0x414   : > { %3327 = vperm.xlu2 %8236, %v1403_v6   ;;  %3322 = vperm.xlu1 %8235, %v1402_v2  }
 0x415   : > { %3317 = vperm.xlu0 %8234, %v1401_v31   ;;  %v1409_v31 = vld [vmem:[%s8405_s30 + $0xc28] sm:$0xff] }
 0x416   : > { %v9475_v30 = vpop.permute.xlu2 %3162  ;;  %v9477_v26 = vpop.permute.xlu1 %3112 }
 0x417   : > { %13004 = vst [vmem:[#allocation298_spill] sm:$0xff] %v9475_v30  ;;  %v9479_v59 = vpop.permute.xlu0 %3107  ;;  %v1407_v30 = vld [vmem:[%s8405_s30 + $0xc18] sm:$0xff]  ;;  %s8251_s30 = sshra.s32 %s8058_s28, 4  ;;  %s8252_s30 = int_to_ptr.hbm [resolvable:$true] %s8251_s30 }
 0x418   : > { %13005 = vst [vmem:[#allocation299_spill] sm:$0xff] %v9477_v26  ;;  %s8253_s4 = scalar_lea.hbm %s8252_s30, 6240  ;;  %p8258_p1 = scmp.lt.s32.totalorder %s8252_s30, %s12367_s3 }
 0x419   : > { %13006 = vst [vmem:[#allocation300_spill] sm:$0xff] %v9479_v59  ;;  %p8254_p12 = scmp.ne.s32.totalorder %s8252_s30, %s8253_s4  ;;  %p8259_p2 = scmp.lt.s32.totalorder %s8257_s7, %s8253_s4 }
 0x41b   : > { %p8255_p13 = pnand %p8254_p12, %p8380_p4  ;;  %p8260_p3 = por %p8259_p2, %p8258_p1 }
 0x41c   : > { %3342 = vperm.xlu2 %8236, %v1406_v46   ;;  %3337 = vperm.xlu1 %8235, %v1405_v39   ;;  %v4141_v46 = vld [vmem:[%s9502_s6 + $0x8] sm:$0xff] }
 0x41d   : > { %3332 = vperm.xlu0 %8234, %v1404_v44   ;;  %v4140_v44 = vld [vmem:[%s9502_s6] sm:$0xff]  ;;  %p8256_p0 = pneg %p8255_p13 }
 0x41e   : > { %v9484_v19 = vpop.permute.xlu2 %3177  ;;  %v9486_v6 = vpop.permute.xlu1 %3127 }
 0x41f   : > { %13007 = vst [vmem:[#allocation301_spill] sm:$0xff] %v9484_v19  ;;  %v9488_v2 = vpop.permute.xlu0 %3122  ;;  %p8261_p5 = pnand %p8260_p3, %p8256_p0 }
 0x420   : > { %13008 = vst [vmem:[#allocation302_spill] sm:$0xff] %v9486_v6  ;;  %v4143_v6 = vld [vmem:[%s9502_s6 + $0x18] sm:$0xff] }
 0x421   : > { %13009 = vst [vmem:[#allocation303_spill] sm:$0xff] %v9488_v2  ;;  %v4144_v2 = vld [vmem:[%s9502_s6 + $0x20] sm:$0xff] }
 0x424   : > { %3357 = vperm.xlu2 %8236, %v1409_v31   ;;  %3352 = vperm.xlu1 %8235, %v1408_v18   ;;  %v4142_v18 = vld [vmem:[%s9502_s6 + $0x10] sm:$0xff] }
 0x425   : > { %3347 = vperm.xlu0 %8234, %v1407_v30  }
 0x426   : > { %v9493_v59 = vpop.permute.xlu2 %3192  ;;  %v9495_v26 = vpop.permute.xlu1 %3142 }
 0x427   : > { %13010 = vst [vmem:[#allocation304_spill] sm:$0xff] %v9493_v59  ;;  %v9504_v39 = vpop.permute.xlu0 %3137  ;;  %v4145_v59 = vld [vmem:[%s9502_s6 + $0x28] sm:$0xff] }
 0x428   : > { %13011 = vst [vmem:[#allocation305_spill] sm:$0xff] %v9495_v26 }
 0x429   : > { %13012 = vst [vmem:[#allocation306_spill] sm:$0xff] %v9504_v39  ;;  %v4147_v39 = vld [vmem:[%s9502_s6 + $0x38] sm:$0xff] }
 0x42c   : > { %4542 = vperm.xlu2 %8236, %v4142_v18   ;;  %4537 = vperm.xlu1 %8235, %v4141_v46  }
 0x42d   : > { %4532 = vperm.xlu0 %8234, %v4140_v44  }
 0x42e   : > { %v9509_v30 = vpop.permute.xlu2 %3207  ;;  %v9511_v31 = vpop.permute.xlu1 %3157 }
 0x42f   : > { %13013 = vst [vmem:[#allocation307_spill] sm:$0xff] %v9509_v30  ;;  %v9513_v26 = vpop.permute.xlu0 %3152  ;;  %v4148_v30 = vld [vmem:[%s9502_s6 + $0x40] sm:$0xff] }
 0x430   : > { %13014 = vst [vmem:[#allocation308_spill] sm:$0xff] %v9511_v31  ;;  %v4146_v31 = vld [vmem:[%s9502_s6 + $0x30] sm:$0xff] }
 0x431   : > { %13015 = vst [vmem:[#allocation309_spill] sm:$0xff] %v9513_v26  ;;  %v4150_v26 = vld [vmem:[%s9502_s6 + $0x50] sm:$0xff] }
 0x434   : > { %4557 = vperm.xlu2 %8236, %v4145_v59   ;;  %4552 = vperm.xlu1 %8235, %v4144_v2  }
 0x435   : > { %4547 = vperm.xlu0 %8234, %v4143_v6  }
 0x436   : > { %v9518_v18 = vpop.permute.xlu2 %3222  ;;  %v9520_v46 = vpop.permute.xlu1 %3172 }
 0x437   : > { %13016 = vst [vmem:[#allocation310_spill] sm:$0xff] %v9518_v18  ;;  %v9522_v44 = vpop.permute.xlu0 %3167  ;;  %v4151_v18 = vld [vmem:[%s9502_s6 + $0x58] sm:$0xff] }
 0x438   : > { %13017 = vst [vmem:[#allocation311_spill] sm:$0xff] %v9520_v46  ;;  %v4149_v46 = vld [vmem:[%s9502_s6 + $0x48] sm:$0xff] }
 0x439   : > { %13018 = vst [vmem:[#allocation312_spill] sm:$0xff] %v9522_v44  ;;  %v4153_v44 = vld [vmem:[%s9502_s6 + $0x68] sm:$0xff] }
 0x43c   : > { %4572 = vperm.xlu2 %8236, %v4148_v30   ;;  %4567 = vperm.xlu1 %8235, %v4147_v39  }
 0x43d   : > { %4562 = vperm.xlu0 %8234, %v4146_v31  }
 0x43e   : > { %v9527_v59 = vpop.permute.xlu2 %3237  ;;  %v9529_v2 = vpop.permute.xlu1 %3187 }
 0x43f   : > { %13019 = vst [vmem:[#allocation313_spill] sm:$0xff] %v9527_v59  ;;  %v9531_v6 = vpop.permute.xlu0 %3182  ;;  %v4154_v59 = vld [vmem:[%s9502_s6 + $0x70] sm:$0xff] }
 0x440   : > { %13020 = vst [vmem:[#allocation314_spill] sm:$0xff] %v9529_v2  ;;  %v4152_v2 = vld [vmem:[%s9502_s6 + $0x60] sm:$0xff] }
 0x441   : > { %13021 = vst [vmem:[#allocation315_spill] sm:$0xff] %v9531_v6  ;;  %v4156_v6 = vld [vmem:[%s9502_s6 + $0x80] sm:$0xff] }
 0x444   : > { %4587 = vperm.xlu2 %8236, %v4151_v18   ;;  %4582 = vperm.xlu1 %8235, %v4150_v26  }
 0x445   : > { %4577 = vperm.xlu0 %8234, %v4149_v46  }
 0x446   : > { %v9536_v30 = vpop.permute.xlu2 %3252  ;;  %v9538_v39 = vpop.permute.xlu1 %3202 }
 0x447   : > { %13022 = vst [vmem:[#allocation316_spill] sm:$0xff] %v9536_v30  ;;  %v9540_v31 = vpop.permute.xlu0 %3197  ;;  %v4157_v30 = vld [vmem:[%s9502_s6 + $0x88] sm:$0xff] }
 0x448   : > { %13023 = vst [vmem:[#allocation317_spill] sm:$0xff] %v9538_v39  ;;  %v4155_v39 = vld [vmem:[%s9502_s6 + $0x78] sm:$0xff] }
 0x449   : > { %13024 = vst [vmem:[#allocation318_spill] sm:$0xff] %v9540_v31  ;;  %v4159_v31 = vld [vmem:[%s9502_s6 + $0x98] sm:$0xff] }
 0x44c   : > { %4602 = vperm.xlu2 %8236, %v4154_v59   ;;  %4597 = vperm.xlu1 %8235, %v4153_v44  }
 0x44d   : > { %4592 = vperm.xlu0 %8234, %v4152_v2  }
 0x44e   : > { %v9545_v18 = vpop.permute.xlu2 %3267  ;;  %v9547_v26 = vpop.permute.xlu1 %3217 }
 0x44f   : > { %13025 = vst [vmem:[#allocation319_spill] sm:$0xff] %v9545_v18  ;;  %v9549_v46 = vpop.permute.xlu0 %3212  ;;  %v4160_v18 = vld [vmem:[%s9502_s6 + $0xa0] sm:$0xff] }
 0x450   : > { %13026 = vst [vmem:[#allocation320_spill] sm:$0xff] %v9547_v26  ;;  %v4158_v26 = vld [vmem:[%s9502_s6 + $0x90] sm:$0xff] }
 0x451   : > { %13027 = vst [vmem:[#allocation321_spill] sm:$0xff] %v9549_v46  ;;  %v4162_v46 = vld [vmem:[%s9502_s6 + $0xb0] sm:$0xff] }
 0x454   : > { %4617 = vperm.xlu2 %8236, %v4157_v30   ;;  %4612 = vperm.xlu1 %8235, %v4156_v6  }
 0x455   : > { %4607 = vperm.xlu0 %8234, %v4155_v39  }
 0x456   : > { %v9554_v59 = vpop.permute.xlu2 %3282  ;;  %v9556_v44 = vpop.permute.xlu1 %3232 }
 0x457   : > { %13028 = vst [vmem:[#allocation322_spill] sm:$0xff] %v9554_v59  ;;  %v9558_v2 = vpop.permute.xlu0 %3227  ;;  %v4163_v59 = vld [vmem:[%s9502_s6 + $0xb8] sm:$0xff] }
 0x458   : > { %13029 = vst [vmem:[#allocation323_spill] sm:$0xff] %v9556_v44  ;;  %v4161_v44 = vld [vmem:[%s9502_s6 + $0xa8] sm:$0xff] }
 0x459   : > { %13030 = vst [vmem:[#allocation324_spill] sm:$0xff] %v9558_v2  ;;  %v4165_v2 = vld [vmem:[%s9502_s6 + $0xc8] sm:$0xff] }
 0x45c   : > { %4632 = vperm.xlu2 %8236, %v4160_v18   ;;  %4627 = vperm.xlu1 %8235, %v4159_v31  }
 0x45d   : > { %4622 = vperm.xlu0 %8234, %v4158_v26  }
 0x45e   : > { %v9563_v30 = vpop.permute.xlu2 %3297  ;;  %v9565_v6 = vpop.permute.xlu1 %3247 }
 0x45f   : > { %13031 = vst [vmem:[#allocation325_spill] sm:$0xff] %v9563_v30  ;;  %v9567_v39 = vpop.permute.xlu0 %3242  ;;  %v4166_v30 = vld [vmem:[%s9502_s6 + $0xd0] sm:$0xff] }
 0x460   : > { %13032 = vst [vmem:[#allocation326_spill] sm:$0xff] %v9565_v6  ;;  %v4164_v6 = vld [vmem:[%s9502_s6 + $0xc0] sm:$0xff] }
 0x461   : > { %13033 = vst [vmem:[#allocation327_spill] sm:$0xff] %v9567_v39  ;;  %v4167_v39 = vld [vmem:[%s9502_s6 + $0xd8] sm:$0xff] }
 0x464   : > { %4647 = vperm.xlu2 %8236, %v4163_v59   ;;  %4642 = vperm.xlu1 %8235, %v4162_v46  }
 0x465   : > { %4637 = vperm.xlu0 %8234, %v4161_v44  }
 0x466   : > { %v9572_v18 = vpop.permute.xlu2 %3312  ;;  %v9574_v31 = vpop.permute.xlu1 %3262 }
 0x467   : > { %13034 = vst [vmem:[#allocation328_spill] sm:$0xff] %v9572_v18  ;;  %v9576_v26 = vpop.permute.xlu0 %3257  ;;  %v4169_v18 = vld [vmem:[%s9502_s6 + $0xe8] sm:$0xff] }
 0x468   : > { %13035 = vst [vmem:[#allocation329_spill] sm:$0xff] %v9574_v31  ;;  %v4168_v31 = vld [vmem:[%s9502_s6 + $0xe0] sm:$0xff] }
 0x469   : > { %13036 = vst [vmem:[#allocation330_spill] sm:$0xff] %v9576_v26 }
 0x46c   : > { %4662 = vperm.xlu2 %8236, %v4166_v30   ;;  %4657 = vperm.xlu1 %8235, %v4165_v2  }
 0x46d   : > { %4652 = vperm.xlu0 %8234, %v4164_v6  }
 0x46e   : > { %v9581_v59 = vpop.permute.xlu2 %3327  ;;  %v9583_v46 = vpop.permute.xlu1 %3277 }
 0x46f   : > { %13037 = vst [vmem:[#allocation331_spill] sm:$0xff] %v9581_v59  ;;  %v9585_v44 = vpop.permute.xlu0 %3272  ;;  %v4172_v59 = vld [vmem:[%s9502_s6 + $0x100] sm:$0xff] }
 0x470   : > { %13038 = vst [vmem:[#allocation332_spill] sm:$0xff] %v9583_v46  ;;  %v4171_v46 = vld [vmem:[%s9502_s6 + $0xf8] sm:$0xff] }
 0x471   : > { %13039 = vst [vmem:[#allocation333_spill] sm:$0xff] %v9585_v44  ;;  %v4170_v44 = vld [vmem:[%s9502_s6 + $0xf0] sm:$0xff] }
 0x474   : > { %4677 = vperm.xlu2 %8236, %v4169_v18   ;;  %4672 = vperm.xlu1 %8235, %v4168_v31  }
 0x475   : > { %4667 = vperm.xlu0 %8234, %v4167_v39  }
 0x476   : > { %v9590_v30 = vpop.permute.xlu2 %3342  ;;  %v9592_v2 = vpop.permute.xlu1 %3292 }
 0x477   : > { %13040 = vst [vmem:[#allocation334_spill] sm:$0xff] %v9590_v30  ;;  %v9594_v6 = vpop.permute.xlu0 %3287  ;;  %v244_v30 = vld [vmem:[%s9607_s10 + $0x20] sm:$0xff] }
 0x478   : > { %13041 = vst [vmem:[#allocation335_spill] sm:$0xff] %v9592_v2  ;;  %v4174_v2 = vld [vmem:[%s9502_s6 + $0x110] sm:$0xff] }
 0x479   : > { %13042 = vst [vmem:[#allocation336_spill] sm:$0xff] %v9594_v6  ;;  %v4175_v6 = vld [vmem:[%s9502_s6 + $0x118] sm:$0xff] }
 0x47c   : > { %4692 = vperm.xlu2 %8236, %v4172_v59   ;;  %4687 = vperm.xlu1 %8235, %v4171_v46   ;;  %v245_v59 = vld [vmem:[%s9607_s10 + $0x28] sm:$0xff] }
 0x47d   : > { %4682 = vperm.xlu0 %8234, %v4170_v44   ;;  %v4173_v46 = vld [vmem:[%s9502_s6 + $0x108] sm:$0xff]  ;;  %v3364_v44 = vmul.f32 %v8460_v50, %v244_v30  ;;  %v250_v30 = vld [vmem:[%s9607_s10 + $0x50] sm:$0xff] }
 0x47e   : > { %v9600_v18 = vpop.permute.xlu2 %3357  ;;  %v9602_v39 = vpop.permute.xlu1 %3307 }
 0x47f   : > { %13043 = vst [vmem:[#allocation337_spill] sm:$0xff] %v9600_v18  ;;  %v9609_v31 = vpop.permute.xlu0 %3302  ;;  %v3365_v18 = vmul.f32 %v8460_v50, %v245_v59  ;;  %v251_v50 = vld [vmem:[%s9607_s10 + $0x58] sm:$0xff]  ;;  %v4176_v59 = vld [vmem:[%s9502_s6 + $0x120] sm:$0xff] }
 0x480   : > { %13044 = vst [vmem:[#allocation338_spill] sm:$0xff] %v9602_v39 }
 0x481   : > { %13045 = vst [vmem:[#allocation339_spill] sm:$0xff] %v9609_v31 }
 0x484   : > { %4707 = vperm.xlu2 %8236, %v4175_v6   ;;  %4702 = vperm.xlu1 %8235, %v4174_v2   ;;  %v4178_v6 = vld [vmem:[%s9502_s6 + $0x130] sm:$0xff]  ;;  %v4177_v2 = vld [vmem:[%s9502_s6 + $0x128] sm:$0xff] }
 0x485   : > { %4697 = vperm.xlu0 %8234, %v4173_v46  }
 0x486   : > { %v4543_v31 = vpop.permute.xlu2 %4542  ;;  %v9621_v39 = vpop.permute.xlu1 %3322 }
 0x487   : > { %13046 = vst [vmem:[#allocation340_spill] sm:$0xff] %v9621_v39  ;;  %v6484_v26 = vadd.f32 %v4543_v31, %v3364_v44  ;;  %v6485_v19 = vadd.f32 %v4543_v31, %v3365_v18  ;;  %v9623_v14 = vpop.permute.xlu0 %3317  ;;  %v3370_v18 = vmul.f32 %v8448_v41, %v250_v30  ;;  %v3371_v31 = vmul.f32 %v8448_v41, %v251_v50  ;;  %v4179_v41 = vld [vmem:[%s9502_s6 + $0x138] sm:$0xff] }
 0x488   : > { %13047 = vst [vmem:[#allocation341_spill] sm:$0xff] %v9623_v14 }
 0x489   : > { %7264 = vst [vmem:[%s9625_s19 + $0x20] sm:$0xff] %v6484_v26 }
 0x48a   : > { %7265 = vst [vmem:[%s9625_s19 + $0x28] sm:$0xff] %v6485_v19  ;;  %v4181_v19 = vld [vmem:[%s9502_s6 + $0x148] sm:$0xff] }
 0x48c   : > { %4722 = vperm.xlu2 %8236, %v4178_v6   ;;  %4717 = vperm.xlu1 %8235, %v4177_v2   ;;  %v256_v6 = vld [vmem:[%s9607_s10 + $0x80] sm:$0xff]  ;;  %v257_v2 = vld [vmem:[%s9607_s10 + $0x88] sm:$0xff] }
 0x48d   : > { %4712 = vperm.xlu0 %8234, %v4176_v59   ;;  %v3376_v30 = vmul.f32 %v8453_v45, %v256_v6  ;;  %v3377_v50 = vmul.f32 %v8453_v45, %v257_v2  ;;  %v4182_v6 = vld [vmem:[%s9502_s6 + $0x150] sm:$0xff]  ;;  %v240_v45 = vld [vmem:[%s9607_s10] sm:$0xff] }
 0x48e   : > { %v4558_v26 = vpop.permute.xlu2 %4557  ;;  %v9636_v46 = vpop.permute.xlu1 %3337 }
 0x48f   : > { %13048 = vst [vmem:[#allocation342_spill] sm:$0xff] %v9636_v46  ;;  %v6490_v44 = vadd.f32 %v4558_v26, %v3370_v18  ;;  %v6491_v14 = vadd.f32 %v4558_v26, %v3371_v31  ;;  %v9638_v39 = vpop.permute.xlu0 %3332  ;;  %v242_v46 = vld [vmem:[%s9607_s10 + $0x10] sm:$0xff] }
 0x490   : > { %13049 = vst [vmem:[#allocation343_spill] sm:$0xff] %v9638_v39  ;;  %v263_v39 = vld [vmem:[%s9607_s10 + $0xb8] sm:$0xff] }
 0x491   : > { %7270 = vst [vmem:[%s9625_s19 + $0x50] sm:$0xff] %v6490_v44  ;;  %v262_v44 = vld [vmem:[%s9607_s10 + $0xb0] sm:$0xff] }
 0x492   : > { %7271 = vst [vmem:[%s9625_s19 + $0x58] sm:$0xff] %v6491_v14  ;;  %v3382_v2 = vmul.f32 %v8458_v49, %v262_v44 }
 0x494   : > { %4737 = vperm.xlu2 %8236, %v4181_v19   ;;  %4732 = vperm.xlu1 %8235, %v4180_v7   ;;  %v4184_v19 = vld [vmem:[%s9502_s6 + $0x160] sm:$0xff]  ;;  %v4183_v7 = vld [vmem:[%s9502_s6 + $0x158] sm:$0xff] }
 0x495   : > { %4727 = vperm.xlu0 %8234, %v4179_v41   ;;  %v3383_v41 = vmul.f32 %v8458_v49, %v263_v39 }
 0x496   : > { %v4573_v59 = vpop.permute.xlu2 %4572  ;;  %v9649_v18 = vpop.permute.xlu1 %3352 }
 0x497   : > { %13050 = vst [vmem:[#allocation344_spill] sm:$0xff] %v9649_v18  ;;  %v6496_v31 = vadd.f32 %v4573_v59, %v3376_v30  ;;  %v6497_v26 = vadd.f32 %v4573_v59, %v3377_v50  ;;  %v9651_v14 = vpop.permute.xlu0 %3347  ;;  %v241_v30 = vld [vmem:[%s9607_s10 + $0x8] sm:$0xff]  ;;  %v3362_v50 = vmul.f32 %v8471_v57, %v242_v46  ;;  %v3363_v59 = vmul.f32 %v8471_v57, %v243_v58  ;;  %v4187_v58 = vld [vmem:[%s9502_s6 + $0x178] sm:$0xff]  ;;  %v4186_v18 = vld [vmem:[%s9502_s6 + $0x170] sm:$0xff] }
 0x498   : > { %13051 = vst [vmem:[#allocation345_spill] sm:$0xff] %v9651_v14  ;;  %v3361_v46 = vmul.f32 %v8462_v51, %v241_v30  ;;  %v248_v14 = vld [vmem:[%s9607_s10 + $0x40] sm:$0xff] }
 0x499   : > { %7276 = vst [vmem:[%s9625_s19 + $0x80] sm:$0xff] %v6496_v31 }
 0x49a   : > { %7277 = vst [vmem:[%s9625_s19 + $0x88] sm:$0xff] %v6497_v26 }
 0x49c   : > { %4752 = vperm.xlu2 %8236, %v4184_v19   ;;  %4747 = vperm.xlu1 %8235, %v4183_v7   ;;  %v3360_v19 = vmul.f32 %v8462_v51, %v240_v45  ;;  %v268_v45 = vld [vmem:[%s9607_s10 + $0xe0] sm:$0xff]  ;;  %v3368_v51 = vmul.f32 %v8443_v37, %v248_v14 }
 0x49d   : > { %4742 = vperm.xlu0 %8234, %v4182_v6   ;;  %v3388_v30 = vmul.f32 %v8467_v55, %v268_v45  ;;  %v275_v45 = vld [vmem:[%s9607_s10 + $0x118] sm:$0xff] }
 0x49e   : > { %v4588_v31 = vpop.permute.xlu2 %4587  ;;  %v4538_v26 = vpop.permute.xlu1 %4537 }
 0x49f   : > { %v6502_v44 = vadd.f32 %v4588_v31, %v3382_v2  ;;  %v6503_v7 = vadd.f32 %v4588_v31, %v3383_v41  ;;  %v6482_v49 = vadd.f32 %v4538_v26, %v3362_v50  ;;  %v4533_v39 = vpop.permute.xlu0 %4532  ;;  %v6483_v6 = vadd.f32 %v4538_v26, %v3363_v59  ;;  %v4185_v41 = vld [vmem:[%s9502_s6 + $0x168] sm:$0xff]  ;;  %v246_v31 = vld [vmem:[%s9607_s10 + $0x30] sm:$0xff]  ;;  %v247_v26 = vld [vmem:[%s9607_s10 + $0x38] sm:$0xff] }
 0x4a0   : > { %v6480_v57 = vadd.f32 %v4533_v39, %v3360_v19  ;;  %v6481_v2 = vadd.f32 %v4533_v39, %v3361_v46  ;;  %v249_v50 = vld [vmem:[%s9607_s10 + $0x48] sm:$0xff]  ;;  %v3389_v59 = vmul.f32 %v8467_v55, %v269_v54  ;;  %v3366_v14 = vmul.f32 %v8469_v56, %v246_v31  ;;  %v274_v46 = vld [vmem:[%s9607_s10 + $0x110] sm:$0xff]  ;;  %v255_v31 = vld [vmem:[%s9607_s10 + $0x78] sm:$0xff] }
 0x4a1   : > { %7282 = vst [vmem:[%s9625_s19 + $0xb0] sm:$0xff] %v6502_v44  ;;  %v3369_v19 = vmul.f32 %v8443_v37, %v249_v50  ;;  %v3367_v39 = vmul.f32 %v8469_v56, %v247_v26  ;;  %v4188_v50 = vld [vmem:[%s9502_s6 + $0x180] sm:$0xff]  ;;  %v3394_v56 = vmul.f32 %v8476_v61, %v274_v46  ;;  %v253_v26 = vld [vmem:[%s9607_s10 + $0x68] sm:$0xff] }
 0x4a2   : > { %7283 = vst [vmem:[%s9625_s19 + $0xb8] sm:$0xff] %v6503_v7  ;;  %v4193_v46 = vld [vmem:[%s9502_s6 + $0x1a8] sm:$0xff] }
 0x4a3   : > { %7262 = vst [vmem:[%s9625_s19 + $0x10] sm:$0xff] %v6482_v49 }
 0x4a4   : > { %7263 = vst [vmem:[%s9625_s19 + $0x18] sm:$0xff] %v6483_v6  ;;  %4767 = vperm.xlu2 %8236, %v4187_v58   ;;  %4762 = vperm.xlu1 %8235, %v4186_v18   ;;  %v4189_v58 = vld [vmem:[%s9502_s6 + $0x188] sm:$0xff] }
 0x4a5   : > { %7260 = vst [vmem:[%s9625_s19] sm:$0xff] %v6480_v57  ;;  %4757 = vperm.xlu0 %8234, %v4185_v41   ;;  %v4190_v57 = vld [vmem:[%s9502_s6 + $0x190] sm:$0xff] }
 0x4a6   : > { %7261 = vst [vmem:[%s9625_s19 + $0x8] sm:$0xff] %v6481_v2  ;;  %v4603_v44 = vpop.permute.xlu2 %4602  ;;  %v4553_v18 = vpop.permute.xlu1 %4552  ;;  %v254_v2 = vld [vmem:[%s9607_s10 + $0x70] sm:$0xff] }
 0x4a7   : > { %v6508_v7 = vadd.f32 %v4603_v44, %v3388_v30  ;;  %v6509_v55 = vadd.f32 %v4603_v44, %v3389_v59  ;;  %v6488_v54 = vadd.f32 %v4553_v18, %v3368_v51  ;;  %v4548_v49 = vpop.permute.xlu0 %4547  ;;  %v6489_v37 = vadd.f32 %v4553_v18, %v3369_v19  ;;  %v252_v51 = vld [vmem:[%s9607_s10 + $0x60] sm:$0xff] }
 0x4a8   : > { %v6486_v6 = vadd.f32 %v4548_v49, %v3366_v14  ;;  %v6487_v41 = vadd.f32 %v4548_v49, %v3367_v39  ;;  %v3395_v30 = vmul.f32 %v8476_v61, %v275_v45  ;;  %v3374_v59 = vmul.f32 %v8478_v62, %v254_v2  ;;  %v280_v39 = vld [vmem:[%s9607_s10 + $0x140] sm:$0xff]  ;;  %v4191_v2 = vld [vmem:[%s9502_s6 + $0x198] sm:$0xff] }
 0x4a9   : > { %7288 = vst [vmem:[%s9625_s19 + $0xe0] sm:$0xff] %v6508_v7  ;;  %v3375_v19 = vmul.f32 %v8478_v62, %v255_v31  ;;  %v3372_v14 = vmul.f32 %v8480_v63, %v252_v51  ;;  %v3373_v49 = vmul.f32 %v8480_v63, %v253_v26  ;;  %v3400_v63 = vmul.f32 %v8485_v3, %v280_v39  ;;  %v266_v39 = vld [vmem:[%s9607_s10 + $0xd0] sm:$0xff] }
 0x4aa   : > { %7289 = vst [vmem:[%s9625_s19 + $0xe8] sm:$0xff] %v6509_v55 }
 0x4ab   : > { %7268 = vst [vmem:[%s9625_s19 + $0x40] sm:$0xff] %v6488_v54 }
 0x4ac   : > { %7269 = vst [vmem:[%s9625_s19 + $0x48] sm:$0xff] %v6489_v37  ;;  %4782 = vperm.xlu2 %8236, %v4190_v57   ;;  %4777 = vperm.xlu1 %8235, %v4189_v58   ;;  %v281_v57 = vld [vmem:[%s9607_s10 + $0x148] sm:$0xff]  ;;  %v260_v58 = vld [vmem:[%s9607_s10 + $0xa0] sm:$0xff] }
 0x4ad   : > { %7266 = vst [vmem:[%s9625_s19 + $0x30] sm:$0xff] %v6486_v6  ;;  %4772 = vperm.xlu0 %8234, %v4188_v50   ;;  %v4192_v6 = vld [vmem:[%s9502_s6 + $0x1a0] sm:$0xff]  ;;  %v258_v50 = vld [vmem:[%s9607_s10 + $0x90] sm:$0xff]  ;;  %v3401_v31 = vmul.f32 %v8485_v3, %v281_v57  ;;  %v3380_v51 = vmul.f32 %v8487_v4, %v260_v58 }
 0x4ae   : > { %7267 = vst [vmem:[%s9625_s19 + $0x38] sm:$0xff] %v6487_v41  ;;  %v4618_v44 = vpop.permute.xlu2 %4617  ;;  %v4568_v18 = vpop.permute.xlu1 %4567  ;;  %v261_v41 = vld [vmem:[%s9607_s10 + $0xa8] sm:$0xff]  ;;  %v264_v57 = vld [vmem:[%s9607_s10 + $0xc0] sm:$0xff] }
 0x4af   : > { %v6514_v61 = vadd.f32 %v4618_v44, %v3394_v56  ;;  %v6515_v7 = vadd.f32 %v4618_v44, %v3395_v30  ;;  %v6494_v55 = vadd.f32 %v4568_v18, %v3374_v59  ;;  %v4563_v54 = vpop.permute.xlu0 %4562  ;;  %v6495_v62 = vadd.f32 %v4568_v18, %v3375_v19  ;;  %v259_v56 = vld [vmem:[%s9607_s10 + $0x98] sm:$0xff] }
 0x4b0   : > { %v6492_v37 = vadd.f32 %v4563_v54, %v3372_v14  ;;  %v6493_v45 = vadd.f32 %v4563_v54, %v3373_v49  ;;  %v3381_v30 = vmul.f32 %v8487_v4, %v261_v41  ;;  %v3378_v19 = vmul.f32 %v8489_v5, %v258_v50  ;;  %v4196_v54 = vld [vmem:[%s9502_s6 + $0x1c0] sm:$0xff]  ;;  %v4195_v49 = vld [vmem:[%s9502_s6 + $0x1b8] sm:$0xff] }
 0x4b1   : > { %7294 = vst [vmem:[%s9625_s19 + $0x110] sm:$0xff] %v6514_v61  ;;  %v3379_v61 = vmul.f32 %v8489_v5, %v259_v56 }
 0x4b2   : > { %7295 = vst [vmem:[%s9625_s19 + $0x118] sm:$0xff] %v6515_v7  ;;  %v286_v7 = vld [vmem:[%s9607_s10 + $0x170] sm:$0xff] }
 0x4b3   : > { %7274 = vst [vmem:[%s9625_s19 + $0x70] sm:$0xff] %v6494_v55  ;;  %v3406_v5 = vmul.f32 %v8494_v9, %v286_v7  ;;  %v273_v7 = vld [vmem:[%s9607_s10 + $0x108] sm:$0xff] }
 0x4b4   : > { %7275 = vst [vmem:[%s9625_s19 + $0x78] sm:$0xff] %v6495_v62  ;;  %4797 = vperm.xlu2 %8236, %v4193_v46   ;;  %4792 = vperm.xlu1 %8235, %v4192_v6   ;;  %v287_v62 = vld [vmem:[%s9607_s10 + $0x178] sm:$0xff]  ;;  %v4194_v46 = vld [vmem:[%s9502_s6 + $0x1b0] sm:$0xff] }
 0x4b5   : > { %7272 = vst [vmem:[%s9625_s19 + $0x60] sm:$0xff] %v6492_v37  ;;  %4787 = vperm.xlu0 %8234, %v4191_v2   ;;  %v267_v6 = vld [vmem:[%s9607_s10 + $0xd8] sm:$0xff]  ;;  %v3407_v58 = vmul.f32 %v8494_v9, %v287_v62  ;;  %v265_v2 = vld [vmem:[%s9607_s10 + $0xc8] sm:$0xff] }
 0x4b6   : > { %7273 = vst [vmem:[%s9625_s19 + $0x68] sm:$0xff] %v6493_v45  ;;  %v4633_v59 = vpop.permute.xlu2 %4632  ;;  %v4583_v26 = vpop.permute.xlu1 %4582  ;;  %v3386_v45 = vmul.f32 %v8496_v10, %v266_v39  ;;  %v3387_v41 = vmul.f32 %v8496_v10, %v267_v6  ;;  %v271_v62 = vld [vmem:[%s9607_s10 + $0xf8] sm:$0xff]  ;;  %v3393_v39 = vmul.f32 %v8505_v16, %v273_v7 }
 0x4b7   : > { %v6520_v3 = vadd.f32 %v4633_v59, %v3400_v63  ;;  %v6521_v44 = vadd.f32 %v4633_v59, %v3401_v31  ;;  %v6500_v18 = vadd.f32 %v4583_v26, %v3380_v51  ;;  %v4578_v14 = vpop.permute.xlu0 %4577  ;;  %v6501_v4 = vadd.f32 %v4583_v26, %v3381_v30  ;;  %v292_v26 = vld [vmem:[%s9607_s10 + $0x1a0] sm:$0xff] }
 0x4b8   : > { %v6498_v55 = vadd.f32 %v4578_v14, %v3378_v19  ;;  %v6499_v37 = vadd.f32 %v4578_v14, %v3379_v61  ;;  %v3384_v31 = vmul.f32 %v8498_v11, %v264_v57  ;;  %v3385_v59 = vmul.f32 %v8498_v11, %v265_v2  ;;  %v272_v14 = vld [vmem:[%s9607_s10 + $0x100] sm:$0xff]  ;;  %v298_v2 = vld [vmem:[%s9607_s10 + $0x1d0] sm:$0xff] }
 0x4b9   : > { %7300 = vst [vmem:[%s9625_s19 + $0x140] sm:$0xff] %v6520_v3  ;;  %v4199_v3 = vld [vmem:[%s9502_s6 + $0x1d8] sm:$0xff]  ;;  %v3412_v11 = vmul.f32 %v8503_v15, %v292_v26 }
 0x4ba   : > { %7301 = vst [vmem:[%s9625_s19 + $0x148] sm:$0xff] %v6521_v44  ;;  %v4198_v44 = vld [vmem:[%s9502_s6 + $0x1d0] sm:$0xff] }
 0x4bb   : > { %7280 = vst [vmem:[%s9625_s19 + $0xa0] sm:$0xff] %v6500_v18  ;;  %v293_v18 = vld [vmem:[%s9607_s10 + $0x1a8] sm:$0xff] }
 0x4bc   : > { %7281 = vst [vmem:[%s9625_s19 + $0xa8] sm:$0xff] %v6501_v4  ;;  %4812 = vperm.xlu2 %8236, %v4196_v54   ;;  %4807 = vperm.xlu1 %8235, %v4195_v49   ;;  %v4197_v4 = vld [vmem:[%s9502_s6 + $0x1c8] sm:$0xff]  ;;  %v3413_v54 = vmul.f32 %v8503_v15, %v293_v18  ;;  %v3392_v49 = vmul.f32 %v8505_v16, %v272_v14 }
 0x4bd   : > { %7278 = vst [vmem:[%s9625_s19 + $0x90] sm:$0xff] %v6498_v55  ;;  %4802 = vperm.xlu0 %8234, %v4194_v46   ;;  %v270_v55 = vld [vmem:[%s9607_s10 + $0xf0] sm:$0xff] }
 0x4be   : > { %7279 = vst [vmem:[%s9625_s19 + $0x98] sm:$0xff] %v6499_v37  ;;  %v4648_v50 = vpop.permute.xlu2 %4647  ;;  %v4598_v63 = vpop.permute.xlu1 %4597  ;;  %v3390_v6 = vmul.f32 %v8507_v17, %v270_v55 }
 0x4bf   : > { %v6526_v9 = vadd.f32 %v4648_v50, %v3406_v5  ;;  %v6527_v51 = vadd.f32 %v4648_v50, %v3407_v58  ;;  %v6506_v56 = vadd.f32 %v4598_v63, %v3386_v45  ;;  %v4593_v30 = vpop.permute.xlu0 %4592  ;;  %v6507_v10 = vadd.f32 %v4598_v63, %v3387_v41  ;;  %v4202_v50 = vld [vmem:[%s9502_s6 + $0x1f0] sm:$0xff]  ;;  %v4201_v63 = vld [vmem:[%s9502_s6 + $0x1e8] sm:$0xff] }
 0x4c0   : > { %v6504_v19 = vadd.f32 %v4593_v30, %v3384_v31  ;;  %v6505_v61 = vadd.f32 %v4593_v30, %v3385_v59  ;;  %v3391_v45 = vmul.f32 %v8507_v17, %v271_v62  ;;  %v299_v31 = vld [vmem:[%s9607_s10 + $0x1d8] sm:$0xff]  ;;  %v276_v59 = vld [vmem:[%s9607_s10 + $0x120] sm:$0xff]  ;;  %v3418_v17 = vmul.f32 %v8512_v21, %v298_v2 }
 0x4c1   : > { %7306 = vst [vmem:[%s9625_s19 + $0x170] sm:$0xff] %v6526_v9  ;;  %v278_v9 = vld [vmem:[%s9607_s10 + $0x130] sm:$0xff]  ;;  %v279_v30 = vld [vmem:[%s9607_s10 + $0x138] sm:$0xff]  ;;  %v3396_v14 = vmul.f32 %v8516_v23, %v276_v59  ;;  %v4204_v62 = vld [vmem:[%s9502_s6 + $0x200] sm:$0xff] }
 0x4c2   : > { %7307 = vst [vmem:[%s9625_s19 + $0x178] sm:$0xff] %v6527_v51  ;;  %v3398_v26 = vmul.f32 %v8514_v22, %v278_v9  ;;  %v4208_v59 = vld [vmem:[%s9502_s6 + $0x220] sm:$0xff] }
 0x4c3   : > { %7286 = vst [vmem:[%s9625_s19 + $0xd0] sm:$0xff] %v6506_v56  ;;  %v4200_v56 = vld [vmem:[%s9502_s6 + $0x1e0] sm:$0xff] }
 0x4c4   : > { %7287 = vst [vmem:[%s9625_s19 + $0xd8] sm:$0xff] %v6507_v10  ;;  %4827 = vperm.xlu2 %8236, %v4199_v3   ;;  %4822 = vperm.xlu1 %8235, %v4198_v44   ;;  %v3419_v10 = vmul.f32 %v8512_v21, %v299_v31  ;;  %v3399_v3 = vmul.f32 %v8514_v22, %v279_v30 }
 0x4c5   : > { %7284 = vst [vmem:[%s9625_s19 + $0xc0] sm:$0xff] %v6504_v19  ;;  %4817 = vperm.xlu0 %8234, %v4197_v4   ;;  %v277_v19 = vld [vmem:[%s9607_s10 + $0x128] sm:$0xff] }
 0x4c6   : > { %7285 = vst [vmem:[%s9625_s19 + $0xc8] sm:$0xff] %v6505_v61  ;;  %v4663_v37 = vpop.permute.xlu2 %4662  ;;  %v4613_v46 = vpop.permute.xlu1 %4612  ;;  %v3397_v55 = vmul.f32 %v8516_v23, %v277_v19 }
 0x4c7   : > { %v6532_v15 = vadd.f32 %v4663_v37, %v3412_v11  ;;  %v6533_v57 = vadd.f32 %v4663_v37, %v3413_v54  ;;  %v6512_v5 = vadd.f32 %v4613_v46, %v3392_v49  ;;  %v4608_v58 = vpop.permute.xlu0 %4607  ;;  %v6513_v16 = vadd.f32 %v4613_v46, %v3393_v39  ;;  %v304_v11 = vld [vmem:[%s9607_s10 + $0x200] sm:$0xff]  ;;  %v4205_v49 = vld [vmem:[%s9502_s6 + $0x208] sm:$0xff] }
 0x4c8   : > { %v6510_v41 = vadd.f32 %v4608_v58, %v3390_v6  ;;  %v6511_v51 = vadd.f32 %v4608_v58, %v3391_v45  ;;  %v305_v39 = vld [vmem:[%s9607_s10 + $0x208] sm:$0xff]  ;;  %v284_v37 = vld [vmem:[%s9607_s10 + $0x160] sm:$0xff]  ;;  %v4203_v6 = vld [vmem:[%s9502_s6 + $0x1f8] sm:$0xff]  ;;  %v3424_v23 = vmul.f32 %v8521_v27, %v304_v11 }
 0x4c9   : > { %7312 = vst [vmem:[%s9625_s19 + $0x1a0] sm:$0xff] %v6532_v15  ;;  %v285_v15 = vld [vmem:[%s9607_s10 + $0x168] sm:$0xff]  ;;  %v3404_v58 = vmul.f32 %v8523_v28, %v284_v37  ;;  %v283_v45 = vld [vmem:[%s9607_s10 + $0x158] sm:$0xff] }
 0x4ca   : > { %7313 = vst [vmem:[%s9625_s19 + $0x1a8] sm:$0xff] %v6533_v57  ;;  %v282_v57 = vld [vmem:[%s9607_s10 + $0x150] sm:$0xff] }
 0x4cb   : > { %7292 = vst [vmem:[%s9625_s19 + $0x100] sm:$0xff] %v6512_v5  ;;  %v3425_v5 = vmul.f32 %v8521_v27, %v305_v39  ;;  %v316_v39 = vld [vmem:[%s9607_s10 + $0x260] sm:$0xff] }
 0x4cc   : > { %7293 = vst [vmem:[%s9625_s19 + $0x108] sm:$0xff] %v6513_v16  ;;  %4842 = vperm.xlu2 %8236, %v4202_v50   ;;  %4837 = vperm.xlu1 %8235, %v4201_v63   ;;  %v3405_v16 = vmul.f32 %v8523_v28, %v285_v15  ;;  %v3402_v50 = vmul.f32 %v8525_v29, %v282_v57  ;;  %v317_v15 = vld [vmem:[%s9607_s10 + $0x268] sm:$0xff]  ;;  %v296_v57 = vld [vmem:[%s9607_s10 + $0x1c0] sm:$0xff] }
 0x4cd   : > { %7290 = vst [vmem:[%s9625_s19 + $0xf0] sm:$0xff] %v6510_v41  ;;  %4832 = vperm.xlu0 %8234, %v4200_v56   ;;  %v310_v56 = vld [vmem:[%s9607_s10 + $0x230] sm:$0xff] }
 0x4ce   : > { %7291 = vst [vmem:[%s9625_s19 + $0xf8] sm:$0xff] %v6511_v51  ;;  %v4678_v44 = vpop.permute.xlu2 %4677  ;;  %v4628_v18 = vpop.permute.xlu1 %4627  ;;  %v3403_v51 = vmul.f32 %v8525_v29, %v283_v45  ;;  %v3430_v29 = vmul.f32 %v8530_v33, %v310_v56  ;;  %v294_v45 = vld [vmem:[%s9607_s10 + $0x1b0] sm:$0xff] }
 0x4cf   : > { %v6538_v21 = vadd.f32 %v4678_v44, %v3418_v17  ;;  %v6539_v61 = vadd.f32 %v4678_v44, %v3419_v10  ;;  %v6518_v4 = vadd.f32 %v4628_v18, %v3398_v26  ;;  %v4623_v7 = vpop.permute.xlu0 %4622  ;;  %v6519_v22 = vadd.f32 %v4628_v18, %v3399_v3  ;;  %v4207_v17 = vld [vmem:[%s9502_s6 + $0x218] sm:$0xff]  ;;  %v290_v26 = vld [vmem:[%s9607_s10 + $0x190] sm:$0xff]  ;;  %v288_v18 = vld [vmem:[%s9607_s10 + $0x180] sm:$0xff] }
 0x4d0   : > { %v6516_v54 = vadd.f32 %v4623_v7, %v3396_v14  ;;  %v6517_v46 = vadd.f32 %v4623_v7, %v3397_v55  ;;  %v311_v10 = vld [vmem:[%s9607_s10 + $0x238] sm:$0xff]  ;;  %v4206_v3 = vld [vmem:[%s9502_s6 + $0x210] sm:$0xff] }
 0x4d1   : > { %7318 = vst [vmem:[%s9625_s19 + $0x1d0] sm:$0xff] %v6538_v21  ;;  %v291_v44 = vld [vmem:[%s9607_s10 + $0x198] sm:$0xff]  ;;  %v3431_v14 = vmul.f32 %v8530_v33, %v311_v10  ;;  %v3410_v21 = vmul.f32 %v8532_v34, %v290_v26  ;;  %v4213_v10 = vld [vmem:[%s9502_s6 + $0x248] sm:$0xff] }
 0x4d2   : > { %7319 = vst [vmem:[%s9625_s19 + $0x1d8] sm:$0xff] %v6539_v61  ;;  %v289_v61 = vld [vmem:[%s9607_s10 + $0x188] sm:$0xff]  ;;  %v323_v26 = vld [vmem:[%s9607_s10 + $0x298] sm:$0xff] }
 0x4d3   : > { %7298 = vst [vmem:[%s9625_s19 + $0x130] sm:$0xff] %v6518_v4  ;;  %v3411_v4 = vmul.f32 %v8532_v34, %v291_v44  ;;  %v4212_v44 = vld [vmem:[%s9502_s6 + $0x240] sm:$0xff] }
 0x4d4   : > { %7299 = vst [vmem:[%s9625_s19 + $0x138] sm:$0xff] %v6519_v22  ;;  %4857 = vperm.xlu2 %8236, %v4205_v49   ;;  %4852 = vperm.xlu1 %8235, %v4204_v62   ;;  %v3408_v22 = vmul.f32 %v8534_v35, %v288_v18  ;;  %v3409_v62 = vmul.f32 %v8534_v35, %v289_v61  ;;  %v303_v18 = vld [vmem:[%s9607_s10 + $0x1f8] sm:$0xff]  ;;  %v301_v61 = vld [vmem:[%s9607_s10 + $0x1e8] sm:$0xff] }
 0x4d5   : > { %7296 = vst [vmem:[%s9625_s19 + $0x120] sm:$0xff] %v6516_v54  ;;  %4847 = vperm.xlu0 %8234, %v4203_v6   ;;  %v4210_v6 = vld [vmem:[%s9502_s6 + $0x230] sm:$0xff]  ;;  %v3436_v35 = vmul.f32 %v8539_v40, %v316_v39  ;;  %v4217_v39 = vld [vmem:[%s9502_s6 + $0x268] sm:$0xff] }
 0x4d6   : > { %7297 = vst [vmem:[%s9625_s19 + $0x128] sm:$0xff] %v6517_v46  ;;  %v4693_v2 = vpop.permute.xlu2 %4692  ;;  %v4643_v41 = vpop.permute.xlu1 %4642  ;;  %v4211_v46 = vld [vmem:[%s9502_s6 + $0x238] sm:$0xff] }
 0x4d7   : > { %v6544_v27 = vadd.f32 %v4693_v2, %v3424_v23  ;;  %v6545_v63 = vadd.f32 %v4693_v2, %v3425_v5  ;;  %v6524_v31 = vadd.f32 %v4643_v41, %v3404_v58  ;;  %v4638_v9 = vpop.permute.xlu0 %4637  ;;  %v6525_v28 = vadd.f32 %v4643_v41, %v3405_v16  ;;  %v4209_v5 = vld [vmem:[%s9502_s6 + $0x228] sm:$0xff]  ;;  %v295_v41 = vld [vmem:[%s9607_s10 + $0x1b8] sm:$0xff] }
 0x4d8   : > { %v6522_v30 = vadd.f32 %v4638_v9, %v3402_v50  ;;  %v6523_v19 = vadd.f32 %v4638_v9, %v3403_v51  ;;  %v297_v58 = vld [vmem:[%s9607_s10 + $0x1c8] sm:$0xff]  ;;  %v3437_v16 = vmul.f32 %v8539_v40, %v317_v15  ;;  %v3416_v2 = vmul.f32 %v8541_v42, %v296_v57  ;;  %v4215_v57 = vld [vmem:[%s9502_s6 + $0x258] sm:$0xff] }
 0x4d9   : > { %7324 = vst [vmem:[%s9625_s19 + $0x200] sm:$0xff] %v6544_v27  ;;  %v3417_v50 = vmul.f32 %v8541_v42, %v297_v58  ;;  %v3415_v56 = vmul.f32 %v8543_v43, %v295_v41 }
 0x4da   : > { %7325 = vst [vmem:[%s9625_s19 + $0x208] sm:$0xff] %v6545_v63 }
 0x4db   : > { %7304 = vst [vmem:[%s9625_s19 + $0x160] sm:$0xff] %v6524_v31  ;;  %v3414_v31 = vmul.f32 %v8543_v43, %v294_v45 }
 0x4dc   : > { %7305 = vst [vmem:[%s9625_s19 + $0x168] sm:$0xff] %v6525_v28  ;;  %4872 = vperm.xlu2 %8236, %v4208_v59   ;;  %4867 = vperm.xlu1 %8235, %v4207_v17   ;;  %v4214_v17 = vld [vmem:[%s9502_s6 + $0x250] sm:$0xff] }
 0x4dd   : > { %7302 = vst [vmem:[%s9625_s19 + $0x150] sm:$0xff] %v6522_v30  ;;  %4862 = vperm.xlu0 %8234, %v4206_v3   ;;  %v322_v30 = vld [vmem:[%s9607_s10 + $0x290] sm:$0xff] }
 0x4de   : > { %7303 = vst [vmem:[%s9625_s19 + $0x158] sm:$0xff] %v6523_v19  ;;  %v4708_v7 = vpop.permute.xlu2 %4707  ;;  %v4658_v55 = vpop.permute.xlu1 %4657  ;;  %v302_v19 = vld [vmem:[%s9607_s10 + $0x1f0] sm:$0xff]  ;;  %v3442_v43 = vmul.f32 %v8548_v48, %v322_v30 }
 0x4df   : > { %v6550_v33 = vadd.f32 %v4708_v7, %v3430_v29  ;;  %v6551_v11 = vadd.f32 %v4708_v7, %v3431_v14  ;;  %v6530_v54 = vadd.f32 %v4658_v55, %v3410_v21  ;;  %v4653_v49 = vpop.permute.xlu0 %4652  ;;  %v6531_v34 = vadd.f32 %v4658_v55, %v3411_v4  ;;  %v300_v29 = vld [vmem:[%s9607_s10 + $0x1e0] sm:$0xff]  ;;  %v314_v30 = vld [vmem:[%s9607_s10 + $0x250] sm:$0xff] }
 0x4e0   : > { %v6528_v37 = vadd.f32 %v4653_v49, %v3408_v22  ;;  %v6529_v23 = vadd.f32 %v4653_v49, %v3409_v62  ;;  %v3443_v14 = vmul.f32 %v8548_v48, %v323_v26  ;;  %v3422_v21 = vmul.f32 %v8550_v52, %v302_v19  ;;  %v328_v62 = vld [vmem:[%s9607_s10 + $0x2c0] sm:$0xff] }
 0x4e1   : > { %7330 = vst [vmem:[%s9625_s19 + $0x230] sm:$0xff] %v6550_v33  ;;  %v3423_v4 = vmul.f32 %v8550_v52, %v303_v18  ;;  %v3420_v22 = vmul.f32 %v8552_v53, %v300_v29  ;;  %v3421_v49 = vmul.f32 %v8552_v53, %v301_v61  ;;  %v3448_v53 = vmul.f32 %v8557_v60, %v328_v62  ;;  %v312_v26 = vld [vmem:[%s9607_s10 + $0x240] sm:$0xff]  ;;  %v321_v62 = vld [vmem:[%s9607_s10 + $0x288] sm:$0xff] }
 0x4e2   : > { %7331 = vst [vmem:[%s9625_s19 + $0x238] sm:$0xff] %v6551_v11 }
 0x4e3   : > { %7310 = vst [vmem:[%s9625_s19 + $0x190] sm:$0xff] %v6530_v54 }
 0x4e4   : > { %7311 = vst [vmem:[%s9625_s19 + $0x198] sm:$0xff] %v6531_v34  ;;  %4887 = vperm.xlu2 %8236, %v4211_v46   ;;  %4882 = vperm.xlu1 %8235, %v4210_v6   ;;  %v329_v46 = vld [vmem:[%s9607_s10 + $0x2c8] sm:$0xff]  ;;  %v308_v6 = vld [vmem:[%s9607_s10 + $0x220] sm:$0xff] }
 0x4e5   : > { %7308 = vst [vmem:[%s9625_s19 + $0x180] sm:$0xff] %v6528_v37  ;;  %4877 = vperm.xlu0 %8234, %v4209_v5   ;;  %v4216_v37 = vld [vmem:[%s9502_s6 + $0x260] sm:$0xff]  ;;  %v306_v5 = vld [vmem:[%s9607_s10 + $0x210] sm:$0xff]  ;;  %v3449_v58 = vmul.f32 %v8557_v60, %v329_v46  ;;  %v3428_v45 = vmul.f32 %v8559_v0, %v308_v6  ;;  %v319_v46 = vld [vmem:[%s9607_s10 + $0x278] sm:$0xff]  ;;  %v3441_v6 = vmul.f32 %v8577_v24, %v321_v62 }
 0x4e6   : > { %7309 = vst [vmem:[%s9625_s19 + $0x188] sm:$0xff] %v6529_v23  ;;  %v4723_v27 = vpop.permute.xlu2 %4722  ;;  %v4673_v63 = vpop.permute.xlu1 %4672  ;;  %v309_v23 = vld [vmem:[%s9607_s10 + $0x228] sm:$0xff] }
 0x4e7   : > { %v6556_v40 = vadd.f32 %v4723_v27, %v3436_v35  ;;  %v6557_v9 = vadd.f32 %v4723_v27, %v3437_v16  ;;  %v6536_v51 = vadd.f32 %v4673_v63, %v3416_v2  ;;  %v4668_v28 = vpop.permute.xlu0 %4667  ;;  %v6537_v42 = vadd.f32 %v4673_v63, %v3417_v50  ;;  %v307_v35 = vld [vmem:[%s9607_s10 + $0x218] sm:$0xff] }
 0x4e8   : > { %v6534_v59 = vadd.f32 %v4668_v28, %v3414_v31  ;;  %v6535_v3 = vadd.f32 %v4668_v28, %v3415_v56  ;;  %v3429_v16 = vmul.f32 %v8559_v0, %v309_v23  ;;  %v3426_v50 = vmul.f32 %v8561_v1, %v306_v5  ;;  %v4220_v28 = vld [vmem:[%s9502_s6 + $0x280] sm:$0xff]  ;;  %v4219_v56 = vld [vmem:[%s9502_s6 + $0x278] sm:$0xff] }
 0x4e9   : > { %7336 = vst [vmem:[%s9625_s19 + $0x260] sm:$0xff] %v6556_v40  ;;  %v3427_v40 = vmul.f32 %v8561_v1, %v307_v35  ;;  %v346_v35 = vld [vmem:[%s9607_s10 + $0x350] sm:$0xff] }
 0x4ea   : > { %7337 = vst [vmem:[%s9625_s19 + $0x268] sm:$0xff] %v6557_v9  ;;  %v334_v9 = vld [vmem:[%s9607_s10 + $0x2f0] sm:$0xff] }
 0x4eb   : > { %7316 = vst [vmem:[%s9625_s19 + $0x1c0] sm:$0xff] %v6536_v51  ;;  %v3454_v1 = vmul.f32 %v8566_v8, %v334_v9 }
 0x4ec   : > { %7317 = vst [vmem:[%s9625_s19 + $0x1c8] sm:$0xff] %v6537_v42  ;;  %4902 = vperm.xlu2 %8236, %v4214_v17   ;;  %4897 = vperm.xlu1 %8235, %v4213_v10   ;;  %v335_v42 = vld [vmem:[%s9607_s10 + $0x2f8] sm:$0xff]  ;;  %v4218_v17 = vld [vmem:[%s9502_s6 + $0x270] sm:$0xff] }
 0x4ed   : > { %7314 = vst [vmem:[%s9625_s19 + $0x1b0] sm:$0xff] %v6534_v59  ;;  %4892 = vperm.xlu0 %8234, %v4212_v44   ;;  %v315_v10 = vld [vmem:[%s9607_s10 + $0x258] sm:$0xff]  ;;  %v3455_v19 = vmul.f32 %v8566_v8, %v335_v42  ;;  %v313_v44 = vld [vmem:[%s9607_s10 + $0x248] sm:$0xff] }
 0x4ee   : > { %7315 = vst [vmem:[%s9625_s19 + $0x1b8] sm:$0xff] %v6535_v3  ;;  %v4738_v7 = vpop.permute.xlu2 %4737  ;;  %v4688_v55 = vpop.permute.xlu1 %4687  ;;  %v3434_v3 = vmul.f32 %v8568_v12, %v314_v30  ;;  %v3435_v18 = vmul.f32 %v8568_v12, %v315_v10 }
 0x4ef   : > { %v6562_v48 = vadd.f32 %v4738_v7, %v3442_v43  ;;  %v6563_v33 = vadd.f32 %v4738_v7, %v3443_v14  ;;  %v6542_v11 = vadd.f32 %v4688_v55, %v3422_v21  ;;  %v4683_v54 = vpop.permute.xlu0 %4682  ;;  %v6543_v52 = vadd.f32 %v4688_v55, %v3423_v4  ;;  %v340_v55 = vld [vmem:[%s9607_s10 + $0x320] sm:$0xff] }
 0x4f0   : > { %v6540_v34 = vadd.f32 %v4683_v54, %v3420_v22  ;;  %v6541_v15 = vadd.f32 %v4683_v54, %v3421_v49  ;;  %v3432_v14 = vmul.f32 %v8570_v13, %v312_v26  ;;  %v3433_v7 = vmul.f32 %v8570_v13, %v313_v44  ;;  %v320_v54 = vld [vmem:[%s9607_s10 + $0x280] sm:$0xff] }
 0x4f1   : > { %7342 = vst [vmem:[%s9625_s19 + $0x290] sm:$0xff] %v6562_v48  ;;  %v4223_v48 = vld [vmem:[%s9502_s6 + $0x298] sm:$0xff]  ;;  %v3460_v13 = vmul.f32 %v8575_v20, %v340_v55  ;;  %v4228_v44 = vld [vmem:[%s9502_s6 + $0x2c0] sm:$0xff] }
 0x4f2   : > { %7343 = vst [vmem:[%s9625_s19 + $0x298] sm:$0xff] %v6563_v33  ;;  %v4222_v33 = vld [vmem:[%s9502_s6 + $0x290] sm:$0xff] }
 0x4f3   : > { %7322 = vst [vmem:[%s9625_s19 + $0x1f0] sm:$0xff] %v6542_v11  ;;  %v341_v11 = vld [vmem:[%s9607_s10 + $0x328] sm:$0xff] }
 0x4f4   : > { %7323 = vst [vmem:[%s9625_s19 + $0x1f8] sm:$0xff] %v6543_v52  ;;  %4917 = vperm.xlu2 %8236, %v4217_v39   ;;  %4912 = vperm.xlu1 %8235, %v4216_v37   ;;  %v4221_v52 = vld [vmem:[%s9502_s6 + $0x288] sm:$0xff]  ;;  %v3461_v39 = vmul.f32 %v8575_v20, %v341_v11  ;;  %v3440_v37 = vmul.f32 %v8577_v24, %v320_v54 }
 0x4f5   : > { %7320 = vst [vmem:[%s9625_s19 + $0x1e0] sm:$0xff] %v6540_v34  ;;  %4907 = vperm.xlu0 %8234, %v4215_v57   ;;  %v318_v34 = vld [vmem:[%s9607_s10 + $0x270] sm:$0xff] }
 0x4f6   : > { %7321 = vst [vmem:[%s9625_s19 + $0x1e8] sm:$0xff] %v6541_v15  ;;  %v4753_v2 = vpop.permute.xlu2 %4752  ;;  %v4703_v41 = vpop.permute.xlu1 %4702  ;;  %v3438_v23 = vmul.f32 %v8579_v25, %v318_v34 }
 0x4f7   : > { %v6568_v60 = vadd.f32 %v4753_v2, %v3448_v53  ;;  %v6569_v27 = vadd.f32 %v4753_v2, %v3449_v58  ;;  %v6548_v63 = vadd.f32 %v4703_v41, %v3428_v45  ;;  %v4698_v31 = vpop.permute.xlu0 %4697  ;;  %v6549_v0 = vadd.f32 %v4703_v41, %v3429_v16  ;;  %v4226_v2 = vld [vmem:[%s9502_s6 + $0x2b0] sm:$0xff]  ;;  %v4225_v41 = vld [vmem:[%s9502_s6 + $0x2a8] sm:$0xff] }
 0x4f8   : > { %v6546_v51 = vadd.f32 %v4698_v31, %v3426_v50  ;;  %v6547_v59 = vadd.f32 %v4698_v31, %v3427_v40  ;;  %v3439_v45 = vmul.f32 %v8579_v25, %v319_v46  ;;  %v347_v50 = vld [vmem:[%s9607_s10 + $0x358] sm:$0xff]  ;;  %v324_v40 = vld [vmem:[%s9607_s10 + $0x2a0] sm:$0xff]  ;;  %v3466_v25 = vmul.f32 %v8584_v32, %v346_v35 }
 0x4f9   : > { %7348 = vst [vmem:[%s9625_s19 + $0x2c0] sm:$0xff] %v6568_v60  ;;  %v326_v60 = vld [vmem:[%s9607_s10 + $0x2b0] sm:$0xff]  ;;  %v327_v31 = vld [vmem:[%s9607_s10 + $0x2b8] sm:$0xff]  ;;  %v3444_v30 = vmul.f32 %v8588_v38, %v324_v40 }
 0x4fa   : > { %7349 = vst [vmem:[%s9625_s19 + $0x2c8] sm:$0xff] %v6569_v27  ;;  %v3446_v9 = vmul.f32 %v8586_v36, %v326_v60  ;;  %v4231_v46 = vld [vmem:[%s9502_s6 + $0x2d8] sm:$0xff]  ;;  %v13056_v60 = vld [vmem:[#allocation9_spill] sm:$0xff] }
 0x4fb   : > { %7328 = vst [vmem:[%s9625_s19 + $0x220] sm:$0xff] %v6548_v63  ;;  %v4224_v63 = vld [vmem:[%s9502_s6 + $0x2a0] sm:$0xff] }
 0x4fc   : > { %7329 = vst [vmem:[%s9625_s19 + $0x228] sm:$0xff] %v6549_v0  ;;  %4932 = vperm.xlu2 %8236, %v4220_v28   ;;  %4927 = vperm.xlu1 %8235, %v4219_v56   ;;  %v3467_v0 = vmul.f32 %v8584_v32, %v347_v50  ;;  %v3447_v28 = vmul.f32 %v8586_v36, %v327_v31 }
 0x4fd   : > { %7326 = vst [vmem:[%s9625_s19 + $0x210] sm:$0xff] %v6546_v51  ;;  %4922 = vperm.xlu0 %8234, %v4218_v17   ;;  %v325_v51 = vld [vmem:[%s9607_s10 + $0x2a8] sm:$0xff] }
 0x4fe   : > { %7327 = vst [vmem:[%s9625_s19 + $0x218] sm:$0xff] %v6547_v59  ;;  %v4768_v29 = vpop.permute.xlu2 %4767  ;;  %v4718_v43 = vpop.permute.xlu1 %4717  ;;  %v3445_v26 = vmul.f32 %v8588_v38, %v325_v51  ;;  %v364_v51 = vld [vmem:[%s9607_s10 + $0x3e0] sm:$0xff] }
 0x4ff   : > { %v6574_v8 = vadd.f32 %v4768_v29, %v3454_v1  ;;  %v6575_v21 = vadd.f32 %v4768_v29, %v3455_v19  ;;  %v6554_v61 = vadd.f32 %v4718_v43, %v3434_v3  ;;  %v4713_v4 = vpop.permute.xlu0 %4712  ;;  %v6555_v12 = vadd.f32 %v4718_v43, %v3435_v18  ;;  %v352_v1 = vld [vmem:[%s9607_s10 + $0x380] sm:$0xff]  ;;  %v4229_v3 = vld [vmem:[%s9502_s6 + $0x2c8] sm:$0xff] }
 0x500   : > { %v6552_v22 = vadd.f32 %v4713_v4, %v3432_v14  ;;  %v6553_v49 = vadd.f32 %v4713_v4, %v3433_v7  ;;  %v353_v18 = vld [vmem:[%s9607_s10 + $0x388] sm:$0xff]  ;;  %v332_v29 = vld [vmem:[%s9607_s10 + $0x2e0] sm:$0xff]  ;;  %v4227_v14 = vld [vmem:[%s9502_s6 + $0x2b8] sm:$0xff]  ;;  %v3472_v38 = vmul.f32 %v8593_v47, %v352_v1 }
 0x501   : > { %7354 = vst [vmem:[%s9625_s19 + $0x2f0] sm:$0xff] %v6574_v8  ;;  %v333_v8 = vld [vmem:[%s9607_s10 + $0x2e8] sm:$0xff]  ;;  %v13052_v4 = vld [vmem:[#allocation5_spill] sm:$0xff] }
 0x502   : > { %7355 = vst [vmem:[%s9625_s19 + $0x2f8] sm:$0xff] %v6575_v21  ;;  %v330_v21 = vld [vmem:[%s9607_s10 + $0x2d0] sm:$0xff]  ;;  %v3452_v7 = vmul.f32 %v13052_v4, %v332_v29  ;;  %v3453_v55 = vmul.f32 %v13052_v4, %v333_v8  ;;  %v13059_v8 = vld [vmem:[#allocation12_spill] sm:$0xff] }
 0x503   : > { %7334 = vst [vmem:[%s9625_s19 + $0x250] sm:$0xff] %v6554_v61  ;;  %v3473_v61 = vmul.f32 %v8593_v47, %v353_v18  ;;  %v343_v18 = vld [vmem:[%s9607_s10 + $0x338] sm:$0xff] }
 0x504   : > { %7335 = vst [vmem:[%s9625_s19 + $0x258] sm:$0xff] %v6555_v12  ;;  %4947 = vperm.xlu2 %8236, %v4223_v48   ;;  %4942 = vperm.xlu1 %8235, %v4222_v33   ;;  %v331_v12 = vld [vmem:[%s9607_s10 + $0x2d8] sm:$0xff]  ;;  %v13053_v33 = vld [vmem:[#allocation6_spill] sm:$0xff] }
 0x505   : > { %7332 = vst [vmem:[%s9625_s19 + $0x240] sm:$0xff] %v6552_v22  ;;  %4937 = vperm.xlu0 %8234, %v4221_v52   ;;  %v3450_v11 = vmul.f32 %v13053_v33, %v330_v21  ;;  %v3451_v62 = vmul.f32 %v13053_v33, %v331_v12  ;;  %v3463_v12 = vmul.f32 %v13059_v8, %v343_v18  ;;  %v4238_v33 = vld [vmem:[%s9502_s6 + $0x310] sm:$0xff] }
 0x506   : > { %7333 = vst [vmem:[%s9625_s19 + $0x248] sm:$0xff] %v6553_v49  ;;  %v4783_v15 = vpop.permute.xlu2 %4782  ;;  %v4733_v57 = vpop.permute.xlu1 %4732 }
 0x507   : > { %v6580_v20 = vadd.f32 %v4783_v15, %v3460_v13  ;;  %v6581_v5 = vadd.f32 %v4783_v15, %v3461_v39  ;;  %v6560_v53 = vadd.f32 %v4733_v57, %v3440_v37  ;;  %v4728_v58 = vpop.permute.xlu0 %4727  ;;  %v6561_v24 = vadd.f32 %v4733_v57, %v3441_v6  ;;  %v358_v13 = vld [vmem:[%s9607_s10 + $0x3b0] sm:$0xff]  ;;  %v4232_v37 = vld [vmem:[%s9502_s6 + $0x2e0] sm:$0xff]  ;;  %v359_v6 = vld [vmem:[%s9607_s10 + $0x3b8] sm:$0xff] }
 0x508   : > { %v6558_v16 = vadd.f32 %v4728_v58, %v3438_v23  ;;  %v6559_v27 = vadd.f32 %v4728_v58, %v3439_v45  ;;  %v338_v15 = vld [vmem:[%s9607_s10 + $0x310] sm:$0xff] }
 0x509   : > { %7360 = vst [vmem:[%s9625_s19 + $0x320] sm:$0xff] %v6580_v20  ;;  %v4230_v23 = vld [vmem:[%s9502_s6 + $0x2d0] sm:$0xff]  ;;  %v339_v20 = vld [vmem:[%s9607_s10 + $0x318] sm:$0xff] }
 0x50a   : > { %7361 = vst [vmem:[%s9625_s19 + $0x328] sm:$0xff] %v6581_v5  ;;  %v336_v5 = vld [vmem:[%s9607_s10 + $0x300] sm:$0xff] }
 0x50b   : > { %7340 = vst [vmem:[%s9625_s19 + $0x280] sm:$0xff] %v6560_v53  ;;  %v13054_v53 = vld [vmem:[#allocation7_spill] sm:$0xff] }
 0x50c   : > { %7341 = vst [vmem:[%s9625_s19 + $0x288] sm:$0xff] %v6561_v24  ;;  %4962 = vperm.xlu2 %8236, %v4226_v2   ;;  %4957 = vperm.xlu1 %8235, %v4225_v41   ;;  %v3478_v58 = vmul.f32 %v13054_v53, %v358_v13  ;;  %v3479_v45 = vmul.f32 %v13054_v53, %v359_v6  ;;  %v13055_v24 = vld [vmem:[#allocation8_spill] sm:$0xff]  ;;  %v13060_v13 = vld [vmem:[#allocation13_spill] sm:$0xff] }
 0x50d   : > { %7338 = vst [vmem:[%s9625_s19 + $0x270] sm:$0xff] %v6558_v16  ;;  %4952 = vperm.xlu0 %8234, %v4224_v63   ;;  %v3458_v35 = vmul.f32 %v13055_v24, %v338_v15  ;;  %v337_v16 = vld [vmem:[%s9607_s10 + $0x308] sm:$0xff]  ;;  %v3459_v2 = vmul.f32 %v13055_v24, %v339_v20 }
 0x50e   : > { %7339 = vst [vmem:[%s9625_s19 + $0x278] sm:$0xff] %v6559_v27  ;;  %v4798_v56 = vpop.permute.xlu2 %4797  ;;  %v4748_v42 = vpop.permute.xlu1 %4747  ;;  %v3456_v27 = vmul.f32 %v13056_v60, %v336_v5  ;;  %v349_v15 = vld [vmem:[%s9607_s10 + $0x368] sm:$0xff]  ;;  %v13062_v5 = vld [vmem:[#allocation15_spill] sm:$0xff] }
 0x50f   : > { %v6586_v32 = vadd.f32 %v4798_v56, %v3466_v25  ;;  %v6587_v59 = vadd.f32 %v4798_v56, %v3467_v0  ;;  %v6566_v17 = vadd.f32 %v4748_v42, %v3446_v9  ;;  %v4743_v10 = vpop.permute.xlu0 %4742  ;;  %v6567_v36 = vadd.f32 %v4748_v42, %v3447_v28  ;;  %v4235_v56 = vld [vmem:[%s9502_s6 + $0x2f8] sm:$0xff]  ;;  %v4234_v42 = vld [vmem:[%s9502_s6 + $0x2f0] sm:$0xff] }
 0x510   : > { %v6564_v19 = vadd.f32 %v4743_v10, %v3444_v30  ;;  %v6565_v43 = vadd.f32 %v4743_v10, %v3445_v26  ;;  %v3457_v0 = vmul.f32 %v13056_v60, %v337_v16  ;;  %v365_v30 = vld [vmem:[%s9607_s10 + $0x3e8] sm:$0xff]  ;;  %v342_v26 = vld [vmem:[%s9607_s10 + $0x330] sm:$0xff]  ;;  %v3469_v16 = vmul.f32 %v13062_v5, %v349_v15 }
 0x511   : > { %7366 = vst [vmem:[%s9625_s19 + $0x350] sm:$0xff] %v6586_v32  ;;  %v344_v32 = vld [vmem:[%s9607_s10 + $0x340] sm:$0xff]  ;;  %v345_v10 = vld [vmem:[%s9607_s10 + $0x348] sm:$0xff]  ;;  %v3462_v21 = vmul.f32 %v13059_v8, %v342_v26 }
 0x512   : > { %7367 = vst [vmem:[%s9625_s19 + $0x358] sm:$0xff] %v6587_v59  ;;  %v4241_v60 = vld [vmem:[%s9502_s6 + $0x328] sm:$0xff]  ;;  %v4244_v8 = vld [vmem:[%s9502_s6 + $0x340] sm:$0xff] }
 0x513   : > { %7346 = vst [vmem:[%s9625_s19 + $0x2b0] sm:$0xff] %v6566_v17  ;;  %v4233_v17 = vld [vmem:[%s9502_s6 + $0x2e8] sm:$0xff] }
 0x514   : > { %7347 = vst [vmem:[%s9625_s19 + $0x2b8] sm:$0xff] %v6567_v36  ;;  %4977 = vperm.xlu2 %8236, %v4229_v3   ;;  %4972 = vperm.xlu1 %8235, %v4228_v44   ;;  %v13057_v36 = vld [vmem:[#allocation10_spill] sm:$0xff]  ;;  %v13058_v3 = vld [vmem:[#allocation11_spill] sm:$0xff] }
 0x515   : > { %7344 = vst [vmem:[%s9625_s19 + $0x2a0] sm:$0xff] %v6564_v19  ;;  %4967 = vperm.xlu0 %8234, %v4227_v14   ;;  %v3484_v1 = vmul.f32 %v13057_v36, %v364_v51  ;;  %v3485_v19 = vmul.f32 %v13057_v36, %v365_v30  ;;  %v3464_v44 = vmul.f32 %v13058_v3, %v344_v32  ;;  %v13063_v51 = vld [vmem:[#allocation16_spill] sm:$0xff]  ;;  %v13065_v26 = vld [vmem:[#allocation18_spill] sm:$0xff] }
 0x516   : > { %7345 = vst [vmem:[%s9625_s19 + $0x2a8] sm:$0xff] %v6565_v43  ;;  %v4813_v22 = vpop.permute.xlu2 %4812  ;;  %v4763_v48 = vpop.permute.xlu1 %4762  ;;  %v3465_v29 = vmul.f32 %v13058_v3, %v345_v10  ;;  %v355_v32 = vld [vmem:[%s9607_s10 + $0x398] sm:$0xff] }
 0x517   : > { %v6592_v47 = vadd.f32 %v4813_v22, %v3472_v38  ;;  %v6593_v54 = vadd.f32 %v4813_v22, %v3473_v61  ;;  %v6572_v49 = vadd.f32 %v4763_v48, %v3452_v7  ;;  %v4758_v52 = vpop.permute.xlu0 %4757  ;;  %v6573_v34 = vadd.f32 %v4763_v48, %v3453_v55  ;;  %v370_v22 = vld [vmem:[%s9607_s10 + $0x410] sm:$0xff] }
 0x518   : > { %v6570_v39 = vadd.f32 %v4758_v52, %v3450_v11  ;;  %v6571_v57 = vadd.f32 %v4758_v52, %v3451_v62  ;;  %v4237_v11 = vld [vmem:[%s9502_s6 + $0x308] sm:$0xff]  ;;  %v4236_v52 = vld [vmem:[%s9502_s6 + $0x300] sm:$0xff]  ;;  %v351_v62 = vld [vmem:[%s9607_s10 + $0x378] sm:$0xff]  ;;  %v3475_v18 = vmul.f32 %v13065_v26, %v355_v32 }
 0x519   : > { %7372 = vst [vmem:[%s9625_s19 + $0x380] sm:$0xff] %v6592_v47  ;;  %v371_v47 = vld [vmem:[%s9607_s10 + $0x418] sm:$0xff] }
 0x51a   : > { %7373 = vst [vmem:[%s9625_s19 + $0x388] sm:$0xff] %v6593_v54  ;;  %v350_v54 = vld [vmem:[%s9607_s10 + $0x370] sm:$0xff] }
 0x51b   : > { %7352 = vst [vmem:[%s9625_s19 + $0x2e0] sm:$0xff] %v6572_v49 }
 0x51c   : > { %7353 = vst [vmem:[%s9625_s19 + $0x2e8] sm:$0xff] %v6573_v34  ;;  %4992 = vperm.xlu2 %8236, %v4232_v37   ;;  %4987 = vperm.xlu1 %8235, %v4231_v46   ;;  %v348_v34 = vld [vmem:[%s9607_s10 + $0x360] sm:$0xff]  ;;  %v3491_v37 = vmul.f32 %v13060_v13, %v371_v47  ;;  %v13061_v46 = vld [vmem:[#allocation14_spill] sm:$0xff] }
 0x51d   : > { %7350 = vst [vmem:[%s9625_s19 + $0x2d0] sm:$0xff] %v6570_v39  ;;  %4982 = vperm.xlu0 %8234, %v4230_v23   ;;  %v3490_v39 = vmul.f32 %v13060_v13, %v370_v22  ;;  %v3470_v6 = vmul.f32 %v13061_v46, %v350_v54  ;;  %v3468_v53 = vmul.f32 %v13062_v5, %v348_v34  ;;  %v13066_v22 = vld [vmem:[#allocation19_spill] sm:$0xff]  ;;  %v361_v54 = vld [vmem:[%s9607_s10 + $0x3c8] sm:$0xff]  ;;  %v13068_v34 = vld [vmem:[#allocation21_spill] sm:$0xff] }
 0x51e   : > { %7351 = vst [vmem:[%s9625_s19 + $0x2d8] sm:$0xff] %v6571_v57  ;;  %v4828_v41 = vpop.permute.xlu2 %4827  ;;  %v4778_v50 = vpop.permute.xlu1 %4777  ;;  %v3471_v57 = vmul.f32 %v13061_v46, %v351_v62  ;;  %v3481_v15 = vmul.f32 %v13068_v34, %v361_v54  ;;  %v4247_v5 = vld [vmem:[%s9502_s6 + $0x358] sm:$0xff] }
 0x51f   : > { %v6598_v63 = vadd.f32 %v4828_v41, %v3478_v58  ;;  %v6599_v31 = vadd.f32 %v4828_v41, %v3479_v45  ;;  %v6578_v40 = vadd.f32 %v4778_v50, %v3458_v35  ;;  %v4773_v25 = vpop.permute.xlu0 %4772  ;;  %v6579_v9 = vadd.f32 %v4778_v50, %v3459_v2  ;;  %v376_v41 = vld [vmem:[%s9607_s10 + $0x440] sm:$0xff] }
 0x520   : > { %v6576_v28 = vadd.f32 %v4773_v25, %v3456_v27  ;;  %v6577_v59 = vadd.f32 %v4773_v25, %v3457_v0  ;;  %v4240_v27 = vld [vmem:[%s9502_s6 + $0x320] sm:$0xff]  ;;  %v4239_v25 = vld [vmem:[%s9502_s6 + $0x318] sm:$0xff]  ;;  %v357_v0 = vld [vmem:[%s9607_s10 + $0x3a8] sm:$0xff] }
 0x521   : > { %7378 = vst [vmem:[%s9625_s19 + $0x3b0] sm:$0xff] %v6598_v63  ;;  %v377_v63 = vld [vmem:[%s9607_s10 + $0x448] sm:$0xff] }
 0x522   : > { %7379 = vst [vmem:[%s9625_s19 + $0x3b8] sm:$0xff] %v6599_v31  ;;  %v356_v31 = vld [vmem:[%s9607_s10 + $0x3a0] sm:$0xff] }
 0x523   : > { %7358 = vst [vmem:[%s9625_s19 + $0x310] sm:$0xff] %v6578_v40 }
 0x524   : > { %7359 = vst [vmem:[%s9625_s19 + $0x318] sm:$0xff] %v6579_v9  ;;  %5007 = vperm.xlu2 %8236, %v4235_v56   ;;  %5002 = vperm.xlu1 %8235, %v4234_v42   ;;  %v354_v9 = vld [vmem:[%s9607_s10 + $0x390] sm:$0xff]  ;;  %v3497_v56 = vmul.f32 %v13063_v51, %v377_v63  ;;  %v13064_v42 = vld [vmem:[#allocation17_spill] sm:$0xff] }
 0x525   : > { %7356 = vst [vmem:[%s9625_s19 + $0x300] sm:$0xff] %v6576_v28  ;;  %4997 = vperm.xlu0 %8234, %v4233_v17   ;;  %v3496_v28 = vmul.f32 %v13063_v51, %v376_v41  ;;  %v3476_v30 = vmul.f32 %v13064_v42, %v356_v31  ;;  %v3474_v36 = vmul.f32 %v13065_v26, %v354_v9  ;;  %v13069_v41 = vld [vmem:[#allocation22_spill] sm:$0xff]  ;;  %v367_v31 = vld [vmem:[%s9607_s10 + $0x3f8] sm:$0xff]  ;;  %v4250_v26 = vld [vmem:[%s9502_s6 + $0x370] sm:$0xff] }
 0x526   : > { %7357 = vst [vmem:[%s9625_s19 + $0x308] sm:$0xff] %v6577_v59  ;;  %v4843_v43 = vpop.permute.xlu2 %4842  ;;  %v4793_v14 = vpop.permute.xlu1 %4792  ;;  %v3477_v59 = vmul.f32 %v13064_v42, %v357_v0  ;;  %v13071_v9 = vld [vmem:[#allocation24_spill] sm:$0xff] }
 0x527   : > { %v6604_v38 = vadd.f32 %v4843_v43, %v3484_v1  ;;  %v6605_v61 = vadd.f32 %v4843_v43, %v3485_v19  ;;  %v6584_v4 = vadd.f32 %v4793_v14, %v3464_v44  ;;  %v4788_v7 = vpop.permute.xlu0 %4787  ;;  %v6585_v55 = vadd.f32 %v4793_v14, %v3465_v29  ;;  %v382_v43 = vld [vmem:[%s9607_s10 + $0x470] sm:$0xff] }
 0x528   : > { %v6582_v48 = vadd.f32 %v4788_v7, %v3462_v21  ;;  %v6583_v49 = vadd.f32 %v4788_v7, %v3463_v12  ;;  %v4243_v21 = vld [vmem:[%s9502_s6 + $0x338] sm:$0xff]  ;;  %v4242_v7 = vld [vmem:[%s9502_s6 + $0x330] sm:$0xff]  ;;  %v3487_v32 = vmul.f32 %v13071_v9, %v367_v31 }
 0x529   : > { %7384 = vst [vmem:[%s9625_s19 + $0x3e0] sm:$0xff] %v6604_v38  ;;  %v383_v38 = vld [vmem:[%s9607_s10 + $0x478] sm:$0xff] }
 0x52a   : > { %7385 = vst [vmem:[%s9625_s19 + $0x3e8] sm:$0xff] %v6605_v61  ;;  %v362_v61 = vld [vmem:[%s9607_s10 + $0x3d0] sm:$0xff]  ;;  %v363_v12 = vld [vmem:[%s9607_s10 + $0x3d8] sm:$0xff] }
 0x52b   : > { %7364 = vst [vmem:[%s9625_s19 + $0x340] sm:$0xff] %v6584_v4 }
 0x52c   : > { %7365 = vst [vmem:[%s9625_s19 + $0x348] sm:$0xff] %v6585_v55  ;;  %5022 = vperm.xlu2 %8236, %v4238_v33   ;;  %5017 = vperm.xlu1 %8235, %v4237_v11   ;;  %v360_v55 = vld [vmem:[%s9607_s10 + $0x3c0] sm:$0xff]  ;;  %v3503_v33 = vmul.f32 %v13066_v22, %v383_v38  ;;  %v13067_v11 = vld [vmem:[#allocation20_spill] sm:$0xff] }
 0x52d   : > { %7362 = vst [vmem:[%s9625_s19 + $0x330] sm:$0xff] %v6582_v48  ;;  %5012 = vperm.xlu0 %8234, %v4236_v52   ;;  %v3502_v48 = vmul.f32 %v13066_v22, %v382_v43  ;;  %v3482_v47 = vmul.f32 %v13067_v11, %v362_v61  ;;  %v3480_v13 = vmul.f32 %v13068_v34, %v360_v55  ;;  %v13072_v43 = vld [vmem:[#allocation25_spill] sm:$0xff]  ;;  %v373_v61 = vld [vmem:[%s9607_s10 + $0x428] sm:$0xff]  ;;  %v13074_v55 = vld [vmem:[#allocation27_spill] sm:$0xff] }
 0x52e   : > { %7363 = vst [vmem:[%s9625_s19 + $0x338] sm:$0xff] %v6583_v49  ;;  %v4858_v23 = vpop.permute.xlu2 %4857  ;;  %v4808_v20 = vpop.permute.xlu1 %4807  ;;  %v3483_v49 = vmul.f32 %v13067_v11, %v363_v12  ;;  %v3493_v54 = vmul.f32 %v13074_v55, %v373_v61  ;;  %v4253_v34 = vld [vmem:[%s9502_s6 + $0x388] sm:$0xff] }
 0x52f   : > { %v6610_v58 = vadd.f32 %v4858_v23, %v3490_v39  ;;  %v6611_v45 = vadd.f32 %v4858_v23, %v3491_v37  ;;  %v6590_v24 = vadd.f32 %v4808_v20, %v3470_v6  ;;  %v4803_v35 = vpop.permute.xlu0 %4802  ;;  %v6591_v2 = vadd.f32 %v4808_v20, %v3471_v57  ;;  %v388_v23 = vld [vmem:[%s9607_s10 + $0x4a0] sm:$0xff] }
 0x530   : > { %v6588_v50 = vadd.f32 %v4803_v35, %v3468_v53  ;;  %v6589_v40 = vadd.f32 %v4803_v35, %v3469_v16  ;;  %v4246_v53 = vld [vmem:[%s9502_s6 + $0x350] sm:$0xff]  ;;  %v4245_v35 = vld [vmem:[%s9502_s6 + $0x348] sm:$0xff] }
 0x531   : > { %7390 = vst [vmem:[%s9625_s19 + $0x410] sm:$0xff] %v6610_v58  ;;  %v389_v58 = vld [vmem:[%s9607_s10 + $0x4a8] sm:$0xff] }
 0x532   : > { %7391 = vst [vmem:[%s9625_s19 + $0x418] sm:$0xff] %v6611_v45  ;;  %v368_v45 = vld [vmem:[%s9607_s10 + $0x400] sm:$0xff]  ;;  %v369_v16 = vld [vmem:[%s9607_s10 + $0x408] sm:$0xff] }
 0x533   : > { %7370 = vst [vmem:[%s9625_s19 + $0x370] sm:$0xff] %v6590_v24 }
 0x534   : > { %7371 = vst [vmem:[%s9625_s19 + $0x378] sm:$0xff] %v6591_v2  ;;  %5037 = vperm.xlu2 %8236, %v4241_v60   ;;  %5032 = vperm.xlu1 %8235, %v4240_v27   ;;  %v366_v2 = vld [vmem:[%s9607_s10 + $0x3f0] sm:$0xff]  ;;  %v3509_v60 = vmul.f32 %v13069_v41, %v389_v58 }
 0x535   : > { %7368 = vst [vmem:[%s9625_s19 + $0x360] sm:$0xff] %v6588_v50  ;;  %5027 = vperm.xlu0 %8234, %v4239_v25   ;;  %v3508_v50 = vmul.f32 %v13069_v41, %v388_v23  ;;  %v13070_v27 = vld [vmem:[#allocation23_spill] sm:$0xff]  ;;  %v3486_v51 = vmul.f32 %v13071_v9, %v366_v2  ;;  %v13075_v23 = vld [vmem:[#allocation28_spill] sm:$0xff]  ;;  %v13077_v2 = vld [vmem:[#allocation30_spill] sm:$0xff] }
 0x536   : > { %7369 = vst [vmem:[%s9625_s19 + $0x368] sm:$0xff] %v6589_v40  ;;  %v4873_v17 = vpop.permute.xlu2 %4872  ;;  %v4823_v10 = vpop.permute.xlu1 %4822  ;;  %v3488_v63 = vmul.f32 %v13070_v27, %v368_v45  ;;  %v3489_v40 = vmul.f32 %v13070_v27, %v369_v16  ;;  %v379_v45 = vld [vmem:[%s9607_s10 + $0x458] sm:$0xff]  ;;  %v4256_v9 = vld [vmem:[%s9502_s6 + $0x3a0] sm:$0xff] }
 0x537   : > { %v6616_v1 = vadd.f32 %v4873_v17, %v3496_v28  ;;  %v6617_v19 = vadd.f32 %v4873_v17, %v3497_v56  ;;  %v6596_v3 = vadd.f32 %v4823_v10, %v3476_v30  ;;  %v4818_v44 = vpop.permute.xlu0 %4817  ;;  %v6597_v29 = vadd.f32 %v4823_v10, %v3477_v59  ;;  %v394_v17 = vld [vmem:[%s9607_s10 + $0x4d0] sm:$0xff] }
 0x538   : > { %v6594_v14 = vadd.f32 %v4818_v44, %v3474_v36  ;;  %v6595_v4 = vadd.f32 %v4818_v44, %v3475_v18  ;;  %v4249_v36 = vld [vmem:[%s9502_s6 + $0x368] sm:$0xff]  ;;  %v4248_v44 = vld [vmem:[%s9502_s6 + $0x360] sm:$0xff]  ;;  %v375_v18 = vld [vmem:[%s9607_s10 + $0x438] sm:$0xff]  ;;  %v3499_v31 = vmul.f32 %v13077_v2, %v379_v45 }
 0x539   : > { %7396 = vst [vmem:[%s9625_s19 + $0x440] sm:$0xff] %v6616_v1  ;;  %v395_v1 = vld [vmem:[%s9607_s10 + $0x4d8] sm:$0xff] }
 0x53a   : > { %7397 = vst [vmem:[%s9625_s19 + $0x448] sm:$0xff] %v6617_v19  ;;  %v374_v19 = vld [vmem:[%s9607_s10 + $0x430] sm:$0xff] }
 0x53b   : > { %7376 = vst [vmem:[%s9625_s19 + $0x3a0] sm:$0xff] %v6596_v3 }
 0x53c   : > { %7377 = vst [vmem:[%s9625_s19 + $0x3a8] sm:$0xff] %v6597_v29  ;;  %5052 = vperm.xlu2 %8236, %v4244_v8   ;;  %5047 = vperm.xlu1 %8235, %v4243_v21   ;;  %v372_v29 = vld [vmem:[%s9607_s10 + $0x420] sm:$0xff]  ;;  %v3515_v8 = vmul.f32 %v13072_v43, %v395_v1  ;;  %v13073_v21 = vld [vmem:[#allocation26_spill] sm:$0xff] }
 0x53d   : > { %7374 = vst [vmem:[%s9625_s19 + $0x390] sm:$0xff] %v6594_v14  ;;  %5042 = vperm.xlu0 %8234, %v4242_v7   ;;  %v3514_v14 = vmul.f32 %v13072_v43, %v394_v17  ;;  %v3494_v38 = vmul.f32 %v13073_v21, %v374_v19  ;;  %v3492_v22 = vmul.f32 %v13074_v55, %v372_v29  ;;  %v13078_v17 = vld [vmem:[#allocation31_spill] sm:$0xff]  ;;  %v385_v19 = vld [vmem:[%s9607_s10 + $0x488] sm:$0xff]  ;;  %v13080_v29 = vld [vmem:[#allocation33_spill] sm:$0xff] }
 0x53e   : > { %7375 = vst [vmem:[%s9625_s19 + $0x398] sm:$0xff] %v6595_v4  ;;  %v4888_v52 = vpop.permute.xlu2 %4887  ;;  %v4838_v62 = vpop.permute.xlu1 %4837  ;;  %v3495_v4 = vmul.f32 %v13073_v21, %v375_v18  ;;  %v3505_v61 = vmul.f32 %v13080_v29, %v385_v19  ;;  %v4259_v55 = vld [vmem:[%s9502_s6 + $0x3b8] sm:$0xff] }
 0x53f   : > { %v6622_v39 = vadd.f32 %v4888_v52, %v3502_v48  ;;  %v6623_v37 = vadd.f32 %v4888_v52, %v3503_v33  ;;  %v6602_v46 = vadd.f32 %v4838_v62, %v3482_v47  ;;  %v4833_v6 = vpop.permute.xlu0 %4832  ;;  %v6603_v57 = vadd.f32 %v4838_v62, %v3483_v49  ;;  %v400_v52 = vld [vmem:[%s9607_s10 + $0x500] sm:$0xff] }
 0x540   : > { %v6600_v20 = vadd.f32 %v4833_v6, %v3480_v13  ;;  %v6601_v24 = vadd.f32 %v4833_v6, %v3481_v15  ;;  %v4252_v13 = vld [vmem:[%s9502_s6 + $0x380] sm:$0xff]  ;;  %v4251_v6 = vld [vmem:[%s9502_s6 + $0x378] sm:$0xff]  ;;  %v381_v15 = vld [vmem:[%s9607_s10 + $0x468] sm:$0xff] }
 0x541   : > { %7402 = vst [vmem:[%s9625_s19 + $0x470] sm:$0xff] %v6622_v39  ;;  %v401_v39 = vld [vmem:[%s9607_s10 + $0x508] sm:$0xff] }
 0x542   : > { %7403 = vst [vmem:[%s9625_s19 + $0x478] sm:$0xff] %v6623_v37  ;;  %v380_v37 = vld [vmem:[%s9607_s10 + $0x460] sm:$0xff] }
 0x543   : > { %7382 = vst [vmem:[%s9625_s19 + $0x3d0] sm:$0xff] %v6602_v46 }
 0x544   : > { %7383 = vst [vmem:[%s9625_s19 + $0x3d8] sm:$0xff] %v6603_v57  ;;  %5067 = vperm.xlu2 %8236, %v4247_v5   ;;  %5062 = vperm.xlu1 %8235, %v4246_v53   ;;  %v378_v57 = vld [vmem:[%s9607_s10 + $0x450] sm:$0xff]  ;;  %v3521_v5 = vmul.f32 %v13075_v23, %v401_v39  ;;  %v13076_v53 = vld [vmem:[#allocation29_spill] sm:$0xff] }
 0x545   : > { %7380 = vst [vmem:[%s9625_s19 + $0x3c0] sm:$0xff] %v6600_v20  ;;  %5057 = vperm.xlu0 %8234, %v4245_v35   ;;  %v3520_v20 = vmul.f32 %v13075_v23, %v400_v52  ;;  %v3500_v58 = vmul.f32 %v13076_v53, %v380_v37  ;;  %v3498_v41 = vmul.f32 %v13077_v2, %v378_v57  ;;  %v13081_v52 = vld [vmem:[#allocation34_spill] sm:$0xff]  ;;  %v391_v37 = vld [vmem:[%s9607_s10 + $0x4b8] sm:$0xff]  ;;  %v4262_v2 = vld [vmem:[%s9502_s6 + $0x3d0] sm:$0xff] }
 0x546   : > { %7381 = vst [vmem:[%s9625_s19 + $0x3c8] sm:$0xff] %v6601_v24  ;;  %v4903_v25 = vpop.permute.xlu2 %4902  ;;  %v4853_v0 = vpop.permute.xlu1 %4852  ;;  %v3501_v24 = vmul.f32 %v13076_v53, %v381_v15  ;;  %v13083_v57 = vld [vmem:[#allocation36_spill] sm:$0xff] }
 0x547   : > { %v6628_v28 = vadd.f32 %v4903_v25, %v3508_v50  ;;  %v6629_v56 = vadd.f32 %v4903_v25, %v3509_v60  ;;  %v6608_v42 = vadd.f32 %v4853_v0, %v3488_v63  ;;  %v4848_v30 = vpop.permute.xlu0 %4847  ;;  %v6609_v59 = vadd.f32 %v4853_v0, %v3489_v40  ;;  %v406_v25 = vld [vmem:[%s9607_s10 + $0x530] sm:$0xff] }
 0x548   : > { %v6606_v10 = vadd.f32 %v4848_v30, %v3486_v51  ;;  %v6607_v3 = vadd.f32 %v4848_v30, %v3487_v32  ;;  %v4255_v51 = vld [vmem:[%s9502_s6 + $0x398] sm:$0xff]  ;;  %v4254_v30 = vld [vmem:[%s9502_s6 + $0x390] sm:$0xff]  ;;  %v3511_v45 = vmul.f32 %v13083_v57, %v391_v37 }
 0x549   : > { %7408 = vst [vmem:[%s9625_s19 + $0x4a0] sm:$0xff] %v6628_v28  ;;  %v407_v28 = vld [vmem:[%s9607_s10 + $0x538] sm:$0xff] }
 0x54a   : > { %7409 = vst [vmem:[%s9625_s19 + $0x4a8] sm:$0xff] %v6629_v56  ;;  %v386_v56 = vld [vmem:[%s9607_s10 + $0x490] sm:$0xff]  ;;  %v387_v32 = vld [vmem:[%s9607_s10 + $0x498] sm:$0xff] }
 0x54b   : > { %7388 = vst [vmem:[%s9625_s19 + $0x400] sm:$0xff] %v6608_v42 }
 0x54c   : > { %7389 = vst [vmem:[%s9625_s19 + $0x408] sm:$0xff] %v6609_v59  ;;  %5082 = vperm.xlu2 %8236, %v4250_v26   ;;  %5077 = vperm.xlu1 %8235, %v4249_v36   ;;  %v384_v59 = vld [vmem:[%s9607_s10 + $0x480] sm:$0xff]  ;;  %v3527_v26 = vmul.f32 %v13078_v17, %v407_v28  ;;  %v13079_v36 = vld [vmem:[#allocation32_spill] sm:$0xff] }
 0x54d   : > { %7386 = vst [vmem:[%s9625_s19 + $0x3f0] sm:$0xff] %v6606_v10  ;;  %5072 = vperm.xlu0 %8234, %v4248_v44   ;;  %v3526_v10 = vmul.f32 %v13078_v17, %v406_v25  ;;  %v3506_v1 = vmul.f32 %v13079_v36, %v386_v56  ;;  %v3504_v43 = vmul.f32 %v13080_v29, %v384_v59  ;;  %v13084_v25 = vld [vmem:[#allocation37_spill] sm:$0xff]  ;;  %v397_v56 = vld [vmem:[%s9607_s10 + $0x4e8] sm:$0xff]  ;;  %v13086_v59 = vld [vmem:[#allocation39_spill] sm:$0xff] }
 0x54e   : > { %7387 = vst [vmem:[%s9625_s19 + $0x3f8] sm:$0xff] %v6607_v3  ;;  %v4918_v7 = vpop.permute.xlu2 %4917  ;;  %v4868_v12 = vpop.permute.xlu1 %4867  ;;  %v3507_v3 = vmul.f32 %v13079_v36, %v387_v32  ;;  %v3517_v19 = vmul.f32 %v13086_v59, %v397_v56  ;;  %v4265_v29 = vld [vmem:[%s9502_s6 + $0x3e8] sm:$0xff] }
 0x54f   : > { %v6634_v48 = vadd.f32 %v4918_v7, %v3514_v14  ;;  %v6635_v33 = vadd.f32 %v4918_v7, %v3515_v8  ;;  %v6614_v11 = vadd.f32 %v4868_v12, %v3494_v38  ;;  %v4863_v47 = vpop.permute.xlu0 %4862  ;;  %v6615_v49 = vadd.f32 %v4868_v12, %v3495_v4  ;;  %v412_v7 = vld [vmem:[%s9607_s10 + $0x560] sm:$0xff] }
 0x550   : > { %v6612_v62 = vadd.f32 %v4863_v47, %v3492_v22  ;;  %v6613_v46 = vadd.f32 %v4863_v47, %v3493_v54  ;;  %v4258_v22 = vld [vmem:[%s9502_s6 + $0x3b0] sm:$0xff]  ;;  %v4257_v47 = vld [vmem:[%s9502_s6 + $0x3a8] sm:$0xff] }
 0x551   : > { %7414 = vst [vmem:[%s9625_s19 + $0x4d0] sm:$0xff] %v6634_v48  ;;  %v413_v48 = vld [vmem:[%s9607_s10 + $0x568] sm:$0xff] }
 0x552   : > { %7415 = vst [vmem:[%s9625_s19 + $0x4d8] sm:$0xff] %v6635_v33  ;;  %v392_v33 = vld [vmem:[%s9607_s10 + $0x4c0] sm:$0xff]  ;;  %v393_v54 = vld [vmem:[%s9607_s10 + $0x4c8] sm:$0xff] }
 0x553   : > { %7394 = vst [vmem:[%s9625_s19 + $0x430] sm:$0xff] %v6614_v11 }
 0x554   : > { %7395 = vst [vmem:[%s9625_s19 + $0x438] sm:$0xff] %v6615_v49  ;;  %5097 = vperm.xlu2 %8236, %v4253_v34   ;;  %5092 = vperm.xlu1 %8235, %v4252_v13   ;;  %v390_v49 = vld [vmem:[%s9607_s10 + $0x4b0] sm:$0xff]  ;;  %v3533_v34 = vmul.f32 %v13081_v52, %v413_v48 }
 0x555   : > { %7392 = vst [vmem:[%s9625_s19 + $0x420] sm:$0xff] %v6612_v62  ;;  %5087 = vperm.xlu0 %8234, %v4251_v6   ;;  %v3532_v62 = vmul.f32 %v13081_v52, %v412_v7  ;;  %v13082_v13 = vld [vmem:[#allocation35_spill] sm:$0xff]  ;;  %v3510_v23 = vmul.f32 %v13083_v57, %v390_v49  ;;  %v13087_v7 = vld [vmem:[#allocation40_spill] sm:$0xff]  ;;  %v13089_v49 = vld [vmem:[#allocation42_spill] sm:$0xff] }
 0x556   : > { %7393 = vst [vmem:[%s9625_s19 + $0x428] sm:$0xff] %v6613_v46  ;;  %v4933_v35 = vpop.permute.xlu2 %4932  ;;  %v4883_v16 = vpop.permute.xlu1 %4882  ;;  %v3512_v39 = vmul.f32 %v13082_v13, %v392_v33  ;;  %v3513_v46 = vmul.f32 %v13082_v13, %v393_v54  ;;  %v403_v33 = vld [vmem:[%s9607_s10 + $0x518] sm:$0xff]  ;;  %v4268_v57 = vld [vmem:[%s9502_s6 + $0x400] sm:$0xff] }
 0x557   : > { %v6640_v50 = vadd.f32 %v4933_v35, %v3520_v20  ;;  %v6641_v60 = vadd.f32 %v4933_v35, %v3521_v5  ;;  %v6620_v27 = vadd.f32 %v4883_v16, %v3500_v58  ;;  %v4878_v63 = vpop.permute.xlu0 %4877  ;;  %v6621_v40 = vadd.f32 %v4883_v16, %v3501_v24  ;;  %v418_v35 = vld [vmem:[%s9607_s10 + $0x590] sm:$0xff] }
 0x558   : > { %v6618_v0 = vadd.f32 %v4878_v63, %v3498_v41  ;;  %v6619_v42 = vadd.f32 %v4878_v63, %v3499_v31  ;;  %v4261_v41 = vld [vmem:[%s9502_s6 + $0x3c8] sm:$0xff]  ;;  %v4260_v63 = vld [vmem:[%s9502_s6 + $0x3c0] sm:$0xff]  ;;  %v399_v31 = vld [vmem:[%s9607_s10 + $0x4f8] sm:$0xff]  ;;  %v3523_v37 = vmul.f32 %v13089_v49, %v403_v33 }
 0x559   : > { %7420 = vst [vmem:[%s9625_s19 + $0x500] sm:$0xff] %v6640_v50  ;;  %v419_v50 = vld [vmem:[%s9607_s10 + $0x598] sm:$0xff] }
 0x55a   : > { %7421 = vst [vmem:[%s9625_s19 + $0x508] sm:$0xff] %v6641_v60  ;;  %v398_v60 = vld [vmem:[%s9607_s10 + $0x4f0] sm:$0xff] }
 0x55b   : > { %7400 = vst [vmem:[%s9625_s19 + $0x460] sm:$0xff] %v6620_v27 }
 0x55c   : > { %7401 = vst [vmem:[%s9625_s19 + $0x468] sm:$0xff] %v6621_v40  ;;  %5112 = vperm.xlu2 %8236, %v4256_v9   ;;  %5107 = vperm.xlu1 %8235, %v4255_v51   ;;  %v396_v40 = vld [vmem:[%s9607_s10 + $0x4e0] sm:$0xff]  ;;  %v3539_v9 = vmul.f32 %v13084_v25, %v419_v50  ;;  %v13085_v51 = vld [vmem:[#allocation38_spill] sm:$0xff] }
 0x55d   : > { %7398 = vst [vmem:[%s9625_s19 + $0x450] sm:$0xff] %v6618_v0  ;;  %5102 = vperm.xlu0 %8234, %v4254_v30   ;;  %v3538_v0 = vmul.f32 %v13084_v25, %v418_v35  ;;  %v3518_v28 = vmul.f32 %v13085_v51, %v398_v60  ;;  %v3516_v17 = vmul.f32 %v13086_v59, %v396_v40  ;;  %v13090_v35 = vld [vmem:[#allocation43_spill] sm:$0xff]  ;;  %v409_v60 = vld [vmem:[%s9607_s10 + $0x548] sm:$0xff]  ;;  %v13092_v40 = vld [vmem:[#allocation45_spill] sm:$0xff] }
 0x55e   : > { %7399 = vst [vmem:[%s9625_s19 + $0x458] sm:$0xff] %v6619_v42  ;;  %v4948_v44 = vpop.permute.xlu2 %4947  ;;  %v4898_v18 = vpop.permute.xlu1 %4897  ;;  %v3519_v42 = vmul.f32 %v13085_v51, %v399_v31  ;;  %v3529_v56 = vmul.f32 %v13092_v40, %v409_v60  ;;  %v4271_v59 = vld [vmem:[%s9502_s6 + $0x418] sm:$0xff] }
 0x55f   : > { %v6646_v14 = vadd.f32 %v4948_v44, %v3526_v10  ;;  %v6647_v8 = vadd.f32 %v4948_v44, %v3527_v26  ;;  %v6626_v21 = vadd.f32 %v4898_v18, %v3506_v1  ;;  %v4893_v38 = vpop.permute.xlu0 %4892  ;;  %v6627_v4 = vadd.f32 %v4898_v18, %v3507_v3  ;;  %v424_v44 = vld [vmem:[%s9607_s10 + $0x5c0] sm:$0xff] }
 0x560   : > { %v6624_v12 = vadd.f32 %v4893_v38, %v3504_v43  ;;  %v6625_v11 = vadd.f32 %v4893_v38, %v3505_v61  ;;  %v4264_v43 = vld [vmem:[%s9502_s6 + $0x3e0] sm:$0xff]  ;;  %v4263_v38 = vld [vmem:[%s9502_s6 + $0x3d8] sm:$0xff]  ;;  %v405_v61 = vld [vmem:[%s9607_s10 + $0x528] sm:$0xff] }
 0x561   : > { %7426 = vst [vmem:[%s9625_s19 + $0x530] sm:$0xff] %v6646_v14  ;;  %v425_v14 = vld [vmem:[%s9607_s10 + $0x5c8] sm:$0xff] }
 0x562   : > { %7427 = vst [vmem:[%s9625_s19 + $0x538] sm:$0xff] %v6647_v8  ;;  %v404_v8 = vld [vmem:[%s9607_s10 + $0x520] sm:$0xff] }
 0x563   : > { %7406 = vst [vmem:[%s9625_s19 + $0x490] sm:$0xff] %v6626_v21 }
 0x564   : > { %7407 = vst [vmem:[%s9625_s19 + $0x498] sm:$0xff] %v6627_v4  ;;  %5127 = vperm.xlu2 %8236, %v4259_v55   ;;  %5122 = vperm.xlu1 %8235, %v4258_v22   ;;  %v402_v4 = vld [vmem:[%s9607_s10 + $0x510] sm:$0xff]  ;;  %v3545_v55 = vmul.f32 %v13087_v7, %v425_v14  ;;  %v13088_v22 = vld [vmem:[#allocation41_spill] sm:$0xff] }
 0x565   : > { %7404 = vst [vmem:[%s9625_s19 + $0x480] sm:$0xff] %v6624_v12  ;;  %5117 = vperm.xlu0 %8234, %v4257_v47   ;;  %v3544_v12 = vmul.f32 %v13087_v7, %v424_v44  ;;  %v3524_v48 = vmul.f32 %v13088_v22, %v404_v8  ;;  %v3522_v52 = vmul.f32 %v13089_v49, %v402_v4  ;;  %v13093_v44 = vld [vmem:[#allocation46_spill] sm:$0xff]  ;;  %v415_v8 = vld [vmem:[%s9607_s10 + $0x578] sm:$0xff]  ;;  %v4274_v49 = vld [vmem:[%s9502_s6 + $0x430] sm:$0xff] }
 0x566   : > { %7405 = vst [vmem:[%s9625_s19 + $0x488] sm:$0xff] %v6625_v11  ;;  %v4963_v6 = vpop.permute.xlu2 %4962  ;;  %v4913_v15 = vpop.permute.xlu1 %4912  ;;  %v3525_v11 = vmul.f32 %v13088_v22, %v405_v61  ;;  %v13095_v4 = vld [vmem:[#allocation48_spill] sm:$0xff] }
 0x567   : > { %v6652_v20 = vadd.f32 %v4963_v6, %v3532_v62  ;;  %v6653_v5 = vadd.f32 %v4963_v6, %v3533_v34  ;;  %v6632_v53 = vadd.f32 %v4913_v15, %v3512_v39  ;;  %v4908_v58 = vpop.permute.xlu0 %4907  ;;  %v6633_v24 = vadd.f32 %v4913_v15, %v3513_v46  ;;  %v430_v6 = vld [vmem:[%s9607_s10 + $0x5f0] sm:$0xff] }
 0x568   : > { %v6630_v16 = vadd.f32 %v4908_v58, %v3510_v23  ;;  %v6631_v27 = vadd.f32 %v4908_v58, %v3511_v45  ;;  %v4267_v23 = vld [vmem:[%s9502_s6 + $0x3f8] sm:$0xff]  ;;  %v4266_v58 = vld [vmem:[%s9502_s6 + $0x3f0] sm:$0xff]  ;;  %v3535_v33 = vmul.f32 %v13095_v4, %v415_v8 }
 0x569   : > { %7432 = vst [vmem:[%s9625_s19 + $0x560] sm:$0xff] %v6652_v20  ;;  %v431_v20 = vld [vmem:[%s9607_s10 + $0x5f8] sm:$0xff] }
 0x56a   : > { %7433 = vst [vmem:[%s9625_s19 + $0x568] sm:$0xff] %v6653_v5  ;;  %v410_v5 = vld [vmem:[%s9607_s10 + $0x550] sm:$0xff]  ;;  %v411_v45 = vld [vmem:[%s9607_s10 + $0x558] sm:$0xff] }
 0x56b   : > { %7412 = vst [vmem:[%s9625_s19 + $0x4c0] sm:$0xff] %v6632_v53 }
 0x56c   : > { %7413 = vst [vmem:[%s9625_s19 + $0x4c8] sm:$0xff] %v6633_v24  ;;  %5142 = vperm.xlu2 %8236, %v4262_v2   ;;  %5137 = vperm.xlu1 %8235, %v4261_v41   ;;  %v408_v24 = vld [vmem:[%s9607_s10 + $0x540] sm:$0xff]  ;;  %v3551_v2 = vmul.f32 %v13090_v35, %v431_v20  ;;  %v13091_v41 = vld [vmem:[#allocation44_spill] sm:$0xff] }
 0x56d   : > { %7410 = vst [vmem:[%s9625_s19 + $0x4b0] sm:$0xff] %v6630_v16  ;;  %5132 = vperm.xlu0 %8234, %v4260_v63   ;;  %v3550_v16 = vmul.f32 %v13090_v35, %v430_v6  ;;  %v3530_v50 = vmul.f32 %v13091_v41, %v410_v5  ;;  %v3528_v25 = vmul.f32 %v13092_v40, %v408_v24  ;;  %v13096_v6 = vld [vmem:[#allocation49_spill] sm:$0xff]  ;;  %v421_v5 = vld [vmem:[%s9607_s10 + $0x5a8] sm:$0xff]  ;;  %v13098_v24 = vld [vmem:[#allocation51_spill] sm:$0xff] }
 0x56e   : > { %7411 = vst [vmem:[%s9625_s19 + $0x4b8] sm:$0xff] %v6631_v27  ;;  %v4978_v30 = vpop.permute.xlu2 %4977  ;;  %v4928_v32 = vpop.permute.xlu1 %4927  ;;  %v3531_v27 = vmul.f32 %v13091_v41, %v411_v45  ;;  %v3541_v60 = vmul.f32 %v13098_v24, %v421_v5  ;;  %v4277_v40 = vld [vmem:[%s9502_s6 + $0x448] sm:$0xff] }
 0x56f   : > { %v6658_v10 = vadd.f32 %v4978_v30, %v3538_v0  ;;  %v6659_v26 = vadd.f32 %v4978_v30, %v3539_v9  ;;  %v6638_v36 = vadd.f32 %v4928_v32, %v3518_v28  ;;  %v4923_v1 = vpop.permute.xlu0 %4922  ;;  %v6639_v3 = vadd.f32 %v4928_v32, %v3519_v42  ;;  %v436_v30 = vld [vmem:[%s9607_s10 + $0x620] sm:$0xff] }
 0x570   : > { %v6636_v18 = vadd.f32 %v4923_v1, %v3516_v17  ;;  %v6637_v21 = vadd.f32 %v4923_v1, %v3517_v19  ;;  %v4270_v17 = vld [vmem:[%s9502_s6 + $0x410] sm:$0xff]  ;;  %v4269_v1 = vld [vmem:[%s9502_s6 + $0x408] sm:$0xff] }
 0x571   : > { %7438 = vst [vmem:[%s9625_s19 + $0x590] sm:$0xff] %v6658_v10  ;;  %v437_v10 = vld [vmem:[%s9607_s10 + $0x628] sm:$0xff] }
 0x572   : > { %7439 = vst [vmem:[%s9625_s19 + $0x598] sm:$0xff] %v6659_v26  ;;  %v416_v26 = vld [vmem:[%s9607_s10 + $0x580] sm:$0xff]  ;;  %v417_v19 = vld [vmem:[%s9607_s10 + $0x588] sm:$0xff] }
 0x573   : > { %7418 = vst [vmem:[%s9625_s19 + $0x4f0] sm:$0xff] %v6638_v36 }
 0x574   : > { %7419 = vst [vmem:[%s9625_s19 + $0x4f8] sm:$0xff] %v6639_v3  ;;  %5157 = vperm.xlu2 %8236, %v4265_v29   ;;  %5152 = vperm.xlu1 %8235, %v4264_v43   ;;  %v414_v3 = vld [vmem:[%s9607_s10 + $0x570] sm:$0xff]  ;;  %v3557_v29 = vmul.f32 %v13093_v44, %v437_v10 }
 0x575   : > { %7416 = vst [vmem:[%s9625_s19 + $0x4e0] sm:$0xff] %v6636_v18  ;;  %5147 = vperm.xlu0 %8234, %v4263_v38   ;;  %v3556_v18 = vmul.f32 %v13093_v44, %v436_v30  ;;  %v13094_v43 = vld [vmem:[#allocation47_spill] sm:$0xff]  ;;  %v3534_v7 = vmul.f32 %v13095_v4, %v414_v3  ;;  %v13099_v30 = vld [vmem:[#allocation52_spill] sm:$0xff]  ;;  %v13101_v3 = vld [vmem:[#allocation54_spill] sm:$0xff] }
 0x576   : > { %7417 = vst [vmem:[%s9625_s19 + $0x4e8] sm:$0xff] %v6637_v21  ;;  %v4993_v47 = vpop.permute.xlu2 %4992  ;;  %v4943_v54 = vpop.permute.xlu1 %4942  ;;  %v3536_v14 = vmul.f32 %v13094_v43, %v416_v26  ;;  %v3537_v21 = vmul.f32 %v13094_v43, %v417_v19  ;;  %v427_v26 = vld [vmem:[%s9607_s10 + $0x5d8] sm:$0xff]  ;;  %v4280_v4 = vld [vmem:[%s9502_s6 + $0x460] sm:$0xff] }
 0x577   : > { %v6664_v62 = vadd.f32 %v4993_v47, %v3544_v12  ;;  %v6665_v34 = vadd.f32 %v4993_v47, %v3545_v55  ;;  %v6644_v13 = vadd.f32 %v4943_v54, %v3524_v48  ;;  %v4938_v39 = vpop.permute.xlu0 %4937  ;;  %v6645_v46 = vadd.f32 %v4943_v54, %v3525_v11  ;;  %v442_v47 = vld [vmem:[%s9607_s10 + $0x650] sm:$0xff] }
 0x578   : > { %v6642_v15 = vadd.f32 %v4938_v39, %v3522_v52  ;;  %v6643_v53 = vadd.f32 %v4938_v39, %v3523_v37  ;;  %v4273_v52 = vld [vmem:[%s9502_s6 + $0x428] sm:$0xff]  ;;  %v4272_v39 = vld [vmem:[%s9502_s6 + $0x420] sm:$0xff]  ;;  %v423_v37 = vld [vmem:[%s9607_s10 + $0x5b8] sm:$0xff]  ;;  %v3547_v8 = vmul.f32 %v13101_v3, %v427_v26 }
 0x579   : > { %7444 = vst [vmem:[%s9625_s19 + $0x5c0] sm:$0xff] %v6664_v62  ;;  %v443_v62 = vld [vmem:[%s9607_s10 + $0x658] sm:$0xff] }
 0x57a   : > { %7445 = vst [vmem:[%s9625_s19 + $0x5c8] sm:$0xff] %v6665_v34  ;;  %v422_v34 = vld [vmem:[%s9607_s10 + $0x5b0] sm:$0xff] }
 0x57b   : > { %7424 = vst [vmem:[%s9625_s19 + $0x520] sm:$0xff] %v6644_v13 }
 0x57c   : > { %7425 = vst [vmem:[%s9625_s19 + $0x528] sm:$0xff] %v6645_v46  ;;  %5172 = vperm.xlu2 %8236, %v4268_v57   ;;  %5167 = vperm.xlu1 %8235, %v4267_v23   ;;  %v420_v46 = vld [vmem:[%s9607_s10 + $0x5a0] sm:$0xff]  ;;  %v3563_v57 = vmul.f32 %v13096_v6, %v443_v62  ;;  %v13097_v23 = vld [vmem:[#allocation50_spill] sm:$0xff] }
 0x57d   : > { %7422 = vst [vmem:[%s9625_s19 + $0x510] sm:$0xff] %v6642_v15  ;;  %5162 = vperm.xlu0 %8234, %v4266_v58   ;;  %v3562_v15 = vmul.f32 %v13096_v6, %v442_v47  ;;  %v3542_v20 = vmul.f32 %v13097_v23, %v422_v34  ;;  %v3540_v35 = vmul.f32 %v13098_v24, %v420_v46  ;;  %v13102_v47 = vld [vmem:[#allocation55_spill] sm:$0xff]  ;;  %v433_v34 = vld [vmem:[%s9607_s10 + $0x608] sm:$0xff]  ;;  %v13104_v46 = vld [vmem:[#allocation57_spill] sm:$0xff] }
 0x57e   : > { %7423 = vst [vmem:[%s9625_s19 + $0x518] sm:$0xff] %v6643_v53  ;;  %v5008_v63 = vpop.permute.xlu2 %5007  ;;  %v4958_v31 = vpop.permute.xlu1 %4957  ;;  %v3543_v53 = vmul.f32 %v13097_v23, %v423_v37  ;;  %v3553_v5 = vmul.f32 %v13104_v46, %v433_v34  ;;  %v4283_v24 = vld [vmem:[%s9502_s6 + $0x478] sm:$0xff] }
 0x57f   : > { %v6670_v0 = vadd.f32 %v5008_v63, %v3550_v16  ;;  %v6671_v9 = vadd.f32 %v5008_v63, %v3551_v2  ;;  %v6650_v51 = vadd.f32 %v4958_v31, %v3530_v50  ;;  %v4953_v28 = vpop.permute.xlu0 %4952  ;;  %v6651_v42 = vadd.f32 %v4958_v31, %v3531_v27  ;;  %v448_v63 = vld [vmem:[%s9607_s10 + $0x680] sm:$0xff] }
 0x580   : > { %v6648_v32 = vadd.f32 %v4953_v28, %v3528_v25  ;;  %v6649_v36 = vadd.f32 %v4953_v28, %v3529_v56  ;;  %v4276_v25 = vld [vmem:[%s9502_s6 + $0x440] sm:$0xff]  ;;  %v4275_v28 = vld [vmem:[%s9502_s6 + $0x438] sm:$0xff]  ;;  %v429_v56 = vld [vmem:[%s9607_s10 + $0x5e8] sm:$0xff] }
 0x581   : > { %7450 = vst [vmem:[%s9625_s19 + $0x5f0] sm:$0xff] %v6670_v0  ;;  %v449_v0 = vld [vmem:[%s9607_s10 + $0x688] sm:$0xff] }
 0x582   : > { %7451 = vst [vmem:[%s9625_s19 + $0x5f8] sm:$0xff] %v6671_v9  ;;  %v428_v9 = vld [vmem:[%s9607_s10 + $0x5e0] sm:$0xff] }
 0x583   : > { %7430 = vst [vmem:[%s9625_s19 + $0x550] sm:$0xff] %v6650_v51 }
 0x584   : > { %7431 = vst [vmem:[%s9625_s19 + $0x558] sm:$0xff] %v6651_v42  ;;  %5187 = vperm.xlu2 %8236, %v4271_v59   ;;  %5182 = vperm.xlu1 %8235, %v4270_v17   ;;  %v426_v42 = vld [vmem:[%s9607_s10 + $0x5d0] sm:$0xff]  ;;  %v3569_v59 = vmul.f32 %v13099_v30, %v449_v0  ;;  %v13100_v17 = vld [vmem:[#allocation53_spill] sm:$0xff] }
 0x585   : > { %7428 = vst [vmem:[%s9625_s19 + $0x540] sm:$0xff] %v6648_v32  ;;  %5177 = vperm.xlu0 %8234, %v4269_v1   ;;  %v3568_v32 = vmul.f32 %v13099_v30, %v448_v63  ;;  %v3548_v10 = vmul.f32 %v13100_v17, %v428_v9  ;;  %v3546_v44 = vmul.f32 %v13101_v3, %v426_v42  ;;  %v13105_v63 = vld [vmem:[#allocation58_spill] sm:$0xff]  ;;  %v439_v9 = vld [vmem:[%s9607_s10 + $0x638] sm:$0xff]  ;;  %v4286_v3 = vld [vmem:[%s9502_s6 + $0x490] sm:$0xff] }
 0x586   : > { %7429 = vst [vmem:[%s9625_s19 + $0x548] sm:$0xff] %v6649_v36  ;;  %v5023_v38 = vpop.permute.xlu2 %5022  ;;  %v4973_v61 = vpop.permute.xlu1 %4972  ;;  %v3549_v36 = vmul.f32 %v13100_v17, %v429_v56  ;;  %v13107_v42 = vld [vmem:[#allocation60_spill] sm:$0xff] }
 0x587   : > { %v6676_v12 = vadd.f32 %v5023_v38, %v3556_v18  ;;  %v6677_v55 = vadd.f32 %v5023_v38, %v3557_v29  ;;  %v6656_v22 = vadd.f32 %v4973_v61, %v3536_v14  ;;  %v4968_v48 = vpop.permute.xlu0 %4967  ;;  %v6657_v11 = vadd.f32 %v4973_v61, %v3537_v21  ;;  %v454_v38 = vld [vmem:[%s9607_s10 + $0x6b0] sm:$0xff] }
 0x588   : > { %v6654_v54 = vadd.f32 %v4968_v48, %v3534_v7  ;;  %v6655_v13 = vadd.f32 %v4968_v48, %v3535_v33  ;;  %v4279_v7 = vld [vmem:[%s9502_s6 + $0x458] sm:$0xff]  ;;  %v4278_v48 = vld [vmem:[%s9502_s6 + $0x450] sm:$0xff]  ;;  %v3559_v26 = vmul.f32 %v13107_v42, %v439_v9 }
 0x589   : > { %7456 = vst [vmem:[%s9625_s19 + $0x620] sm:$0xff] %v6676_v12  ;;  %v455_v12 = vld [vmem:[%s9607_s10 + $0x6b8] sm:$0xff] }
 0x58a   : > { %7457 = vst [vmem:[%s9625_s19 + $0x628] sm:$0xff] %v6677_v55  ;;  %v434_v55 = vld [vmem:[%s9607_s10 + $0x610] sm:$0xff]  ;;  %v435_v33 = vld [vmem:[%s9607_s10 + $0x618] sm:$0xff] }
 0x58b   : > { %7436 = vst [vmem:[%s9625_s19 + $0x580] sm:$0xff] %v6656_v22 }
 0x58c   : > { %7437 = vst [vmem:[%s9625_s19 + $0x588] sm:$0xff] %v6657_v11  ;;  %5202 = vperm.xlu2 %8236, %v4274_v49   ;;  %5197 = vperm.xlu1 %8235, %v4273_v52   ;;  %v432_v11 = vld [vmem:[%s9607_s10 + $0x600] sm:$0xff]  ;;  %v3575_v49 = vmul.f32 %v13102_v47, %v455_v12  ;;  %v13103_v52 = vld [vmem:[#allocation56_spill] sm:$0xff] }
 0x58d   : > { %7434 = vst [vmem:[%s9625_s19 + $0x570] sm:$0xff] %v6654_v54  ;;  %5192 = vperm.xlu0 %8234, %v4272_v39   ;;  %v3574_v54 = vmul.f32 %v13102_v47, %v454_v38  ;;  %v3554_v62 = vmul.f32 %v13103_v52, %v434_v55  ;;  %v3552_v6 = vmul.f32 %v13104_v46, %v432_v11  ;;  %v13108_v38 = vld [vmem:[#allocation61_spill] sm:$0xff]  ;;  %v445_v55 = vld [vmem:[%s9607_s10 + $0x668] sm:$0xff]  ;;  %v13110_v11 = vld [vmem:[#allocation63_spill] sm:$0xff] }
 0x58e   : > { %7435 = vst [vmem:[%s9625_s19 + $0x578] sm:$0xff] %v6655_v13  ;;  %v5038_v58 = vpop.permute.xlu2 %5037  ;;  %v4988_v45 = vpop.permute.xlu1 %4987  ;;  %v3555_v13 = vmul.f32 %v13103_v52, %v435_v33  ;;  %v3565_v34 = vmul.f32 %v13110_v11, %v445_v55  ;;  %v4289_v46 = vld [vmem:[%s9502_s6 + $0x4a8] sm:$0xff] }
 0x58f   : > { %v6682_v16 = vadd.f32 %v5038_v58, %v3562_v15  ;;  %v6683_v2 = vadd.f32 %v5038_v58, %v3563_v57  ;;  %v6662_v41 = vadd.f32 %v4988_v45, %v3542_v20  ;;  %v4983_v50 = vpop.permute.xlu0 %4982  ;;  %v6663_v27 = vadd.f32 %v4988_v45, %v3543_v53  ;;  %v460_v58 = vld [vmem:[%s9607_s10 + $0x6e0] sm:$0xff] }
 0x590   : > { %v6660_v31 = vadd.f32 %v4983_v50, %v3540_v35  ;;  %v6661_v51 = vadd.f32 %v4983_v50, %v3541_v60  ;;  %v4282_v35 = vld [vmem:[%s9502_s6 + $0x470] sm:$0xff]  ;;  %v4281_v50 = vld [vmem:[%s9502_s6 + $0x468] sm:$0xff] }
 0x591   : > { %7462 = vst [vmem:[%s9625_s19 + $0x650] sm:$0xff] %v6682_v16  ;;  %v461_v16 = vld [vmem:[%s9607_s10 + $0x6e8] sm:$0xff] }
 0x592   : > { %7463 = vst [vmem:[%s9625_s19 + $0x658] sm:$0xff] %v6683_v2  ;;  %v440_v2 = vld [vmem:[%s9607_s10 + $0x640] sm:$0xff]  ;;  %v441_v60 = vld [vmem:[%s9607_s10 + $0x648] sm:$0xff] }
 0x593   : > { %7442 = vst [vmem:[%s9625_s19 + $0x5b0] sm:$0xff] %v6662_v41 }
 0x594   : > { %7443 = vst [vmem:[%s9625_s19 + $0x5b8] sm:$0xff] %v6663_v27  ;;  %5217 = vperm.xlu2 %8236, %v4277_v40   ;;  %5212 = vperm.xlu1 %8235, %v4276_v25   ;;  %v438_v27 = vld [vmem:[%s9607_s10 + $0x630] sm:$0xff]  ;;  %v3581_v40 = vmul.f32 %v13105_v63, %v461_v16 }
 0x595   : > { %7440 = vst [vmem:[%s9625_s19 + $0x5a0] sm:$0xff] %v6660_v31  ;;  %5207 = vperm.xlu0 %8234, %v4275_v28   ;;  %v3580_v31 = vmul.f32 %v13105_v63, %v460_v58  ;;  %v13106_v25 = vld [vmem:[#allocation59_spill] sm:$0xff]  ;;  %v3558_v30 = vmul.f32 %v13107_v42, %v438_v27  ;;  %v13111_v58 = vld [vmem:[#allocation64_spill] sm:$0xff]  ;;  %v13113_v27 = vld [vmem:[#allocation66_spill] sm:$0xff] }
 0x596   : > { %7441 = vst [vmem:[%s9625_s19 + $0x5a8] sm:$0xff] %v6661_v51  ;;  %v5053_v1 = vpop.permute.xlu2 %5052  ;;  %v5003_v19 = vpop.permute.xlu1 %5002  ;;  %v3560_v0 = vmul.f32 %v13106_v25, %v440_v2  ;;  %v3561_v51 = vmul.f32 %v13106_v25, %v441_v60  ;;  %v451_v2 = vld [vmem:[%s9607_s10 + $0x698] sm:$0xff]  ;;  %v4292_v42 = vld [vmem:[%s9502_s6 + $0x4c0] sm:$0xff] }
 0x597   : > { %v6688_v18 = vadd.f32 %v5053_v1, %v3568_v32  ;;  %v6689_v29 = vadd.f32 %v5053_v1, %v3569_v59  ;;  %v6668_v43 = vadd.f32 %v5003_v19, %v3548_v10  ;;  %v4998_v14 = vpop.permute.xlu0 %4997  ;;  %v6669_v21 = vadd.f32 %v5003_v19, %v3549_v36  ;;  %v466_v1 = vld [vmem:[%s9607_s10 + $0x710] sm:$0xff] }
 0x598   : > { %v6666_v61 = vadd.f32 %v4998_v14, %v3546_v44  ;;  %v6667_v22 = vadd.f32 %v4998_v14, %v3547_v8  ;;  %v4285_v44 = vld [vmem:[%s9502_s6 + $0x488] sm:$0xff]  ;;  %v4284_v14 = vld [vmem:[%s9502_s6 + $0x480] sm:$0xff]  ;;  %v447_v8 = vld [vmem:[%s9607_s10 + $0x678] sm:$0xff]  ;;  %v3571_v9 = vmul.f32 %v13113_v27, %v451_v2 }
 0x599   : > { %7468 = vst [vmem:[%s9625_s19 + $0x680] sm:$0xff] %v6688_v18  ;;  %v467_v18 = vld [vmem:[%s9607_s10 + $0x718] sm:$0xff] }
 0x59a   : > { %7469 = vst [vmem:[%s9625_s19 + $0x688] sm:$0xff] %v6689_v29  ;;  %v446_v29 = vld [vmem:[%s9607_s10 + $0x670] sm:$0xff] }
 0x59b   : > { %7448 = vst [vmem:[%s9625_s19 + $0x5e0] sm:$0xff] %v6668_v43 }
 0x59c   : > { %7449 = vst [vmem:[%s9625_s19 + $0x5e8] sm:$0xff] %v6669_v21  ;;  %5232 = vperm.xlu2 %8236, %v4280_v4   ;;  %5227 = vperm.xlu1 %8235, %v4279_v7   ;;  %v444_v21 = vld [vmem:[%s9607_s10 + $0x660] sm:$0xff]  ;;  %v3587_v4 = vmul.f32 %v13108_v38, %v467_v18  ;;  %v13109_v7 = vld [vmem:[#allocation62_spill] sm:$0xff] }
 0x59d   : > { %7446 = vst [vmem:[%s9625_s19 + $0x5d0] sm:$0xff] %v6666_v61  ;;  %5222 = vperm.xlu0 %8234, %v4278_v48   ;;  %v3586_v61 = vmul.f32 %v13108_v38, %v466_v1  ;;  %v3566_v12 = vmul.f32 %v13109_v7, %v446_v29  ;;  %v3564_v47 = vmul.f32 %v13110_v11, %v444_v21  ;;  %v13114_v1 = vld [vmem:[#allocation67_spill] sm:$0xff]  ;;  %v457_v29 = vld [vmem:[%s9607_s10 + $0x6c8] sm:$0xff]  ;;  %v13116_v21 = vld [vmem:[#allocation69_spill] sm:$0xff] }
 0x59e   : > { %7447 = vst [vmem:[%s9625_s19 + $0x5d8] sm:$0xff] %v6667_v22  ;;  %v5068_v39 = vpop.permute.xlu2 %5067  ;;  %v5018_v37 = vpop.permute.xlu1 %5017  ;;  %v3567_v22 = vmul.f32 %v13109_v7, %v447_v8  ;;  %v3577_v55 = vmul.f32 %v13116_v21, %v457_v29  ;;  %v4295_v11 = vld [vmem:[%s9502_s6 + $0x4d8] sm:$0xff] }
 0x59f   : > { %v6694_v15 = vadd.f32 %v5068_v39, %v3574_v54  ;;  %v6695_v57 = vadd.f32 %v5068_v39, %v3575_v49  ;;  %v6674_v23 = vadd.f32 %v5018_v37, %v3554_v62  ;;  %v5013_v20 = vpop.permute.xlu0 %5012  ;;  %v6675_v53 = vadd.f32 %v5018_v37, %v3555_v13  ;;  %v472_v39 = vld [vmem:[%s9607_s10 + $0x740] sm:$0xff] }
 0x5a0   : > { %v6672_v45 = vadd.f32 %v5013_v20, %v3552_v6  ;;  %v6673_v41 = vadd.f32 %v5013_v20, %v3553_v5  ;;  %v4288_v6 = vld [vmem:[%s9502_s6 + $0x4a0] sm:$0xff]  ;;  %v4287_v20 = vld [vmem:[%s9502_s6 + $0x498] sm:$0xff]  ;;  %v453_v5 = vld [vmem:[%s9607_s10 + $0x6a8] sm:$0xff] }
 0x5a1   : > { %7474 = vst [vmem:[%s9625_s19 + $0x6b0] sm:$0xff] %v6694_v15  ;;  %v473_v15 = vld [vmem:[%s9607_s10 + $0x748] sm:$0xff] }
 0x5a2   : > { %7475 = vst [vmem:[%s9625_s19 + $0x6b8] sm:$0xff] %v6695_v57  ;;  %v452_v57 = vld [vmem:[%s9607_s10 + $0x6a0] sm:$0xff] }
 0x5a3   : > { %7454 = vst [vmem:[%s9625_s19 + $0x610] sm:$0xff] %v6674_v23 }
 0x5a4   : > { %7455 = vst [vmem:[%s9625_s19 + $0x618] sm:$0xff] %v6675_v53  ;;  %5247 = vperm.xlu2 %8236, %v4283_v24   ;;  %5242 = vperm.xlu1 %8235, %v4282_v35   ;;  %v450_v53 = vld [vmem:[%s9607_s10 + $0x690] sm:$0xff]  ;;  %v3593_v24 = vmul.f32 %v13111_v58, %v473_v15  ;;  %v13112_v35 = vld [vmem:[#allocation65_spill] sm:$0xff] }
 0x5a5   : > { %7452 = vst [vmem:[%s9625_s19 + $0x600] sm:$0xff] %v6672_v45  ;;  %5237 = vperm.xlu0 %8234, %v4281_v50   ;;  %v3592_v45 = vmul.f32 %v13111_v58, %v472_v39  ;;  %v3572_v16 = vmul.f32 %v13112_v35, %v452_v57  ;;  %v3570_v63 = vmul.f32 %v13113_v27, %v450_v53  ;;  %v13117_v39 = vld [vmem:[#allocation70_spill] sm:$0xff]  ;;  %v463_v57 = vld [vmem:[%s9607_s10 + $0x6f8] sm:$0xff]  ;;  %v4298_v27 = vld [vmem:[%s9502_s6 + $0x4f0] sm:$0xff] }
 0x5a6   : > { %7453 = vst [vmem:[%s9625_s19 + $0x608] sm:$0xff] %v6673_v41  ;;  %v5083_v28 = vpop.permute.xlu2 %5082  ;;  %v5033_v56 = vpop.permute.xlu1 %5032  ;;  %v3573_v41 = vmul.f32 %v13112_v35, %v453_v5  ;;  %v13119_v53 = vld [vmem:[#allocation72_spill] sm:$0xff] }
 0x5a7   : > { %v6700_v32 = vadd.f32 %v5083_v28, %v3580_v31  ;;  %v6701_v59 = vadd.f32 %v5083_v28, %v3581_v40  ;;  %v6680_v17 = vadd.f32 %v5033_v56, %v3560_v0  ;;  %v5028_v10 = vpop.permute.xlu0 %5027  ;;  %v6681_v36 = vadd.f32 %v5033_v56, %v3561_v51  ;;  %v478_v28 = vld [vmem:[%s9607_s10 + $0x770] sm:$0xff] }
 0x5a8   : > { %v6678_v19 = vadd.f32 %v5028_v10, %v3558_v30  ;;  %v6679_v43 = vadd.f32 %v5028_v10, %v3559_v26  ;;  %v4291_v30 = vld [vmem:[%s9502_s6 + $0x4b8] sm:$0xff]  ;;  %v4290_v10 = vld [vmem:[%s9502_s6 + $0x4b0] sm:$0xff]  ;;  %v3583_v2 = vmul.f32 %v13119_v53, %v463_v57 }
 0x5a9   : > { %7480 = vst [vmem:[%s9625_s19 + $0x6e0] sm:$0xff] %v6700_v32  ;;  %v479_v32 = vld [vmem:[%s9607_s10 + $0x778] sm:$0xff] }
 0x5aa   : > { %7481 = vst [vmem:[%s9625_s19 + $0x6e8] sm:$0xff] %v6701_v59  ;;  %v458_v59 = vld [vmem:[%s9607_s10 + $0x6d0] sm:$0xff]  ;;  %v459_v26 = vld [vmem:[%s9607_s10 + $0x6d8] sm:$0xff] }
 0x5ab   : > { %7460 = vst [vmem:[%s9625_s19 + $0x640] sm:$0xff] %v6680_v17 }
 0x5ac   : > { %7461 = vst [vmem:[%s9625_s19 + $0x648] sm:$0xff] %v6681_v36  ;;  %5262 = vperm.xlu2 %8236, %v4286_v3   ;;  %5257 = vperm.xlu1 %8235, %v4285_v44   ;;  %v456_v36 = vld [vmem:[%s9607_s10 + $0x6c0] sm:$0xff]  ;;  %v3599_v3 = vmul.f32 %v13114_v1, %v479_v32  ;;  %v13115_v44 = vld [vmem:[#allocation68_spill] sm:$0xff] }
 0x5ad   : > { %7458 = vst [vmem:[%s9625_s19 + $0x630] sm:$0xff] %v6678_v19  ;;  %5252 = vperm.xlu0 %8234, %v4284_v14   ;;  %v3598_v19 = vmul.f32 %v13114_v1, %v478_v28  ;;  %v3578_v18 = vmul.f32 %v13115_v44, %v458_v59  ;;  %v3576_v38 = vmul.f32 %v13116_v21, %v456_v36  ;;  %v13120_v28 = vld [vmem:[#allocation73_spill] sm:$0xff]  ;;  %v469_v59 = vld [vmem:[%s9607_s10 + $0x728] sm:$0xff]  ;;  %v13122_v36 = vld [vmem:[#allocation75_spill] sm:$0xff] }
 0x5ae   : > { %7459 = vst [vmem:[%s9625_s19 + $0x638] sm:$0xff] %v6679_v43  ;;  %v5098_v48 = vpop.permute.xlu2 %5097  ;;  %v5048_v33 = vpop.permute.xlu1 %5047  ;;  %v3579_v43 = vmul.f32 %v13115_v44, %v459_v26  ;;  %v3589_v29 = vmul.f32 %v13122_v36, %v469_v59  ;;  %v4301_v21 = vld [vmem:[%s9502_s6 + $0x508] sm:$0xff] }
 0x5af   : > { %v6706_v54 = vadd.f32 %v5098_v48, %v3586_v61  ;;  %v6707_v49 = vadd.f32 %v5098_v48, %v3587_v4  ;;  %v6686_v52 = vadd.f32 %v5048_v33, %v3566_v12  ;;  %v5043_v62 = vpop.permute.xlu0 %5042  ;;  %v6687_v13 = vadd.f32 %v5048_v33, %v3567_v22  ;;  %v484_v48 = vld [vmem:[%s9607_s10 + $0x7a0] sm:$0xff] }
 0x5b0   : > { %v6684_v37 = vadd.f32 %v5043_v62, %v3564_v47  ;;  %v6685_v23 = vadd.f32 %v5043_v62, %v3565_v34  ;;  %v4294_v47 = vld [vmem:[%s9502_s6 + $0x4d0] sm:$0xff]  ;;  %v4293_v62 = vld [vmem:[%s9502_s6 + $0x4c8] sm:$0xff] }
 0x5b1   : > { %7486 = vst [vmem:[%s9625_s19 + $0x710] sm:$0xff] %v6706_v54  ;;  %v485_v54 = vld [vmem:[%s9607_s10 + $0x7a8] sm:$0xff] }
 0x5b2   : > { %7487 = vst [vmem:[%s9625_s19 + $0x718] sm:$0xff] %v6707_v49  ;;  %v464_v49 = vld [vmem:[%s9607_s10 + $0x700] sm:$0xff]  ;;  %v465_v34 = vld [vmem:[%s9607_s10 + $0x708] sm:$0xff] }
 0x5b3   : > { %7466 = vst [vmem:[%s9625_s19 + $0x670] sm:$0xff] %v6686_v52 }
 0x5b4   : > { %7467 = vst [vmem:[%s9625_s19 + $0x678] sm:$0xff] %v6687_v13  ;;  %5277 = vperm.xlu2 %8236, %v4289_v46   ;;  %5272 = vperm.xlu1 %8235, %v4288_v6   ;;  %v462_v13 = vld [vmem:[%s9607_s10 + $0x6f0] sm:$0xff]  ;;  %v3605_v46 = vmul.f32 %v13117_v39, %v485_v54 }
 0x5b5   : > { %7464 = vst [vmem:[%s9625_s19 + $0x660] sm:$0xff] %v6684_v37  ;;  %5267 = vperm.xlu0 %8234, %v4287_v20   ;;  %v3604_v37 = vmul.f32 %v13117_v39, %v484_v48  ;;  %v13118_v6 = vld [vmem:[#allocation71_spill] sm:$0xff]  ;;  %v3582_v58 = vmul.f32 %v13119_v53, %v462_v13  ;;  %v13123_v48 = vld [vmem:[#allocation76_spill] sm:$0xff]  ;;  %v13125_v13 = vld [vmem:[#allocation78_spill] sm:$0xff] }
 0x5b6   : > { %7465 = vst [vmem:[%s9625_s19 + $0x668] sm:$0xff] %v6685_v23  ;;  %v5113_v50 = vpop.permute.xlu2 %5112  ;;  %v5063_v60 = vpop.permute.xlu1 %5062  ;;  %v3584_v15 = vmul.f32 %v13118_v6, %v464_v49  ;;  %v3585_v23 = vmul.f32 %v13118_v6, %v465_v34  ;;  %v475_v49 = vld [vmem:[%s9607_s10 + $0x758] sm:$0xff]  ;;  %v4304_v53 = vld [vmem:[%s9502_s6 + $0x520] sm:$0xff] }
 0x5b7   : > { %v6712_v31 = vadd.f32 %v5113_v50, %v3592_v45  ;;  %v6713_v40 = vadd.f32 %v5113_v50, %v3593_v24  ;;  %v6692_v25 = vadd.f32 %v5063_v60, %v3572_v16  ;;  %v5058_v0 = vpop.permute.xlu0 %5057  ;;  %v6693_v51 = vadd.f32 %v5063_v60, %v3573_v41  ;;  %v490_v50 = vld [vmem:[%s9607_s10 + $0x7d0] sm:$0xff] }
 0x5b8   : > { %v6690_v56 = vadd.f32 %v5058_v0, %v3570_v63  ;;  %v6691_v17 = vadd.f32 %v5058_v0, %v3571_v9  ;;  %v4297_v63 = vld [vmem:[%s9502_s6 + $0x4e8] sm:$0xff]  ;;  %v4296_v0 = vld [vmem:[%s9502_s6 + $0x4e0] sm:$0xff]  ;;  %v471_v9 = vld [vmem:[%s9607_s10 + $0x738] sm:$0xff]  ;;  %v3595_v57 = vmul.f32 %v13125_v13, %v475_v49 }
 0x5b9   : > { %7492 = vst [vmem:[%s9625_s19 + $0x740] sm:$0xff] %v6712_v31  ;;  %v491_v31 = vld [vmem:[%s9607_s10 + $0x7d8] sm:$0xff] }
 0x5ba   : > { %7493 = vst [vmem:[%s9625_s19 + $0x748] sm:$0xff] %v6713_v40  ;;  %v470_v40 = vld [vmem:[%s9607_s10 + $0x730] sm:$0xff] }
 0x5bb   : > { %7472 = vst [vmem:[%s9625_s19 + $0x6a0] sm:$0xff] %v6692_v25 }
 0x5bc   : > { %7473 = vst [vmem:[%s9625_s19 + $0x6a8] sm:$0xff] %v6693_v51  ;;  %5292 = vperm.xlu2 %8236, %v4292_v42   ;;  %5287 = vperm.xlu1 %8235, %v4291_v30   ;;  %v468_v51 = vld [vmem:[%s9607_s10 + $0x720] sm:$0xff]  ;;  %v3611_v42 = vmul.f32 %v13120_v28, %v491_v31  ;;  %v13121_v30 = vld [vmem:[#allocation74_spill] sm:$0xff] }
 0x5bd   : > { %7470 = vst [vmem:[%s9625_s19 + $0x690] sm:$0xff] %v6690_v56  ;;  %5282 = vperm.xlu0 %8234, %v4290_v10   ;;  %v3610_v56 = vmul.f32 %v13120_v28, %v490_v50  ;;  %v3590_v32 = vmul.f32 %v13121_v30, %v470_v40  ;;  %v3588_v1 = vmul.f32 %v13122_v36, %v468_v51  ;;  %v13126_v50 = vld [vmem:[#allocation79_spill] sm:$0xff]  ;;  %v481_v40 = vld [vmem:[%s9607_s10 + $0x788] sm:$0xff]  ;;  %v13128_v51 = vld [vmem:[#allocation81_spill] sm:$0xff] }
 0x5be   : > { %7471 = vst [vmem:[%s9625_s19 + $0x698] sm:$0xff] %v6691_v17  ;;  %v5128_v14 = vpop.permute.xlu2 %5127  ;;  %v5078_v8 = vpop.permute.xlu1 %5077  ;;  %v3591_v17 = vmul.f32 %v13121_v30, %v471_v9  ;;  %v3601_v59 = vmul.f32 %v13128_v51, %v481_v40  ;;  %v4307_v36 = vld [vmem:[%s9502_s6 + $0x538] sm:$0xff] }
 0x5bf   : > { %v6718_v61 = vadd.f32 %v5128_v14, %v3598_v19  ;;  %v6719_v4 = vadd.f32 %v5128_v14, %v3599_v3  ;;  %v6698_v7 = vadd.f32 %v5078_v8, %v3578_v18  ;;  %v5073_v12 = vpop.permute.xlu0 %5072  ;;  %v6699_v22 = vadd.f32 %v5078_v8, %v3579_v43  ;;  %v496_v14 = vld [vmem:[%s9607_s10 + $0x800] sm:$0xff] }
 0x5c0   : > { %v6696_v33 = vadd.f32 %v5073_v12, %v3576_v38  ;;  %v6697_v52 = vadd.f32 %v5073_v12, %v3577_v55  ;;  %v4300_v38 = vld [vmem:[%s9502_s6 + $0x500] sm:$0xff]  ;;  %v4299_v12 = vld [vmem:[%s9502_s6 + $0x4f8] sm:$0xff]  ;;  %v477_v55 = vld [vmem:[%s9607_s10 + $0x768] sm:$0xff] }
 0x5c1   : > { %7498 = vst [vmem:[%s9625_s19 + $0x770] sm:$0xff] %v6718_v61  ;;  %v497_v61 = vld [vmem:[%s9607_s10 + $0x808] sm:$0xff] }
 0x5c2   : > { %7499 = vst [vmem:[%s9625_s19 + $0x778] sm:$0xff] %v6719_v4  ;;  %v476_v4 = vld [vmem:[%s9607_s10 + $0x760] sm:$0xff] }
 0x5c3   : > { %7478 = vst [vmem:[%s9625_s19 + $0x6d0] sm:$0xff] %v6698_v7 }
 0x5c4   : > { %7479 = vst [vmem:[%s9625_s19 + $0x6d8] sm:$0xff] %v6699_v22  ;;  %5307 = vperm.xlu2 %8236, %v4295_v11   ;;  %5302 = vperm.xlu1 %8235, %v4294_v47   ;;  %v474_v22 = vld [vmem:[%s9607_s10 + $0x750] sm:$0xff]  ;;  %v3617_v11 = vmul.f32 %v13123_v48, %v497_v61  ;;  %v13124_v47 = vld [vmem:[#allocation77_spill] sm:$0xff] }
 0x5c5   : > { %7476 = vst [vmem:[%s9625_s19 + $0x6c0] sm:$0xff] %v6696_v33  ;;  %5297 = vperm.xlu0 %8234, %v4293_v62   ;;  %v3616_v33 = vmul.f32 %v13123_v48, %v496_v14  ;;  %v3596_v54 = vmul.f32 %v13124_v47, %v476_v4  ;;  %v3594_v39 = vmul.f32 %v13125_v13, %v474_v22  ;;  %v13129_v14 = vld [vmem:[#allocation82_spill] sm:$0xff]  ;;  %v487_v4 = vld [vmem:[%s9607_s10 + $0x7b8] sm:$0xff]  ;;  %v4310_v13 = vld [vmem:[%s9502_s6 + $0x550] sm:$0xff] }
 0x5c6   : > { %7477 = vst [vmem:[%s9625_s19 + $0x6c8] sm:$0xff] %v6697_v52  ;;  %v5143_v20 = vpop.permute.xlu2 %5142  ;;  %v5093_v5 = vpop.permute.xlu1 %5092  ;;  %v3597_v52 = vmul.f32 %v13124_v47, %v477_v55  ;;  %v13131_v22 = vld [vmem:[#allocation84_spill] sm:$0xff] }
 0x5c7   : > { %v6724_v45 = vadd.f32 %v5143_v20, %v3604_v37  ;;  %v6725_v24 = vadd.f32 %v5143_v20, %v3605_v46  ;;  %v6704_v35 = vadd.f32 %v5093_v5, %v3584_v15  ;;  %v5088_v16 = vpop.permute.xlu0 %5087  ;;  %v6705_v41 = vadd.f32 %v5093_v5, %v3585_v23  ;;  %v502_v20 = vld [vmem:[%s9607_s10 + $0x830] sm:$0xff] }
 0x5c8   : > { %v6702_v60 = vadd.f32 %v5088_v16, %v3582_v58  ;;  %v6703_v25 = vadd.f32 %v5088_v16, %v3583_v2  ;;  %v4303_v58 = vld [vmem:[%s9502_s6 + $0x518] sm:$0xff]  ;;  %v4302_v16 = vld [vmem:[%s9502_s6 + $0x510] sm:$0xff]  ;;  %v3607_v49 = vmul.f32 %v13131_v22, %v487_v4 }
 0x5c9   : > { %7504 = vst [vmem:[%s9625_s19 + $0x7a0] sm:$0xff] %v6724_v45  ;;  %v503_v45 = vld [vmem:[%s9607_s10 + $0x838] sm:$0xff] }
 0x5ca   : > { %7505 = vst [vmem:[%s9625_s19 + $0x7a8] sm:$0xff] %v6725_v24  ;;  %v482_v24 = vld [vmem:[%s9607_s10 + $0x790] sm:$0xff]  ;;  %v483_v2 = vld [vmem:[%s9607_s10 + $0x798] sm:$0xff] }
 0x5cb   : > { %7484 = vst [vmem:[%s9625_s19 + $0x700] sm:$0xff] %v6704_v35 }
 0x5cc   : > { %7485 = vst [vmem:[%s9625_s19 + $0x708] sm:$0xff] %v6705_v41  ;;  %5322 = vperm.xlu2 %8236, %v4298_v27   ;;  %5317 = vperm.xlu1 %8235, %v4297_v63   ;;  %v480_v41 = vld [vmem:[%s9607_s10 + $0x780] sm:$0xff]  ;;  %v3623_v27 = vmul.f32 %v13126_v50, %v503_v45  ;;  %v13127_v63 = vld [vmem:[#allocation80_spill] sm:$0xff] }
 0x5cd   : > { %7482 = vst [vmem:[%s9625_s19 + $0x6f0] sm:$0xff] %v6702_v60  ;;  %5312 = vperm.xlu0 %8234, %v4296_v0   ;;  %v3622_v60 = vmul.f32 %v13126_v50, %v502_v20  ;;  %v3602_v31 = vmul.f32 %v13127_v63, %v482_v24  ;;  %v3600_v28 = vmul.f32 %v13128_v51, %v480_v41  ;;  %v13132_v20 = vld [vmem:[#allocation85_spill] sm:$0xff]  ;;  %v493_v24 = vld [vmem:[%s9607_s10 + $0x7e8] sm:$0xff]  ;;  %v13134_v41 = vld [vmem:[#allocation87_spill] sm:$0xff] }
 0x5ce   : > { %7483 = vst [vmem:[%s9625_s19 + $0x6f8] sm:$0xff] %v6703_v25  ;;  %v5158_v10 = vpop.permute.xlu2 %5157  ;;  %v5108_v26 = vpop.permute.xlu1 %5107  ;;  %v3603_v25 = vmul.f32 %v13127_v63, %v483_v2  ;;  %v3613_v40 = vmul.f32 %v13134_v41, %v493_v24  ;;  %v4313_v51 = vld [vmem:[%s9502_s6 + $0x568] sm:$0xff] }
 0x5cf   : > { %v6730_v19 = vadd.f32 %v5158_v10, %v3610_v56  ;;  %v6731_v3 = vadd.f32 %v5158_v10, %v3611_v42  ;;  %v6710_v44 = vadd.f32 %v5108_v26, %v3590_v32  ;;  %v5103_v18 = vpop.permute.xlu0 %5102  ;;  %v6711_v43 = vadd.f32 %v5108_v26, %v3591_v17  ;;  %v508_v10 = vld [vmem:[%s9607_s10 + $0x860] sm:$0xff] }
 0x5d0   : > { %v6708_v8 = vadd.f32 %v5103_v18, %v3588_v1  ;;  %v6709_v7 = vadd.f32 %v5103_v18, %v3589_v29  ;;  %v4306_v1 = vld [vmem:[%s9502_s6 + $0x530] sm:$0xff]  ;;  %v4305_v18 = vld [vmem:[%s9502_s6 + $0x528] sm:$0xff] }
 0x5d1   : > { %7510 = vst [vmem:[%s9625_s19 + $0x7d0] sm:$0xff] %v6730_v19  ;;  %v509_v19 = vld [vmem:[%s9607_s10 + $0x868] sm:$0xff] }
 0x5d2   : > { %7511 = vst [vmem:[%s9625_s19 + $0x7d8] sm:$0xff] %v6731_v3  ;;  %v488_v3 = vld [vmem:[%s9607_s10 + $0x7c0] sm:$0xff]  ;;  %v489_v29 = vld [vmem:[%s9607_s10 + $0x7c8] sm:$0xff] }
 0x5d3   : > { %7490 = vst [vmem:[%s9625_s19 + $0x730] sm:$0xff] %v6710_v44 }
 0x5d4   : > { %7491 = vst [vmem:[%s9625_s19 + $0x738] sm:$0xff] %v6711_v43  ;;  %5337 = vperm.xlu2 %8236, %v4301_v21   ;;  %5332 = vperm.xlu1 %8235, %v4300_v38   ;;  %v486_v43 = vld [vmem:[%s9607_s10 + $0x7b0] sm:$0xff]  ;;  %v3629_v21 = vmul.f32 %v13129_v14, %v509_v19 }
 0x5d5   : > { %7488 = vst [vmem:[%s9625_s19 + $0x720] sm:$0xff] %v6708_v8  ;;  %5327 = vperm.xlu0 %8234, %v4299_v12   ;;  %v3628_v8 = vmul.f32 %v13129_v14, %v508_v10  ;;  %v13130_v38 = vld [vmem:[#allocation83_spill] sm:$0xff]  ;;  %v3606_v48 = vmul.f32 %v13131_v22, %v486_v43  ;;  %v13135_v10 = vld [vmem:[#allocation88_spill] sm:$0xff]  ;;  %v13137_v43 = vld [vmem:[#allocation90_spill] sm:$0xff] }
 0x5d6   : > { %7489 = vst [vmem:[%s9625_s19 + $0x728] sm:$0xff] %v6709_v7  ;;  %v5173_v62 = vpop.permute.xlu2 %5172  ;;  %v5123_v34 = vpop.permute.xlu1 %5122  ;;  %v3608_v61 = vmul.f32 %v13130_v38, %v488_v3  ;;  %v3609_v7 = vmul.f32 %v13130_v38, %v489_v29  ;;  %v499_v3 = vld [vmem:[%s9607_s10 + $0x818] sm:$0xff]  ;;  %v4316_v22 = vld [vmem:[%s9502_s6 + $0x580] sm:$0xff] }
 0x5d7   : > { %v6736_v37 = vadd.f32 %v5173_v62, %v3616_v33  ;;  %v6737_v46 = vadd.f32 %v5173_v62, %v3617_v11  ;;  %v6716_v6 = vadd.f32 %v5123_v34, %v3596_v54  ;;  %v5118_v15 = vpop.permute.xlu0 %5117  ;;  %v6717_v23 = vadd.f32 %v5123_v34, %v3597_v52  ;;  %v514_v62 = vld [vmem:[%s9607_s10 + $0x890] sm:$0xff] }
 0x5d8   : > { %v6714_v5 = vadd.f32 %v5118_v15, %v3594_v39  ;;  %v6715_v35 = vadd.f32 %v5118_v15, %v3595_v57  ;;  %v4309_v39 = vld [vmem:[%s9502_s6 + $0x548] sm:$0xff]  ;;  %v4308_v15 = vld [vmem:[%s9502_s6 + $0x540] sm:$0xff]  ;;  %v495_v57 = vld [vmem:[%s9607_s10 + $0x7f8] sm:$0xff]  ;;  %v3619_v4 = vmul.f32 %v13137_v43, %v499_v3 }
 0x5d9   : > { %7516 = vst [vmem:[%s9625_s19 + $0x800] sm:$0xff] %v6736_v37  ;;  %v515_v37 = vld [vmem:[%s9607_s10 + $0x898] sm:$0xff] }
 0x5da   : > { %7517 = vst [vmem:[%s9625_s19 + $0x808] sm:$0xff] %v6737_v46  ;;  %v494_v46 = vld [vmem:[%s9607_s10 + $0x7f0] sm:$0xff] }
 0x5db   : > { %7496 = vst [vmem:[%s9625_s19 + $0x760] sm:$0xff] %v6716_v6 }
 0x5dc   : > { %7497 = vst [vmem:[%s9625_s19 + $0x768] sm:$0xff] %v6717_v23  ;;  %5352 = vperm.xlu2 %8236, %v4304_v53   ;;  %5347 = vperm.xlu1 %8235, %v4303_v58   ;;  %v492_v23 = vld [vmem:[%s9607_s10 + $0x7e0] sm:$0xff]  ;;  %v3635_v53 = vmul.f32 %v13132_v20, %v515_v37  ;;  %v13133_v58 = vld [vmem:[#allocation86_spill] sm:$0xff] }
 0x5dd   : > { %7494 = vst [vmem:[%s9625_s19 + $0x750] sm:$0xff] %v6714_v5  ;;  %5342 = vperm.xlu0 %8234, %v4302_v16   ;;  %v3634_v5 = vmul.f32 %v13132_v20, %v514_v62  ;;  %v3614_v45 = vmul.f32 %v13133_v58, %v494_v46  ;;  %v3612_v50 = vmul.f32 %v13134_v41, %v492_v23  ;;  %v13138_v62 = vld [vmem:[#allocation91_spill] sm:$0xff]  ;;  %v505_v46 = vld [vmem:[%s9607_s10 + $0x848] sm:$0xff]  ;;  %v13140_v23 = vld [vmem:[#allocation93_spill] sm:$0xff] }
 0x5de   : > { %7495 = vst [vmem:[%s9625_s19 + $0x758] sm:$0xff] %v6715_v35  ;;  %v5188_v0 = vpop.permute.xlu2 %5187  ;;  %v5138_v9 = vpop.permute.xlu1 %5137  ;;  %v3615_v35 = vmul.f32 %v13133_v58, %v495_v57  ;;  %v3625_v24 = vmul.f32 %v13140_v23, %v505_v46  ;;  %v4319_v41 = vld [vmem:[%s9502_s6 + $0x598] sm:$0xff] }
 0x5df   : > { %v6742_v56 = vadd.f32 %v5188_v0, %v3622_v60  ;;  %v6743_v42 = vadd.f32 %v5188_v0, %v3623_v27  ;;  %v6722_v30 = vadd.f32 %v5138_v9, %v3602_v31  ;;  %v5133_v32 = vpop.permute.xlu0 %5132  ;;  %v6723_v17 = vadd.f32 %v5138_v9, %v3603_v25  ;;  %v520_v0 = vld [vmem:[%s9607_s10 + $0x8c0] sm:$0xff] }
 0x5e0   : > { %v6720_v26 = vadd.f32 %v5133_v32, %v3600_v28  ;;  %v6721_v44 = vadd.f32 %v5133_v32, %v3601_v59  ;;  %v4312_v28 = vld [vmem:[%s9502_s6 + $0x560] sm:$0xff]  ;;  %v4311_v32 = vld [vmem:[%s9502_s6 + $0x558] sm:$0xff]  ;;  %v501_v59 = vld [vmem:[%s9607_s10 + $0x828] sm:$0xff] }
 0x5e1   : > { %7522 = vst [vmem:[%s9625_s19 + $0x830] sm:$0xff] %v6742_v56  ;;  %v521_v56 = vld [vmem:[%s9607_s10 + $0x8c8] sm:$0xff] }
 0x5e2   : > { %7523 = vst [vmem:[%s9625_s19 + $0x838] sm:$0xff] %v6743_v42  ;;  %v500_v42 = vld [vmem:[%s9607_s10 + $0x820] sm:$0xff] }
 0x5e3   : > { %7502 = vst [vmem:[%s9625_s19 + $0x790] sm:$0xff] %v6722_v30 }
 0x5e4   : > { %7503 = vst [vmem:[%s9625_s19 + $0x798] sm:$0xff] %v6723_v17  ;;  %5367 = vperm.xlu2 %8236, %v4307_v36   ;;  %5362 = vperm.xlu1 %8235, %v4306_v1   ;;  %v498_v17 = vld [vmem:[%s9607_s10 + $0x810] sm:$0xff]  ;;  %v3641_v36 = vmul.f32 %v13135_v10, %v521_v56  ;;  %v13136_v1 = vld [vmem:[#allocation89_spill] sm:$0xff] }
 0x5e5   : > { %7500 = vst [vmem:[%s9625_s19 + $0x780] sm:$0xff] %v6720_v26  ;;  %5357 = vperm.xlu0 %8234, %v4305_v18   ;;  %v3640_v26 = vmul.f32 %v13135_v10, %v520_v0  ;;  %v3620_v19 = vmul.f32 %v13136_v1, %v500_v42  ;;  %v3618_v14 = vmul.f32 %v13137_v43, %v498_v17  ;;  %v13141_v0 = vld [vmem:[#allocation94_spill] sm:$0xff]  ;;  %v511_v42 = vld [vmem:[%s9607_s10 + $0x878] sm:$0xff]  ;;  %v4322_v43 = vld [vmem:[%s9502_s6 + $0x5b0] sm:$0xff] }
 0x5e6   : > { %7501 = vst [vmem:[%s9625_s19 + $0x788] sm:$0xff] %v6721_v44  ;;  %v5203_v12 = vpop.permute.xlu2 %5202  ;;  %v5153_v55 = vpop.permute.xlu1 %5152  ;;  %v3621_v44 = vmul.f32 %v13136_v1, %v501_v59  ;;  %v13143_v17 = vld [vmem:[#allocation96_spill] sm:$0xff] }
 0x5e7   : > { %v6748_v33 = vadd.f32 %v5203_v12, %v3628_v8  ;;  %v6749_v11 = vadd.f32 %v5203_v12, %v3629_v21  ;;  %v6728_v47 = vadd.f32 %v5153_v55, %v3608_v61  ;;  %v5148_v54 = vpop.permute.xlu0 %5147  ;;  %v6729_v52 = vadd.f32 %v5153_v55, %v3609_v7  ;;  %v526_v12 = vld [vmem:[%s9607_s10 + $0x8f0] sm:$0xff] }
 0x5e8   : > { %v6726_v34 = vadd.f32 %v5148_v54, %v3606_v48  ;;  %v6727_v6 = vadd.f32 %v5148_v54, %v3607_v49  ;;  %v4315_v48 = vld [vmem:[%s9502_s6 + $0x578] sm:$0xff]  ;;  %v4314_v54 = vld [vmem:[%s9502_s6 + $0x570] sm:$0xff]  ;;  %v3631_v3 = vmul.f32 %v13143_v17, %v511_v42 }
 0x5e9   : > { %7528 = vst [vmem:[%s9625_s19 + $0x860] sm:$0xff] %v6748_v33  ;;  %v527_v33 = vld [vmem:[%s9607_s10 + $0x8f8] sm:$0xff] }
 0x5ea   : > { %7529 = vst [vmem:[%s9625_s19 + $0x868] sm:$0xff] %v6749_v11  ;;  %v506_v11 = vld [vmem:[%s9607_s10 + $0x850] sm:$0xff]  ;;  %v507_v49 = vld [vmem:[%s9607_s10 + $0x858] sm:$0xff] }
 0x5eb   : > { %7508 = vst [vmem:[%s9625_s19 + $0x7c0] sm:$0xff] %v6728_v47 }
 0x5ec   : > { %7509 = vst [vmem:[%s9625_s19 + $0x7c8] sm:$0xff] %v6729_v52  ;;  %5382 = vperm.xlu2 %8236, %v4310_v13   ;;  %5377 = vperm.xlu1 %8235, %v4309_v39   ;;  %v504_v52 = vld [vmem:[%s9607_s10 + $0x840] sm:$0xff]  ;;  %v3647_v13 = vmul.f32 %v13138_v62, %v527_v33  ;;  %v13139_v39 = vld [vmem:[#allocation92_spill] sm:$0xff] }
 0x5ed   : > { %7506 = vst [vmem:[%s9625_s19 + $0x7b0] sm:$0xff] %v6726_v34  ;;  %5372 = vperm.xlu0 %8234, %v4308_v15   ;;  %v3646_v34 = vmul.f32 %v13138_v62, %v526_v12  ;;  %v3626_v37 = vmul.f32 %v13139_v39, %v506_v11  ;;  %v3624_v20 = vmul.f32 %v13140_v23, %v504_v52  ;;  %v13144_v12 = vld [vmem:[#allocation97_spill] sm:$0xff]  ;;  %v517_v11 = vld [vmem:[%s9607_s10 + $0x8a8] sm:$0xff]  ;;  %v13146_v52 = vld [vmem:[#allocation99_spill] sm:$0xff] }
 0x5ee   : > { %7507 = vst [vmem:[%s9625_s19 + $0x7b8] sm:$0xff] %v6727_v6  ;;  %v5218_v16 = vpop.permute.xlu2 %5217  ;;  %v5168_v2 = vpop.permute.xlu1 %5167  ;;  %v3627_v6 = vmul.f32 %v13139_v39, %v507_v49  ;;  %v3637_v46 = vmul.f32 %v13146_v52, %v517_v11  ;;  %v4325_v23 = vld [vmem:[%s9502_s6 + $0x5c8] sm:$0xff] }
 0x5ef   : > { %v6754_v60 = vadd.f32 %v5218_v16, %v3634_v5  ;;  %v6755_v27 = vadd.f32 %v5218_v16, %v3635_v53  ;;  %v6734_v63 = vadd.f32 %v5168_v2, %v3614_v45  ;;  %v5163_v31 = vpop.permute.xlu0 %5162  ;;  %v6735_v25 = vadd.f32 %v5168_v2, %v3615_v35  ;;  %v532_v16 = vld [vmem:[%s9607_s10 + $0x920] sm:$0xff] }
 0x5f0   : > { %v6732_v9 = vadd.f32 %v5163_v31, %v3612_v50  ;;  %v6733_v30 = vadd.f32 %v5163_v31, %v3613_v40  ;;  %v4318_v50 = vld [vmem:[%s9502_s6 + $0x590] sm:$0xff]  ;;  %v4317_v31 = vld [vmem:[%s9502_s6 + $0x588] sm:$0xff] }
 0x5f1   : > { %7534 = vst [vmem:[%s9625_s19 + $0x890] sm:$0xff] %v6754_v60  ;;  %v533_v60 = vld [vmem:[%s9607_s10 + $0x928] sm:$0xff] }
 0x5f2   : > { %7535 = vst [vmem:[%s9625_s19 + $0x898] sm:$0xff] %v6755_v27  ;;  %v512_v27 = vld [vmem:[%s9607_s10 + $0x880] sm:$0xff]  ;;  %v513_v40 = vld [vmem:[%s9607_s10 + $0x888] sm:$0xff] }
 0x5f3   : > { %7514 = vst [vmem:[%s9625_s19 + $0x7f0] sm:$0xff] %v6734_v63 }
 0x5f4   : > { %7515 = vst [vmem:[%s9625_s19 + $0x7f8] sm:$0xff] %v6735_v25  ;;  %5397 = vperm.xlu2 %8236, %v4313_v51   ;;  %5392 = vperm.xlu1 %8235, %v4312_v28   ;;  %v510_v25 = vld [vmem:[%s9607_s10 + $0x870] sm:$0xff]  ;;  %v3653_v51 = vmul.f32 %v13141_v0, %v533_v60 }
 0x5f5   : > { %7512 = vst [vmem:[%s9625_s19 + $0x7e0] sm:$0xff] %v6732_v9  ;;  %5387 = vperm.xlu0 %8234, %v4311_v32   ;;  %v3652_v9 = vmul.f32 %v13141_v0, %v532_v16  ;;  %v13142_v28 = vld [vmem:[#allocation95_spill] sm:$0xff]  ;;  %v3630_v10 = vmul.f32 %v13143_v17, %v510_v25  ;;  %v13147_v16 = vld [vmem:[#allocation100_spill] sm:$0xff]  ;;  %v13149_v25 = vld [vmem:[#allocation102_spill] sm:$0xff] }
 0x5f6   : > { %7513 = vst [vmem:[%s9625_s19 + $0x7e8] sm:$0xff] %v6733_v30  ;;  %v5233_v18 = vpop.permute.xlu2 %5232  ;;  %v5183_v29 = vpop.permute.xlu1 %5182  ;;  %v3632_v56 = vmul.f32 %v13142_v28, %v512_v27  ;;  %v3633_v30 = vmul.f32 %v13142_v28, %v513_v40  ;;  %v523_v27 = vld [vmem:[%s9607_s10 + $0x8d8] sm:$0xff]  ;;  %v4328_v17 = vld [vmem:[%s9502_s6 + $0x5e0] sm:$0xff] }
 0x5f7   : > { %v6760_v8 = vadd.f32 %v5233_v18, %v3640_v26  ;;  %v6761_v21 = vadd.f32 %v5233_v18, %v3641_v36  ;;  %v6740_v38 = vadd.f32 %v5183_v29, %v3620_v19  ;;  %v5178_v61 = vpop.permute.xlu0 %5177  ;;  %v6741_v7 = vadd.f32 %v5183_v29, %v3621_v44  ;;  %v538_v18 = vld [vmem:[%s9607_s10 + $0x950] sm:$0xff] }
 0x5f8   : > { %v6738_v55 = vadd.f32 %v5178_v61, %v3618_v14  ;;  %v6739_v47 = vadd.f32 %v5178_v61, %v3619_v4  ;;  %v4321_v14 = vld [vmem:[%s9502_s6 + $0x5a8] sm:$0xff]  ;;  %v4320_v61 = vld [vmem:[%s9502_s6 + $0x5a0] sm:$0xff]  ;;  %v519_v4 = vld [vmem:[%s9607_s10 + $0x8b8] sm:$0xff]  ;;  %v3643_v42 = vmul.f32 %v13149_v25, %v523_v27 }
 0x5f9   : > { %7540 = vst [vmem:[%s9625_s19 + $0x8c0] sm:$0xff] %v6760_v8  ;;  %v539_v8 = vld [vmem:[%s9607_s10 + $0x958] sm:$0xff] }
 0x5fa   : > { %7541 = vst [vmem:[%s9625_s19 + $0x8c8] sm:$0xff] %v6761_v21  ;;  %v518_v21 = vld [vmem:[%s9607_s10 + $0x8b0] sm:$0xff] }
 0x5fb   : > { %7520 = vst [vmem:[%s9625_s19 + $0x820] sm:$0xff] %v6740_v38 }
 0x5fc   : > { %7521 = vst [vmem:[%s9625_s19 + $0x828] sm:$0xff] %v6741_v7  ;;  %5412 = vperm.xlu2 %8236, %v4316_v22   ;;  %5407 = vperm.xlu1 %8235, %v4315_v48   ;;  %v516_v7 = vld [vmem:[%s9607_s10 + $0x8a0] sm:$0xff]  ;;  %v3659_v22 = vmul.f32 %v13144_v12, %v539_v8  ;;  %v13145_v48 = vld [vmem:[#allocation98_spill] sm:$0xff] }
 0x5fd   : > { %7518 = vst [vmem:[%s9625_s19 + $0x810] sm:$0xff] %v6738_v55  ;;  %5402 = vperm.xlu0 %8234, %v4314_v54   ;;  %v3658_v55 = vmul.f32 %v13144_v12, %v538_v18  ;;  %v3638_v33 = vmul.f32 %v13145_v48, %v518_v21  ;;  %v3636_v62 = vmul.f32 %v13146_v52, %v516_v7  ;;  %v13150_v18 = vld [vmem:[#allocation103_spill] sm:$0xff]  ;;  %v529_v21 = vld [vmem:[%s9607_s10 + $0x908] sm:$0xff]  ;;  %v13152_v7 = vld [vmem:[#allocation105_spill] sm:$0xff] }
 0x5fe   : > { %7519 = vst [vmem:[%s9625_s19 + $0x818] sm:$0xff] %v6739_v47  ;;  %v5248_v15 = vpop.permute.xlu2 %5247  ;;  %v5198_v57 = vpop.permute.xlu1 %5197  ;;  %v3639_v47 = vmul.f32 %v13145_v48, %v519_v4  ;;  %v3649_v11 = vmul.f32 %v13152_v7, %v529_v21  ;;  %v4331_v52 = vld [vmem:[%s9502_s6 + $0x5f8] sm:$0xff] }
 0x5ff   : > { %v6766_v5 = vadd.f32 %v5248_v15, %v3646_v34  ;;  %v6767_v53 = vadd.f32 %v5248_v15, %v3647_v13  ;;  %v6746_v58 = vadd.f32 %v5198_v57, %v3626_v37  ;;  %v5193_v45 = vpop.permute.xlu0 %5192  ;;  %v6747_v35 = vadd.f32 %v5198_v57, %v3627_v6  ;;  %v544_v15 = vld [vmem:[%s9607_s10 + $0x980] sm:$0xff] }
 0x600   : > { %v6744_v2 = vadd.f32 %v5193_v45, %v3624_v20  ;;  %v6745_v63 = vadd.f32 %v5193_v45, %v3625_v24  ;;  %v4324_v20 = vld [vmem:[%s9502_s6 + $0x5c0] sm:$0xff]  ;;  %v4323_v45 = vld [vmem:[%s9502_s6 + $0x5b8] sm:$0xff]  ;;  %v525_v24 = vld [vmem:[%s9607_s10 + $0x8e8] sm:$0xff] }
 0x601   : > { %7546 = vst [vmem:[%s9625_s19 + $0x8f0] sm:$0xff] %v6766_v5  ;;  %v545_v5 = vld [vmem:[%s9607_s10 + $0x988] sm:$0xff] }
 0x602   : > { %7547 = vst [vmem:[%s9625_s19 + $0x8f8] sm:$0xff] %v6767_v53  ;;  %v524_v53 = vld [vmem:[%s9607_s10 + $0x8e0] sm:$0xff] }
 0x603   : > { %7526 = vst [vmem:[%s9625_s19 + $0x850] sm:$0xff] %v6746_v58 }
 0x604   : > { %7527 = vst [vmem:[%s9625_s19 + $0x858] sm:$0xff] %v6747_v35  ;;  %5427 = vperm.xlu2 %8236, %v4319_v41   ;;  %5422 = vperm.xlu1 %8235, %v4318_v50   ;;  %v522_v35 = vld [vmem:[%s9607_s10 + $0x8d0] sm:$0xff]  ;;  %v3665_v41 = vmul.f32 %v13147_v16, %v545_v5  ;;  %v13148_v50 = vld [vmem:[#allocation101_spill] sm:$0xff] }
 0x605   : > { %7524 = vst [vmem:[%s9625_s19 + $0x840] sm:$0xff] %v6744_v2  ;;  %5417 = vperm.xlu0 %8234, %v4317_v31   ;;  %v3664_v2 = vmul.f32 %v13147_v16, %v544_v15  ;;  %v3644_v60 = vmul.f32 %v13148_v50, %v524_v53  ;;  %v3642_v0 = vmul.f32 %v13149_v25, %v522_v35  ;;  %v13153_v15 = vld [vmem:[#allocation106_spill] sm:$0xff]  ;;  %v535_v53 = vld [vmem:[%s9607_s10 + $0x938] sm:$0xff]  ;;  %v4334_v25 = vld [vmem:[%s9502_s6 + $0x610] sm:$0xff] }
 0x606   : > { %7525 = vst [vmem:[%s9625_s19 + $0x848] sm:$0xff] %v6745_v63  ;;  %v5263_v32 = vpop.permute.xlu2 %5262  ;;  %v5213_v59 = vpop.permute.xlu1 %5212  ;;  %v3645_v63 = vmul.f32 %v13148_v50, %v525_v24  ;;  %v13155_v35 = vld [vmem:[#allocation108_spill] sm:$0xff] }
 0x607   : > { %v6772_v26 = vadd.f32 %v5263_v32, %v3652_v9  ;;  %v6773_v36 = vadd.f32 %v5263_v32, %v3653_v51  ;;  %v6752_v1 = vadd.f32 %v5213_v59, %v3632_v56  ;;  %v5208_v19 = vpop.permute.xlu0 %5207  ;;  %v6753_v44 = vadd.f32 %v5213_v59, %v3633_v30  ;;  %v550_v32 = vld [vmem:[%s9607_s10 + $0x9b0] sm:$0xff] }
 0x608   : > { %v6750_v29 = vadd.f32 %v5208_v19, %v3630_v10  ;;  %v6751_v38 = vadd.f32 %v5208_v19, %v3631_v3  ;;  %v4327_v10 = vld [vmem:[%s9502_s6 + $0x5d8] sm:$0xff]  ;;  %v4326_v19 = vld [vmem:[%s9502_s6 + $0x5d0] sm:$0xff]  ;;  %v3655_v27 = vmul.f32 %v13155_v35, %v535_v53 }
 0x609   : > { %7552 = vst [vmem:[%s9625_s19 + $0x920] sm:$0xff] %v6772_v26  ;;  %v551_v26 = vld [vmem:[%s9607_s10 + $0x9b8] sm:$0xff] }
 0x60a   : > { %7553 = vst [vmem:[%s9625_s19 + $0x928] sm:$0xff] %v6773_v36  ;;  %v530_v36 = vld [vmem:[%s9607_s10 + $0x910] sm:$0xff]  ;;  %v531_v3 = vld [vmem:[%s9607_s10 + $0x918] sm:$0xff] }
 0x60b   : > { %7532 = vst [vmem:[%s9625_s19 + $0x880] sm:$0xff] %v6752_v1 }
 0x60c   : > { %7533 = vst [vmem:[%s9625_s19 + $0x888] sm:$0xff] %v6753_v44  ;;  %5442 = vperm.xlu2 %8236, %v4322_v43   ;;  %5437 = vperm.xlu1 %8235, %v4321_v14   ;;  %v528_v44 = vld [vmem:[%s9607_s10 + $0x900] sm:$0xff]  ;;  %v3671_v43 = vmul.f32 %v13150_v18, %v551_v26  ;;  %v13151_v14 = vld [vmem:[#allocation104_spill] sm:$0xff] }
 0x60d   : > { %7530 = vst [vmem:[%s9625_s19 + $0x870] sm:$0xff] %v6750_v29  ;;  %5432 = vperm.xlu0 %8234, %v4320_v61   ;;  %v3670_v29 = vmul.f32 %v13150_v18, %v550_v32  ;;  %v3650_v8 = vmul.f32 %v13151_v14, %v530_v36  ;;  %v3648_v12 = vmul.f32 %v13152_v7, %v528_v44  ;;  %v13156_v32 = vld [vmem:[#allocation109_spill] sm:$0xff]  ;;  %v541_v36 = vld [vmem:[%s9607_s10 + $0x968] sm:$0xff]  ;;  %v13158_v44 = vld [vmem:[#allocation111_spill] sm:$0xff] }
 0x60e   : > { %7531 = vst [vmem:[%s9625_s19 + $0x878] sm:$0xff] %v6751_v38  ;;  %v5278_v54 = vpop.permute.xlu2 %5277  ;;  %v5228_v49 = vpop.permute.xlu1 %5227  ;;  %v3651_v38 = vmul.f32 %v13151_v14, %v531_v3  ;;  %v3661_v21 = vmul.f32 %v13158_v44, %v541_v36  ;;  %v4337_v7 = vld [vmem:[%s9502_s6 + $0x628] sm:$0xff] }
 0x60f   : > { %v6778_v34 = vadd.f32 %v5278_v54, %v3658_v55  ;;  %v6779_v13 = vadd.f32 %v5278_v54, %v3659_v22  ;;  %v6758_v39 = vadd.f32 %v5228_v49, %v3638_v33  ;;  %v5223_v37 = vpop.permute.xlu0 %5222  ;;  %v6759_v6 = vadd.f32 %v5228_v49, %v3639_v47  ;;  %v556_v54 = vld [vmem:[%s9607_s10 + $0x9e0] sm:$0xff] }
 0x610   : > { %v6756_v57 = vadd.f32 %v5223_v37, %v3636_v62  ;;  %v6757_v58 = vadd.f32 %v5223_v37, %v3637_v46  ;;  %v4330_v62 = vld [vmem:[%s9502_s6 + $0x5f0] sm:$0xff]  ;;  %v4329_v37 = vld [vmem:[%s9502_s6 + $0x5e8] sm:$0xff] }
 0x611   : > { %7558 = vst [vmem:[%s9625_s19 + $0x950] sm:$0xff] %v6778_v34  ;;  %v557_v34 = vld [vmem:[%s9607_s10 + $0x9e8] sm:$0xff] }
 0x612   : > { %7559 = vst [vmem:[%s9625_s19 + $0x958] sm:$0xff] %v6779_v13  ;;  %v536_v13 = vld [vmem:[%s9607_s10 + $0x940] sm:$0xff]  ;;  %v537_v46 = vld [vmem:[%s9607_s10 + $0x948] sm:$0xff] }
 0x613   : > { %7538 = vst [vmem:[%s9625_s19 + $0x8b0] sm:$0xff] %v6758_v39 }
 0x614   : > { %7539 = vst [vmem:[%s9625_s19 + $0x8b8] sm:$0xff] %v6759_v6  ;;  %5457 = vperm.xlu2 %8236, %v4325_v23   ;;  %5452 = vperm.xlu1 %8235, %v4324_v20   ;;  %v534_v6 = vld [vmem:[%s9607_s10 + $0x930] sm:$0xff]  ;;  %v3677_v23 = vmul.f32 %v13153_v15, %v557_v34 }
 0x615   : > { %7536 = vst [vmem:[%s9625_s19 + $0x8a0] sm:$0xff] %v6756_v57  ;;  %5447 = vperm.xlu0 %8234, %v4323_v45   ;;  %v3676_v57 = vmul.f32 %v13153_v15, %v556_v54  ;;  %v13154_v20 = vld [vmem:[#allocation107_spill] sm:$0xff]  ;;  %v3654_v16 = vmul.f32 %v13155_v35, %v534_v6  ;;  %v13159_v54 = vld [vmem:[#allocation112_spill] sm:$0xff]  ;;  %v13161_v6 = vld [vmem:[#allocation114_spill] sm:$0xff] }
 0x616   : > { %7537 = vst [vmem:[%s9625_s19 + $0x8a8] sm:$0xff] %v6757_v58  ;;  %v5293_v31 = vpop.permute.xlu2 %5292  ;;  %v5243_v40 = vpop.permute.xlu1 %5242  ;;  %v3656_v5 = vmul.f32 %v13154_v20, %v536_v13  ;;  %v3657_v58 = vmul.f32 %v13154_v20, %v537_v46  ;;  %v547_v13 = vld [vmem:[%s9607_s10 + $0x998] sm:$0xff]  ;;  %v4340_v35 = vld [vmem:[%s9502_s6 + $0x640] sm:$0xff] }
 0x617   : > { %v6784_v9 = vadd.f32 %v5293_v31, %v3664_v2  ;;  %v6785_v51 = vadd.f32 %v5293_v31, %v3665_v41  ;;  %v6764_v28 = vadd.f32 %v5243_v40, %v3644_v60  ;;  %v5238_v56 = vpop.permute.xlu0 %5237  ;;  %v6765_v30 = vadd.f32 %v5243_v40, %v3645_v63  ;;  %v562_v31 = vld [vmem:[%s9607_s10 + $0xa10] sm:$0xff] }
 0x618   : > { %v6762_v59 = vadd.f32 %v5238_v56, %v3642_v0  ;;  %v6763_v1 = vadd.f32 %v5238_v56, %v3643_v42  ;;  %v4333_v0 = vld [vmem:[%s9502_s6 + $0x608] sm:$0xff]  ;;  %v4332_v56 = vld [vmem:[%s9502_s6 + $0x600] sm:$0xff]  ;;  %v543_v42 = vld [vmem:[%s9607_s10 + $0x978] sm:$0xff]  ;;  %v3667_v53 = vmul.f32 %v13161_v6, %v547_v13 }
 0x619   : > { %7564 = vst [vmem:[%s9625_s19 + $0x980] sm:$0xff] %v6784_v9  ;;  %v563_v9 = vld [vmem:[%s9607_s10 + $0xa18] sm:$0xff] }
 0x61a   : > { %7565 = vst [vmem:[%s9625_s19 + $0x988] sm:$0xff] %v6785_v51  ;;  %v542_v51 = vld [vmem:[%s9607_s10 + $0x970] sm:$0xff] }
 0x61b   : > { %7544 = vst [vmem:[%s9625_s19 + $0x8e0] sm:$0xff] %v6764_v28 }
 0x61c   : > { %7545 = vst [vmem:[%s9625_s19 + $0x8e8] sm:$0xff] %v6765_v30  ;;  %5472 = vperm.xlu2 %8236, %v4328_v17   ;;  %5467 = vperm.xlu1 %8235, %v4327_v10   ;;  %v540_v30 = vld [vmem:[%s9607_s10 + $0x960] sm:$0xff]  ;;  %v3683_v17 = vmul.f32 %v13156_v32, %v563_v9  ;;  %v13157_v10 = vld [vmem:[#allocation110_spill] sm:$0xff] }
 0x61d   : > { %7542 = vst [vmem:[%s9625_s19 + $0x8d0] sm:$0xff] %v6762_v59  ;;  %5462 = vperm.xlu0 %8234, %v4326_v19   ;;  %v3682_v59 = vmul.f32 %v13156_v32, %v562_v31  ;;  %v3662_v26 = vmul.f32 %v13157_v10, %v542_v51  ;;  %v3660_v18 = vmul.f32 %v13158_v44, %v540_v30  ;;  %v13162_v31 = vld [vmem:[#allocation115_spill] sm:$0xff]  ;;  %v553_v51 = vld [vmem:[%s9607_s10 + $0x9c8] sm:$0xff]  ;;  %v13164_v30 = vld [vmem:[#allocation117_spill] sm:$0xff] }
 0x61e   : > { %7543 = vst [vmem:[%s9625_s19 + $0x8d8] sm:$0xff] %v6763_v1  ;;  %v5308_v61 = vpop.permute.xlu2 %5307  ;;  %v5258_v4 = vpop.permute.xlu1 %5257  ;;  %v3663_v1 = vmul.f32 %v13157_v10, %v543_v42  ;;  %v3673_v36 = vmul.f32 %v13164_v30, %v553_v51  ;;  %v4343_v44 = vld [vmem:[%s9502_s6 + $0x658] sm:$0xff] }
 0x61f   : > { %v6790_v55 = vadd.f32 %v5308_v61, %v3670_v29  ;;  %v6791_v22 = vadd.f32 %v5308_v61, %v3671_v43  ;;  %v6770_v48 = vadd.f32 %v5258_v4, %v3650_v8  ;;  %v5253_v33 = vpop.permute.xlu0 %5252  ;;  %v6771_v47 = vadd.f32 %v5258_v4, %v3651_v38  ;;  %v568_v61 = vld [vmem:[%s9607_s10 + $0xa40] sm:$0xff] }
 0x620   : > { %v6768_v49 = vadd.f32 %v5253_v33, %v3648_v12  ;;  %v6769_v39 = vadd.f32 %v5253_v33, %v3649_v11  ;;  %v4336_v12 = vld [vmem:[%s9502_s6 + $0x620] sm:$0xff]  ;;  %v4335_v33 = vld [vmem:[%s9502_s6 + $0x618] sm:$0xff]  ;;  %v549_v11 = vld [vmem:[%s9607_s10 + $0x9a8] sm:$0xff] }
 0x621   : > { %7570 = vst [vmem:[%s9625_s19 + $0x9b0] sm:$0xff] %v6790_v55  ;;  %v569_v55 = vld [vmem:[%s9607_s10 + $0xa48] sm:$0xff] }
 0x622   : > { %7571 = vst [vmem:[%s9625_s19 + $0x9b8] sm:$0xff] %v6791_v22  ;;  %v548_v22 = vld [vmem:[%s9607_s10 + $0x9a0] sm:$0xff] }
 0x623   : > { %7550 = vst [vmem:[%s9625_s19 + $0x910] sm:$0xff] %v6770_v48 }
 0x624   : > { %7551 = vst [vmem:[%s9625_s19 + $0x918] sm:$0xff] %v6771_v47  ;;  %5487 = vperm.xlu2 %8236, %v4331_v52   ;;  %5482 = vperm.xlu1 %8235, %v4330_v62   ;;  %v546_v47 = vld [vmem:[%s9607_s10 + $0x990] sm:$0xff]  ;;  %v3689_v52 = vmul.f32 %v13159_v54, %v569_v55  ;;  %v13160_v62 = vld [vmem:[#allocation113_spill] sm:$0xff] }
 0x625   : > { %7548 = vst [vmem:[%s9625_s19 + $0x900] sm:$0xff] %v6768_v49  ;;  %5477 = vperm.xlu0 %8234, %v4329_v37   ;;  %v3688_v49 = vmul.f32 %v13159_v54, %v568_v61  ;;  %v3668_v34 = vmul.f32 %v13160_v62, %v548_v22  ;;  %v3666_v15 = vmul.f32 %v13161_v6, %v546_v47  ;;  %v13165_v61 = vld [vmem:[#allocation118_spill] sm:$0xff]  ;;  %v559_v22 = vld [vmem:[%s9607_s10 + $0x9f8] sm:$0xff]  ;;  %v4346_v6 = vld [vmem:[%s9502_s6 + $0x670] sm:$0xff] }
 0x626   : > { %7549 = vst [vmem:[%s9625_s19 + $0x908] sm:$0xff] %v6769_v39  ;;  %v5323_v45 = vpop.permute.xlu2 %5322  ;;  %v5273_v24 = vpop.permute.xlu1 %5272  ;;  %v3669_v39 = vmul.f32 %v13160_v62, %v549_v11  ;;  %v13167_v47 = vld [vmem:[#allocation120_spill] sm:$0xff] }
 0x627   : > { %v6796_v2 = vadd.f32 %v5323_v45, %v3676_v57  ;;  %v6797_v41 = vadd.f32 %v5323_v45, %v3677_v23  ;;  %v6776_v50 = vadd.f32 %v5273_v24, %v3656_v5  ;;  %v5268_v60 = vpop.permute.xlu0 %5267  ;;  %v6777_v63 = vadd.f32 %v5273_v24, %v3657_v58  ;;  %v574_v45 = vld [vmem:[%s9607_s10 + $0xa70] sm:$0xff] }
 0x628   : > { %v6774_v40 = vadd.f32 %v5268_v60, %v3654_v16  ;;  %v6775_v28 = vadd.f32 %v5268_v60, %v3655_v27  ;;  %v4339_v16 = vld [vmem:[%s9502_s6 + $0x638] sm:$0xff]  ;;  %v4338_v60 = vld [vmem:[%s9502_s6 + $0x630] sm:$0xff]  ;;  %v3679_v13 = vmul.f32 %v13167_v47, %v559_v22 }
 0x629   : > { %7576 = vst [vmem:[%s9625_s19 + $0x9e0] sm:$0xff] %v6796_v2  ;;  %v575_v2 = vld [vmem:[%s9607_s10 + $0xa78] sm:$0xff] }
 0x62a   : > { %7577 = vst [vmem:[%s9625_s19 + $0x9e8] sm:$0xff] %v6797_v41  ;;  %v554_v41 = vld [vmem:[%s9607_s10 + $0x9d0] sm:$0xff]  ;;  %v555_v27 = vld [vmem:[%s9607_s10 + $0x9d8] sm:$0xff] }
 0x62b   : > { %7556 = vst [vmem:[%s9625_s19 + $0x940] sm:$0xff] %v6776_v50 }
 0x62c   : > { %7557 = vst [vmem:[%s9625_s19 + $0x948] sm:$0xff] %v6777_v63  ;;  %5502 = vperm.xlu2 %8236, %v4334_v25   ;;  %5497 = vperm.xlu1 %8235, %v4333_v0   ;;  %v552_v63 = vld [vmem:[%s9607_s10 + $0x9c0] sm:$0xff]  ;;  %v3695_v25 = vmul.f32 %v13162_v31, %v575_v2  ;;  %v13163_v0 = vld [vmem:[#allocation116_spill] sm:$0xff] }
 0x62d   : > { %7554 = vst [vmem:[%s9625_s19 + $0x930] sm:$0xff] %v6774_v40  ;;  %5492 = vperm.xlu0 %8234, %v4332_v56   ;;  %v3694_v40 = vmul.f32 %v13162_v31, %v574_v45  ;;  %v3674_v9 = vmul.f32 %v13163_v0, %v554_v41  ;;  %v3672_v32 = vmul.f32 %v13164_v30, %v552_v63  ;;  %v13168_v45 = vld [vmem:[#allocation121_spill] sm:$0xff]  ;;  %v565_v41 = vld [vmem:[%s9607_s10 + $0xa28] sm:$0xff]  ;;  %v13170_v63 = vld [vmem:[#allocation123_spill] sm:$0xff] }
 0x62e   : > { %7555 = vst [vmem:[%s9625_s19 + $0x938] sm:$0xff] %v6775_v28  ;;  %v5338_v19 = vpop.permute.xlu2 %5337  ;;  %v5288_v3 = vpop.permute.xlu1 %5287  ;;  %v3675_v28 = vmul.f32 %v13163_v0, %v555_v27  ;;  %v3685_v51 = vmul.f32 %v13170_v63, %v565_v41  ;;  %v4349_v30 = vld [vmem:[%s9502_s6 + $0x688] sm:$0xff] }
 0x62f   : > { %v6802_v29 = vadd.f32 %v5338_v19, %v3682_v59  ;;  %v6803_v43 = vadd.f32 %v5338_v19, %v3683_v17  ;;  %v6782_v14 = vadd.f32 %v5288_v3, %v3662_v26  ;;  %v5283_v8 = vpop.permute.xlu0 %5282  ;;  %v6783_v38 = vadd.f32 %v5288_v3, %v3663_v1  ;;  %v580_v19 = vld [vmem:[%s9607_s10 + $0xaa0] sm:$0xff] }
 0x630   : > { %v6780_v4 = vadd.f32 %v5283_v8, %v3660_v18  ;;  %v6781_v48 = vadd.f32 %v5283_v8, %v3661_v21  ;;  %v4342_v18 = vld [vmem:[%s9502_s6 + $0x650] sm:$0xff]  ;;  %v4341_v8 = vld [vmem:[%s9502_s6 + $0x648] sm:$0xff] }
 0x631   : > { %7582 = vst [vmem:[%s9625_s19 + $0xa10] sm:$0xff] %v6802_v29  ;;  %v581_v29 = vld [vmem:[%s9607_s10 + $0xaa8] sm:$0xff] }
 0x632   : > { %7583 = vst [vmem:[%s9625_s19 + $0xa18] sm:$0xff] %v6803_v43  ;;  %v560_v43 = vld [vmem:[%s9607_s10 + $0xa00] sm:$0xff]  ;;  %v561_v21 = vld [vmem:[%s9607_s10 + $0xa08] sm:$0xff] }
 0x633   : > { %7562 = vst [vmem:[%s9625_s19 + $0x970] sm:$0xff] %v6782_v14 }
 0x634   : > { %7563 = vst [vmem:[%s9625_s19 + $0x978] sm:$0xff] %v6783_v38  ;;  %5517 = vperm.xlu2 %8236, %v4337_v7   ;;  %5512 = vperm.xlu1 %8235, %v4336_v12   ;;  %v558_v38 = vld [vmem:[%s9607_s10 + $0x9f0] sm:$0xff]  ;;  %v3701_v7 = vmul.f32 %v13165_v61, %v581_v29 }
 0x635   : > { %7560 = vst [vmem:[%s9625_s19 + $0x960] sm:$0xff] %v6780_v4  ;;  %5507 = vperm.xlu0 %8234, %v4335_v33   ;;  %v3700_v4 = vmul.f32 %v13165_v61, %v580_v19  ;;  %v13166_v12 = vld [vmem:[#allocation119_spill] sm:$0xff]  ;;  %v3678_v54 = vmul.f32 %v13167_v47, %v558_v38  ;;  %v13171_v19 = vld [vmem:[#allocation124_spill] sm:$0xff]  ;;  %v13173_v38 = vld [vmem:[#allocation126_spill] sm:$0xff] }
 0x636   : > { %7561 = vst [vmem:[%s9625_s19 + $0x968] sm:$0xff] %v6781_v48  ;;  %v5353_v37 = vpop.permute.xlu2 %5352  ;;  %v5303_v46 = vpop.permute.xlu1 %5302  ;;  %v3680_v55 = vmul.f32 %v13166_v12, %v560_v43  ;;  %v3681_v48 = vmul.f32 %v13166_v12, %v561_v21  ;;  %v571_v43 = vld [vmem:[%s9607_s10 + $0xa58] sm:$0xff]  ;;  %v4352_v47 = vld [vmem:[%s9502_s6 + $0x6a0] sm:$0xff] }
 0x637   : > { %v6808_v57 = vadd.f32 %v5353_v37, %v3688_v49  ;;  %v6809_v23 = vadd.f32 %v5353_v37, %v3689_v52  ;;  %v6788_v20 = vadd.f32 %v5303_v46, %v3668_v34  ;;  %v5298_v5 = vpop.permute.xlu0 %5297  ;;  %v6789_v58 = vadd.f32 %v5303_v46, %v3669_v39  ;;  %v586_v37 = vld [vmem:[%s9607_s10 + $0xad0] sm:$0xff] }
 0x638   : > { %v6786_v24 = vadd.f32 %v5298_v5, %v3666_v15  ;;  %v6787_v50 = vadd.f32 %v5298_v5, %v3667_v53  ;;  %v4345_v15 = vld [vmem:[%s9502_s6 + $0x668] sm:$0xff]  ;;  %v4344_v5 = vld [vmem:[%s9502_s6 + $0x660] sm:$0xff]  ;;  %v567_v53 = vld [vmem:[%s9607_s10 + $0xa38] sm:$0xff]  ;;  %v3691_v22 = vmul.f32 %v13173_v38, %v571_v43 }
 0x639   : > { %7588 = vst [vmem:[%s9625_s19 + $0xa40] sm:$0xff] %v6808_v57  ;;  %v587_v57 = vld [vmem:[%s9607_s10 + $0xad8] sm:$0xff] }
 0x63a   : > { %7589 = vst [vmem:[%s9625_s19 + $0xa48] sm:$0xff] %v6809_v23  ;;  %v566_v23 = vld [vmem:[%s9607_s10 + $0xa30] sm:$0xff] }
 0x63b   : > { %7568 = vst [vmem:[%s9625_s19 + $0x9a0] sm:$0xff] %v6788_v20 }
 0x63c   : > { %7569 = vst [vmem:[%s9625_s19 + $0x9a8] sm:$0xff] %v6789_v58  ;;  %5532 = vperm.xlu2 %8236, %v4340_v35   ;;  %5527 = vperm.xlu1 %8235, %v4339_v16   ;;  %v564_v58 = vld [vmem:[%s9607_s10 + $0xa20] sm:$0xff]  ;;  %v3707_v35 = vmul.f32 %v13168_v45, %v587_v57  ;;  %v13169_v16 = vld [vmem:[#allocation122_spill] sm:$0xff] }
 0x63d   : > { %7566 = vst [vmem:[%s9625_s19 + $0x990] sm:$0xff] %v6786_v24  ;;  %5522 = vperm.xlu0 %8234, %v4338_v60   ;;  %v3706_v24 = vmul.f32 %v13168_v45, %v586_v37  ;;  %v3686_v2 = vmul.f32 %v13169_v16, %v566_v23  ;;  %v3684_v31 = vmul.f32 %v13170_v63, %v564_v58  ;;  %v13174_v37 = vld [vmem:[#allocation127_spill] sm:$0xff]  ;;  %v577_v23 = vld [vmem:[%s9607_s10 + $0xa88] sm:$0xff]  ;;  %v13176_v58 = vld [vmem:[#allocation129_spill] sm:$0xff] }
 0x63e   : > { %7567 = vst [vmem:[%s9625_s19 + $0x998] sm:$0xff] %v6787_v50  ;;  %v5368_v56 = vpop.permute.xlu2 %5367  ;;  %v5318_v42 = vpop.permute.xlu1 %5317  ;;  %v3687_v50 = vmul.f32 %v13169_v16, %v567_v53  ;;  %v3697_v41 = vmul.f32 %v13176_v58, %v577_v23  ;;  %v4355_v63 = vld [vmem:[%s9502_s6 + $0x6b8] sm:$0xff] }
 0x63f   : > { %v6814_v59 = vadd.f32 %v5368_v56, %v3694_v40  ;;  %v6815_v17 = vadd.f32 %v5368_v56, %v3695_v25  ;;  %v6794_v10 = vadd.f32 %v5318_v42, %v3674_v9  ;;  %v5313_v26 = vpop.permute.xlu0 %5312  ;;  %v6795_v1 = vadd.f32 %v5318_v42, %v3675_v28  ;;  %v592_v56 = vld [vmem:[%s9607_s10 + $0xb00] sm:$0xff] }
 0x640   : > { %v6792_v3 = vadd.f32 %v5313_v26, %v3672_v32  ;;  %v6793_v14 = vadd.f32 %v5313_v26, %v3673_v36  ;;  %v4348_v32 = vld [vmem:[%s9502_s6 + $0x680] sm:$0xff]  ;;  %v4347_v26 = vld [vmem:[%s9502_s6 + $0x678] sm:$0xff]  ;;  %v573_v36 = vld [vmem:[%s9607_s10 + $0xa68] sm:$0xff] }
 0x641   : > { %7594 = vst [vmem:[%s9625_s19 + $0xa70] sm:$0xff] %v6814_v59  ;;  %v593_v59 = vld [vmem:[%s9607_s10 + $0xb08] sm:$0xff] }
 0x642   : > { %7595 = vst [vmem:[%s9625_s19 + $0xa78] sm:$0xff] %v6815_v17  ;;  %v572_v17 = vld [vmem:[%s9607_s10 + $0xa60] sm:$0xff] }
 0x643   : > { %7574 = vst [vmem:[%s9625_s19 + $0x9d0] sm:$0xff] %v6794_v10 }
 0x644   : > { %7575 = vst [vmem:[%s9625_s19 + $0x9d8] sm:$0xff] %v6795_v1  ;;  %5547 = vperm.xlu2 %8236, %v4343_v44   ;;  %5542 = vperm.xlu1 %8235, %v4342_v18   ;;  %v570_v1 = vld [vmem:[%s9607_s10 + $0xa50] sm:$0xff]  ;;  %v3713_v44 = vmul.f32 %v13171_v19, %v593_v59  ;;  %v13172_v18 = vld [vmem:[#allocation125_spill] sm:$0xff] }
 0x645   : > { %7572 = vst [vmem:[%s9625_s19 + $0x9c0] sm:$0xff] %v6792_v3  ;;  %5537 = vperm.xlu0 %8234, %v4341_v8   ;;  %v3712_v3 = vmul.f32 %v13171_v19, %v592_v56  ;;  %v3692_v29 = vmul.f32 %v13172_v18, %v572_v17  ;;  %v3690_v61 = vmul.f32 %v13173_v38, %v570_v1  ;;  %v13177_v56 = vld [vmem:[#allocation130_spill] sm:$0xff]  ;;  %v583_v17 = vld [vmem:[%s9607_s10 + $0xab8] sm:$0xff]  ;;  %v4358_v38 = vld [vmem:[%s9502_s6 + $0x6d0] sm:$0xff] }
 0x646   : > { %7573 = vst [vmem:[%s9625_s19 + $0x9c8] sm:$0xff] %v6793_v14  ;;  %v5383_v33 = vpop.permute.xlu2 %5382  ;;  %v5333_v11 = vpop.permute.xlu1 %5332  ;;  %v3693_v14 = vmul.f32 %v13172_v18, %v573_v36  ;;  %v13179_v1 = vld [vmem:[#allocation132_spill] sm:$0xff] }
 0x647   : > { %v6820_v49 = vadd.f32 %v5383_v33, %v3700_v4  ;;  %v6821_v52 = vadd.f32 %v5383_v33, %v3701_v7  ;;  %v6800_v62 = vadd.f32 %v5333_v11, %v3680_v55  ;;  %v5328_v34 = vpop.permute.xlu0 %5327  ;;  %v6801_v39 = vadd.f32 %v5333_v11, %v3681_v48  ;;  %v598_v33 = vld [vmem:[%s9607_s10 + $0xb30] sm:$0xff] }
 0x648   : > { %v6798_v46 = vadd.f32 %v5328_v34, %v3678_v54  ;;  %v6799_v20 = vadd.f32 %v5328_v34, %v3679_v13  ;;  %v4351_v54 = vld [vmem:[%s9502_s6 + $0x698] sm:$0xff]  ;;  %v4350_v34 = vld [vmem:[%s9502_s6 + $0x690] sm:$0xff]  ;;  %v3703_v43 = vmul.f32 %v13179_v1, %v583_v17 }
 0x649   : > { %7600 = vst [vmem:[%s9625_s19 + $0xaa0] sm:$0xff] %v6820_v49  ;;  %v599_v49 = vld [vmem:[%s9607_s10 + $0xb38] sm:$0xff] }
 0x64a   : > { %7601 = vst [vmem:[%s9625_s19 + $0xaa8] sm:$0xff] %v6821_v52  ;;  %v578_v52 = vld [vmem:[%s9607_s10 + $0xa90] sm:$0xff]  ;;  %v579_v13 = vld [vmem:[%s9607_s10 + $0xa98] sm:$0xff] }
 0x64b   : > { %7580 = vst [vmem:[%s9625_s19 + $0xa00] sm:$0xff] %v6800_v62 }
 0x64c   : > { %7581 = vst [vmem:[%s9625_s19 + $0xa08] sm:$0xff] %v6801_v39  ;;  %5562 = vperm.xlu2 %8236, %v4346_v6   ;;  %5557 = vperm.xlu1 %8235, %v4345_v15   ;;  %v576_v39 = vld [vmem:[%s9607_s10 + $0xa80] sm:$0xff]  ;;  %v3719_v6 = vmul.f32 %v13174_v37, %v599_v49  ;;  %v13175_v15 = vld [vmem:[#allocation128_spill] sm:$0xff] }
 0x64d   : > { %7578 = vst [vmem:[%s9625_s19 + $0x9f0] sm:$0xff] %v6798_v46  ;;  %5552 = vperm.xlu0 %8234, %v4344_v5   ;;  %v3718_v46 = vmul.f32 %v13174_v37, %v598_v33  ;;  %v3698_v57 = vmul.f32 %v13175_v15, %v578_v52  ;;  %v3696_v45 = vmul.f32 %v13176_v58, %v576_v39  ;;  %v13180_v33 = vld [vmem:[#allocation133_spill] sm:$0xff]  ;;  %v589_v52 = vld [vmem:[%s9607_s10 + $0xae8] sm:$0xff]  ;;  %v13182_v39 = vld [vmem:[#allocation135_spill] sm:$0xff] }
 0x64e   : > { %7579 = vst [vmem:[%s9625_s19 + $0x9f8] sm:$0xff] %v6799_v20  ;;  %v5398_v60 = vpop.permute.xlu2 %5397  ;;  %v5348_v27 = vpop.permute.xlu1 %5347  ;;  %v3699_v20 = vmul.f32 %v13175_v15, %v579_v13  ;;  %v3709_v23 = vmul.f32 %v13182_v39, %v589_v52  ;;  %v4361_v58 = vld [vmem:[%s9502_s6 + $0x6e8] sm:$0xff] }
 0x64f   : > { %v6826_v40 = vadd.f32 %v5398_v60, %v3706_v24  ;;  %v6827_v25 = vadd.f32 %v5398_v60, %v3707_v35  ;;  %v6806_v0 = vadd.f32 %v5348_v27, %v3686_v2  ;;  %v5343_v9 = vpop.permute.xlu0 %5342  ;;  %v6807_v28 = vadd.f32 %v5348_v27, %v3687_v50  ;;  %v604_v60 = vld [vmem:[%s9607_s10 + $0xb60] sm:$0xff] }
 0x650   : > { %v6804_v42 = vadd.f32 %v5343_v9, %v3684_v31  ;;  %v6805_v10 = vadd.f32 %v5343_v9, %v3685_v51  ;;  %v4354_v31 = vld [vmem:[%s9502_s6 + $0x6b0] sm:$0xff]  ;;  %v4353_v9 = vld [vmem:[%s9502_s6 + $0x6a8] sm:$0xff] }
 0x651   : > { %7606 = vst [vmem:[%s9625_s19 + $0xad0] sm:$0xff] %v6826_v40  ;;  %v605_v40 = vld [vmem:[%s9607_s10 + $0xb68] sm:$0xff] }
 0x652   : > { %7607 = vst [vmem:[%s9625_s19 + $0xad8] sm:$0xff] %v6827_v25  ;;  %v584_v25 = vld [vmem:[%s9607_s10 + $0xac0] sm:$0xff]  ;;  %v585_v51 = vld [vmem:[%s9607_s10 + $0xac8] sm:$0xff] }
 0x653   : > { %7586 = vst [vmem:[%s9625_s19 + $0xa30] sm:$0xff] %v6806_v0 }
 0x654   : > { %7587 = vst [vmem:[%s9625_s19 + $0xa38] sm:$0xff] %v6807_v28  ;;  %5577 = vperm.xlu2 %8236, %v4349_v30   ;;  %5572 = vperm.xlu1 %8235, %v4348_v32   ;;  %v582_v28 = vld [vmem:[%s9607_s10 + $0xab0] sm:$0xff]  ;;  %v3725_v30 = vmul.f32 %v13177_v56, %v605_v40 }
 0x655   : > { %7584 = vst [vmem:[%s9625_s19 + $0xa20] sm:$0xff] %v6804_v42  ;;  %5567 = vperm.xlu0 %8234, %v4347_v26   ;;  %v3724_v42 = vmul.f32 %v13177_v56, %v604_v60  ;;  %v13178_v32 = vld [vmem:[#allocation131_spill] sm:$0xff]  ;;  %v3702_v19 = vmul.f32 %v13179_v1, %v582_v28  ;;  %v13183_v60 = vld [vmem:[#allocation136_spill] sm:$0xff]  ;;  %v13185_v28 = vld [vmem:[#allocation138_spill] sm:$0xff] }
 0x656   : > { %7585 = vst [vmem:[%s9625_s19 + $0xa28] sm:$0xff] %v6805_v10  ;;  %v5413_v8 = vpop.permute.xlu2 %5412  ;;  %v5363_v21 = vpop.permute.xlu1 %5362  ;;  %v3704_v59 = vmul.f32 %v13178_v32, %v584_v25  ;;  %v3705_v10 = vmul.f32 %v13178_v32, %v585_v51  ;;  %v595_v25 = vld [vmem:[%s9607_s10 + $0xb18] sm:$0xff]  ;;  %v4364_v1 = vld [vmem:[%s9502_s6 + $0x700] sm:$0xff] }
 0x657   : > { %v6832_v4 = vadd.f32 %v5413_v8, %v3712_v3  ;;  %v6833_v7 = vadd.f32 %v5413_v8, %v3713_v44  ;;  %v6812_v12 = vadd.f32 %v5363_v21, %v3692_v29  ;;  %v5358_v55 = vpop.permute.xlu0 %5357  ;;  %v6813_v48 = vadd.f32 %v5363_v21, %v3693_v14  ;;  %v610_v8 = vld [vmem:[%s9607_s10 + $0xb90] sm:$0xff] }
 0x658   : > { %v6810_v11 = vadd.f32 %v5358_v55, %v3690_v61  ;;  %v6811_v62 = vadd.f32 %v5358_v55, %v3691_v22  ;;  %v4357_v61 = vld [vmem:[%s9502_s6 + $0x6c8] sm:$0xff]  ;;  %v4356_v55 = vld [vmem:[%s9502_s6 + $0x6c0] sm:$0xff]  ;;  %v591_v22 = vld [vmem:[%s9607_s10 + $0xaf8] sm:$0xff]  ;;  %v3715_v17 = vmul.f32 %v13185_v28, %v595_v25 }
 0x659   : > { %7612 = vst [vmem:[%s9625_s19 + $0xb00] sm:$0xff] %v6832_v4  ;;  %v611_v4 = vld [vmem:[%s9607_s10 + $0xb98] sm:$0xff] }
 0x65a   : > { %7613 = vst [vmem:[%s9625_s19 + $0xb08] sm:$0xff] %v6833_v7  ;;  %v590_v7 = vld [vmem:[%s9607_s10 + $0xaf0] sm:$0xff] }
 0x65b   : > { %7592 = vst [vmem:[%s9625_s19 + $0xa60] sm:$0xff] %v6812_v12 }
 0x65c   : > { %7593 = vst [vmem:[%s9625_s19 + $0xa68] sm:$0xff] %v6813_v48  ;;  %5592 = vperm.xlu2 %8236, %v4352_v47   ;;  %5587 = vperm.xlu1 %8235, %v4351_v54   ;;  %v588_v48 = vld [vmem:[%s9607_s10 + $0xae0] sm:$0xff]  ;;  %v3731_v47 = vmul.f32 %v13180_v33, %v611_v4  ;;  %v13181_v54 = vld [vmem:[#allocation134_spill] sm:$0xff] }
 0x65d   : > { %7590 = vst [vmem:[%s9625_s19 + $0xa50] sm:$0xff] %v6810_v11  ;;  %5582 = vperm.xlu0 %8234, %v4350_v34   ;;  %v3730_v11 = vmul.f32 %v13180_v33, %v610_v8  ;;  %v3710_v49 = vmul.f32 %v13181_v54, %v590_v7  ;;  %v3708_v37 = vmul.f32 %v13182_v39, %v588_v48  ;;  %v13186_v8 = vld [vmem:[#allocation139_spill] sm:$0xff]  ;;  %v601_v7 = vld [vmem:[%s9607_s10 + $0xb48] sm:$0xff]  ;;  %v13188_v48 = vld [vmem:[#allocation141_spill] sm:$0xff] }
 0x65e   : > { %7591 = vst [vmem:[%s9625_s19 + $0xa58] sm:$0xff] %v6811_v62  ;;  %v5428_v5 = vpop.permute.xlu2 %5427  ;;  %v5378_v53 = vpop.permute.xlu1 %5377  ;;  %v3711_v62 = vmul.f32 %v13181_v54, %v591_v22  ;;  %v3721_v52 = vmul.f32 %v13188_v48, %v601_v7  ;;  %v4367_v39 = vld [vmem:[%s9502_s6 + $0x718] sm:$0xff] }
 0x65f   : > { %v6838_v24 = vadd.f32 %v5428_v5, %v3718_v46  ;;  %v6839_v35 = vadd.f32 %v5428_v5, %v3719_v6  ;;  %v6818_v16 = vadd.f32 %v5378_v53, %v3698_v57  ;;  %v5373_v2 = vpop.permute.xlu0 %5372  ;;  %v6819_v50 = vadd.f32 %v5378_v53, %v3699_v20  ;;  %v616_v5 = vld [vmem:[%s9607_s10 + $0xbc0] sm:$0xff] }
 0x660   : > { %v6816_v27 = vadd.f32 %v5373_v2, %v3696_v45  ;;  %v6817_v0 = vadd.f32 %v5373_v2, %v3697_v41  ;;  %v4360_v45 = vld [vmem:[%s9502_s6 + $0x6e0] sm:$0xff]  ;;  %v4359_v2 = vld [vmem:[%s9502_s6 + $0x6d8] sm:$0xff]  ;;  %v597_v41 = vld [vmem:[%s9607_s10 + $0xb28] sm:$0xff] }
 0x661   : > { %7618 = vst [vmem:[%s9625_s19 + $0xb30] sm:$0xff] %v6838_v24  ;;  %v617_v24 = vld [vmem:[%s9607_s10 + $0xbc8] sm:$0xff] }
 0x662   : > { %7619 = vst [vmem:[%s9625_s19 + $0xb38] sm:$0xff] %v6839_v35  ;;  %v596_v35 = vld [vmem:[%s9607_s10 + $0xb20] sm:$0xff] }
 0x663   : > { %7598 = vst [vmem:[%s9625_s19 + $0xa90] sm:$0xff] %v6818_v16 }
 0x664   : > { %7599 = vst [vmem:[%s9625_s19 + $0xa98] sm:$0xff] %v6819_v50  ;;  %5607 = vperm.xlu2 %8236, %v4355_v63   ;;  %5602 = vperm.xlu1 %8235, %v4354_v31   ;;  %v594_v50 = vld [vmem:[%s9607_s10 + $0xb10] sm:$0xff]  ;;  %v3737_v63 = vmul.f32 %v13183_v60, %v617_v24  ;;  %v13184_v31 = vld [vmem:[#allocation137_spill] sm:$0xff] }
 0x665   : > { %7596 = vst [vmem:[%s9625_s19 + $0xa80] sm:$0xff] %v6816_v27  ;;  %5597 = vperm.xlu0 %8234, %v4353_v9   ;;  %v3736_v27 = vmul.f32 %v13183_v60, %v616_v5  ;;  %v3716_v40 = vmul.f32 %v13184_v31, %v596_v35  ;;  %v3714_v56 = vmul.f32 %v13185_v28, %v594_v50  ;;  %v13189_v5 = vld [vmem:[#allocation142_spill] sm:$0xff]  ;;  %v607_v35 = vld [vmem:[%s9607_s10 + $0xb78] sm:$0xff]  ;;  %v4370_v28 = vld [vmem:[%s9502_s6 + $0x730] sm:$0xff] }
 0x666   : > { %7597 = vst [vmem:[%s9625_s19 + $0xa88] sm:$0xff] %v6817_v0  ;;  %v5443_v26 = vpop.permute.xlu2 %5442  ;;  %v5393_v36 = vpop.permute.xlu1 %5392  ;;  %v3717_v0 = vmul.f32 %v13184_v31, %v597_v41  ;;  %v13191_v50 = vld [vmem:[#allocation144_spill] sm:$0xff] }
 0x667   : > { %v6844_v3 = vadd.f32 %v5443_v26, %v3724_v42  ;;  %v6845_v44 = vadd.f32 %v5443_v26, %v3725_v30  ;;  %v6824_v18 = vadd.f32 %v5393_v36, %v3704_v59  ;;  %v5388_v29 = vpop.permute.xlu0 %5387  ;;  %v6825_v14 = vadd.f32 %v5393_v36, %v3705_v10  ;;  %v622_v26 = vld [vmem:[%s9607_s10 + $0xbf0] sm:$0xff] }
 0x668   : > { %v6822_v21 = vadd.f32 %v5388_v29, %v3702_v19  ;;  %v6823_v12 = vadd.f32 %v5388_v29, %v3703_v43  ;;  %v4363_v19 = vld [vmem:[%s9502_s6 + $0x6f8] sm:$0xff]  ;;  %v4362_v29 = vld [vmem:[%s9502_s6 + $0x6f0] sm:$0xff]  ;;  %v3727_v25 = vmul.f32 %v13191_v50, %v607_v35 }
 0x669   : > { %7624 = vst [vmem:[%s9625_s19 + $0xb60] sm:$0xff] %v6844_v3  ;;  %v623_v3 = vld [vmem:[%s9607_s10 + $0xbf8] sm:$0xff] }
 0x66a   : > { %7625 = vst [vmem:[%s9625_s19 + $0xb68] sm:$0xff] %v6845_v44  ;;  %v602_v44 = vld [vmem:[%s9607_s10 + $0xb50] sm:$0xff]  ;;  %v603_v43 = vld [vmem:[%s9607_s10 + $0xb58] sm:$0xff] }
 0x66b   : > { %7604 = vst [vmem:[%s9625_s19 + $0xac0] sm:$0xff] %v6824_v18 }
 0x66c   : > { %7605 = vst [vmem:[%s9625_s19 + $0xac8] sm:$0xff] %v6825_v14  ;;  %5622 = vperm.xlu2 %8236, %v4358_v38   ;;  %5617 = vperm.xlu1 %8235, %v4357_v61   ;;  %v600_v14 = vld [vmem:[%s9607_s10 + $0xb40] sm:$0xff]  ;;  %v3743_v38 = vmul.f32 %v13186_v8, %v623_v3  ;;  %v13187_v61 = vld [vmem:[#allocation140_spill] sm:$0xff] }
 0x66d   : > { %7602 = vst [vmem:[%s9625_s19 + $0xab0] sm:$0xff] %v6822_v21  ;;  %5612 = vperm.xlu0 %8234, %v4356_v55   ;;  %v3742_v21 = vmul.f32 %v13186_v8, %v622_v26  ;;  %v3722_v4 = vmul.f32 %v13187_v61, %v602_v44  ;;  %v3720_v33 = vmul.f32 %v13188_v48, %v600_v14  ;;  %v13192_v26 = vld [vmem:[#allocation145_spill] sm:$0xff]  ;;  %v613_v44 = vld [vmem:[%s9607_s10 + $0xba8] sm:$0xff]  ;;  %v13194_v14 = vld [vmem:[#allocation147_spill] sm:$0xff] }
 0x66e   : > { %7603 = vst [vmem:[%s9625_s19 + $0xab8] sm:$0xff] %v6823_v12  ;;  %v5458_v34 = vpop.permute.xlu2 %5457  ;;  %v5408_v13 = vpop.permute.xlu1 %5407  ;;  %v3723_v12 = vmul.f32 %v13187_v61, %v603_v43  ;;  %v3733_v7 = vmul.f32 %v13194_v14, %v613_v44  ;;  %v4373_v48 = vld [vmem:[%s9502_s6 + $0x748] sm:$0xff] }
 0x66f   : > { %v6850_v46 = vadd.f32 %v5458_v34, %v3730_v11  ;;  %v6851_v6 = vadd.f32 %v5458_v34, %v3731_v47  ;;  %v6830_v15 = vadd.f32 %v5408_v13, %v3710_v49  ;;  %v5403_v57 = vpop.permute.xlu0 %5402  ;;  %v6831_v20 = vadd.f32 %v5408_v13, %v3711_v62  ;;  %v628_v34 = vld [vmem:[%s9607_s10 + $0xc20] sm:$0xff] }
 0x670   : > { %v6828_v53 = vadd.f32 %v5403_v57, %v3708_v37  ;;  %v6829_v16 = vadd.f32 %v5403_v57, %v3709_v23  ;;  %v4366_v37 = vld [vmem:[%s9502_s6 + $0x710] sm:$0xff]  ;;  %v4365_v57 = vld [vmem:[%s9502_s6 + $0x708] sm:$0xff] }
 0x671   : > { %7630 = vst [vmem:[%s9625_s19 + $0xb90] sm:$0xff] %v6850_v46  ;;  %v629_v46 = vld [vmem:[%s9607_s10 + $0xc28] sm:$0xff] }
 0x672   : > { %7631 = vst [vmem:[%s9625_s19 + $0xb98] sm:$0xff] %v6851_v6  ;;  %v608_v6 = vld [vmem:[%s9607_s10 + $0xb80] sm:$0xff]  ;;  %v609_v23 = vld [vmem:[%s9607_s10 + $0xb88] sm:$0xff] }
 0x673   : > { %7610 = vst [vmem:[%s9625_s19 + $0xaf0] sm:$0xff] %v6830_v15 }
 0x674   : > { %7611 = vst [vmem:[%s9625_s19 + $0xaf8] sm:$0xff] %v6831_v20  ;;  %5637 = vperm.xlu2 %8236, %v4361_v58   ;;  %5632 = vperm.xlu1 %8235, %v4360_v45   ;;  %v606_v20 = vld [vmem:[%s9607_s10 + $0xb70] sm:$0xff]  ;;  %v3749_v58 = vmul.f32 %v13189_v5, %v629_v46 }
 0x675   : > { %7608 = vst [vmem:[%s9625_s19 + $0xae0] sm:$0xff] %v6828_v53  ;;  %5627 = vperm.xlu0 %8234, %v4359_v2   ;;  %v3748_v53 = vmul.f32 %v13189_v5, %v628_v34  ;;  %v13190_v45 = vld [vmem:[#allocation143_spill] sm:$0xff]  ;;  %v3726_v60 = vmul.f32 %v13191_v50, %v606_v20  ;;  %v13195_v34 = vld [vmem:[#allocation148_spill] sm:$0xff]  ;;  %v13197_v20 = vld [vmem:[#allocation150_spill] sm:$0xff] }
 0x676   : > { %7609 = vst [vmem:[%s9625_s19 + $0xae8] sm:$0xff] %v6829_v16  ;;  %v5473_v9 = vpop.permute.xlu2 %5472  ;;  %v5423_v51 = vpop.permute.xlu1 %5422  ;;  %v3728_v24 = vmul.f32 %v13190_v45, %v608_v6  ;;  %v3729_v16 = vmul.f32 %v13190_v45, %v609_v23  ;;  %v619_v6 = vld [vmem:[%s9607_s10 + $0xbd8] sm:$0xff]  ;;  %v4376_v50 = vld [vmem:[%s9502_s6 + $0x760] sm:$0xff] }
 0x677   : > { %v6856_v42 = vadd.f32 %v5473_v9, %v3736_v27  ;;  %v6857_v30 = vadd.f32 %v5473_v9, %v3737_v63  ;;  %v6836_v32 = vadd.f32 %v5423_v51, %v3716_v40  ;;  %v5418_v59 = vpop.permute.xlu0 %5417  ;;  %v6837_v10 = vadd.f32 %v5423_v51, %v3717_v0  ;;  %v634_v9 = vld [vmem:[%s9607_s10 + $0xc50] sm:$0xff] }
 0x678   : > { %v6834_v36 = vadd.f32 %v5418_v59, %v3714_v56  ;;  %v6835_v18 = vadd.f32 %v5418_v59, %v3715_v17  ;;  %v4369_v56 = vld [vmem:[%s9502_s6 + $0x728] sm:$0xff]  ;;  %v4368_v59 = vld [vmem:[%s9502_s6 + $0x720] sm:$0xff]  ;;  %v615_v17 = vld [vmem:[%s9607_s10 + $0xbb8] sm:$0xff]  ;;  %v3739_v35 = vmul.f32 %v13197_v20, %v619_v6 }
 0x679   : > { %7636 = vst [vmem:[%s9625_s19 + $0xbc0] sm:$0xff] %v6856_v42  ;;  %v635_v42 = vld [vmem:[%s9607_s10 + $0xc58] sm:$0xff] }
 0x67a   : > { %7637 = vst [vmem:[%s9625_s19 + $0xbc8] sm:$0xff] %v6857_v30  ;;  %v614_v30 = vld [vmem:[%s9607_s10 + $0xbb0] sm:$0xff] }
 0x67b   : > { %7616 = vst [vmem:[%s9625_s19 + $0xb20] sm:$0xff] %v6836_v32 }
 0x67c   : > { %7617 = vst [vmem:[%s9625_s19 + $0xb28] sm:$0xff] %v6837_v10  ;;  %5652 = vperm.xlu2 %8236, %v4364_v1   ;;  %5647 = vperm.xlu1 %8235, %v4363_v19   ;;  %v612_v10 = vld [vmem:[%s9607_s10 + $0xba0] sm:$0xff]  ;;  %v3755_v1 = vmul.f32 %v13192_v26, %v635_v42  ;;  %v13193_v19 = vld [vmem:[#allocation146_spill] sm:$0xff] }
 0x67d   : > { %7614 = vst [vmem:[%s9625_s19 + $0xb10] sm:$0xff] %v6834_v36  ;;  %5642 = vperm.xlu0 %8234, %v4362_v29   ;;  %v3754_v36 = vmul.f32 %v13192_v26, %v634_v9  ;;  %v3734_v3 = vmul.f32 %v13193_v19, %v614_v30  ;;  %v3732_v8 = vmul.f32 %v13194_v14, %v612_v10  ;;  %v13198_v9 = vld [vmem:[#allocation151_spill] sm:$0xff]  ;;  %v625_v30 = vld [vmem:[%s9607_s10 + $0xc08] sm:$0xff]  ;;  %v13200_v10 = vld [vmem:[#allocation153_spill] sm:$0xff] }
 0x67e   : > { %7615 = vst [vmem:[%s9625_s19 + $0xb18] sm:$0xff] %v6835_v18  ;;  %v5488_v55 = vpop.permute.xlu2 %5487  ;;  %v5438_v22 = vpop.permute.xlu1 %5437  ;;  %v3735_v18 = vmul.f32 %v13193_v19, %v615_v17  ;;  %v3745_v44 = vmul.f32 %v13200_v10, %v625_v30  ;;  %v4379_v14 = vld [vmem:[%s9502_s6 + $0x778] sm:$0xff] }
 0x67f   : > { %v6862_v11 = vadd.f32 %v5488_v55, %v3742_v21  ;;  %v6863_v47 = vadd.f32 %v5488_v55, %v3743_v38  ;;  %v6842_v54 = vadd.f32 %v5438_v22, %v3722_v4  ;;  %v5433_v49 = vpop.permute.xlu0 %5432  ;;  %v6843_v62 = vadd.f32 %v5438_v22, %v3723_v12  ;;  %v640_v55 = vld [vmem:[%s9607_s10 + $0xc80] sm:$0xff] }
 0x680   : > { %v6840_v13 = vadd.f32 %v5433_v49, %v3720_v33  ;;  %v6841_v15 = vadd.f32 %v5433_v49, %v3721_v52  ;;  %v4372_v33 = vld [vmem:[%s9502_s6 + $0x740] sm:$0xff]  ;;  %v4371_v49 = vld [vmem:[%s9502_s6 + $0x738] sm:$0xff]  ;;  %v621_v52 = vld [vmem:[%s9607_s10 + $0xbe8] sm:$0xff] }
 0x681   : > { %7642 = vst [vmem:[%s9625_s19 + $0xbf0] sm:$0xff] %v6862_v11  ;;  %v641_v11 = vld [vmem:[%s9607_s10 + $0xc88] sm:$0xff] }
 0x682   : > { %7643 = vst [vmem:[%s9625_s19 + $0xbf8] sm:$0xff] %v6863_v47  ;;  %v620_v47 = vld [vmem:[%s9607_s10 + $0xbe0] sm:$0xff] }
 0x683   : > { %7622 = vst [vmem:[%s9625_s19 + $0xb50] sm:$0xff] %v6842_v54 }
 0x684   : > { %7623 = vst [vmem:[%s9625_s19 + $0xb58] sm:$0xff] %v6843_v62  ;;  %5667 = vperm.xlu2 %8236, %v4367_v39   ;;  %5662 = vperm.xlu1 %8235, %v4366_v37   ;;  %v618_v62 = vld [vmem:[%s9607_s10 + $0xbd0] sm:$0xff]  ;;  %v3761_v39 = vmul.f32 %v13195_v34, %v641_v11  ;;  %v13196_v37 = vld [vmem:[#allocation149_spill] sm:$0xff] }
 0x685   : > { %7620 = vst [vmem:[%s9625_s19 + $0xb40] sm:$0xff] %v6840_v13  ;;  %5657 = vperm.xlu0 %8234, %v4365_v57   ;;  %v3760_v13 = vmul.f32 %v13195_v34, %v640_v55  ;;  %v3740_v46 = vmul.f32 %v13196_v37, %v620_v47  ;;  %v3738_v5 = vmul.f32 %v13197_v20, %v618_v62  ;;  %v13201_v55 = vld [vmem:[#allocation154_spill] sm:$0xff]  ;;  %v631_v47 = vld [vmem:[%s9607_s10 + $0xc38] sm:$0xff]  ;;  %v4382_v20 = vld [vmem:[%s9502_s6 + $0x790] sm:$0xff] }
 0x686   : > { %7621 = vst [vmem:[%s9625_s19 + $0xb48] sm:$0xff] %v6841_v15  ;;  %v5503_v2 = vpop.permute.xlu2 %5502  ;;  %v5453_v41 = vpop.permute.xlu1 %5452  ;;  %v3741_v15 = vmul.f32 %v13196_v37, %v621_v52  ;;  %v13203_v62 = vld [vmem:[#allocation156_spill] sm:$0xff] }
 0x687   : > { %v6868_v27 = vadd.f32 %v5503_v2, %v3748_v53  ;;  %v6869_v63 = vadd.f32 %v5503_v2, %v3749_v58  ;;  %v6848_v31 = vadd.f32 %v5453_v41, %v3728_v24  ;;  %v5448_v40 = vpop.permute.xlu0 %5447  ;;  %v6849_v0 = vadd.f32 %v5453_v41, %v3729_v16  ;;  %v646_v2 = vld [vmem:[%s9607_s10 + $0xcb0] sm:$0xff] }
 0x688   : > { %v6846_v51 = vadd.f32 %v5448_v40, %v3726_v60  ;;  %v6847_v32 = vadd.f32 %v5448_v40, %v3727_v25  ;;  %v4375_v60 = vld [vmem:[%s9502_s6 + $0x758] sm:$0xff]  ;;  %v4374_v40 = vld [vmem:[%s9502_s6 + $0x750] sm:$0xff]  ;;  %v3751_v6 = vmul.f32 %v13203_v62, %v631_v47 }
 0x689   : > { %7648 = vst [vmem:[%s9625_s19 + $0xc20] sm:$0xff] %v6868_v27  ;;  %v647_v27 = vld [vmem:[%s9607_s10 + $0xcb8] sm:$0xff] }
 0x68a   : > { %7649 = vst [vmem:[%s9625_s19 + $0xc28] sm:$0xff] %v6869_v63  ;;  %v626_v63 = vld [vmem:[%s9607_s10 + $0xc10] sm:$0xff]  ;;  %v627_v25 = vld [vmem:[%s9607_s10 + $0xc18] sm:$0xff] }
 0x68b   : > { %7628 = vst [vmem:[%s9625_s19 + $0xb80] sm:$0xff] %v6848_v31 }
 0x68c   : > { %7629 = vst [vmem:[%s9625_s19 + $0xb88] sm:$0xff] %v6849_v0  ;;  %5682 = vperm.xlu2 %8236, %v4370_v28   ;;  %5677 = vperm.xlu1 %8235, %v4369_v56   ;;  %v624_v0 = vld [vmem:[%s9607_s10 + $0xc00] sm:$0xff]  ;;  %v3767_v28 = vmul.f32 %v13198_v9, %v647_v27  ;;  %v13199_v56 = vld [vmem:[#allocation152_spill] sm:$0xff] }
 0x68d   : > { %7626 = vst [vmem:[%s9625_s19 + $0xb70] sm:$0xff] %v6846_v51  ;;  %5672 = vperm.xlu0 %8234, %v4368_v59   ;;  %v3766_v51 = vmul.f32 %v13198_v9, %v646_v2  ;;  %v3746_v42 = vmul.f32 %v13199_v56, %v626_v63  ;;  %v3744_v26 = vmul.f32 %v13200_v10, %v624_v0  ;;  %v13204_v2 = vld [vmem:[#allocation157_spill] sm:$0xff]  ;;  %v637_v63 = vld [vmem:[%s9607_s10 + $0xc68] sm:$0xff]  ;;  %v13206_v0 = vld [vmem:[#allocation159_spill] sm:$0xff] }
 0x68e   : > { %7627 = vst [vmem:[%s9625_s19 + $0xb78] sm:$0xff] %v6847_v32  ;;  %v5518_v29 = vpop.permute.xlu2 %5517  ;;  %v5468_v43 = vpop.permute.xlu1 %5467  ;;  %v3747_v32 = vmul.f32 %v13199_v56, %v627_v25  ;;  %v3757_v30 = vmul.f32 %v13206_v0, %v637_v63  ;;  %v4385_v10 = vld [vmem:[%s9502_s6 + $0x7a8] sm:$0xff] }
 0x68f   : > { %v6874_v21 = vadd.f32 %v5518_v29, %v3754_v36  ;;  %v6875_v38 = vadd.f32 %v5518_v29, %v3755_v1  ;;  %v6854_v61 = vadd.f32 %v5468_v43, %v3734_v3  ;;  %v5463_v4 = vpop.permute.xlu0 %5462  ;;  %v6855_v12 = vadd.f32 %v5468_v43, %v3735_v18  ;;  %v652_v29 = vld [vmem:[%s9607_s10 + $0xce0] sm:$0xff] }
 0x690   : > { %v6852_v22 = vadd.f32 %v5463_v4, %v3732_v8  ;;  %v6853_v54 = vadd.f32 %v5463_v4, %v3733_v7  ;;  %v4378_v8 = vld [vmem:[%s9502_s6 + $0x770] sm:$0xff]  ;;  %v4377_v4 = vld [vmem:[%s9502_s6 + $0x768] sm:$0xff] }
 0x691   : > { %7654 = vst [vmem:[%s9625_s19 + $0xc50] sm:$0xff] %v6874_v21  ;;  %v653_v21 = vld [vmem:[%s9607_s10 + $0xce8] sm:$0xff] }
 0x692   : > { %7655 = vst [vmem:[%s9625_s19 + $0xc58] sm:$0xff] %v6875_v38  ;;  %v632_v38 = vld [vmem:[%s9607_s10 + $0xc40] sm:$0xff]  ;;  %v633_v7 = vld [vmem:[%s9607_s10 + $0xc48] sm:$0xff] }
 0x693   : > { %7634 = vst [vmem:[%s9625_s19 + $0xbb0] sm:$0xff] %v6854_v61 }
 0x694   : > { %7635 = vst [vmem:[%s9625_s19 + $0xbb8] sm:$0xff] %v6855_v12  ;;  %5697 = vperm.xlu2 %8236, %v4373_v48   ;;  %5692 = vperm.xlu1 %8235, %v4372_v33   ;;  %v630_v12 = vld [vmem:[%s9607_s10 + $0xc30] sm:$0xff]  ;;  %v3773_v48 = vmul.f32 %v13201_v55, %v653_v21 }
 0x695   : > { %7632 = vst [vmem:[%s9625_s19 + $0xba0] sm:$0xff] %v6852_v22  ;;  %5687 = vperm.xlu0 %8234, %v4371_v49   ;;  %v3772_v22 = vmul.f32 %v13201_v55, %v652_v29  ;;  %v13202_v33 = vld [vmem:[#allocation155_spill] sm:$0xff]  ;;  %v3750_v34 = vmul.f32 %v13203_v62, %v630_v12  ;;  %v13207_v29 = vld [vmem:[#allocation160_spill] sm:$0xff]  ;;  %v13209_v12 = vld [vmem:[#allocation162_spill] sm:$0xff] }
 0x696   : > { %7633 = vst [vmem:[%s9625_s19 + $0xba8] sm:$0xff] %v6853_v54  ;;  %v5533_v57 = vpop.permute.xlu2 %5532  ;;  %v5483_v23 = vpop.permute.xlu1 %5482  ;;  %v3752_v11 = vmul.f32 %v13202_v33, %v632_v38  ;;  %v3753_v54 = vmul.f32 %v13202_v33, %v633_v7  ;;  %v643_v38 = vld [vmem:[%s9607_s10 + $0xc98] sm:$0xff]  ;;  %v4388_v62 = vld [vmem:[%s9502_s6 + $0x7c0] sm:$0xff] }
 0x697   : > { %v6880_v53 = vadd.f32 %v5533_v57, %v3760_v13  ;;  %v6881_v58 = vadd.f32 %v5533_v57, %v3761_v39  ;;  %v6860_v45 = vadd.f32 %v5483_v23, %v3740_v46  ;;  %v5478_v24 = vpop.permute.xlu0 %5477  ;;  %v6861_v16 = vadd.f32 %v5483_v23, %v3741_v15  ;;  %v658_v57 = vld [vmem:[%s9607_s10 + $0xd10] sm:$0xff] }
 0x698   : > { %v6858_v41 = vadd.f32 %v5478_v24, %v3738_v5  ;;  %v6859_v31 = vadd.f32 %v5478_v24, %v3739_v35  ;;  %v4381_v5 = vld [vmem:[%s9502_s6 + $0x788] sm:$0xff]  ;;  %v4380_v24 = vld [vmem:[%s9502_s6 + $0x780] sm:$0xff]  ;;  %v639_v35 = vld [vmem:[%s9607_s10 + $0xc78] sm:$0xff]  ;;  %v3763_v47 = vmul.f32 %v13209_v12, %v643_v38 }
 0x699   : > { %7660 = vst [vmem:[%s9625_s19 + $0xc80] sm:$0xff] %v6880_v53  ;;  %v659_v53 = vld [vmem:[%s9607_s10 + $0xd18] sm:$0xff] }
 0x69a   : > { %7661 = vst [vmem:[%s9625_s19 + $0xc88] sm:$0xff] %v6881_v58  ;;  %v638_v58 = vld [vmem:[%s9607_s10 + $0xc70] sm:$0xff] }
 0x69b   : > { %7640 = vst [vmem:[%s9625_s19 + $0xbe0] sm:$0xff] %v6860_v45 }
 0x69c   : > { %7641 = vst [vmem:[%s9625_s19 + $0xbe8] sm:$0xff] %v6861_v16  ;;  %5712 = vperm.xlu2 %8236, %v4376_v50   ;;  %5707 = vperm.xlu1 %8235, %v4375_v60   ;;  %v636_v16 = vld [vmem:[%s9607_s10 + $0xc60] sm:$0xff]  ;;  %v3779_v50 = vmul.f32 %v13204_v2, %v659_v53  ;;  %v13205_v60 = vld [vmem:[#allocation158_spill] sm:$0xff] }
 0x69d   : > { %7638 = vst [vmem:[%s9625_s19 + $0xbd0] sm:$0xff] %v6858_v41  ;;  %5702 = vperm.xlu0 %8234, %v4374_v40   ;;  %v3778_v41 = vmul.f32 %v13204_v2, %v658_v57  ;;  %v3758_v27 = vmul.f32 %v13205_v60, %v638_v58  ;;  %v3756_v9 = vmul.f32 %v13206_v0, %v636_v16  ;;  %v13210_v57 = vld [vmem:[#allocation163_spill] sm:$0xff]  ;;  %v649_v58 = vld [vmem:[%s9607_s10 + $0xcc8] sm:$0xff]  ;;  %v13212_v16 = vld [vmem:[#allocation165_spill] sm:$0xff] }
 0x69e   : > { %7639 = vst [vmem:[%s9625_s19 + $0xbd8] sm:$0xff] %v6859_v31  ;;  %v5548_v59 = vpop.permute.xlu2 %5547  ;;  %v5498_v17 = vpop.permute.xlu1 %5497  ;;  %v3759_v31 = vmul.f32 %v13205_v60, %v639_v35  ;;  %v3769_v63 = vmul.f32 %v13212_v16, %v649_v58  ;;  %v4391_v0 = vld [vmem:[%s9502_s6 + $0x7d8] sm:$0xff] }
 0x69f   : > { %v6886_v36 = vadd.f32 %v5548_v59, %v3766_v51  ;;  %v6887_v1 = vadd.f32 %v5548_v59, %v3767_v28  ;;  %v6866_v19 = vadd.f32 %v5498_v17, %v3746_v42  ;;  %v5493_v3 = vpop.permute.xlu0 %5492  ;;  %v6867_v18 = vadd.f32 %v5498_v17, %v3747_v32  ;;  %v664_v59 = vld [vmem:[%s9607_s10 + $0xd40] sm:$0xff] }
 0x6a0   : > { %v6864_v43 = vadd.f32 %v5493_v3, %v3744_v26  ;;  %v6865_v61 = vadd.f32 %v5493_v3, %v3745_v44  ;;  %v4384_v26 = vld [vmem:[%s9502_s6 + $0x7a0] sm:$0xff]  ;;  %v4383_v3 = vld [vmem:[%s9502_s6 + $0x798] sm:$0xff]  ;;  %v645_v44 = vld [vmem:[%s9607_s10 + $0xca8] sm:$0xff] }
 0x6a1   : > { %7666 = vst [vmem:[%s9625_s19 + $0xcb0] sm:$0xff] %v6886_v36  ;;  %v665_v36 = vld [vmem:[%s9607_s10 + $0xd48] sm:$0xff] }
 0x6a2   : > { %7667 = vst [vmem:[%s9625_s19 + $0xcb8] sm:$0xff] %v6887_v1  ;;  %v644_v1 = vld [vmem:[%s9607_s10 + $0xca0] sm:$0xff] }
 0x6a3   : > { %7646 = vst [vmem:[%s9625_s19 + $0xc10] sm:$0xff] %v6866_v19 }
 0x6a4   : > { %7647 = vst [vmem:[%s9625_s19 + $0xc18] sm:$0xff] %v6867_v18  ;;  %5727 = vperm.xlu2 %8236, %v4379_v14   ;;  %5722 = vperm.xlu1 %8235, %v4378_v8   ;;  %v642_v18 = vld [vmem:[%s9607_s10 + $0xc90] sm:$0xff]  ;;  %v3785_v14 = vmul.f32 %v13207_v29, %v665_v36  ;;  %v13208_v8 = vld [vmem:[#allocation161_spill] sm:$0xff] }
 0x6a5   : > { %7644 = vst [vmem:[%s9625_s19 + $0xc00] sm:$0xff] %v6864_v43  ;;  %5717 = vperm.xlu0 %8234, %v4377_v4   ;;  %v3784_v43 = vmul.f32 %v13207_v29, %v664_v59  ;;  %v3764_v21 = vmul.f32 %v13208_v8, %v644_v1  ;;  %v3762_v55 = vmul.f32 %v13209_v12, %v642_v18  ;;  %v13213_v59 = vld [vmem:[#allocation166_spill] sm:$0xff]  ;;  %v655_v1 = vld [vmem:[%s9607_s10 + $0xcf8] sm:$0xff]  ;;  %v4394_v12 = vld [vmem:[%s9502_s6 + $0x7f0] sm:$0xff] }
 0x6a6   : > { %7645 = vst [vmem:[%s9625_s19 + $0xc08] sm:$0xff] %v6865_v61  ;;  %v5563_v49 = vpop.permute.xlu2 %5562  ;;  %v5513_v52 = vpop.permute.xlu1 %5512  ;;  %v3765_v61 = vmul.f32 %v13208_v8, %v645_v44  ;;  %v13215_v18 = vld [vmem:[#allocation168_spill] sm:$0xff] }
 0x6a7   : > { %v6892_v13 = vadd.f32 %v5563_v49, %v3772_v22  ;;  %v6893_v39 = vadd.f32 %v5563_v49, %v3773_v48  ;;  %v6872_v37 = vadd.f32 %v5513_v52, %v3752_v11  ;;  %v5508_v46 = vpop.permute.xlu0 %5507  ;;  %v6873_v15 = vadd.f32 %v5513_v52, %v3753_v54  ;;  %v670_v49 = vld [vmem:[%s9607_s10 + $0xd70] sm:$0xff] }
 0x6a8   : > { %v6870_v23 = vadd.f32 %v5508_v46, %v3750_v34  ;;  %v6871_v45 = vadd.f32 %v5508_v46, %v3751_v6  ;;  %v4387_v34 = vld [vmem:[%s9502_s6 + $0x7b8] sm:$0xff]  ;;  %v4386_v46 = vld [vmem:[%s9502_s6 + $0x7b0] sm:$0xff]  ;;  %v3775_v38 = vmul.f32 %v13215_v18, %v655_v1 }
 0x6a9   : > { %7672 = vst [vmem:[%s9625_s19 + $0xce0] sm:$0xff] %v6892_v13  ;;  %v671_v13 = vld [vmem:[%s9607_s10 + $0xd78] sm:$0xff] }
 0x6aa   : > { %7673 = vst [vmem:[%s9625_s19 + $0xce8] sm:$0xff] %v6893_v39  ;;  %v650_v39 = vld [vmem:[%s9607_s10 + $0xcd0] sm:$0xff]  ;;  %v651_v6 = vld [vmem:[%s9607_s10 + $0xcd8] sm:$0xff] }
 0x6ab   : > { %7652 = vst [vmem:[%s9625_s19 + $0xc40] sm:$0xff] %v6872_v37 }
 0x6ac   : > { %7653 = vst [vmem:[%s9625_s19 + $0xc48] sm:$0xff] %v6873_v15  ;;  %5742 = vperm.xlu2 %8236, %v4382_v20   ;;  %5737 = vperm.xlu1 %8235, %v4381_v5   ;;  %v648_v15 = vld [vmem:[%s9607_s10 + $0xcc0] sm:$0xff]  ;;  %v3791_v20 = vmul.f32 %v13210_v57, %v671_v13  ;;  %v13211_v5 = vld [vmem:[#allocation164_spill] sm:$0xff] }
 0x6ad   : > { %7650 = vst [vmem:[%s9625_s19 + $0xc30] sm:$0xff] %v6870_v23  ;;  %5732 = vperm.xlu0 %8234, %v4380_v24   ;;  %v3790_v23 = vmul.f32 %v13210_v57, %v670_v49  ;;  %v3770_v53 = vmul.f32 %v13211_v5, %v650_v39  ;;  %v3768_v2 = vmul.f32 %v13212_v16, %v648_v15  ;;  %v13216_v49 = vld [vmem:[#allocation169_spill] sm:$0xff]  ;;  %v661_v39 = vld [vmem:[%s9607_s10 + $0xd28] sm:$0xff]  ;;  %v13218_v15 = vld [vmem:[#allocation171_spill] sm:$0xff] }
 0x6ae   : > { %7651 = vst [vmem:[%s9625_s19 + $0xc38] sm:$0xff] %v6871_v45  ;;  %v5578_v40 = vpop.permute.xlu2 %5577  ;;  %v5528_v25 = vpop.permute.xlu1 %5527  ;;  %v3771_v45 = vmul.f32 %v13211_v5, %v651_v6  ;;  %v3781_v58 = vmul.f32 %v13218_v15, %v661_v39  ;;  %v4397_v16 = vld [vmem:[%s9502_s6 + $0x808] sm:$0xff] }
 0x6af   : > { %v6898_v51 = vadd.f32 %v5578_v40, %v3778_v41  ;;  %v6899_v28 = vadd.f32 %v5578_v40, %v3779_v50  ;;  %v6878_v56 = vadd.f32 %v5528_v25, %v3758_v27  ;;  %v5523_v42 = vpop.permute.xlu0 %5522  ;;  %v6879_v32 = vadd.f32 %v5528_v25, %v3759_v31  ;;  %v676_v40 = vld [vmem:[%s9607_s10 + $0xda0] sm:$0xff] }
 0x6b0   : > { %v6876_v17 = vadd.f32 %v5523_v42, %v3756_v9  ;;  %v6877_v19 = vadd.f32 %v5523_v42, %v3757_v30  ;;  %v4390_v9 = vld [vmem:[%s9502_s6 + $0x7d0] sm:$0xff]  ;;  %v4389_v42 = vld [vmem:[%s9502_s6 + $0x7c8] sm:$0xff] }
 0x6b1   : > { %7678 = vst [vmem:[%s9625_s19 + $0xd10] sm:$0xff] %v6898_v51  ;;  %v677_v51 = vld [vmem:[%s9607_s10 + $0xda8] sm:$0xff] }
 0x6b2   : > { %7679 = vst [vmem:[%s9625_s19 + $0xd18] sm:$0xff] %v6899_v28  ;;  %v656_v28 = vld [vmem:[%s9607_s10 + $0xd00] sm:$0xff]  ;;  %v657_v30 = vld [vmem:[%s9607_s10 + $0xd08] sm:$0xff] }
 0x6b3   : > { %7658 = vst [vmem:[%s9625_s19 + $0xc70] sm:$0xff] %v6878_v56 }
 0x6b4   : > { %7659 = vst [vmem:[%s9625_s19 + $0xc78] sm:$0xff] %v6879_v32  ;;  %5757 = vperm.xlu2 %8236, %v4385_v10   ;;  %5752 = vperm.xlu1 %8235, %v4384_v26   ;;  %v654_v32 = vld [vmem:[%s9607_s10 + $0xcf0] sm:$0xff]  ;;  %v3797_v10 = vmul.f32 %v13213_v59, %v677_v51 }
 0x6b5   : > { %7656 = vst [vmem:[%s9625_s19 + $0xc60] sm:$0xff] %v6876_v17  ;;  %5747 = vperm.xlu0 %8234, %v4383_v3   ;;  %v3796_v17 = vmul.f32 %v13213_v59, %v676_v40  ;;  %v13214_v26 = vld [vmem:[#allocation167_spill] sm:$0xff]  ;;  %v3774_v29 = vmul.f32 %v13215_v18, %v654_v32  ;;  %v13219_v40 = vld [vmem:[#allocation172_spill] sm:$0xff]  ;;  %v13221_v32 = vld [vmem:[#allocation174_spill] sm:$0xff] }
 0x6b6   : > { %7657 = vst [vmem:[%s9625_s19 + $0xc68] sm:$0xff] %v6877_v19  ;;  %v5593_v4 = vpop.permute.xlu2 %5592  ;;  %v5543_v7 = vpop.permute.xlu1 %5542  ;;  %v3776_v36 = vmul.f32 %v13214_v26, %v656_v28  ;;  %v3777_v19 = vmul.f32 %v13214_v26, %v657_v30  ;;  %v667_v28 = vld [vmem:[%s9607_s10 + $0xd58] sm:$0xff]  ;;  %v4400_v18 = vld [vmem:[%s9502_s6 + $0x820] sm:$0xff] }
 0x6b7   : > { %v6904_v22 = vadd.f32 %v5593_v4, %v3784_v43  ;;  %v6905_v48 = vadd.f32 %v5593_v4, %v3785_v14  ;;  %v6884_v33 = vadd.f32 %v5543_v7, %v3764_v21  ;;  %v5538_v11 = vpop.permute.xlu0 %5537  ;;  %v6885_v54 = vadd.f32 %v5543_v7, %v3765_v61  ;;  %v682_v4 = vld [vmem:[%s9607_s10 + $0xdd0] sm:$0xff] }
 0x6b8   : > { %v6882_v52 = vadd.f32 %v5538_v11, %v3762_v55  ;;  %v6883_v37 = vadd.f32 %v5538_v11, %v3763_v47  ;;  %v4393_v55 = vld [vmem:[%s9502_s6 + $0x7e8] sm:$0xff]  ;;  %v4392_v11 = vld [vmem:[%s9502_s6 + $0x7e0] sm:$0xff]  ;;  %v663_v47 = vld [vmem:[%s9607_s10 + $0xd38] sm:$0xff]  ;;  %v3787_v1 = vmul.f32 %v13221_v32, %v667_v28 }
 0x6b9   : > { %7684 = vst [vmem:[%s9625_s19 + $0xd40] sm:$0xff] %v6904_v22  ;;  %v683_v22 = vld [vmem:[%s9607_s10 + $0xdd8] sm:$0xff] }
 0x6ba   : > { %7685 = vst [vmem:[%s9625_s19 + $0xd48] sm:$0xff] %v6905_v48  ;;  %v662_v48 = vld [vmem:[%s9607_s10 + $0xd30] sm:$0xff] }
 0x6bb   : > { %7664 = vst [vmem:[%s9625_s19 + $0xca0] sm:$0xff] %v6884_v33 }
 0x6bc   : > { %7665 = vst [vmem:[%s9625_s19 + $0xca8] sm:$0xff] %v6885_v54  ;;  %5772 = vperm.xlu2 %8236, %v4388_v62   ;;  %5767 = vperm.xlu1 %8235, %v4387_v34   ;;  %v660_v54 = vld [vmem:[%s9607_s10 + $0xd20] sm:$0xff]  ;;  %v3803_v62 = vmul.f32 %v13216_v49, %v683_v22  ;;  %v13217_v34 = vld [vmem:[#allocation170_spill] sm:$0xff] }
 0x6bd   : > { %7662 = vst [vmem:[%s9625_s19 + $0xc90] sm:$0xff] %v6882_v52  ;;  %5762 = vperm.xlu0 %8234, %v4386_v46   ;;  %v3802_v52 = vmul.f32 %v13216_v49, %v682_v4  ;;  %v3782_v13 = vmul.f32 %v13217_v34, %v662_v48  ;;  %v3780_v57 = vmul.f32 %v13218_v15, %v660_v54  ;;  %v13222_v4 = vld [vmem:[#allocation175_spill] sm:$0xff]  ;;  %v673_v48 = vld [vmem:[%s9607_s10 + $0xd88] sm:$0xff]  ;;  %v13224_v54 = vld [vmem:[#allocation177_spill] sm:$0xff] }
 0x6be   : > { %7663 = vst [vmem:[%s9625_s19 + $0xc98] sm:$0xff] %v6883_v37  ;;  %v5608_v24 = vpop.permute.xlu2 %5607  ;;  %v5558_v35 = vpop.permute.xlu1 %5557  ;;  %v3783_v37 = vmul.f32 %v13217_v34, %v663_v47  ;;  %v3793_v39 = vmul.f32 %v13224_v54, %v673_v48  ;;  %v4403_v15 = vld [vmem:[%s9502_s6 + $0x838] sm:$0xff] }
 0x6bf   : > { %v6910_v41 = vadd.f32 %v5608_v24, %v3790_v23  ;;  %v6911_v50 = vadd.f32 %v5608_v24, %v3791_v20  ;;  %v6890_v60 = vadd.f32 %v5558_v35, %v3770_v53  ;;  %v5553_v27 = vpop.permute.xlu0 %5552  ;;  %v6891_v31 = vadd.f32 %v5558_v35, %v3771_v45  ;;  %v688_v24 = vld [vmem:[%s9607_s10 + $0xe00] sm:$0xff] }
 0x6c0   : > { %v6888_v25 = vadd.f32 %v5553_v27, %v3768_v2  ;;  %v6889_v56 = vadd.f32 %v5553_v27, %v3769_v63  ;;  %v4396_v2 = vld [vmem:[%s9502_s6 + $0x800] sm:$0xff]  ;;  %v4395_v27 = vld [vmem:[%s9502_s6 + $0x7f8] sm:$0xff]  ;;  %v669_v63 = vld [vmem:[%s9607_s10 + $0xd68] sm:$0xff] }
 0x6c1   : > { %7690 = vst [vmem:[%s9625_s19 + $0xd70] sm:$0xff] %v6910_v41  ;;  %v689_v41 = vld [vmem:[%s9607_s10 + $0xe08] sm:$0xff] }
 0x6c2   : > { %7691 = vst [vmem:[%s9625_s19 + $0xd78] sm:$0xff] %v6911_v50  ;;  %v668_v50 = vld [vmem:[%s9607_s10 + $0xd60] sm:$0xff] }
 0x6c3   : > { %7670 = vst [vmem:[%s9625_s19 + $0xcd0] sm:$0xff] %v6890_v60 }
 0x6c4   : > { %7671 = vst [vmem:[%s9625_s19 + $0xcd8] sm:$0xff] %v6891_v31  ;;  %5787 = vperm.xlu2 %8236, %v4391_v0   ;;  %5782 = vperm.xlu1 %8235, %v4390_v9   ;;  %v666_v31 = vld [vmem:[%s9607_s10 + $0xd50] sm:$0xff]  ;;  %v3809_v0 = vmul.f32 %v13219_v40, %v689_v41  ;;  %v13220_v9 = vld [vmem:[#allocation173_spill] sm:$0xff] }
 0x6c5   : > { %7668 = vst [vmem:[%s9625_s19 + $0xcc0] sm:$0xff] %v6888_v25  ;;  %5777 = vperm.xlu0 %8234, %v4389_v42   ;;  %v3808_v25 = vmul.f32 %v13219_v40, %v688_v24  ;;  %v3788_v51 = vmul.f32 %v13220_v9, %v668_v50  ;;  %v3786_v59 = vmul.f32 %v13221_v32, %v666_v31  ;;  %v13225_v24 = vld [vmem:[#allocation178_spill] sm:$0xff]  ;;  %v679_v50 = vld [vmem:[%s9607_s10 + $0xdb8] sm:$0xff]  ;;  %v4406_v32 = vld [vmem:[%s9502_s6 + $0x850] sm:$0xff] }
 0x6c6   : > { %7669 = vst [vmem:[%s9625_s19 + $0xcc8] sm:$0xff] %v6889_v56  ;;  %v5623_v3 = vpop.permute.xlu2 %5622  ;;  %v5573_v44 = vpop.permute.xlu1 %5572  ;;  %v3789_v56 = vmul.f32 %v13220_v9, %v669_v63  ;;  %v13227_v31 = vld [vmem:[#allocation180_spill] sm:$0xff] }
 0x6c7   : > { %v6916_v43 = vadd.f32 %v5623_v3, %v3796_v17  ;;  %v6917_v14 = vadd.f32 %v5623_v3, %v3797_v10  ;;  %v6896_v8 = vadd.f32 %v5573_v44, %v3776_v36  ;;  %v5568_v21 = vpop.permute.xlu0 %5567  ;;  %v6897_v61 = vadd.f32 %v5573_v44, %v3777_v19  ;;  %v694_v3 = vld [vmem:[%s9607_s10 + $0xe30] sm:$0xff] }
 0x6c8   : > { %v6894_v7 = vadd.f32 %v5568_v21, %v3774_v29  ;;  %v6895_v33 = vadd.f32 %v5568_v21, %v3775_v38  ;;  %v4399_v29 = vld [vmem:[%s9502_s6 + $0x818] sm:$0xff]  ;;  %v4398_v21 = vld [vmem:[%s9502_s6 + $0x810] sm:$0xff]  ;;  %v3799_v28 = vmul.f32 %v13227_v31, %v679_v50 }
 0x6c9   : > { %7696 = vst [vmem:[%s9625_s19 + $0xda0] sm:$0xff] %v6916_v43  ;;  %v695_v43 = vld [vmem:[%s9607_s10 + $0xe38] sm:$0xff] }
 0x6ca   : > { %7697 = vst [vmem:[%s9625_s19 + $0xda8] sm:$0xff] %v6917_v14  ;;  %v674_v14 = vld [vmem:[%s9607_s10 + $0xd90] sm:$0xff]  ;;  %v675_v38 = vld [vmem:[%s9607_s10 + $0xd98] sm:$0xff] }
 0x6cb   : > { %7676 = vst [vmem:[%s9625_s19 + $0xd00] sm:$0xff] %v6896_v8 }
 0x6cc   : > { %7677 = vst [vmem:[%s9625_s19 + $0xd08] sm:$0xff] %v6897_v61  ;;  %5802 = vperm.xlu2 %8236, %v4394_v12   ;;  %5797 = vperm.xlu1 %8235, %v4393_v55   ;;  %v672_v61 = vld [vmem:[%s9607_s10 + $0xd80] sm:$0xff]  ;;  %v3815_v12 = vmul.f32 %v13222_v4, %v695_v43  ;;  %v13223_v55 = vld [vmem:[#allocation176_spill] sm:$0xff] }
 0x6cd   : > { %7674 = vst [vmem:[%s9625_s19 + $0xcf0] sm:$0xff] %v6894_v7  ;;  %5792 = vperm.xlu0 %8234, %v4392_v11   ;;  %v3814_v7 = vmul.f32 %v13222_v4, %v694_v3  ;;  %v3794_v22 = vmul.f32 %v13223_v55, %v674_v14  ;;  %v3792_v49 = vmul.f32 %v13224_v54, %v672_v61  ;;  %v13228_v3 = vld [vmem:[#allocation181_spill] sm:$0xff]  ;;  %v685_v14 = vld [vmem:[%s9607_s10 + $0xde8] sm:$0xff]  ;;  %v13230_v61 = vld [vmem:[#allocation183_spill] sm:$0xff] }
 0x6ce   : > { %7675 = vst [vmem:[%s9625_s19 + $0xcf8] sm:$0xff] %v6895_v33  ;;  %v5638_v46 = vpop.permute.xlu2 %5637  ;;  %v5588_v6 = vpop.permute.xlu1 %5587  ;;  %v3795_v33 = vmul.f32 %v13223_v55, %v675_v38  ;;  %v3805_v48 = vmul.f32 %v13230_v61, %v685_v14  ;;  %v4409_v54 = vld [vmem:[%s9502_s6 + $0x868] sm:$0xff] }
 0x6cf   : > { %v6922_v23 = vadd.f32 %v5638_v46, %v3802_v52  ;;  %v6923_v20 = vadd.f32 %v5638_v46, %v3803_v62  ;;  %v6902_v5 = vadd.f32 %v5588_v6, %v3782_v13  ;;  %v5583_v53 = vpop.permute.xlu0 %5582  ;;  %v6903_v45 = vadd.f32 %v5588_v6, %v3783_v37  ;;  %v700_v46 = vld [vmem:[%s9607_s10 + $0xe60] sm:$0xff] }
 0x6d0   : > { %v6900_v35 = vadd.f32 %v5583_v53, %v3780_v57  ;;  %v6901_v60 = vadd.f32 %v5583_v53, %v3781_v58  ;;  %v4402_v57 = vld [vmem:[%s9502_s6 + $0x830] sm:$0xff]  ;;  %v4401_v53 = vld [vmem:[%s9502_s6 + $0x828] sm:$0xff] }
 0x6d1   : > { %7702 = vst [vmem:[%s9625_s19 + $0xdd0] sm:$0xff] %v6922_v23  ;;  %v701_v23 = vld [vmem:[%s9607_s10 + $0xe68] sm:$0xff] }
 0x6d2   : > { %7703 = vst [vmem:[%s9625_s19 + $0xdd8] sm:$0xff] %v6923_v20  ;;  %v680_v20 = vld [vmem:[%s9607_s10 + $0xdc0] sm:$0xff]  ;;  %v681_v58 = vld [vmem:[%s9607_s10 + $0xdc8] sm:$0xff] }
 0x6d3   : > { %7682 = vst [vmem:[%s9625_s19 + $0xd30] sm:$0xff] %v6902_v5 }
 0x6d4   : > { %7683 = vst [vmem:[%s9625_s19 + $0xd38] sm:$0xff] %v6903_v45  ;;  %5817 = vperm.xlu2 %8236, %v4397_v16   ;;  %5812 = vperm.xlu1 %8235, %v4396_v2   ;;  %v678_v45 = vld [vmem:[%s9607_s10 + $0xdb0] sm:$0xff]  ;;  %v3821_v16 = vmul.f32 %v13225_v24, %v701_v23 }
 0x6d5   : > { %7680 = vst [vmem:[%s9625_s19 + $0xd20] sm:$0xff] %v6900_v35  ;;  %5807 = vperm.xlu0 %8234, %v4395_v27   ;;  %v3820_v35 = vmul.f32 %v13225_v24, %v700_v46  ;;  %v13226_v2 = vld [vmem:[#allocation179_spill] sm:$0xff]  ;;  %v3798_v40 = vmul.f32 %v13227_v31, %v678_v45  ;;  %v13231_v46 = vld [vmem:[#allocation184_spill] sm:$0xff]  ;;  %v13233_v45 = vld [vmem:[#allocation186_spill] sm:$0xff] }
 0x6d6   : > { %7681 = vst [vmem:[%s9625_s19 + $0xd28] sm:$0xff] %v6901_v60  ;;  %v5653_v42 = vpop.permute.xlu2 %5652  ;;  %v5603_v30 = vpop.permute.xlu1 %5602  ;;  %v3800_v41 = vmul.f32 %v13226_v2, %v680_v20  ;;  %v3801_v60 = vmul.f32 %v13226_v2, %v681_v58  ;;  %v691_v20 = vld [vmem:[%s9607_s10 + $0xe18] sm:$0xff]  ;;  %v4412_v31 = vld [vmem:[%s9502_s6 + $0x880] sm:$0xff] }
 0x6d7   : > { %v6928_v17 = vadd.f32 %v5653_v42, %v3808_v25  ;;  %v6929_v10 = vadd.f32 %v5653_v42, %v3809_v0  ;;  %v6908_v26 = vadd.f32 %v5603_v30, %v3788_v51  ;;  %v5598_v36 = vpop.permute.xlu0 %5597  ;;  %v6909_v19 = vadd.f32 %v5603_v30, %v3789_v56  ;;  %v706_v42 = vld [vmem:[%s9607_s10 + $0xe90] sm:$0xff] }
 0x6d8   : > { %v6906_v44 = vadd.f32 %v5598_v36, %v3786_v59  ;;  %v6907_v8 = vadd.f32 %v5598_v36, %v3787_v1  ;;  %v4405_v59 = vld [vmem:[%s9502_s6 + $0x848] sm:$0xff]  ;;  %v4404_v36 = vld [vmem:[%s9502_s6 + $0x840] sm:$0xff]  ;;  %v687_v1 = vld [vmem:[%s9607_s10 + $0xdf8] sm:$0xff]  ;;  %v3811_v50 = vmul.f32 %v13233_v45, %v691_v20 }
 0x6d9   : > { %7708 = vst [vmem:[%s9625_s19 + $0xe00] sm:$0xff] %v6928_v17  ;;  %v707_v17 = vld [vmem:[%s9607_s10 + $0xe98] sm:$0xff] }
 0x6da   : > { %7709 = vst [vmem:[%s9625_s19 + $0xe08] sm:$0xff] %v6929_v10  ;;  %v686_v10 = vld [vmem:[%s9607_s10 + $0xdf0] sm:$0xff] }
 0x6db   : > { %7688 = vst [vmem:[%s9625_s19 + $0xd60] sm:$0xff] %v6908_v26 }
 0x6dc   : > { %7689 = vst [vmem:[%s9625_s19 + $0xd68] sm:$0xff] %v6909_v19  ;;  %5832 = vperm.xlu2 %8236, %v4400_v18   ;;  %5827 = vperm.xlu1 %8235, %v4399_v29   ;;  %v684_v19 = vld [vmem:[%s9607_s10 + $0xde0] sm:$0xff]  ;;  %v3827_v18 = vmul.f32 %v13228_v3, %v707_v17  ;;  %v13229_v29 = vld [vmem:[#allocation182_spill] sm:$0xff] }
 0x6dd   : > { %7686 = vst [vmem:[%s9625_s19 + $0xd50] sm:$0xff] %v6906_v44  ;;  %5822 = vperm.xlu0 %8234, %v4398_v21   ;;  %v3826_v44 = vmul.f32 %v13228_v3, %v706_v42  ;;  %v3806_v43 = vmul.f32 %v13229_v29, %v686_v10  ;;  %v3804_v4 = vmul.f32 %v13230_v61, %v684_v19  ;;  %v13234_v42 = vld [vmem:[#allocation187_spill] sm:$0xff]  ;;  %v697_v10 = vld [vmem:[%s9607_s10 + $0xe48] sm:$0xff]  ;;  %v13236_v19 = vld [vmem:[#allocation189_spill] sm:$0xff] }
 0x6de   : > { %7687 = vst [vmem:[%s9625_s19 + $0xd58] sm:$0xff] %v6907_v8  ;;  %v5668_v11 = vpop.permute.xlu2 %5667  ;;  %v5618_v47 = vpop.permute.xlu1 %5617  ;;  %v3807_v8 = vmul.f32 %v13229_v29, %v687_v1  ;;  %v3817_v14 = vmul.f32 %v13236_v19, %v697_v10  ;;  %v4415_v61 = vld [vmem:[%s9502_s6 + $0x898] sm:$0xff] }
 0x6df   : > { %v6934_v52 = vadd.f32 %v5668_v11, %v3814_v7  ;;  %v6935_v62 = vadd.f32 %v5668_v11, %v3815_v12  ;;  %v6914_v34 = vadd.f32 %v5618_v47, %v3794_v22  ;;  %v5613_v13 = vpop.permute.xlu0 %5612  ;;  %v6915_v37 = vadd.f32 %v5618_v47, %v3795_v33  ;;  %v712_v11 = vld [vmem:[%s9607_s10 + $0xec0] sm:$0xff] }
 0x6e0   : > { %v6912_v6 = vadd.f32 %v5613_v13, %v3792_v49  ;;  %v6913_v5 = vadd.f32 %v5613_v13, %v3793_v39  ;;  %v4408_v49 = vld [vmem:[%s9502_s6 + $0x860] sm:$0xff]  ;;  %v4407_v13 = vld [vmem:[%s9502_s6 + $0x858] sm:$0xff]  ;;  %v693_v39 = vld [vmem:[%s9607_s10 + $0xe28] sm:$0xff] }
 0x6e1   : > { %7714 = vst [vmem:[%s9625_s19 + $0xe30] sm:$0xff] %v6934_v52  ;;  %v713_v52 = vld [vmem:[%s9607_s10 + $0xec8] sm:$0xff] }
 0x6e2   : > { %7715 = vst [vmem:[%s9625_s19 + $0xe38] sm:$0xff] %v6935_v62  ;;  %v692_v62 = vld [vmem:[%s9607_s10 + $0xe20] sm:$0xff] }
 0x6e3   : > { %7694 = vst [vmem:[%s9625_s19 + $0xd90] sm:$0xff] %v6914_v34 }
 0x6e4   : > { %7695 = vst [vmem:[%s9625_s19 + $0xd98] sm:$0xff] %v6915_v37  ;;  %5847 = vperm.xlu2 %8236, %v4403_v15   ;;  %5842 = vperm.xlu1 %8235, %v4402_v57   ;;  %v690_v37 = vld [vmem:[%s9607_s10 + $0xe10] sm:$0xff]  ;;  %v3833_v15 = vmul.f32 %v13231_v46, %v713_v52  ;;  %v13232_v57 = vld [vmem:[#allocation185_spill] sm:$0xff] }
 0x6e5   : > { %7692 = vst [vmem:[%s9625_s19 + $0xd80] sm:$0xff] %v6912_v6  ;;  %5837 = vperm.xlu0 %8234, %v4401_v53   ;;  %v3832_v6 = vmul.f32 %v13231_v46, %v712_v11  ;;  %v3812_v23 = vmul.f32 %v13232_v57, %v692_v62  ;;  %v3810_v24 = vmul.f32 %v13233_v45, %v690_v37  ;;  %v13237_v11 = vld [vmem:[#allocation190_spill] sm:$0xff]  ;;  %v703_v62 = vld [vmem:[%s9607_s10 + $0xe78] sm:$0xff]  ;;  %v4418_v45 = vld [vmem:[%s9502_s6 + $0x8b0] sm:$0xff] }
 0x6e6   : > { %7693 = vst [vmem:[%s9625_s19 + $0xd88] sm:$0xff] %v6913_v5  ;;  %v5683_v27 = vpop.permute.xlu2 %5682  ;;  %v5633_v63 = vpop.permute.xlu1 %5632  ;;  %v3813_v5 = vmul.f32 %v13232_v57, %v693_v39  ;;  %v13239_v37 = vld [vmem:[#allocation192_spill] sm:$0xff] }
 0x6e7   : > { %v6940_v25 = vadd.f32 %v5683_v27, %v3820_v35  ;;  %v6941_v0 = vadd.f32 %v5683_v27, %v3821_v16  ;;  %v6920_v9 = vadd.f32 %v5633_v63, %v3800_v41  ;;  %v5628_v51 = vpop.permute.xlu0 %5627  ;;  %v6921_v56 = vadd.f32 %v5633_v63, %v3801_v60  ;;  %v718_v27 = vld [vmem:[%s9607_s10 + $0xef0] sm:$0xff] }
 0x6e8   : > { %v6918_v30 = vadd.f32 %v5628_v51, %v3798_v40  ;;  %v6919_v26 = vadd.f32 %v5628_v51, %v3799_v28  ;;  %v4411_v40 = vld [vmem:[%s9502_s6 + $0x878] sm:$0xff]  ;;  %v4410_v51 = vld [vmem:[%s9502_s6 + $0x870] sm:$0xff]  ;;  %v3823_v20 = vmul.f32 %v13239_v37, %v703_v62 }
 0x6e9   : > { %7720 = vst [vmem:[%s9625_s19 + $0xe60] sm:$0xff] %v6940_v25  ;;  %v719_v25 = vld [vmem:[%s9607_s10 + $0xef8] sm:$0xff] }
 0x6ea   : > { %7721 = vst [vmem:[%s9625_s19 + $0xe68] sm:$0xff] %v6941_v0  ;;  %v698_v0 = vld [vmem:[%s9607_s10 + $0xe50] sm:$0xff]  ;;  %v699_v28 = vld [vmem:[%s9607_s10 + $0xe58] sm:$0xff] }
 0x6eb   : > { %7700 = vst [vmem:[%s9625_s19 + $0xdc0] sm:$0xff] %v6920_v9 }
 0x6ec   : > { %7701 = vst [vmem:[%s9625_s19 + $0xdc8] sm:$0xff] %v6921_v56  ;;  %5862 = vperm.xlu2 %8236, %v4406_v32   ;;  %5857 = vperm.xlu1 %8235, %v4405_v59   ;;  %v696_v56 = vld [vmem:[%s9607_s10 + $0xe40] sm:$0xff]  ;;  %v3839_v32 = vmul.f32 %v13234_v42, %v719_v25  ;;  %v13235_v59 = vld [vmem:[#allocation188_spill] sm:$0xff] }
 0x6ed   : > { %7698 = vst [vmem:[%s9625_s19 + $0xdb0] sm:$0xff] %v6918_v30  ;;  %5852 = vperm.xlu0 %8234, %v4404_v36   ;;  %v3838_v30 = vmul.f32 %v13234_v42, %v718_v27  ;;  %v3818_v17 = vmul.f32 %v13235_v59, %v698_v0  ;;  %v3816_v3 = vmul.f32 %v13236_v19, %v696_v56  ;;  %v13240_v27 = vld [vmem:[#allocation193_spill] sm:$0xff]  ;;  %v709_v0 = vld [vmem:[%s9607_s10 + $0xea8] sm:$0xff]  ;;  %v13242_v56 = vld [vmem:[#allocation195_spill] sm:$0xff] }
 0x6ee   : > { %7699 = vst [vmem:[%s9625_s19 + $0xdb8] sm:$0xff] %v6919_v26  ;;  %v5698_v21 = vpop.permute.xlu2 %5697  ;;  %v5648_v38 = vpop.permute.xlu1 %5647  ;;  %v3819_v26 = vmul.f32 %v13235_v59, %v699_v28  ;;  %v3829_v10 = vmul.f32 %v13242_v56, %v709_v0  ;;  %v4421_v19 = vld [vmem:[%s9502_s6 + $0x8c8] sm:$0xff] }
 0x6ef   : > { %v6946_v7 = vadd.f32 %v5698_v21, %v3826_v44  ;;  %v6947_v12 = vadd.f32 %v5698_v21, %v3827_v18  ;;  %v6926_v55 = vadd.f32 %v5648_v38, %v3806_v43  ;;  %v5643_v22 = vpop.permute.xlu0 %5642  ;;  %v6927_v33 = vadd.f32 %v5648_v38, %v3807_v8  ;;  %v724_v21 = vld [vmem:[%s9607_s10 + $0xf20] sm:$0xff] }
 0x6f0   : > { %v6924_v47 = vadd.f32 %v5643_v22, %v3804_v4  ;;  %v6925_v34 = vadd.f32 %v5643_v22, %v3805_v48  ;;  %v4414_v4 = vld [vmem:[%s9502_s6 + $0x890] sm:$0xff]  ;;  %v4413_v22 = vld [vmem:[%s9502_s6 + $0x888] sm:$0xff] }
 0x6f1   : > { %7726 = vst [vmem:[%s9625_s19 + $0xe90] sm:$0xff] %v6946_v7  ;;  %v725_v7 = vld [vmem:[%s9607_s10 + $0xf28] sm:$0xff] }
 0x6f2   : > { %7727 = vst [vmem:[%s9625_s19 + $0xe98] sm:$0xff] %v6947_v12  ;;  %v704_v12 = vld [vmem:[%s9607_s10 + $0xe80] sm:$0xff]  ;;  %v705_v48 = vld [vmem:[%s9607_s10 + $0xe88] sm:$0xff] }
 0x6f3   : > { %7706 = vst [vmem:[%s9625_s19 + $0xdf0] sm:$0xff] %v6926_v55 }
 0x6f4   : > { %7707 = vst [vmem:[%s9625_s19 + $0xdf8] sm:$0xff] %v6927_v33  ;;  %5877 = vperm.xlu2 %8236, %v4409_v54   ;;  %5872 = vperm.xlu1 %8235, %v4408_v49   ;;  %v702_v33 = vld [vmem:[%s9607_s10 + $0xe70] sm:$0xff]  ;;  %v3845_v54 = vmul.f32 %v13237_v11, %v725_v7 }
 0x6f5   : > { %7704 = vst [vmem:[%s9625_s19 + $0xde0] sm:$0xff] %v6924_v47  ;;  %5867 = vperm.xlu0 %8234, %v4407_v13   ;;  %v3844_v47 = vmul.f32 %v13237_v11, %v724_v21  ;;  %v13238_v49 = vld [vmem:[#allocation191_spill] sm:$0xff]  ;;  %v3822_v46 = vmul.f32 %v13239_v37, %v702_v33  ;;  %v13243_v21 = vld [vmem:[#allocation196_spill] sm:$0xff]  ;;  %v13245_v33 = vld [vmem:[#allocation198_spill] sm:$0xff] }
 0x6f6   : > { %7705 = vst [vmem:[%s9625_s19 + $0xde8] sm:$0xff] %v6925_v34  ;;  %v5713_v53 = vpop.permute.xlu2 %5712  ;;  %v5663_v58 = vpop.permute.xlu1 %5662  ;;  %v3824_v52 = vmul.f32 %v13238_v49, %v704_v12  ;;  %v3825_v34 = vmul.f32 %v13238_v49, %v705_v48  ;;  %v715_v12 = vld [vmem:[%s9607_s10 + $0xed8] sm:$0xff]  ;;  %v4424_v37 = vld [vmem:[%s9502_s6 + $0x8e0] sm:$0xff] }
 0x6f7   : > { %v6952_v35 = vadd.f32 %v5713_v53, %v3832_v6  ;;  %v6953_v16 = vadd.f32 %v5713_v53, %v3833_v15  ;;  %v6932_v2 = vadd.f32 %v5663_v58, %v3812_v23  ;;  %v5658_v41 = vpop.permute.xlu0 %5657  ;;  %v6933_v60 = vadd.f32 %v5663_v58, %v3813_v5  ;;  %v730_v53 = vld [vmem:[%s9607_s10 + $0xf50] sm:$0xff] }
 0x6f8   : > { %v6930_v63 = vadd.f32 %v5658_v41, %v3810_v24  ;;  %v6931_v9 = vadd.f32 %v5658_v41, %v3811_v50  ;;  %v4417_v24 = vld [vmem:[%s9502_s6 + $0x8a8] sm:$0xff]  ;;  %v4416_v41 = vld [vmem:[%s9502_s6 + $0x8a0] sm:$0xff]  ;;  %v711_v50 = vld [vmem:[%s9607_s10 + $0xeb8] sm:$0xff]  ;;  %v3835_v62 = vmul.f32 %v13245_v33, %v715_v12 }
 0x6f9   : > { %7732 = vst [vmem:[%s9625_s19 + $0xec0] sm:$0xff] %v6952_v35  ;;  %v731_v35 = vld [vmem:[%s9607_s10 + $0xf58] sm:$0xff] }
 0x6fa   : > { %7733 = vst [vmem:[%s9625_s19 + $0xec8] sm:$0xff] %v6953_v16  ;;  %v710_v16 = vld [vmem:[%s9607_s10 + $0xeb0] sm:$0xff] }
 0x6fb   : > { %7712 = vst [vmem:[%s9625_s19 + $0xe20] sm:$0xff] %v6932_v2 }
 0x6fc   : > { %7713 = vst [vmem:[%s9625_s19 + $0xe28] sm:$0xff] %v6933_v60  ;;  %5892 = vperm.xlu2 %8236, %v4412_v31   ;;  %5887 = vperm.xlu1 %8235, %v4411_v40   ;;  %v708_v60 = vld [vmem:[%s9607_s10 + $0xea0] sm:$0xff]  ;;  %v3851_v31 = vmul.f32 %v13240_v27, %v731_v35  ;;  %v13241_v40 = vld [vmem:[#allocation194_spill] sm:$0xff] }
 0x6fd   : > { %7710 = vst [vmem:[%s9625_s19 + $0xe10] sm:$0xff] %v6930_v63  ;;  %5882 = vperm.xlu0 %8234, %v4410_v51   ;;  %v3850_v63 = vmul.f32 %v13240_v27, %v730_v53  ;;  %v3830_v25 = vmul.f32 %v13241_v40, %v710_v16  ;;  %v3828_v42 = vmul.f32 %v13242_v56, %v708_v60  ;;  %v13246_v53 = vld [vmem:[#allocation199_spill] sm:$0xff]  ;;  %v721_v16 = vld [vmem:[%s9607_s10 + $0xf08] sm:$0xff]  ;;  %v13248_v60 = vld [vmem:[#allocation201_spill] sm:$0xff] }
 0x6fe   : > { %7711 = vst [vmem:[%s9625_s19 + $0xe18] sm:$0xff] %v6931_v9  ;;  %v5728_v36 = vpop.permute.xlu2 %5727  ;;  %v5678_v1 = vpop.permute.xlu1 %5677  ;;  %v3831_v9 = vmul.f32 %v13241_v40, %v711_v50  ;;  %v3841_v0 = vmul.f32 %v13248_v60, %v721_v16  ;;  %v4427_v56 = vld [vmem:[%s9502_s6 + $0x8f8] sm:$0xff] }
 0x6ff   : > { %v6958_v44 = vadd.f32 %v5728_v36, %v3838_v30  ;;  %v6959_v18 = vadd.f32 %v5728_v36, %v3839_v32  ;;  %v6938_v29 = vadd.f32 %v5678_v1, %v3818_v17  ;;  %v5673_v43 = vpop.permute.xlu0 %5672  ;;  %v6939_v8 = vadd.f32 %v5678_v1, %v3819_v26  ;;  %v736_v36 = vld [vmem:[%s9607_s10 + $0xf80] sm:$0xff] }
 0x700   : > { %v6936_v38 = vadd.f32 %v5673_v43, %v3816_v3  ;;  %v6937_v55 = vadd.f32 %v5673_v43, %v3817_v14  ;;  %v4420_v3 = vld [vmem:[%s9502_s6 + $0x8c0] sm:$0xff]  ;;  %v4419_v43 = vld [vmem:[%s9502_s6 + $0x8b8] sm:$0xff]  ;;  %v717_v14 = vld [vmem:[%s9607_s10 + $0xee8] sm:$0xff] }
 0x701   : > { %7738 = vst [vmem:[%s9625_s19 + $0xef0] sm:$0xff] %v6958_v44  ;;  %v737_v44 = vld [vmem:[%s9607_s10 + $0xf88] sm:$0xff] }
 0x702   : > { %7739 = vst [vmem:[%s9625_s19 + $0xef8] sm:$0xff] %v6959_v18  ;;  %v716_v18 = vld [vmem:[%s9607_s10 + $0xee0] sm:$0xff] }
 0x703   : > { %7718 = vst [vmem:[%s9625_s19 + $0xe50] sm:$0xff] %v6938_v29 }
 0x704   : > { %7719 = vst [vmem:[%s9625_s19 + $0xe58] sm:$0xff] %v6939_v8  ;;  %5907 = vperm.xlu2 %8236, %v4415_v61   ;;  %5902 = vperm.xlu1 %8235, %v4414_v4   ;;  %v714_v8 = vld [vmem:[%s9607_s10 + $0xed0] sm:$0xff]  ;;  %v3857_v61 = vmul.f32 %v13243_v21, %v737_v44  ;;  %v13244_v4 = vld [vmem:[#allocation197_spill] sm:$0xff] }
 0x705   : > { %7716 = vst [vmem:[%s9625_s19 + $0xe40] sm:$0xff] %v6936_v38  ;;  %5897 = vperm.xlu0 %8234, %v4413_v22   ;;  %v3856_v38 = vmul.f32 %v13243_v21, %v736_v36  ;;  %v3836_v7 = vmul.f32 %v13244_v4, %v716_v18  ;;  %v3834_v11 = vmul.f32 %v13245_v33, %v714_v8  ;;  %v13249_v36 = vld [vmem:[#allocation202_spill] sm:$0xff]  ;;  %v727_v18 = vld [vmem:[%s9607_s10 + $0xf38] sm:$0xff]  ;;  %v4430_v33 = vld [vmem:[%s9502_s6 + $0x910] sm:$0xff] }
 0x706   : > { %7717 = vst [vmem:[%s9625_s19 + $0xe48] sm:$0xff] %v6937_v55  ;;  %v5743_v13 = vpop.permute.xlu2 %5742  ;;  %v5693_v39 = vpop.permute.xlu1 %5692  ;;  %v3837_v55 = vmul.f32 %v13244_v4, %v717_v14  ;;  %v13251_v8 = vld [vmem:[#allocation204_spill] sm:$0xff] }
 0x707   : > { %v6964_v6 = vadd.f32 %v5743_v13, %v3844_v47  ;;  %v6965_v15 = vadd.f32 %v5743_v13, %v3845_v54  ;;  %v6944_v57 = vadd.f32 %v5693_v39, %v3824_v52  ;;  %v5688_v23 = vpop.permute.xlu0 %5687  ;;  %v6945_v5 = vadd.f32 %v5693_v39, %v3825_v34  ;;  %v742_v13 = vld [vmem:[%s9607_s10 + $0xfb0] sm:$0xff] }
 0x708   : > { %v6942_v58 = vadd.f32 %v5688_v23, %v3822_v46  ;;  %v6943_v2 = vadd.f32 %v5688_v23, %v3823_v20  ;;  %v4423_v46 = vld [vmem:[%s9502_s6 + $0x8d8] sm:$0xff]  ;;  %v4422_v23 = vld [vmem:[%s9502_s6 + $0x8d0] sm:$0xff]  ;;  %v3847_v12 = vmul.f32 %v13251_v8, %v727_v18 }
 0x709   : > { %7744 = vst [vmem:[%s9625_s19 + $0xf20] sm:$0xff] %v6964_v6  ;;  %v743_v6 = vld [vmem:[%s9607_s10 + $0xfb8] sm:$0xff] }
 0x70a   : > { %7745 = vst [vmem:[%s9625_s19 + $0xf28] sm:$0xff] %v6965_v15  ;;  %v722_v15 = vld [vmem:[%s9607_s10 + $0xf10] sm:$0xff]  ;;  %v723_v20 = vld [vmem:[%s9607_s10 + $0xf18] sm:$0xff] }
 0x70b   : > { %7724 = vst [vmem:[%s9625_s19 + $0xe80] sm:$0xff] %v6944_v57 }
 0x70c   : > { %7725 = vst [vmem:[%s9625_s19 + $0xe88] sm:$0xff] %v6945_v5  ;;  %5922 = vperm.xlu2 %8236, %v4418_v45   ;;  %5917 = vperm.xlu1 %8235, %v4417_v24   ;;  %v720_v5 = vld [vmem:[%s9607_s10 + $0xf00] sm:$0xff]  ;;  %v3863_v45 = vmul.f32 %v13246_v53, %v743_v6  ;;  %v13247_v24 = vld [vmem:[#allocation200_spill] sm:$0xff] }
 0x70d   : > { %7722 = vst [vmem:[%s9625_s19 + $0xe70] sm:$0xff] %v6942_v58  ;;  %5912 = vperm.xlu0 %8234, %v4416_v41   ;;  %v3862_v58 = vmul.f32 %v13246_v53, %v742_v13  ;;  %v3842_v35 = vmul.f32 %v13247_v24, %v722_v15  ;;  %v3840_v27 = vmul.f32 %v13248_v60, %v720_v5  ;;  %v13252_v13 = vld [vmem:[#allocation205_spill] sm:$0xff]  ;;  %v733_v15 = vld [vmem:[%s9607_s10 + $0xf68] sm:$0xff]  ;;  %v13254_v5 = vld [vmem:[#allocation207_spill] sm:$0xff] }
 0x70e   : > { %7723 = vst [vmem:[%s9625_s19 + $0xe78] sm:$0xff] %v6943_v2  ;;  %v5758_v51 = vpop.permute.xlu2 %5757  ;;  %v5708_v28 = vpop.permute.xlu1 %5707  ;;  %v3843_v2 = vmul.f32 %v13247_v24, %v723_v20  ;;  %v3853_v16 = vmul.f32 %v13254_v5, %v733_v15  ;;  %v4433_v60 = vld [vmem:[%s9502_s6 + $0x928] sm:$0xff] }
 0x70f   : > { %v6970_v30 = vadd.f32 %v5758_v51, %v3850_v63  ;;  %v6971_v32 = vadd.f32 %v5758_v51, %v3851_v31  ;;  %v6950_v59 = vadd.f32 %v5708_v28, %v3830_v25  ;;  %v5703_v17 = vpop.permute.xlu0 %5702  ;;  %v6951_v26 = vadd.f32 %v5708_v28, %v3831_v9  ;;  %v748_v51 = vld [vmem:[%s9607_s10 + $0xfe0] sm:$0xff] }
 0x710   : > { %v6948_v1 = vadd.f32 %v5703_v17, %v3828_v42  ;;  %v6949_v29 = vadd.f32 %v5703_v17, %v3829_v10  ;;  %v4426_v42 = vld [vmem:[%s9502_s6 + $0x8f0] sm:$0xff]  ;;  %v4425_v17 = vld [vmem:[%s9502_s6 + $0x8e8] sm:$0xff] }
 0x711   : > { %7750 = vst [vmem:[%s9625_s19 + $0xf50] sm:$0xff] %v6970_v30  ;;  %v749_v30 = vld [vmem:[%s9607_s10 + $0xfe8] sm:$0xff] }
 0x712   : > { %7751 = vst [vmem:[%s9625_s19 + $0xf58] sm:$0xff] %v6971_v32  ;;  %v728_v32 = vld [vmem:[%s9607_s10 + $0xf40] sm:$0xff]  ;;  %v729_v10 = vld [vmem:[%s9607_s10 + $0xf48] sm:$0xff] }
 0x713   : > { %7730 = vst [vmem:[%s9625_s19 + $0xeb0] sm:$0xff] %v6950_v59 }
 0x714   : > { %7731 = vst [vmem:[%s9625_s19 + $0xeb8] sm:$0xff] %v6951_v26  ;;  %5937 = vperm.xlu2 %8236, %v4421_v19   ;;  %5932 = vperm.xlu1 %8235, %v4420_v3   ;;  %v726_v26 = vld [vmem:[%s9607_s10 + $0xf30] sm:$0xff]  ;;  %v3869_v19 = vmul.f32 %v13249_v36, %v749_v30 }
 0x715   : > { %7728 = vst [vmem:[%s9625_s19 + $0xea0] sm:$0xff] %v6948_v1  ;;  %5927 = vperm.xlu0 %8234, %v4419_v43   ;;  %v3868_v1 = vmul.f32 %v13249_v36, %v748_v51  ;;  %v13250_v3 = vld [vmem:[#allocation203_spill] sm:$0xff]  ;;  %v3846_v21 = vmul.f32 %v13251_v8, %v726_v26  ;;  %v13255_v51 = vld [vmem:[#allocation208_spill] sm:$0xff]  ;;  %v13257_v26 = vld [vmem:[#allocation210_spill] sm:$0xff] }
 0x716   : > { %7729 = vst [vmem:[%s9625_s19 + $0xea8] sm:$0xff] %v6949_v29  ;;  %v5773_v22 = vpop.permute.xlu2 %5772  ;;  %v5723_v48 = vpop.permute.xlu1 %5722  ;;  %v3848_v44 = vmul.f32 %v13250_v3, %v728_v32  ;;  %v3849_v29 = vmul.f32 %v13250_v3, %v729_v10  ;;  %v739_v32 = vld [vmem:[%s9607_s10 + $0xf98] sm:$0xff]  ;;  %v4436_v8 = vld [vmem:[%s9502_s6 + $0x940] sm:$0xff] }
 0x717   : > { %v6976_v47 = vadd.f32 %v5773_v22, %v3856_v38  ;;  %v6977_v54 = vadd.f32 %v5773_v22, %v3857_v61  ;;  %v6956_v49 = vadd.f32 %v5723_v48, %v3836_v7  ;;  %v5718_v52 = vpop.permute.xlu0 %5717  ;;  %v6957_v34 = vadd.f32 %v5723_v48, %v3837_v55  ;;  %v754_v22 = vld [vmem:[%s9607_s10 + $0x1010] sm:$0xff] }
 0x718   : > { %v6954_v39 = vadd.f32 %v5718_v52, %v3834_v11  ;;  %v6955_v57 = vadd.f32 %v5718_v52, %v3835_v62  ;;  %v4429_v11 = vld [vmem:[%s9502_s6 + $0x908] sm:$0xff]  ;;  %v4428_v52 = vld [vmem:[%s9502_s6 + $0x900] sm:$0xff]  ;;  %v735_v62 = vld [vmem:[%s9607_s10 + $0xf78] sm:$0xff]  ;;  %v3859_v18 = vmul.f32 %v13257_v26, %v739_v32 }
 0x719   : > { %7756 = vst [vmem:[%s9625_s19 + $0xf80] sm:$0xff] %v6976_v47  ;;  %v755_v47 = vld [vmem:[%s9607_s10 + $0x1018] sm:$0xff] }
 0x71a   : > { %7757 = vst [vmem:[%s9625_s19 + $0xf88] sm:$0xff] %v6977_v54  ;;  %v734_v54 = vld [vmem:[%s9607_s10 + $0xf70] sm:$0xff] }
 0x71b   : > { %7736 = vst [vmem:[%s9625_s19 + $0xee0] sm:$0xff] %v6956_v49 }
 0x71c   : > { %7737 = vst [vmem:[%s9625_s19 + $0xee8] sm:$0xff] %v6957_v34  ;;  %5952 = vperm.xlu2 %8236, %v4424_v37   ;;  %5947 = vperm.xlu1 %8235, %v4423_v46   ;;  %v732_v34 = vld [vmem:[%s9607_s10 + $0xf60] sm:$0xff]  ;;  %v3875_v37 = vmul.f32 %v13252_v13, %v755_v47  ;;  %v13253_v46 = vld [vmem:[#allocation206_spill] sm:$0xff] }
 0x71d   : > { %7734 = vst [vmem:[%s9625_s19 + $0xed0] sm:$0xff] %v6954_v39  ;;  %5942 = vperm.xlu0 %8234, %v4422_v23   ;;  %v3874_v39 = vmul.f32 %v13252_v13, %v754_v22  ;;  %v3854_v6 = vmul.f32 %v13253_v46, %v734_v54  ;;  %v3852_v53 = vmul.f32 %v13254_v5, %v732_v34  ;;  %v13258_v22 = vld [vmem:[#allocation211_spill] sm:$0xff]  ;;  %v745_v54 = vld [vmem:[%s9607_s10 + $0xfc8] sm:$0xff]  ;;  %v13260_v34 = vld [vmem:[#allocation213_spill] sm:$0xff] }
 0x71e   : > { %7735 = vst [vmem:[%s9625_s19 + $0xed8] sm:$0xff] %v6955_v57  ;;  %v5788_v41 = vpop.permute.xlu2 %5787  ;;  %v5738_v50 = vpop.permute.xlu1 %5737  ;;  %v3855_v57 = vmul.f32 %v13253_v46, %v735_v62  ;;  %v3865_v15 = vmul.f32 %v13260_v34, %v745_v54  ;;  %v4439_v5 = vld [vmem:[%s9502_s6 + $0x958] sm:$0xff] }
 0x71f   : > { %v6982_v63 = vadd.f32 %v5788_v41, %v3862_v58  ;;  %v6983_v31 = vadd.f32 %v5788_v41, %v3863_v45  ;;  %v6962_v40 = vadd.f32 %v5738_v50, %v3842_v35  ;;  %v5733_v25 = vpop.permute.xlu0 %5732  ;;  %v6963_v9 = vadd.f32 %v5738_v50, %v3843_v2  ;;  %v760_v41 = vld [vmem:[%s9607_s10 + $0x1040] sm:$0xff] }
 0x720   : > { %v6960_v28 = vadd.f32 %v5733_v25, %v3840_v27  ;;  %v6961_v59 = vadd.f32 %v5733_v25, %v3841_v0  ;;  %v4432_v27 = vld [vmem:[%s9502_s6 + $0x920] sm:$0xff]  ;;  %v4431_v25 = vld [vmem:[%s9502_s6 + $0x918] sm:$0xff]  ;;  %v741_v0 = vld [vmem:[%s9607_s10 + $0xfa8] sm:$0xff] }
 0x721   : > { %7762 = vst [vmem:[%s9625_s19 + $0xfb0] sm:$0xff] %v6982_v63  ;;  %v761_v63 = vld [vmem:[%s9607_s10 + $0x1048] sm:$0xff] }
 0x722   : > { %7763 = vst [vmem:[%s9625_s19 + $0xfb8] sm:$0xff] %v6983_v31  ;;  %v740_v31 = vld [vmem:[%s9607_s10 + $0xfa0] sm:$0xff] }
 0x723   : > { %7742 = vst [vmem:[%s9625_s19 + $0xf10] sm:$0xff] %v6962_v40 }
 0x724   : > { %7743 = vst [vmem:[%s9625_s19 + $0xf18] sm:$0xff] %v6963_v9  ;;  %5967 = vperm.xlu2 %8236, %v4427_v56   ;;  %5962 = vperm.xlu1 %8235, %v4426_v42   ;;  %v738_v9 = vld [vmem:[%s9607_s10 + $0xf90] sm:$0xff]  ;;  %v3881_v56 = vmul.f32 %v13255_v51, %v761_v63  ;;  %v13256_v42 = vld [vmem:[#allocation209_spill] sm:$0xff] }
 0x725   : > { %7740 = vst [vmem:[%s9625_s19 + $0xf00] sm:$0xff] %v6960_v28  ;;  %5957 = vperm.xlu0 %8234, %v4425_v17   ;;  %v3880_v28 = vmul.f32 %v13255_v51, %v760_v41  ;;  %v3860_v30 = vmul.f32 %v13256_v42, %v740_v31  ;;  %v3858_v36 = vmul.f32 %v13257_v26, %v738_v9  ;;  %v13261_v41 = vld [vmem:[#allocation214_spill] sm:$0xff]  ;;  %v751_v31 = vld [vmem:[%s9607_s10 + $0xff8] sm:$0xff]  ;;  %v4442_v26 = vld [vmem:[%s9502_s6 + $0x970] sm:$0xff] }
 0x726   : > { %7741 = vst [vmem:[%s9625_s19 + $0xf08] sm:$0xff] %v6961_v59  ;;  %v5803_v43 = vpop.permute.xlu2 %5802  ;;  %v5753_v14 = vpop.permute.xlu1 %5752  ;;  %v3861_v59 = vmul.f32 %v13256_v42, %v741_v0  ;;  %v13263_v9 = vld [vmem:[#allocation216_spill] sm:$0xff] }
 0x727   : > { %v6988_v38 = vadd.f32 %v5803_v43, %v3868_v1  ;;  %v6989_v61 = vadd.f32 %v5803_v43, %v3869_v19  ;;  %v6968_v4 = vadd.f32 %v5753_v14, %v3848_v44  ;;  %v5748_v7 = vpop.permute.xlu0 %5747  ;;  %v6969_v55 = vadd.f32 %v5753_v14, %v3849_v29  ;;  %v766_v43 = vld [vmem:[%s9607_s10 + $0x1070] sm:$0xff] }
 0x728   : > { %v6966_v48 = vadd.f32 %v5748_v7, %v3846_v21  ;;  %v6967_v49 = vadd.f32 %v5748_v7, %v3847_v12  ;;  %v4435_v21 = vld [vmem:[%s9502_s6 + $0x938] sm:$0xff]  ;;  %v4434_v7 = vld [vmem:[%s9502_s6 + $0x930] sm:$0xff]  ;;  %v3871_v32 = vmul.f32 %v13263_v9, %v751_v31 }
 0x729   : > { %7768 = vst [vmem:[%s9625_s19 + $0xfe0] sm:$0xff] %v6988_v38  ;;  %v767_v38 = vld [vmem:[%s9607_s10 + $0x1078] sm:$0xff] }
 0x72a   : > { %7769 = vst [vmem:[%s9625_s19 + $0xfe8] sm:$0xff] %v6989_v61  ;;  %v746_v61 = vld [vmem:[%s9607_s10 + $0xfd0] sm:$0xff]  ;;  %v747_v12 = vld [vmem:[%s9607_s10 + $0xfd8] sm:$0xff] }
 0x72b   : > { %7748 = vst [vmem:[%s9625_s19 + $0xf40] sm:$0xff] %v6968_v4 }
 0x72c   : > { %7749 = vst [vmem:[%s9625_s19 + $0xf48] sm:$0xff] %v6969_v55  ;;  %5982 = vperm.xlu2 %8236, %v4430_v33   ;;  %5977 = vperm.xlu1 %8235, %v4429_v11   ;;  %v744_v55 = vld [vmem:[%s9607_s10 + $0xfc0] sm:$0xff]  ;;  %v3887_v33 = vmul.f32 %v13258_v22, %v767_v38  ;;  %v13259_v11 = vld [vmem:[#allocation212_spill] sm:$0xff] }
 0x72d   : > { %7746 = vst [vmem:[%s9625_s19 + $0xf30] sm:$0xff] %v6966_v48  ;;  %5972 = vperm.xlu0 %8234, %v4428_v52   ;;  %v3886_v48 = vmul.f32 %v13258_v22, %v766_v43  ;;  %v3866_v47 = vmul.f32 %v13259_v11, %v746_v61  ;;  %v3864_v13 = vmul.f32 %v13260_v34, %v744_v55  ;;  %v13264_v43 = vld [vmem:[#allocation217_spill] sm:$0xff]  ;;  %v757_v61 = vld [vmem:[%s9607_s10 + $0x1028] sm:$0xff]  ;;  %v13266_v55 = vld [vmem:[#allocation219_spill] sm:$0xff] }
 0x72e   : > { %7747 = vst [vmem:[%s9625_s19 + $0xf38] sm:$0xff] %v6967_v49  ;;  %v5818_v23 = vpop.permute.xlu2 %5817  ;;  %v5768_v20 = vpop.permute.xlu1 %5767  ;;  %v3867_v49 = vmul.f32 %v13259_v11, %v747_v12  ;;  %v3877_v54 = vmul.f32 %v13266_v55, %v757_v61  ;;  %v4445_v34 = vld [vmem:[%s9502_s6 + $0x988] sm:$0xff] }
 0x72f   : > { %v6994_v58 = vadd.f32 %v5818_v23, %v3874_v39  ;;  %v6995_v45 = vadd.f32 %v5818_v23, %v3875_v37  ;;  %v6974_v24 = vadd.f32 %v5768_v20, %v3854_v6  ;;  %v5763_v35 = vpop.permute.xlu0 %5762  ;;  %v6975_v2 = vadd.f32 %v5768_v20, %v3855_v57  ;;  %v772_v23 = vld [vmem:[%s9607_s10 + $0x10a0] sm:$0xff] }
 0x730   : > { %v6972_v50 = vadd.f32 %v5763_v35, %v3852_v53  ;;  %v6973_v40 = vadd.f32 %v5763_v35, %v3853_v16  ;;  %v4438_v53 = vld [vmem:[%s9502_s6 + $0x950] sm:$0xff]  ;;  %v4437_v35 = vld [vmem:[%s9502_s6 + $0x948] sm:$0xff] }
 0x731   : > { %7774 = vst [vmem:[%s9625_s19 + $0x1010] sm:$0xff] %v6994_v58  ;;  %v773_v58 = vld [vmem:[%s9607_s10 + $0x10a8] sm:$0xff] }
 0x732   : > { %7775 = vst [vmem:[%s9625_s19 + $0x1018] sm:$0xff] %v6995_v45  ;;  %v752_v45 = vld [vmem:[%s9607_s10 + $0x1000] sm:$0xff]  ;;  %v753_v16 = vld [vmem:[%s9607_s10 + $0x1008] sm:$0xff] }
 0x733   : > { %7754 = vst [vmem:[%s9625_s19 + $0xf70] sm:$0xff] %v6974_v24 }
 0x734   : > { %7755 = vst [vmem:[%s9625_s19 + $0xf78] sm:$0xff] %v6975_v2  ;;  %5997 = vperm.xlu2 %8236, %v4433_v60   ;;  %5992 = vperm.xlu1 %8235, %v4432_v27   ;;  %v750_v2 = vld [vmem:[%s9607_s10 + $0xff0] sm:$0xff]  ;;  %v3893_v60 = vmul.f32 %v13261_v41, %v773_v58 }
 0x735   : > { %7752 = vst [vmem:[%s9625_s19 + $0xf60] sm:$0xff] %v6972_v50  ;;  %5987 = vperm.xlu0 %8234, %v4431_v25   ;;  %v3892_v50 = vmul.f32 %v13261_v41, %v772_v23  ;;  %v13262_v27 = vld [vmem:[#allocation215_spill] sm:$0xff]  ;;  %v3870_v51 = vmul.f32 %v13263_v9, %v750_v2  ;;  %v13267_v23 = vld [vmem:[#allocation220_spill] sm:$0xff]  ;;  %v13269_v2 = vld [vmem:[#allocation222_spill] sm:$0xff] }
 0x736   : > { %7753 = vst [vmem:[%s9625_s19 + $0xf68] sm:$0xff] %v6973_v40  ;;  %v5833_v17 = vpop.permute.xlu2 %5832  ;;  %v5783_v10 = vpop.permute.xlu1 %5782  ;;  %v3872_v63 = vmul.f32 %v13262_v27, %v752_v45  ;;  %v3873_v40 = vmul.f32 %v13262_v27, %v753_v16  ;;  %v763_v45 = vld [vmem:[%s9607_s10 + $0x1058] sm:$0xff]  ;;  %v4448_v9 = vld [vmem:[%s9502_s6 + $0x9a0] sm:$0xff] }
 0x737   : > { %v7000_v1 = vadd.f32 %v5833_v17, %v3880_v28  ;;  %v7001_v19 = vadd.f32 %v5833_v17, %v3881_v56  ;;  %v6980_v3 = vadd.f32 %v5783_v10, %v3860_v30  ;;  %v5778_v44 = vpop.permute.xlu0 %5777  ;;  %v6981_v29 = vadd.f32 %v5783_v10, %v3861_v59  ;;  %v778_v17 = vld [vmem:[%s9607_s10 + $0x10d0] sm:$0xff] }
 0x738   : > { %v6978_v14 = vadd.f32 %v5778_v44, %v3858_v36  ;;  %v6979_v4 = vadd.f32 %v5778_v44, %v3859_v18  ;;  %v4441_v36 = vld [vmem:[%s9502_s6 + $0x968] sm:$0xff]  ;;  %v4440_v44 = vld [vmem:[%s9502_s6 + $0x960] sm:$0xff]  ;;  %v759_v18 = vld [vmem:[%s9607_s10 + $0x1038] sm:$0xff]  ;;  %v3883_v31 = vmul.f32 %v13269_v2, %v763_v45 }
 0x739   : > { %7780 = vst [vmem:[%s9625_s19 + $0x1040] sm:$0xff] %v7000_v1  ;;  %v779_v1 = vld [vmem:[%s9607_s10 + $0x10d8] sm:$0xff] }
 0x73a   : > { %7781 = vst [vmem:[%s9625_s19 + $0x1048] sm:$0xff] %v7001_v19  ;;  %v758_v19 = vld [vmem:[%s9607_s10 + $0x1030] sm:$0xff] }
 0x73b   : > { %7760 = vst [vmem:[%s9625_s19 + $0xfa0] sm:$0xff] %v6980_v3 }
 0x73c   : > { %7761 = vst [vmem:[%s9625_s19 + $0xfa8] sm:$0xff] %v6981_v29  ;;  %6012 = vperm.xlu2 %8236, %v4436_v8   ;;  %6007 = vperm.xlu1 %8235, %v4435_v21   ;;  %v756_v29 = vld [vmem:[%s9607_s10 + $0x1020] sm:$0xff]  ;;  %v3899_v8 = vmul.f32 %v13264_v43, %v779_v1  ;;  %v13265_v21 = vld [vmem:[#allocation218_spill] sm:$0xff] }
 0x73d   : > { %7758 = vst [vmem:[%s9625_s19 + $0xf90] sm:$0xff] %v6978_v14  ;;  %6002 = vperm.xlu0 %8234, %v4434_v7   ;;  %v3898_v14 = vmul.f32 %v13264_v43, %v778_v17  ;;  %v3878_v38 = vmul.f32 %v13265_v21, %v758_v19  ;;  %v3876_v22 = vmul.f32 %v13266_v55, %v756_v29  ;;  %v13270_v17 = vld [vmem:[#allocation223_spill] sm:$0xff]  ;;  %v769_v19 = vld [vmem:[%s9607_s10 + $0x1088] sm:$0xff]  ;;  %v13272_v29 = vld [vmem:[#allocation225_spill] sm:$0xff] }
 0x73e   : > { %7759 = vst [vmem:[%s9625_s19 + $0xf98] sm:$0xff] %v6979_v4  ;;  %v5848_v52 = vpop.permute.xlu2 %5847  ;;  %v5798_v62 = vpop.permute.xlu1 %5797  ;;  %v3879_v4 = vmul.f32 %v13265_v21, %v759_v18  ;;  %v3889_v61 = vmul.f32 %v13272_v29, %v769_v19  ;;  %v4451_v55 = vld [vmem:[%s9502_s6 + $0x9b8] sm:$0xff] }
 0x73f   : > { %v7006_v39 = vadd.f32 %v5848_v52, %v3886_v48  ;;  %v7007_v37 = vadd.f32 %v5848_v52, %v3887_v33  ;;  %v6986_v46 = vadd.f32 %v5798_v62, %v3866_v47  ;;  %v5793_v6 = vpop.permute.xlu0 %5792  ;;  %v6987_v57 = vadd.f32 %v5798_v62, %v3867_v49  ;;  %v784_v52 = vld [vmem:[%s9607_s10 + $0x1100] sm:$0xff] }
 0x740   : > { %v6984_v20 = vadd.f32 %v5793_v6, %v3864_v13  ;;  %v6985_v24 = vadd.f32 %v5793_v6, %v3865_v15  ;;  %v4444_v13 = vld [vmem:[%s9502_s6 + $0x980] sm:$0xff]  ;;  %v4443_v6 = vld [vmem:[%s9502_s6 + $0x978] sm:$0xff]  ;;  %v765_v15 = vld [vmem:[%s9607_s10 + $0x1068] sm:$0xff] }
 0x741   : > { %7786 = vst [vmem:[%s9625_s19 + $0x1070] sm:$0xff] %v7006_v39  ;;  %v785_v39 = vld [vmem:[%s9607_s10 + $0x1108] sm:$0xff] }
 0x742   : > { %7787 = vst [vmem:[%s9625_s19 + $0x1078] sm:$0xff] %v7007_v37  ;;  %v764_v37 = vld [vmem:[%s9607_s10 + $0x1060] sm:$0xff] }
 0x743   : > { %7766 = vst [vmem:[%s9625_s19 + $0xfd0] sm:$0xff] %v6986_v46 }
 0x744   : > { %7767 = vst [vmem:[%s9625_s19 + $0xfd8] sm:$0xff] %v6987_v57  ;;  %6027 = vperm.xlu2 %8236, %v4439_v5   ;;  %6022 = vperm.xlu1 %8235, %v4438_v53   ;;  %v762_v57 = vld [vmem:[%s9607_s10 + $0x1050] sm:$0xff]  ;;  %v3905_v5 = vmul.f32 %v13267_v23, %v785_v39  ;;  %v13268_v53 = vld [vmem:[#allocation221_spill] sm:$0xff] }
 0x745   : > { %7764 = vst [vmem:[%s9625_s19 + $0xfc0] sm:$0xff] %v6984_v20  ;;  %6017 = vperm.xlu0 %8234, %v4437_v35   ;;  %v3904_v20 = vmul.f32 %v13267_v23, %v784_v52  ;;  %v3884_v58 = vmul.f32 %v13268_v53, %v764_v37  ;;  %v3882_v41 = vmul.f32 %v13269_v2, %v762_v57  ;;  %v13273_v52 = vld [vmem:[#allocation226_spill] sm:$0xff]  ;;  %v775_v37 = vld [vmem:[%s9607_s10 + $0x10b8] sm:$0xff]  ;;  %v4454_v2 = vld [vmem:[%s9502_s6 + $0x9d0] sm:$0xff] }
 0x746   : > { %7765 = vst [vmem:[%s9625_s19 + $0xfc8] sm:$0xff] %v6985_v24  ;;  %v5863_v25 = vpop.permute.xlu2 %5862  ;;  %v5813_v0 = vpop.permute.xlu1 %5812  ;;  %v3885_v24 = vmul.f32 %v13268_v53, %v765_v15  ;;  %v13275_v57 = vld [vmem:[#allocation228_spill] sm:$0xff] }
 0x747   : > { %v7012_v28 = vadd.f32 %v5863_v25, %v3892_v50  ;;  %v7013_v56 = vadd.f32 %v5863_v25, %v3893_v60  ;;  %v6992_v42 = vadd.f32 %v5813_v0, %v3872_v63  ;;  %v5808_v30 = vpop.permute.xlu0 %5807  ;;  %v6993_v59 = vadd.f32 %v5813_v0, %v3873_v40  ;;  %v790_v25 = vld [vmem:[%s9607_s10 + $0x1130] sm:$0xff] }
 0x748   : > { %v6990_v10 = vadd.f32 %v5808_v30, %v3870_v51  ;;  %v6991_v3 = vadd.f32 %v5808_v30, %v3871_v32  ;;  %v4447_v51 = vld [vmem:[%s9502_s6 + $0x998] sm:$0xff]  ;;  %v4446_v30 = vld [vmem:[%s9502_s6 + $0x990] sm:$0xff]  ;;  %v3895_v45 = vmul.f32 %v13275_v57, %v775_v37 }
 0x749   : > { %7792 = vst [vmem:[%s9625_s19 + $0x10a0] sm:$0xff] %v7012_v28  ;;  %v791_v28 = vld [vmem:[%s9607_s10 + $0x1138] sm:$0xff] }
 0x74a   : > { %7793 = vst [vmem:[%s9625_s19 + $0x10a8] sm:$0xff] %v7013_v56  ;;  %v770_v56 = vld [vmem:[%s9607_s10 + $0x1090] sm:$0xff]  ;;  %v771_v32 = vld [vmem:[%s9607_s10 + $0x1098] sm:$0xff] }
 0x74b   : > { %7772 = vst [vmem:[%s9625_s19 + $0x1000] sm:$0xff] %v6992_v42 }
 0x74c   : > { %7773 = vst [vmem:[%s9625_s19 + $0x1008] sm:$0xff] %v6993_v59  ;;  %6042 = vperm.xlu2 %8236, %v4442_v26   ;;  %6037 = vperm.xlu1 %8235, %v4441_v36   ;;  %v768_v59 = vld [vmem:[%s9607_s10 + $0x1080] sm:$0xff]  ;;  %v3911_v26 = vmul.f32 %v13270_v17, %v791_v28  ;;  %v13271_v36 = vld [vmem:[#allocation224_spill] sm:$0xff] }
 0x74d   : > { %7770 = vst [vmem:[%s9625_s19 + $0xff0] sm:$0xff] %v6990_v10  ;;  %6032 = vperm.xlu0 %8234, %v4440_v44   ;;  %v3910_v10 = vmul.f32 %v13270_v17, %v790_v25  ;;  %v3890_v1 = vmul.f32 %v13271_v36, %v770_v56  ;;  %v3888_v43 = vmul.f32 %v13272_v29, %v768_v59  ;;  %v13276_v25 = vld [vmem:[#allocation229_spill] sm:$0xff]  ;;  %v781_v56 = vld [vmem:[%s9607_s10 + $0x10e8] sm:$0xff]  ;;  %v13278_v59 = vld [vmem:[#allocation231_spill] sm:$0xff] }
 0x74e   : > { %7771 = vst [vmem:[%s9625_s19 + $0xff8] sm:$0xff] %v6991_v3  ;;  %v5878_v7 = vpop.permute.xlu2 %5877  ;;  %v5828_v12 = vpop.permute.xlu1 %5827  ;;  %v3891_v3 = vmul.f32 %v13271_v36, %v771_v32  ;;  %v3901_v19 = vmul.f32 %v13278_v59, %v781_v56  ;;  %v4457_v29 = vld [vmem:[%s9502_s6 + $0x9e8] sm:$0xff] }
 0x74f   : > { %v7018_v48 = vadd.f32 %v5878_v7, %v3898_v14  ;;  %v7019_v33 = vadd.f32 %v5878_v7, %v3899_v8  ;;  %v6998_v11 = vadd.f32 %v5828_v12, %v3878_v38  ;;  %v5823_v47 = vpop.permute.xlu0 %5822  ;;  %v6999_v49 = vadd.f32 %v5828_v12, %v3879_v4  ;;  %v796_v7 = vld [vmem:[%s9607_s10 + $0x1160] sm:$0xff] }
 0x750   : > { %v6996_v62 = vadd.f32 %v5823_v47, %v3876_v22  ;;  %v6997_v46 = vadd.f32 %v5823_v47, %v3877_v54  ;;  %v4450_v22 = vld [vmem:[%s9502_s6 + $0x9b0] sm:$0xff]  ;;  %v4449_v47 = vld [vmem:[%s9502_s6 + $0x9a8] sm:$0xff] }
 0x751   : > { %7798 = vst [vmem:[%s9625_s19 + $0x10d0] sm:$0xff] %v7018_v48  ;;  %v797_v48 = vld [vmem:[%s9607_s10 + $0x1168] sm:$0xff] }
 0x752   : > { %7799 = vst [vmem:[%s9625_s19 + $0x10d8] sm:$0xff] %v7019_v33  ;;  %v776_v33 = vld [vmem:[%s9607_s10 + $0x10c0] sm:$0xff]  ;;  %v777_v54 = vld [vmem:[%s9607_s10 + $0x10c8] sm:$0xff] }
 0x753   : > { %7778 = vst [vmem:[%s9625_s19 + $0x1030] sm:$0xff] %v6998_v11 }
 0x754   : > { %7779 = vst [vmem:[%s9625_s19 + $0x1038] sm:$0xff] %v6999_v49  ;;  %6057 = vperm.xlu2 %8236, %v4445_v34   ;;  %6052 = vperm.xlu1 %8235, %v4444_v13   ;;  %v774_v49 = vld [vmem:[%s9607_s10 + $0x10b0] sm:$0xff]  ;;  %v3917_v34 = vmul.f32 %v13273_v52, %v797_v48 }
 0x755   : > { %7776 = vst [vmem:[%s9625_s19 + $0x1020] sm:$0xff] %v6996_v62  ;;  %6047 = vperm.xlu0 %8234, %v4443_v6   ;;  %v3916_v62 = vmul.f32 %v13273_v52, %v796_v7  ;;  %v13274_v13 = vld [vmem:[#allocation227_spill] sm:$0xff]  ;;  %v3894_v23 = vmul.f32 %v13275_v57, %v774_v49  ;;  %v13279_v7 = vld [vmem:[#allocation232_spill] sm:$0xff]  ;;  %v13281_v49 = vld [vmem:[#allocation234_spill] sm:$0xff] }
 0x756   : > { %7777 = vst [vmem:[%s9625_s19 + $0x1028] sm:$0xff] %v6997_v46  ;;  %v5893_v35 = vpop.permute.xlu2 %5892  ;;  %v5843_v16 = vpop.permute.xlu1 %5842  ;;  %v3896_v39 = vmul.f32 %v13274_v13, %v776_v33  ;;  %v3897_v46 = vmul.f32 %v13274_v13, %v777_v54  ;;  %v787_v33 = vld [vmem:[%s9607_s10 + $0x1118] sm:$0xff]  ;;  %v4460_v57 = vld [vmem:[%s9502_s6 + $0xa00] sm:$0xff] }
 0x757   : > { %v7024_v50 = vadd.f32 %v5893_v35, %v3904_v20  ;;  %v7025_v60 = vadd.f32 %v5893_v35, %v3905_v5  ;;  %v7004_v27 = vadd.f32 %v5843_v16, %v3884_v58  ;;  %v5838_v63 = vpop.permute.xlu0 %5837  ;;  %v7005_v40 = vadd.f32 %v5843_v16, %v3885_v24  ;;  %v802_v35 = vld [vmem:[%s9607_s10 + $0x1190] sm:$0xff] }
 0x758   : > { %v7002_v0 = vadd.f32 %v5838_v63, %v3882_v41  ;;  %v7003_v42 = vadd.f32 %v5838_v63, %v3883_v31  ;;  %v4453_v41 = vld [vmem:[%s9502_s6 + $0x9c8] sm:$0xff]  ;;  %v4452_v63 = vld [vmem:[%s9502_s6 + $0x9c0] sm:$0xff]  ;;  %v783_v31 = vld [vmem:[%s9607_s10 + $0x10f8] sm:$0xff]  ;;  %v3907_v37 = vmul.f32 %v13281_v49, %v787_v33 }
 0x759   : > { %7804 = vst [vmem:[%s9625_s19 + $0x1100] sm:$0xff] %v7024_v50  ;;  %v803_v50 = vld [vmem:[%s9607_s10 + $0x1198] sm:$0xff] }
 0x75a   : > { %7805 = vst [vmem:[%s9625_s19 + $0x1108] sm:$0xff] %v7025_v60  ;;  %v782_v60 = vld [vmem:[%s9607_s10 + $0x10f0] sm:$0xff] }
 0x75b   : > { %7784 = vst [vmem:[%s9625_s19 + $0x1060] sm:$0xff] %v7004_v27 }
 0x75c   : > { %7785 = vst [vmem:[%s9625_s19 + $0x1068] sm:$0xff] %v7005_v40  ;;  %6072 = vperm.xlu2 %8236, %v4448_v9   ;;  %6067 = vperm.xlu1 %8235, %v4447_v51   ;;  %v780_v40 = vld [vmem:[%s9607_s10 + $0x10e0] sm:$0xff]  ;;  %v3923_v9 = vmul.f32 %v13276_v25, %v803_v50  ;;  %v13277_v51 = vld [vmem:[#allocation230_spill] sm:$0xff] }
 0x75d   : > { %7782 = vst [vmem:[%s9625_s19 + $0x1050] sm:$0xff] %v7002_v0  ;;  %6062 = vperm.xlu0 %8234, %v4446_v30   ;;  %v3922_v0 = vmul.f32 %v13276_v25, %v802_v35  ;;  %v3902_v28 = vmul.f32 %v13277_v51, %v782_v60  ;;  %v3900_v17 = vmul.f32 %v13278_v59, %v780_v40  ;;  %v13282_v35 = vld [vmem:[#allocation235_spill] sm:$0xff]  ;;  %v793_v60 = vld [vmem:[%s9607_s10 + $0x1148] sm:$0xff]  ;;  %v13284_v40 = vld [vmem:[#allocation237_spill] sm:$0xff] }
 0x75e   : > { %7783 = vst [vmem:[%s9625_s19 + $0x1058] sm:$0xff] %v7003_v42  ;;  %v5908_v44 = vpop.permute.xlu2 %5907  ;;  %v5858_v18 = vpop.permute.xlu1 %5857  ;;  %v3903_v42 = vmul.f32 %v13277_v51, %v783_v31  ;;  %v3913_v56 = vmul.f32 %v13284_v40, %v793_v60  ;;  %v4463_v59 = vld [vmem:[%s9502_s6 + $0xa18] sm:$0xff] }
 0x75f   : > { %v7030_v14 = vadd.f32 %v5908_v44, %v3910_v10  ;;  %v7031_v8 = vadd.f32 %v5908_v44, %v3911_v26  ;;  %v7010_v21 = vadd.f32 %v5858_v18, %v3890_v1  ;;  %v5853_v38 = vpop.permute.xlu0 %5852  ;;  %v7011_v4 = vadd.f32 %v5858_v18, %v3891_v3  ;;  %v808_v44 = vld [vmem:[%s9607_s10 + $0x11c0] sm:$0xff] }
 0x760   : > { %v7008_v12 = vadd.f32 %v5853_v38, %v3888_v43  ;;  %v7009_v11 = vadd.f32 %v5853_v38, %v3889_v61  ;;  %v4456_v43 = vld [vmem:[%s9502_s6 + $0x9e0] sm:$0xff]  ;;  %v4455_v38 = vld [vmem:[%s9502_s6 + $0x9d8] sm:$0xff]  ;;  %v789_v61 = vld [vmem:[%s9607_s10 + $0x1128] sm:$0xff] }
 0x761   : > { %7810 = vst [vmem:[%s9625_s19 + $0x1130] sm:$0xff] %v7030_v14  ;;  %v809_v14 = vld [vmem:[%s9607_s10 + $0x11c8] sm:$0xff] }
 0x762   : > { %7811 = vst [vmem:[%s9625_s19 + $0x1138] sm:$0xff] %v7031_v8  ;;  %v788_v8 = vld [vmem:[%s9607_s10 + $0x1120] sm:$0xff] }
 0x763   : > { %7790 = vst [vmem:[%s9625_s19 + $0x1090] sm:$0xff] %v7010_v21 }
 0x764   : > { %7791 = vst [vmem:[%s9625_s19 + $0x1098] sm:$0xff] %v7011_v4  ;;  %6087 = vperm.xlu2 %8236, %v4451_v55   ;;  %6082 = vperm.xlu1 %8235, %v4450_v22   ;;  %v786_v4 = vld [vmem:[%s9607_s10 + $0x1110] sm:$0xff]  ;;  %v3929_v55 = vmul.f32 %v13279_v7, %v809_v14  ;;  %v13280_v22 = vld [vmem:[#allocation233_spill] sm:$0xff] }
 0x765   : > { %7788 = vst [vmem:[%s9625_s19 + $0x1080] sm:$0xff] %v7008_v12  ;;  %6077 = vperm.xlu0 %8234, %v4449_v47   ;;  %v3928_v12 = vmul.f32 %v13279_v7, %v808_v44  ;;  %v3908_v48 = vmul.f32 %v13280_v22, %v788_v8  ;;  %v3906_v52 = vmul.f32 %v13281_v49, %v786_v4  ;;  %v13285_v44 = vld [vmem:[#allocation238_spill] sm:$0xff]  ;;  %v799_v8 = vld [vmem:[%s9607_s10 + $0x1178] sm:$0xff]  ;;  %v4466_v49 = vld [vmem:[%s9502_s6 + $0xa30] sm:$0xff] }
 0x766   : > { %7789 = vst [vmem:[%s9625_s19 + $0x1088] sm:$0xff] %v7009_v11  ;;  %v5923_v6 = vpop.permute.xlu2 %5922  ;;  %v5873_v15 = vpop.permute.xlu1 %5872  ;;  %v3909_v11 = vmul.f32 %v13280_v22, %v789_v61  ;;  %v13287_v4 = vld [vmem:[#allocation240_spill] sm:$0xff] }
 0x767   : > { %v7036_v20 = vadd.f32 %v5923_v6, %v3916_v62  ;;  %v7037_v5 = vadd.f32 %v5923_v6, %v3917_v34  ;;  %v7016_v53 = vadd.f32 %v5873_v15, %v3896_v39  ;;  %v5868_v58 = vpop.permute.xlu0 %5867  ;;  %v7017_v24 = vadd.f32 %v5873_v15, %v3897_v46  ;;  %v814_v6 = vld [vmem:[%s9607_s10 + $0x11f0] sm:$0xff] }
 0x768   : > { %v7014_v16 = vadd.f32 %v5868_v58, %v3894_v23  ;;  %v7015_v27 = vadd.f32 %v5868_v58, %v3895_v45  ;;  %v4459_v23 = vld [vmem:[%s9502_s6 + $0x9f8] sm:$0xff]  ;;  %v4458_v58 = vld [vmem:[%s9502_s6 + $0x9f0] sm:$0xff]  ;;  %v3919_v33 = vmul.f32 %v13287_v4, %v799_v8 }
 0x769   : > { %7816 = vst [vmem:[%s9625_s19 + $0x1160] sm:$0xff] %v7036_v20  ;;  %v815_v20 = vld [vmem:[%s9607_s10 + $0x11f8] sm:$0xff] }
 0x76a   : > { %7817 = vst [vmem:[%s9625_s19 + $0x1168] sm:$0xff] %v7037_v5  ;;  %v794_v5 = vld [vmem:[%s9607_s10 + $0x1150] sm:$0xff]  ;;  %v795_v45 = vld [vmem:[%s9607_s10 + $0x1158] sm:$0xff] }
 0x76b   : > { %7796 = vst [vmem:[%s9625_s19 + $0x10c0] sm:$0xff] %v7016_v53 }
 0x76c   : > { %7797 = vst [vmem:[%s9625_s19 + $0x10c8] sm:$0xff] %v7017_v24  ;;  %6102 = vperm.xlu2 %8236, %v4454_v2   ;;  %6097 = vperm.xlu1 %8235, %v4453_v41   ;;  %v792_v24 = vld [vmem:[%s9607_s10 + $0x1140] sm:$0xff]  ;;  %v3935_v2 = vmul.f32 %v13282_v35, %v815_v20  ;;  %v13283_v41 = vld [vmem:[#allocation236_spill] sm:$0xff] }
 0x76d   : > { %7794 = vst [vmem:[%s9625_s19 + $0x10b0] sm:$0xff] %v7014_v16  ;;  %6092 = vperm.xlu0 %8234, %v4452_v63   ;;  %v3934_v16 = vmul.f32 %v13282_v35, %v814_v6  ;;  %v3914_v50 = vmul.f32 %v13283_v41, %v794_v5  ;;  %v3912_v25 = vmul.f32 %v13284_v40, %v792_v24  ;;  %v13288_v6 = vld [vmem:[#allocation241_spill] sm:$0xff]  ;;  %v805_v5 = vld [vmem:[%s9607_s10 + $0x11a8] sm:$0xff]  ;;  %v13290_v24 = vld [vmem:[#allocation243_spill] sm:$0xff] }
 0x76e   : > { %7795 = vst [vmem:[%s9625_s19 + $0x10b8] sm:$0xff] %v7015_v27  ;;  %v5938_v30 = vpop.permute.xlu2 %5937  ;;  %v5888_v32 = vpop.permute.xlu1 %5887  ;;  %v3915_v27 = vmul.f32 %v13283_v41, %v795_v45  ;;  %v3925_v60 = vmul.f32 %v13290_v24, %v805_v5  ;;  %v4469_v40 = vld [vmem:[%s9502_s6 + $0xa48] sm:$0xff] }
 0x76f   : > { %v7042_v10 = vadd.f32 %v5938_v30, %v3922_v0  ;;  %v7043_v26 = vadd.f32 %v5938_v30, %v3923_v9  ;;  %v7022_v36 = vadd.f32 %v5888_v32, %v3902_v28  ;;  %v5883_v1 = vpop.permute.xlu0 %5882  ;;  %v7023_v3 = vadd.f32 %v5888_v32, %v3903_v42  ;;  %v820_v30 = vld [vmem:[%s9607_s10 + $0x1220] sm:$0xff] }
 0x770   : > { %v7020_v18 = vadd.f32 %v5883_v1, %v3900_v17  ;;  %v7021_v21 = vadd.f32 %v5883_v1, %v3901_v19  ;;  %v4462_v17 = vld [vmem:[%s9502_s6 + $0xa10] sm:$0xff]  ;;  %v4461_v1 = vld [vmem:[%s9502_s6 + $0xa08] sm:$0xff] }
 0x771   : > { %7822 = vst [vmem:[%s9625_s19 + $0x1190] sm:$0xff] %v7042_v10  ;;  %v821_v10 = vld [vmem:[%s9607_s10 + $0x1228] sm:$0xff] }
 0x772   : > { %7823 = vst [vmem:[%s9625_s19 + $0x1198] sm:$0xff] %v7043_v26  ;;  %v800_v26 = vld [vmem:[%s9607_s10 + $0x1180] sm:$0xff]  ;;  %v801_v19 = vld [vmem:[%s9607_s10 + $0x1188] sm:$0xff] }
 0x773   : > { %7802 = vst [vmem:[%s9625_s19 + $0x10f0] sm:$0xff] %v7022_v36 }
 0x774   : > { %7803 = vst [vmem:[%s9625_s19 + $0x10f8] sm:$0xff] %v7023_v3  ;;  %6117 = vperm.xlu2 %8236, %v4457_v29   ;;  %6112 = vperm.xlu1 %8235, %v4456_v43   ;;  %v798_v3 = vld [vmem:[%s9607_s10 + $0x1170] sm:$0xff]  ;;  %v3941_v29 = vmul.f32 %v13285_v44, %v821_v10 }
 0x775   : > { %7800 = vst [vmem:[%s9625_s19 + $0x10e0] sm:$0xff] %v7020_v18  ;;  %6107 = vperm.xlu0 %8234, %v4455_v38   ;;  %v3940_v18 = vmul.f32 %v13285_v44, %v820_v30  ;;  %v13286_v43 = vld [vmem:[#allocation239_spill] sm:$0xff]  ;;  %v3918_v7 = vmul.f32 %v13287_v4, %v798_v3  ;;  %v13291_v30 = vld [vmem:[#allocation244_spill] sm:$0xff]  ;;  %v13293_v3 = vld [vmem:[#allocation246_spill] sm:$0xff] }
 0x776   : > { %7801 = vst [vmem:[%s9625_s19 + $0x10e8] sm:$0xff] %v7021_v21  ;;  %v5953_v47 = vpop.permute.xlu2 %5952  ;;  %v5903_v54 = vpop.permute.xlu1 %5902  ;;  %v3920_v14 = vmul.f32 %v13286_v43, %v800_v26  ;;  %v3921_v21 = vmul.f32 %v13286_v43, %v801_v19  ;;  %v811_v26 = vld [vmem:[%s9607_s10 + $0x11d8] sm:$0xff]  ;;  %v4472_v4 = vld [vmem:[%s9502_s6 + $0xa60] sm:$0xff] }
 0x777   : > { %v7048_v62 = vadd.f32 %v5953_v47, %v3928_v12  ;;  %v7049_v34 = vadd.f32 %v5953_v47, %v3929_v55  ;;  %v7028_v13 = vadd.f32 %v5903_v54, %v3908_v48  ;;  %v5898_v39 = vpop.permute.xlu0 %5897  ;;  %v7029_v46 = vadd.f32 %v5903_v54, %v3909_v11  ;;  %v826_v47 = vld [vmem:[%s9607_s10 + $0x1250] sm:$0xff] }
 0x778   : > { %v7026_v15 = vadd.f32 %v5898_v39, %v3906_v52  ;;  %v7027_v53 = vadd.f32 %v5898_v39, %v3907_v37  ;;  %v4465_v52 = vld [vmem:[%s9502_s6 + $0xa28] sm:$0xff]  ;;  %v4464_v39 = vld [vmem:[%s9502_s6 + $0xa20] sm:$0xff]  ;;  %v807_v37 = vld [vmem:[%s9607_s10 + $0x11b8] sm:$0xff]  ;;  %v3931_v8 = vmul.f32 %v13293_v3, %v811_v26 }
 0x779   : > { %7828 = vst [vmem:[%s9625_s19 + $0x11c0] sm:$0xff] %v7048_v62  ;;  %v827_v62 = vld [vmem:[%s9607_s10 + $0x1258] sm:$0xff] }
 0x77a   : > { %7829 = vst [vmem:[%s9625_s19 + $0x11c8] sm:$0xff] %v7049_v34  ;;  %v806_v34 = vld [vmem:[%s9607_s10 + $0x11b0] sm:$0xff] }
 0x77b   : > { %7808 = vst [vmem:[%s9625_s19 + $0x1120] sm:$0xff] %v7028_v13 }
 0x77c   : > { %7809 = vst [vmem:[%s9625_s19 + $0x1128] sm:$0xff] %v7029_v46  ;;  %6132 = vperm.xlu2 %8236, %v4460_v57   ;;  %6127 = vperm.xlu1 %8235, %v4459_v23   ;;  %v804_v46 = vld [vmem:[%s9607_s10 + $0x11a0] sm:$0xff]  ;;  %v3947_v57 = vmul.f32 %v13288_v6, %v827_v62  ;;  %v13289_v23 = vld [vmem:[#allocation242_spill] sm:$0xff] }
 0x77d   : > { %7806 = vst [vmem:[%s9625_s19 + $0x1110] sm:$0xff] %v7026_v15  ;;  %6122 = vperm.xlu0 %8234, %v4458_v58   ;;  %v3946_v15 = vmul.f32 %v13288_v6, %v826_v47  ;;  %v3926_v20 = vmul.f32 %v13289_v23, %v806_v34  ;;  %v3924_v35 = vmul.f32 %v13290_v24, %v804_v46  ;;  %v13294_v47 = vld [vmem:[#allocation247_spill] sm:$0xff]  ;;  %v817_v34 = vld [vmem:[%s9607_s10 + $0x1208] sm:$0xff]  ;;  %v13296_v46 = vld [vmem:[#allocation249_spill] sm:$0xff] }
 0x77e   : > { %7807 = vst [vmem:[%s9625_s19 + $0x1118] sm:$0xff] %v7027_v53  ;;  %v5968_v63 = vpop.permute.xlu2 %5967  ;;  %v5918_v31 = vpop.permute.xlu1 %5917  ;;  %v3927_v53 = vmul.f32 %v13289_v23, %v807_v37  ;;  %v3937_v5 = vmul.f32 %v13296_v46, %v817_v34  ;;  %v4475_v24 = vld [vmem:[%s9502_s6 + $0xa78] sm:$0xff] }
 0x77f   : > { %v7054_v0 = vadd.f32 %v5968_v63, %v3934_v16  ;;  %v7055_v9 = vadd.f32 %v5968_v63, %v3935_v2  ;;  %v7034_v51 = vadd.f32 %v5918_v31, %v3914_v50  ;;  %v5913_v28 = vpop.permute.xlu0 %5912  ;;  %v7035_v42 = vadd.f32 %v5918_v31, %v3915_v27  ;;  %v832_v63 = vld [vmem:[%s9607_s10 + $0x1280] sm:$0xff] }
 0x780   : > { %v7032_v32 = vadd.f32 %v5913_v28, %v3912_v25  ;;  %v7033_v36 = vadd.f32 %v5913_v28, %v3913_v56  ;;  %v4468_v25 = vld [vmem:[%s9502_s6 + $0xa40] sm:$0xff]  ;;  %v4467_v28 = vld [vmem:[%s9502_s6 + $0xa38] sm:$0xff]  ;;  %v813_v56 = vld [vmem:[%s9607_s10 + $0x11e8] sm:$0xff] }
 0x781   : > { %7834 = vst [vmem:[%s9625_s19 + $0x11f0] sm:$0xff] %v7054_v0  ;;  %v833_v0 = vld [vmem:[%s9607_s10 + $0x1288] sm:$0xff] }
 0x782   : > { %7835 = vst [vmem:[%s9625_s19 + $0x11f8] sm:$0xff] %v7055_v9  ;;  %v812_v9 = vld [vmem:[%s9607_s10 + $0x11e0] sm:$0xff] }
 0x783   : > { %7814 = vst [vmem:[%s9625_s19 + $0x1150] sm:$0xff] %v7034_v51 }
 0x784   : > { %7815 = vst [vmem:[%s9625_s19 + $0x1158] sm:$0xff] %v7035_v42  ;;  %6147 = vperm.xlu2 %8236, %v4463_v59   ;;  %6142 = vperm.xlu1 %8235, %v4462_v17   ;;  %v810_v42 = vld [vmem:[%s9607_s10 + $0x11d0] sm:$0xff]  ;;  %v3953_v59 = vmul.f32 %v13291_v30, %v833_v0  ;;  %v13292_v17 = vld [vmem:[#allocation245_spill] sm:$0xff] }
 0x785   : > { %7812 = vst [vmem:[%s9625_s19 + $0x1140] sm:$0xff] %v7032_v32  ;;  %6137 = vperm.xlu0 %8234, %v4461_v1   ;;  %v3952_v32 = vmul.f32 %v13291_v30, %v832_v63  ;;  %v3932_v10 = vmul.f32 %v13292_v17, %v812_v9  ;;  %v3930_v44 = vmul.f32 %v13293_v3, %v810_v42  ;;  %v13297_v63 = vld [vmem:[#allocation250_spill] sm:$0xff]  ;;  %v823_v9 = vld [vmem:[%s9607_s10 + $0x1238] sm:$0xff]  ;;  %v4478_v3 = vld [vmem:[%s9502_s6 + $0xa90] sm:$0xff] }
 0x786   : > { %7813 = vst [vmem:[%s9625_s19 + $0x1148] sm:$0xff] %v7033_v36  ;;  %v5983_v38 = vpop.permute.xlu2 %5982  ;;  %v5933_v61 = vpop.permute.xlu1 %5932  ;;  %v3933_v36 = vmul.f32 %v13292_v17, %v813_v56  ;;  %v13299_v42 = vld [vmem:[#allocation252_spill] sm:$0xff] }
 0x787   : > { %v7060_v12 = vadd.f32 %v5983_v38, %v3940_v18  ;;  %v7061_v55 = vadd.f32 %v5983_v38, %v3941_v29  ;;  %v7040_v22 = vadd.f32 %v5933_v61, %v3920_v14  ;;  %v5928_v48 = vpop.permute.xlu0 %5927  ;;  %v7041_v11 = vadd.f32 %v5933_v61, %v3921_v21  ;;  %v838_v38 = vld [vmem:[%s9607_s10 + $0x12b0] sm:$0xff] }
 0x788   : > { %v7038_v54 = vadd.f32 %v5928_v48, %v3918_v7  ;;  %v7039_v13 = vadd.f32 %v5928_v48, %v3919_v33  ;;  %v4471_v7 = vld [vmem:[%s9502_s6 + $0xa58] sm:$0xff]  ;;  %v4470_v48 = vld [vmem:[%s9502_s6 + $0xa50] sm:$0xff]  ;;  %v3943_v26 = vmul.f32 %v13299_v42, %v823_v9 }
 0x789   : > { %7840 = vst [vmem:[%s9625_s19 + $0x1220] sm:$0xff] %v7060_v12  ;;  %v839_v12 = vld [vmem:[%s9607_s10 + $0x12b8] sm:$0xff] }
 0x78a   : > { %7841 = vst [vmem:[%s9625_s19 + $0x1228] sm:$0xff] %v7061_v55  ;;  %v818_v55 = vld [vmem:[%s9607_s10 + $0x1210] sm:$0xff]  ;;  %v819_v33 = vld [vmem:[%s9607_s10 + $0x1218] sm:$0xff] }
 0x78b   : > { %7820 = vst [vmem:[%s9625_s19 + $0x1180] sm:$0xff] %v7040_v22 }
 0x78c   : > { %7821 = vst [vmem:[%s9625_s19 + $0x1188] sm:$0xff] %v7041_v11  ;;  %6162 = vperm.xlu2 %8236, %v4466_v49   ;;  %6157 = vperm.xlu1 %8235, %v4465_v52   ;;  %v816_v11 = vld [vmem:[%s9607_s10 + $0x1200] sm:$0xff]  ;;  %v3959_v49 = vmul.f32 %v13294_v47, %v839_v12  ;;  %v13295_v52 = vld [vmem:[#allocation248_spill] sm:$0xff] }
 0x78d   : > { %7818 = vst [vmem:[%s9625_s19 + $0x1170] sm:$0xff] %v7038_v54  ;;  %6152 = vperm.xlu0 %8234, %v4464_v39   ;;  %v3958_v54 = vmul.f32 %v13294_v47, %v838_v38  ;;  %v3938_v62 = vmul.f32 %v13295_v52, %v818_v55  ;;  %v3936_v6 = vmul.f32 %v13296_v46, %v816_v11  ;;  %v13300_v38 = vld [vmem:[#allocation253_spill] sm:$0xff]  ;;  %v829_v55 = vld [vmem:[%s9607_s10 + $0x1268] sm:$0xff]  ;;  %v13302_v11 = vld [vmem:[#allocation255_spill] sm:$0xff] }
 0x78e   : > { %7819 = vst [vmem:[%s9625_s19 + $0x1178] sm:$0xff] %v7039_v13  ;;  %v5998_v58 = vpop.permute.xlu2 %5997  ;;  %v5948_v45 = vpop.permute.xlu1 %5947  ;;  %v3939_v13 = vmul.f32 %v13295_v52, %v819_v33  ;;  %v3949_v34 = vmul.f32 %v13302_v11, %v829_v55  ;;  %v4481_v46 = vld [vmem:[%s9502_s6 + $0xaa8] sm:$0xff] }
 0x78f   : > { %v7066_v16 = vadd.f32 %v5998_v58, %v3946_v15  ;;  %v7067_v2 = vadd.f32 %v5998_v58, %v3947_v57  ;;  %v7046_v41 = vadd.f32 %v5948_v45, %v3926_v20  ;;  %v5943_v50 = vpop.permute.xlu0 %5942  ;;  %v7047_v27 = vadd.f32 %v5948_v45, %v3927_v53  ;;  %v844_v58 = vld [vmem:[%s9607_s10 + $0x12e0] sm:$0xff] }
 0x790   : > { %v7044_v31 = vadd.f32 %v5943_v50, %v3924_v35  ;;  %v7045_v51 = vadd.f32 %v5943_v50, %v3925_v60  ;;  %v4474_v35 = vld [vmem:[%s9502_s6 + $0xa70] sm:$0xff]  ;;  %v4473_v50 = vld [vmem:[%s9502_s6 + $0xa68] sm:$0xff] }
 0x791   : > { %7846 = vst [vmem:[%s9625_s19 + $0x1250] sm:$0xff] %v7066_v16  ;;  %v845_v16 = vld [vmem:[%s9607_s10 + $0x12e8] sm:$0xff] }
 0x792   : > { %7847 = vst [vmem:[%s9625_s19 + $0x1258] sm:$0xff] %v7067_v2  ;;  %v824_v2 = vld [vmem:[%s9607_s10 + $0x1240] sm:$0xff]  ;;  %v825_v60 = vld [vmem:[%s9607_s10 + $0x1248] sm:$0xff] }
 0x793   : > { %7826 = vst [vmem:[%s9625_s19 + $0x11b0] sm:$0xff] %v7046_v41 }
 0x794   : > { %7827 = vst [vmem:[%s9625_s19 + $0x11b8] sm:$0xff] %v7047_v27  ;;  %6177 = vperm.xlu2 %8236, %v4469_v40   ;;  %6172 = vperm.xlu1 %8235, %v4468_v25   ;;  %v822_v27 = vld [vmem:[%s9607_s10 + $0x1230] sm:$0xff]  ;;  %v3965_v40 = vmul.f32 %v13297_v63, %v845_v16 }
 0x795   : > { %7824 = vst [vmem:[%s9625_s19 + $0x11a0] sm:$0xff] %v7044_v31  ;;  %6167 = vperm.xlu0 %8234, %v4467_v28   ;;  %v3964_v31 = vmul.f32 %v13297_v63, %v844_v58  ;;  %v13298_v25 = vld [vmem:[#allocation251_spill] sm:$0xff]  ;;  %v3942_v30 = vmul.f32 %v13299_v42, %v822_v27  ;;  %v13303_v58 = vld [vmem:[#allocation256_spill] sm:$0xff]  ;;  %v13305_v27 = vld [vmem:[#allocation258_spill] sm:$0xff] }
 0x796   : > { %7825 = vst [vmem:[%s9625_s19 + $0x11a8] sm:$0xff] %v7045_v51  ;;  %v6013_v1 = vpop.permute.xlu2 %6012  ;;  %v5963_v19 = vpop.permute.xlu1 %5962  ;;  %v3944_v0 = vmul.f32 %v13298_v25, %v824_v2  ;;  %v3945_v51 = vmul.f32 %v13298_v25, %v825_v60  ;;  %v835_v2 = vld [vmem:[%s9607_s10 + $0x1298] sm:$0xff]  ;;  %v4484_v42 = vld [vmem:[%s9502_s6 + $0xac0] sm:$0xff] }
 0x797   : > { %v7072_v18 = vadd.f32 %v6013_v1, %v3952_v32  ;;  %v7073_v29 = vadd.f32 %v6013_v1, %v3953_v59  ;;  %v7052_v43 = vadd.f32 %v5963_v19, %v3932_v10  ;;  %v5958_v14 = vpop.permute.xlu0 %5957  ;;  %v7053_v21 = vadd.f32 %v5963_v19, %v3933_v36  ;;  %v850_v1 = vld [vmem:[%s9607_s10 + $0x1310] sm:$0xff] }
 0x798   : > { %v7050_v61 = vadd.f32 %v5958_v14, %v3930_v44  ;;  %v7051_v22 = vadd.f32 %v5958_v14, %v3931_v8  ;;  %v4477_v44 = vld [vmem:[%s9502_s6 + $0xa88] sm:$0xff]  ;;  %v4476_v14 = vld [vmem:[%s9502_s6 + $0xa80] sm:$0xff]  ;;  %v831_v8 = vld [vmem:[%s9607_s10 + $0x1278] sm:$0xff]  ;;  %v3955_v9 = vmul.f32 %v13305_v27, %v835_v2 }
 0x799   : > { %7852 = vst [vmem:[%s9625_s19 + $0x1280] sm:$0xff] %v7072_v18  ;;  %v851_v18 = vld [vmem:[%s9607_s10 + $0x1318] sm:$0xff] }
 0x79a   : > { %7853 = vst [vmem:[%s9625_s19 + $0x1288] sm:$0xff] %v7073_v29  ;;  %v830_v29 = vld [vmem:[%s9607_s10 + $0x1270] sm:$0xff] }
 0x79b   : > { %7832 = vst [vmem:[%s9625_s19 + $0x11e0] sm:$0xff] %v7052_v43 }
 0x79c   : > { %7833 = vst [vmem:[%s9625_s19 + $0x11e8] sm:$0xff] %v7053_v21  ;;  %6192 = vperm.xlu2 %8236, %v4472_v4   ;;  %6187 = vperm.xlu1 %8235, %v4471_v7   ;;  %v828_v21 = vld [vmem:[%s9607_s10 + $0x1260] sm:$0xff]  ;;  %v3971_v4 = vmul.f32 %v13300_v38, %v851_v18  ;;  %v13301_v7 = vld [vmem:[#allocation254_spill] sm:$0xff] }
 0x79d   : > { %7830 = vst [vmem:[%s9625_s19 + $0x11d0] sm:$0xff] %v7050_v61  ;;  %6182 = vperm.xlu0 %8234, %v4470_v48   ;;  %v3970_v61 = vmul.f32 %v13300_v38, %v850_v1  ;;  %v3950_v12 = vmul.f32 %v13301_v7, %v830_v29  ;;  %v3948_v47 = vmul.f32 %v13302_v11, %v828_v21  ;;  %v13306_v1 = vld [vmem:[#allocation259_spill] sm:$0xff]  ;;  %v841_v29 = vld [vmem:[%s9607_s10 + $0x12c8] sm:$0xff]  ;;  %v13308_v21 = vld [vmem:[#allocation261_spill] sm:$0xff] }
 0x79e   : > { %7831 = vst [vmem:[%s9625_s19 + $0x11d8] sm:$0xff] %v7051_v22  ;;  %v6028_v39 = vpop.permute.xlu2 %6027  ;;  %v5978_v37 = vpop.permute.xlu1 %5977  ;;  %v3951_v22 = vmul.f32 %v13301_v7, %v831_v8  ;;  %v3961_v55 = vmul.f32 %v13308_v21, %v841_v29  ;;  %v4487_v11 = vld [vmem:[%s9502_s6 + $0xad8] sm:$0xff] }
 0x79f   : > { %v7078_v15 = vadd.f32 %v6028_v39, %v3958_v54  ;;  %v7079_v57 = vadd.f32 %v6028_v39, %v3959_v49  ;;  %v7058_v23 = vadd.f32 %v5978_v37, %v3938_v62  ;;  %v5973_v20 = vpop.permute.xlu0 %5972  ;;  %v7059_v53 = vadd.f32 %v5978_v37, %v3939_v13  ;;  %v856_v39 = vld [vmem:[%s9607_s10 + $0x1340] sm:$0xff] }
 0x7a0   : > { %v7056_v45 = vadd.f32 %v5973_v20, %v3936_v6  ;;  %v7057_v41 = vadd.f32 %v5973_v20, %v3937_v5  ;;  %v4480_v6 = vld [vmem:[%s9502_s6 + $0xaa0] sm:$0xff]  ;;  %v4479_v20 = vld [vmem:[%s9502_s6 + $0xa98] sm:$0xff]  ;;  %v837_v5 = vld [vmem:[%s9607_s10 + $0x12a8] sm:$0xff] }
 0x7a1   : > { %7858 = vst [vmem:[%s9625_s19 + $0x12b0] sm:$0xff] %v7078_v15  ;;  %v857_v15 = vld [vmem:[%s9607_s10 + $0x1348] sm:$0xff] }
 0x7a2   : > { %7859 = vst [vmem:[%s9625_s19 + $0x12b8] sm:$0xff] %v7079_v57  ;;  %v836_v57 = vld [vmem:[%s9607_s10 + $0x12a0] sm:$0xff] }
 0x7a3   : > { %7838 = vst [vmem:[%s9625_s19 + $0x1210] sm:$0xff] %v7058_v23 }
 0x7a4   : > { %7839 = vst [vmem:[%s9625_s19 + $0x1218] sm:$0xff] %v7059_v53  ;;  %6207 = vperm.xlu2 %8236, %v4475_v24   ;;  %6202 = vperm.xlu1 %8235, %v4474_v35   ;;  %v834_v53 = vld [vmem:[%s9607_s10 + $0x1290] sm:$0xff]  ;;  %v3977_v24 = vmul.f32 %v13303_v58, %v857_v15  ;;  %v13304_v35 = vld [vmem:[#allocation257_spill] sm:$0xff] }
 0x7a5   : > { %7836 = vst [vmem:[%s9625_s19 + $0x1200] sm:$0xff] %v7056_v45  ;;  %6197 = vperm.xlu0 %8234, %v4473_v50   ;;  %v3976_v45 = vmul.f32 %v13303_v58, %v856_v39  ;;  %v3956_v16 = vmul.f32 %v13304_v35, %v836_v57  ;;  %v3954_v63 = vmul.f32 %v13305_v27, %v834_v53  ;;  %v13309_v39 = vld [vmem:[#allocation262_spill] sm:$0xff]  ;;  %v847_v57 = vld [vmem:[%s9607_s10 + $0x12f8] sm:$0xff]  ;;  %v4490_v27 = vld [vmem:[%s9502_s6 + $0xaf0] sm:$0xff] }
 0x7a6   : > { %7837 = vst [vmem:[%s9625_s19 + $0x1208] sm:$0xff] %v7057_v41  ;;  %v6043_v28 = vpop.permute.xlu2 %6042  ;;  %v5993_v56 = vpop.permute.xlu1 %5992  ;;  %v3957_v41 = vmul.f32 %v13304_v35, %v837_v5  ;;  %v13311_v53 = vld [vmem:[#allocation264_spill] sm:$0xff] }
 0x7a7   : > { %v7084_v32 = vadd.f32 %v6043_v28, %v3964_v31  ;;  %v7085_v59 = vadd.f32 %v6043_v28, %v3965_v40  ;;  %v7064_v17 = vadd.f32 %v5993_v56, %v3944_v0  ;;  %v5988_v10 = vpop.permute.xlu0 %5987  ;;  %v7065_v36 = vadd.f32 %v5993_v56, %v3945_v51  ;;  %v862_v28 = vld [vmem:[%s9607_s10 + $0x1370] sm:$0xff] }
 0x7a8   : > { %v7062_v19 = vadd.f32 %v5988_v10, %v3942_v30  ;;  %v7063_v43 = vadd.f32 %v5988_v10, %v3943_v26  ;;  %v4483_v30 = vld [vmem:[%s9502_s6 + $0xab8] sm:$0xff]  ;;  %v4482_v10 = vld [vmem:[%s9502_s6 + $0xab0] sm:$0xff]  ;;  %v3967_v2 = vmul.f32 %v13311_v53, %v847_v57 }
 0x7a9   : > { %7864 = vst [vmem:[%s9625_s19 + $0x12e0] sm:$0xff] %v7084_v32  ;;  %v863_v32 = vld [vmem:[%s9607_s10 + $0x1378] sm:$0xff] }
 0x7aa   : > { %7865 = vst [vmem:[%s9625_s19 + $0x12e8] sm:$0xff] %v7085_v59  ;;  %v842_v59 = vld [vmem:[%s9607_s10 + $0x12d0] sm:$0xff]  ;;  %v843_v26 = vld [vmem:[%s9607_s10 + $0x12d8] sm:$0xff] }
 0x7ab   : > { %7844 = vst [vmem:[%s9625_s19 + $0x1240] sm:$0xff] %v7064_v17 }
 0x7ac   : > { %7845 = vst [vmem:[%s9625_s19 + $0x1248] sm:$0xff] %v7065_v36  ;;  %6222 = vperm.xlu2 %8236, %v4478_v3   ;;  %6217 = vperm.xlu1 %8235, %v4477_v44   ;;  %v840_v36 = vld [vmem:[%s9607_s10 + $0x12c0] sm:$0xff]  ;;  %v3983_v3 = vmul.f32 %v13306_v1, %v863_v32  ;;  %v13307_v44 = vld [vmem:[#allocation260_spill] sm:$0xff] }
 0x7ad   : > { %7842 = vst [vmem:[%s9625_s19 + $0x1230] sm:$0xff] %v7062_v19  ;;  %6212 = vperm.xlu0 %8234, %v4476_v14   ;;  %v3982_v19 = vmul.f32 %v13306_v1, %v862_v28  ;;  %v3962_v18 = vmul.f32 %v13307_v44, %v842_v59  ;;  %v3960_v38 = vmul.f32 %v13308_v21, %v840_v36  ;;  %v13312_v28 = vld [vmem:[#allocation265_spill] sm:$0xff]  ;;  %v853_v59 = vld [vmem:[%s9607_s10 + $0x1328] sm:$0xff]  ;;  %v13314_v36 = vld [vmem:[#allocation267_spill] sm:$0xff] }
 0x7ae   : > { %7843 = vst [vmem:[%s9625_s19 + $0x1238] sm:$0xff] %v7063_v43  ;;  %v6058_v48 = vpop.permute.xlu2 %6057  ;;  %v6008_v33 = vpop.permute.xlu1 %6007  ;;  %v3963_v43 = vmul.f32 %v13307_v44, %v843_v26  ;;  %v3973_v29 = vmul.f32 %v13314_v36, %v853_v59  ;;  %v4493_v21 = vld [vmem:[%s9502_s6 + $0xb08] sm:$0xff] }
 0x7af   : > { %v7090_v54 = vadd.f32 %v6058_v48, %v3970_v61  ;;  %v7091_v49 = vadd.f32 %v6058_v48, %v3971_v4  ;;  %v7070_v52 = vadd.f32 %v6008_v33, %v3950_v12  ;;  %v6003_v62 = vpop.permute.xlu0 %6002  ;;  %v7071_v13 = vadd.f32 %v6008_v33, %v3951_v22  ;;  %v868_v48 = vld [vmem:[%s9607_s10 + $0x13a0] sm:$0xff] }
 0x7b0   : > { %v7068_v37 = vadd.f32 %v6003_v62, %v3948_v47  ;;  %v7069_v23 = vadd.f32 %v6003_v62, %v3949_v34  ;;  %v4486_v47 = vld [vmem:[%s9502_s6 + $0xad0] sm:$0xff]  ;;  %v4485_v62 = vld [vmem:[%s9502_s6 + $0xac8] sm:$0xff] }
 0x7b1   : > { %7870 = vst [vmem:[%s9625_s19 + $0x1310] sm:$0xff] %v7090_v54  ;;  %v869_v54 = vld [vmem:[%s9607_s10 + $0x13a8] sm:$0xff] }
 0x7b2   : > { %7871 = vst [vmem:[%s9625_s19 + $0x1318] sm:$0xff] %v7091_v49  ;;  %v848_v49 = vld [vmem:[%s9607_s10 + $0x1300] sm:$0xff]  ;;  %v849_v34 = vld [vmem:[%s9607_s10 + $0x1308] sm:$0xff] }
 0x7b3   : > { %7850 = vst [vmem:[%s9625_s19 + $0x1270] sm:$0xff] %v7070_v52 }
 0x7b4   : > { %7851 = vst [vmem:[%s9625_s19 + $0x1278] sm:$0xff] %v7071_v13  ;;  %6237 = vperm.xlu2 %8236, %v4481_v46   ;;  %6232 = vperm.xlu1 %8235, %v4480_v6   ;;  %v846_v13 = vld [vmem:[%s9607_s10 + $0x12f0] sm:$0xff]  ;;  %v3989_v46 = vmul.f32 %v13309_v39, %v869_v54 }
 0x7b5   : > { %7848 = vst [vmem:[%s9625_s19 + $0x1260] sm:$0xff] %v7068_v37  ;;  %6227 = vperm.xlu0 %8234, %v4479_v20   ;;  %v3988_v37 = vmul.f32 %v13309_v39, %v868_v48  ;;  %v13310_v6 = vld [vmem:[#allocation263_spill] sm:$0xff]  ;;  %v3966_v58 = vmul.f32 %v13311_v53, %v846_v13  ;;  %v13315_v48 = vld [vmem:[#allocation268_spill] sm:$0xff]  ;;  %v13317_v13 = vld [vmem:[#allocation270_spill] sm:$0xff] }
 0x7b6   : > { %7849 = vst [vmem:[%s9625_s19 + $0x1268] sm:$0xff] %v7069_v23  ;;  %v6073_v50 = vpop.permute.xlu2 %6072  ;;  %v6023_v60 = vpop.permute.xlu1 %6022  ;;  %v3968_v15 = vmul.f32 %v13310_v6, %v848_v49  ;;  %v3969_v23 = vmul.f32 %v13310_v6, %v849_v34  ;;  %v859_v49 = vld [vmem:[%s9607_s10 + $0x1358] sm:$0xff]  ;;  %v4496_v53 = vld [vmem:[%s9502_s6 + $0xb20] sm:$0xff] }
 0x7b7   : > { %v7096_v31 = vadd.f32 %v6073_v50, %v3976_v45  ;;  %v7097_v40 = vadd.f32 %v6073_v50, %v3977_v24  ;;  %v7076_v25 = vadd.f32 %v6023_v60, %v3956_v16  ;;  %v6018_v0 = vpop.permute.xlu0 %6017  ;;  %v7077_v51 = vadd.f32 %v6023_v60, %v3957_v41  ;;  %v874_v50 = vld [vmem:[%s9607_s10 + $0x13d0] sm:$0xff] }
 0x7b8   : > { %v7074_v56 = vadd.f32 %v6018_v0, %v3954_v63  ;;  %v7075_v17 = vadd.f32 %v6018_v0, %v3955_v9  ;;  %v4489_v63 = vld [vmem:[%s9502_s6 + $0xae8] sm:$0xff]  ;;  %v4488_v0 = vld [vmem:[%s9502_s6 + $0xae0] sm:$0xff]  ;;  %v855_v9 = vld [vmem:[%s9607_s10 + $0x1338] sm:$0xff]  ;;  %v3979_v57 = vmul.f32 %v13317_v13, %v859_v49 }
 0x7b9   : > { %7876 = vst [vmem:[%s9625_s19 + $0x1340] sm:$0xff] %v7096_v31  ;;  %v875_v31 = vld [vmem:[%s9607_s10 + $0x13d8] sm:$0xff] }
 0x7ba   : > { %7877 = vst [vmem:[%s9625_s19 + $0x1348] sm:$0xff] %v7097_v40  ;;  %v854_v40 = vld [vmem:[%s9607_s10 + $0x1330] sm:$0xff] }
 0x7bb   : > { %7856 = vst [vmem:[%s9625_s19 + $0x12a0] sm:$0xff] %v7076_v25 }
 0x7bc   : > { %7857 = vst [vmem:[%s9625_s19 + $0x12a8] sm:$0xff] %v7077_v51  ;;  %6252 = vperm.xlu2 %8236, %v4484_v42   ;;  %6247 = vperm.xlu1 %8235, %v4483_v30   ;;  %v852_v51 = vld [vmem:[%s9607_s10 + $0x1320] sm:$0xff]  ;;  %v3995_v42 = vmul.f32 %v13312_v28, %v875_v31  ;;  %v13313_v30 = vld [vmem:[#allocation266_spill] sm:$0xff] }
 0x7bd   : > { %7854 = vst [vmem:[%s9625_s19 + $0x1290] sm:$0xff] %v7074_v56  ;;  %6242 = vperm.xlu0 %8234, %v4482_v10   ;;  %v3994_v56 = vmul.f32 %v13312_v28, %v874_v50  ;;  %v3974_v32 = vmul.f32 %v13313_v30, %v854_v40  ;;  %v3972_v1 = vmul.f32 %v13314_v36, %v852_v51  ;;  %v13318_v50 = vld [vmem:[#allocation271_spill] sm:$0xff]  ;;  %v865_v40 = vld [vmem:[%s9607_s10 + $0x1388] sm:$0xff]  ;;  %v13320_v51 = vld [vmem:[#allocation273_spill] sm:$0xff] }
 0x7be   : > { %7855 = vst [vmem:[%s9625_s19 + $0x1298] sm:$0xff] %v7075_v17  ;;  %v6088_v14 = vpop.permute.xlu2 %6087  ;;  %v6038_v8 = vpop.permute.xlu1 %6037  ;;  %v3975_v17 = vmul.f32 %v13313_v30, %v855_v9  ;;  %v3985_v59 = vmul.f32 %v13320_v51, %v865_v40  ;;  %v4499_v36 = vld [vmem:[%s9502_s6 + $0xb38] sm:$0xff] }
 0x7bf   : > { %v7102_v61 = vadd.f32 %v6088_v14, %v3982_v19  ;;  %v7103_v4 = vadd.f32 %v6088_v14, %v3983_v3  ;;  %v7082_v7 = vadd.f32 %v6038_v8, %v3962_v18  ;;  %v6033_v12 = vpop.permute.xlu0 %6032  ;;  %v7083_v22 = vadd.f32 %v6038_v8, %v3963_v43  ;;  %v880_v14 = vld [vmem:[%s9607_s10 + $0x1400] sm:$0xff] }
 0x7c0   : > { %v7080_v33 = vadd.f32 %v6033_v12, %v3960_v38  ;;  %v7081_v52 = vadd.f32 %v6033_v12, %v3961_v55  ;;  %v4492_v38 = vld [vmem:[%s9502_s6 + $0xb00] sm:$0xff]  ;;  %v4491_v12 = vld [vmem:[%s9502_s6 + $0xaf8] sm:$0xff]  ;;  %v861_v55 = vld [vmem:[%s9607_s10 + $0x1368] sm:$0xff] }
 0x7c1   : > { %7882 = vst [vmem:[%s9625_s19 + $0x1370] sm:$0xff] %v7102_v61  ;;  %v881_v61 = vld [vmem:[%s9607_s10 + $0x1408] sm:$0xff] }
 0x7c2   : > { %7883 = vst [vmem:[%s9625_s19 + $0x1378] sm:$0xff] %v7103_v4  ;;  %v860_v4 = vld [vmem:[%s9607_s10 + $0x1360] sm:$0xff] }
 0x7c3   : > { %7862 = vst [vmem:[%s9625_s19 + $0x12d0] sm:$0xff] %v7082_v7 }
 0x7c4   : > { %7863 = vst [vmem:[%s9625_s19 + $0x12d8] sm:$0xff] %v7083_v22  ;;  %6267 = vperm.xlu2 %8236, %v4487_v11   ;;  %6262 = vperm.xlu1 %8235, %v4486_v47   ;;  %v858_v22 = vld [vmem:[%s9607_s10 + $0x1350] sm:$0xff]  ;;  %v4001_v11 = vmul.f32 %v13315_v48, %v881_v61  ;;  %v13316_v47 = vld [vmem:[#allocation269_spill] sm:$0xff] }
 0x7c5   : > { %7860 = vst [vmem:[%s9625_s19 + $0x12c0] sm:$0xff] %v7080_v33  ;;  %6257 = vperm.xlu0 %8234, %v4485_v62   ;;  %v4000_v33 = vmul.f32 %v13315_v48, %v880_v14  ;;  %v3980_v54 = vmul.f32 %v13316_v47, %v860_v4  ;;  %v3978_v39 = vmul.f32 %v13317_v13, %v858_v22  ;;  %v13321_v14 = vld [vmem:[#allocation274_spill] sm:$0xff]  ;;  %v871_v4 = vld [vmem:[%s9607_s10 + $0x13b8] sm:$0xff]  ;;  %v4502_v13 = vld [vmem:[%s9502_s6 + $0xb50] sm:$0xff] }
 0x7c6   : > { %7861 = vst [vmem:[%s9625_s19 + $0x12c8] sm:$0xff] %v7081_v52  ;;  %v6103_v20 = vpop.permute.xlu2 %6102  ;;  %v6053_v5 = vpop.permute.xlu1 %6052  ;;  %v3981_v52 = vmul.f32 %v13316_v47, %v861_v55  ;;  %v13323_v22 = vld [vmem:[#allocation276_spill] sm:$0xff] }
 0x7c7   : > { %v7108_v45 = vadd.f32 %v6103_v20, %v3988_v37  ;;  %v7109_v24 = vadd.f32 %v6103_v20, %v3989_v46  ;;  %v7088_v35 = vadd.f32 %v6053_v5, %v3968_v15  ;;  %v6048_v16 = vpop.permute.xlu0 %6047  ;;  %v7089_v41 = vadd.f32 %v6053_v5, %v3969_v23  ;;  %v886_v20 = vld [vmem:[%s9607_s10 + $0x1430] sm:$0xff] }
 0x7c8   : > { %v7086_v60 = vadd.f32 %v6048_v16, %v3966_v58  ;;  %v7087_v25 = vadd.f32 %v6048_v16, %v3967_v2  ;;  %v4495_v58 = vld [vmem:[%s9502_s6 + $0xb18] sm:$0xff]  ;;  %v4494_v16 = vld [vmem:[%s9502_s6 + $0xb10] sm:$0xff]  ;;  %v3991_v49 = vmul.f32 %v13323_v22, %v871_v4 }
 0x7c9   : > { %7888 = vst [vmem:[%s9625_s19 + $0x13a0] sm:$0xff] %v7108_v45  ;;  %v887_v45 = vld [vmem:[%s9607_s10 + $0x1438] sm:$0xff] }
 0x7ca   : > { %7889 = vst [vmem:[%s9625_s19 + $0x13a8] sm:$0xff] %v7109_v24  ;;  %v866_v24 = vld [vmem:[%s9607_s10 + $0x1390] sm:$0xff]  ;;  %v867_v2 = vld [vmem:[%s9607_s10 + $0x1398] sm:$0xff] }
 0x7cb   : > { %7868 = vst [vmem:[%s9625_s19 + $0x1300] sm:$0xff] %v7088_v35 }
 0x7cc   : > { %7869 = vst [vmem:[%s9625_s19 + $0x1308] sm:$0xff] %v7089_v41  ;;  %6282 = vperm.xlu2 %8236, %v4490_v27   ;;  %6277 = vperm.xlu1 %8235, %v4489_v63   ;;  %v864_v41 = vld [vmem:[%s9607_s10 + $0x1380] sm:$0xff]  ;;  %v4007_v27 = vmul.f32 %v13318_v50, %v887_v45  ;;  %v13319_v63 = vld [vmem:[#allocation272_spill] sm:$0xff] }
 0x7cd   : > { %7866 = vst [vmem:[%s9625_s19 + $0x12f0] sm:$0xff] %v7086_v60  ;;  %6272 = vperm.xlu0 %8234, %v4488_v0   ;;  %v4006_v60 = vmul.f32 %v13318_v50, %v886_v20  ;;  %v3986_v31 = vmul.f32 %v13319_v63, %v866_v24  ;;  %v3984_v28 = vmul.f32 %v13320_v51, %v864_v41  ;;  %v13324_v20 = vld [vmem:[#allocation277_spill] sm:$0xff]  ;;  %v877_v24 = vld [vmem:[%s9607_s10 + $0x13e8] sm:$0xff]  ;;  %v13326_v41 = vld [vmem:[#allocation279_spill] sm:$0xff] }
 0x7ce   : > { %7867 = vst [vmem:[%s9625_s19 + $0x12f8] sm:$0xff] %v7087_v25  ;;  %v6118_v10 = vpop.permute.xlu2 %6117  ;;  %v6068_v26 = vpop.permute.xlu1 %6067  ;;  %v3987_v25 = vmul.f32 %v13319_v63, %v867_v2  ;;  %v3997_v40 = vmul.f32 %v13326_v41, %v877_v24  ;;  %v4505_v51 = vld [vmem:[%s9502_s6 + $0xb68] sm:$0xff] }
 0x7cf   : > { %v7114_v19 = vadd.f32 %v6118_v10, %v3994_v56  ;;  %v7115_v3 = vadd.f32 %v6118_v10, %v3995_v42  ;;  %v7094_v44 = vadd.f32 %v6068_v26, %v3974_v32  ;;  %v6063_v18 = vpop.permute.xlu0 %6062  ;;  %v7095_v43 = vadd.f32 %v6068_v26, %v3975_v17  ;;  %v892_v10 = vld [vmem:[%s9607_s10 + $0x1460] sm:$0xff] }
 0x7d0   : > { %v7092_v8 = vadd.f32 %v6063_v18, %v3972_v1  ;;  %v7093_v7 = vadd.f32 %v6063_v18, %v3973_v29  ;;  %v4498_v1 = vld [vmem:[%s9502_s6 + $0xb30] sm:$0xff]  ;;  %v4497_v18 = vld [vmem:[%s9502_s6 + $0xb28] sm:$0xff] }
 0x7d1   : > { %7894 = vst [vmem:[%s9625_s19 + $0x13d0] sm:$0xff] %v7114_v19  ;;  %v893_v19 = vld [vmem:[%s9607_s10 + $0x1468] sm:$0xff] }
 0x7d2   : > { %7895 = vst [vmem:[%s9625_s19 + $0x13d8] sm:$0xff] %v7115_v3  ;;  %v872_v3 = vld [vmem:[%s9607_s10 + $0x13c0] sm:$0xff]  ;;  %v873_v29 = vld [vmem:[%s9607_s10 + $0x13c8] sm:$0xff] }
 0x7d3   : > { %7874 = vst [vmem:[%s9625_s19 + $0x1330] sm:$0xff] %v7094_v44 }
 0x7d4   : > { %7875 = vst [vmem:[%s9625_s19 + $0x1338] sm:$0xff] %v7095_v43  ;;  %6297 = vperm.xlu2 %8236, %v4493_v21   ;;  %6292 = vperm.xlu1 %8235, %v4492_v38   ;;  %v870_v43 = vld [vmem:[%s9607_s10 + $0x13b0] sm:$0xff]  ;;  %v4013_v21 = vmul.f32 %v13321_v14, %v893_v19 }
 0x7d5   : > { %7872 = vst [vmem:[%s9625_s19 + $0x1320] sm:$0xff] %v7092_v8  ;;  %6287 = vperm.xlu0 %8234, %v4491_v12   ;;  %v4012_v8 = vmul.f32 %v13321_v14, %v892_v10  ;;  %v13322_v38 = vld [vmem:[#allocation275_spill] sm:$0xff]  ;;  %v3990_v48 = vmul.f32 %v13323_v22, %v870_v43  ;;  %v13327_v10 = vld [vmem:[#allocation280_spill] sm:$0xff]  ;;  %v13329_v43 = vld [vmem:[#allocation282_spill] sm:$0xff] }
 0x7d6   : > { %7873 = vst [vmem:[%s9625_s19 + $0x1328] sm:$0xff] %v7093_v7  ;;  %v6133_v62 = vpop.permute.xlu2 %6132  ;;  %v6083_v34 = vpop.permute.xlu1 %6082  ;;  %v3992_v61 = vmul.f32 %v13322_v38, %v872_v3  ;;  %v3993_v7 = vmul.f32 %v13322_v38, %v873_v29  ;;  %v883_v3 = vld [vmem:[%s9607_s10 + $0x1418] sm:$0xff]  ;;  %v4508_v22 = vld [vmem:[%s9502_s6 + $0xb80] sm:$0xff] }
 0x7d7   : > { %v7120_v37 = vadd.f32 %v6133_v62, %v4000_v33  ;;  %v7121_v46 = vadd.f32 %v6133_v62, %v4001_v11  ;;  %v7100_v6 = vadd.f32 %v6083_v34, %v3980_v54  ;;  %v6078_v15 = vpop.permute.xlu0 %6077  ;;  %v7101_v23 = vadd.f32 %v6083_v34, %v3981_v52  ;;  %v898_v62 = vld [vmem:[%s9607_s10 + $0x1490] sm:$0xff] }
 0x7d8   : > { %v7098_v5 = vadd.f32 %v6078_v15, %v3978_v39  ;;  %v7099_v35 = vadd.f32 %v6078_v15, %v3979_v57  ;;  %v4501_v39 = vld [vmem:[%s9502_s6 + $0xb48] sm:$0xff]  ;;  %v4500_v15 = vld [vmem:[%s9502_s6 + $0xb40] sm:$0xff]  ;;  %v879_v57 = vld [vmem:[%s9607_s10 + $0x13f8] sm:$0xff]  ;;  %v4003_v4 = vmul.f32 %v13329_v43, %v883_v3 }
 0x7d9   : > { %7900 = vst [vmem:[%s9625_s19 + $0x1400] sm:$0xff] %v7120_v37  ;;  %v899_v37 = vld [vmem:[%s9607_s10 + $0x1498] sm:$0xff] }
 0x7da   : > { %7901 = vst [vmem:[%s9625_s19 + $0x1408] sm:$0xff] %v7121_v46  ;;  %v878_v46 = vld [vmem:[%s9607_s10 + $0x13f0] sm:$0xff] }
 0x7db   : > { %7880 = vst [vmem:[%s9625_s19 + $0x1360] sm:$0xff] %v7100_v6 }
 0x7dc   : > { %7881 = vst [vmem:[%s9625_s19 + $0x1368] sm:$0xff] %v7101_v23  ;;  %6312 = vperm.xlu2 %8236, %v4496_v53   ;;  %6307 = vperm.xlu1 %8235, %v4495_v58   ;;  %v876_v23 = vld [vmem:[%s9607_s10 + $0x13e0] sm:$0xff]  ;;  %v4019_v53 = vmul.f32 %v13324_v20, %v899_v37  ;;  %v13325_v58 = vld [vmem:[#allocation278_spill] sm:$0xff] }
 0x7dd   : > { %7878 = vst [vmem:[%s9625_s19 + $0x1350] sm:$0xff] %v7098_v5  ;;  %6302 = vperm.xlu0 %8234, %v4494_v16   ;;  %v4018_v5 = vmul.f32 %v13324_v20, %v898_v62  ;;  %v3998_v45 = vmul.f32 %v13325_v58, %v878_v46  ;;  %v3996_v50 = vmul.f32 %v13326_v41, %v876_v23  ;;  %v13330_v62 = vld [vmem:[#allocation283_spill] sm:$0xff]  ;;  %v889_v46 = vld [vmem:[%s9607_s10 + $0x1448] sm:$0xff]  ;;  %v13332_v23 = vld [vmem:[#allocation285_spill] sm:$0xff] }
 0x7de   : > { %7879 = vst [vmem:[%s9625_s19 + $0x1358] sm:$0xff] %v7099_v35  ;;  %v6148_v0 = vpop.permute.xlu2 %6147  ;;  %v6098_v9 = vpop.permute.xlu1 %6097  ;;  %v3999_v35 = vmul.f32 %v13325_v58, %v879_v57  ;;  %v4009_v24 = vmul.f32 %v13332_v23, %v889_v46  ;;  %v4511_v41 = vld [vmem:[%s9502_s6 + $0xb98] sm:$0xff] }
 0x7df   : > { %v7126_v56 = vadd.f32 %v6148_v0, %v4006_v60  ;;  %v7127_v42 = vadd.f32 %v6148_v0, %v4007_v27  ;;  %v7106_v30 = vadd.f32 %v6098_v9, %v3986_v31  ;;  %v6093_v32 = vpop.permute.xlu0 %6092  ;;  %v7107_v17 = vadd.f32 %v6098_v9, %v3987_v25  ;;  %v904_v0 = vld [vmem:[%s9607_s10 + $0x14c0] sm:$0xff] }
 0x7e0   : > { %v7104_v26 = vadd.f32 %v6093_v32, %v3984_v28  ;;  %v7105_v44 = vadd.f32 %v6093_v32, %v3985_v59  ;;  %v4504_v28 = vld [vmem:[%s9502_s6 + $0xb60] sm:$0xff]  ;;  %v4503_v32 = vld [vmem:[%s9502_s6 + $0xb58] sm:$0xff]  ;;  %v885_v59 = vld [vmem:[%s9607_s10 + $0x1428] sm:$0xff] }
 0x7e1   : > { %7906 = vst [vmem:[%s9625_s19 + $0x1430] sm:$0xff] %v7126_v56  ;;  %v905_v56 = vld [vmem:[%s9607_s10 + $0x14c8] sm:$0xff] }
 0x7e2   : > { %7907 = vst [vmem:[%s9625_s19 + $0x1438] sm:$0xff] %v7127_v42  ;;  %v884_v42 = vld [vmem:[%s9607_s10 + $0x1420] sm:$0xff] }
 0x7e3   : > { %7886 = vst [vmem:[%s9625_s19 + $0x1390] sm:$0xff] %v7106_v30 }
 0x7e4   : > { %7887 = vst [vmem:[%s9625_s19 + $0x1398] sm:$0xff] %v7107_v17  ;;  %6327 = vperm.xlu2 %8236, %v4499_v36   ;;  %6322 = vperm.xlu1 %8235, %v4498_v1   ;;  %v882_v17 = vld [vmem:[%s9607_s10 + $0x1410] sm:$0xff]  ;;  %v4025_v36 = vmul.f32 %v13327_v10, %v905_v56  ;;  %v13328_v1 = vld [vmem:[#allocation281_spill] sm:$0xff] }
 0x7e5   : > { %7884 = vst [vmem:[%s9625_s19 + $0x1380] sm:$0xff] %v7104_v26  ;;  %6317 = vperm.xlu0 %8234, %v4497_v18   ;;  %v4024_v26 = vmul.f32 %v13327_v10, %v904_v0  ;;  %v4004_v19 = vmul.f32 %v13328_v1, %v884_v42  ;;  %v4002_v14 = vmul.f32 %v13329_v43, %v882_v17  ;;  %v13333_v0 = vld [vmem:[#allocation286_spill] sm:$0xff]  ;;  %v895_v42 = vld [vmem:[%s9607_s10 + $0x1478] sm:$0xff]  ;;  %v4514_v43 = vld [vmem:[%s9502_s6 + $0xbb0] sm:$0xff] }
 0x7e6   : > { %7885 = vst [vmem:[%s9625_s19 + $0x1388] sm:$0xff] %v7105_v44  ;;  %v6163_v12 = vpop.permute.xlu2 %6162  ;;  %v6113_v55 = vpop.permute.xlu1 %6112  ;;  %v4005_v44 = vmul.f32 %v13328_v1, %v885_v59  ;;  %v13335_v17 = vld [vmem:[#allocation288_spill] sm:$0xff] }
 0x7e7   : > { %v7132_v33 = vadd.f32 %v6163_v12, %v4012_v8  ;;  %v7133_v11 = vadd.f32 %v6163_v12, %v4013_v21  ;;  %v7112_v47 = vadd.f32 %v6113_v55, %v3992_v61  ;;  %v6108_v54 = vpop.permute.xlu0 %6107  ;;  %v7113_v52 = vadd.f32 %v6113_v55, %v3993_v7  ;;  %v910_v12 = vld [vmem:[%s9607_s10 + $0x14f0] sm:$0xff] }
 0x7e8   : > { %v7110_v34 = vadd.f32 %v6108_v54, %v3990_v48  ;;  %v7111_v6 = vadd.f32 %v6108_v54, %v3991_v49  ;;  %v4507_v48 = vld [vmem:[%s9502_s6 + $0xb78] sm:$0xff]  ;;  %v4506_v54 = vld [vmem:[%s9502_s6 + $0xb70] sm:$0xff]  ;;  %v4015_v3 = vmul.f32 %v13335_v17, %v895_v42 }
 0x7e9   : > { %7912 = vst [vmem:[%s9625_s19 + $0x1460] sm:$0xff] %v7132_v33  ;;  %v911_v33 = vld [vmem:[%s9607_s10 + $0x14f8] sm:$0xff] }
 0x7ea   : > { %7913 = vst [vmem:[%s9625_s19 + $0x1468] sm:$0xff] %v7133_v11  ;;  %v890_v11 = vld [vmem:[%s9607_s10 + $0x1450] sm:$0xff]  ;;  %v891_v49 = vld [vmem:[%s9607_s10 + $0x1458] sm:$0xff] }
 0x7eb   : > { %7892 = vst [vmem:[%s9625_s19 + $0x13c0] sm:$0xff] %v7112_v47 }
 0x7ec   : > { %7893 = vst [vmem:[%s9625_s19 + $0x13c8] sm:$0xff] %v7113_v52  ;;  %6342 = vperm.xlu2 %8236, %v4502_v13   ;;  %6337 = vperm.xlu1 %8235, %v4501_v39   ;;  %v888_v52 = vld [vmem:[%s9607_s10 + $0x1440] sm:$0xff]  ;;  %v4031_v13 = vmul.f32 %v13330_v62, %v911_v33  ;;  %v13331_v39 = vld [vmem:[#allocation284_spill] sm:$0xff] }
 0x7ed   : > { %7890 = vst [vmem:[%s9625_s19 + $0x13b0] sm:$0xff] %v7110_v34  ;;  %6332 = vperm.xlu0 %8234, %v4500_v15   ;;  %v4030_v34 = vmul.f32 %v13330_v62, %v910_v12  ;;  %v4010_v37 = vmul.f32 %v13331_v39, %v890_v11  ;;  %v4008_v20 = vmul.f32 %v13332_v23, %v888_v52  ;;  %v13336_v12 = vld [vmem:[#allocation289_spill] sm:$0xff]  ;;  %v901_v11 = vld [vmem:[%s9607_s10 + $0x14a8] sm:$0xff]  ;;  %v13338_v52 = vld [vmem:[#allocation291_spill] sm:$0xff] }
 0x7ee   : > { %7891 = vst [vmem:[%s9625_s19 + $0x13b8] sm:$0xff] %v7111_v6  ;;  %v6178_v16 = vpop.permute.xlu2 %6177  ;;  %v6128_v2 = vpop.permute.xlu1 %6127  ;;  %v4011_v6 = vmul.f32 %v13331_v39, %v891_v49  ;;  %v4021_v46 = vmul.f32 %v13338_v52, %v901_v11  ;;  %v4517_v23 = vld [vmem:[%s9502_s6 + $0xbc8] sm:$0xff] }
 0x7ef   : > { %v7138_v60 = vadd.f32 %v6178_v16, %v4018_v5  ;;  %v7139_v27 = vadd.f32 %v6178_v16, %v4019_v53  ;;  %v7118_v63 = vadd.f32 %v6128_v2, %v3998_v45  ;;  %v6123_v31 = vpop.permute.xlu0 %6122  ;;  %v7119_v25 = vadd.f32 %v6128_v2, %v3999_v35  ;;  %v916_v16 = vld [vmem:[%s9607_s10 + $0x1520] sm:$0xff] }
 0x7f0   : > { %v7116_v9 = vadd.f32 %v6123_v31, %v3996_v50  ;;  %v7117_v30 = vadd.f32 %v6123_v31, %v3997_v40  ;;  %v4510_v50 = vld [vmem:[%s9502_s6 + $0xb90] sm:$0xff]  ;;  %v4509_v31 = vld [vmem:[%s9502_s6 + $0xb88] sm:$0xff] }
 0x7f1   : > { %7918 = vst [vmem:[%s9625_s19 + $0x1490] sm:$0xff] %v7138_v60  ;;  %v917_v60 = vld [vmem:[%s9607_s10 + $0x1528] sm:$0xff] }
 0x7f2   : > { %7919 = vst [vmem:[%s9625_s19 + $0x1498] sm:$0xff] %v7139_v27  ;;  %v896_v27 = vld [vmem:[%s9607_s10 + $0x1480] sm:$0xff]  ;;  %v897_v40 = vld [vmem:[%s9607_s10 + $0x1488] sm:$0xff] }
 0x7f3   : > { %7898 = vst [vmem:[%s9625_s19 + $0x13f0] sm:$0xff] %v7118_v63 }
 0x7f4   : > { %7899 = vst [vmem:[%s9625_s19 + $0x13f8] sm:$0xff] %v7119_v25  ;;  %6357 = vperm.xlu2 %8236, %v4505_v51   ;;  %6352 = vperm.xlu1 %8235, %v4504_v28   ;;  %v894_v25 = vld [vmem:[%s9607_s10 + $0x1470] sm:$0xff]  ;;  %v4037_v51 = vmul.f32 %v13333_v0, %v917_v60 }
 0x7f5   : > { %7896 = vst [vmem:[%s9625_s19 + $0x13e0] sm:$0xff] %v7116_v9  ;;  %6347 = vperm.xlu0 %8234, %v4503_v32   ;;  %v4036_v9 = vmul.f32 %v13333_v0, %v916_v16  ;;  %v13334_v28 = vld [vmem:[#allocation287_spill] sm:$0xff]  ;;  %v4014_v10 = vmul.f32 %v13335_v17, %v894_v25  ;;  %v13339_v16 = vld [vmem:[#allocation292_spill] sm:$0xff]  ;;  %v13341_v25 = vld [vmem:[#allocation294_spill] sm:$0xff] }
 0x7f6   : > { %7897 = vst [vmem:[%s9625_s19 + $0x13e8] sm:$0xff] %v7117_v30  ;;  %v6193_v18 = vpop.permute.xlu2 %6192  ;;  %v6143_v29 = vpop.permute.xlu1 %6142  ;;  %v4016_v56 = vmul.f32 %v13334_v28, %v896_v27  ;;  %v4017_v30 = vmul.f32 %v13334_v28, %v897_v40  ;;  %v907_v27 = vld [vmem:[%s9607_s10 + $0x14d8] sm:$0xff]  ;;  %v4520_v17 = vld [vmem:[%s9502_s6 + $0xbe0] sm:$0xff] }
 0x7f7   : > { %v7144_v8 = vadd.f32 %v6193_v18, %v4024_v26  ;;  %v7145_v21 = vadd.f32 %v6193_v18, %v4025_v36  ;;  %v7124_v38 = vadd.f32 %v6143_v29, %v4004_v19  ;;  %v6138_v61 = vpop.permute.xlu0 %6137  ;;  %v7125_v7 = vadd.f32 %v6143_v29, %v4005_v44  ;;  %v922_v18 = vld [vmem:[%s9607_s10 + $0x1550] sm:$0xff] }
 0x7f8   : > { %v7122_v55 = vadd.f32 %v6138_v61, %v4002_v14  ;;  %v7123_v47 = vadd.f32 %v6138_v61, %v4003_v4  ;;  %v4513_v14 = vld [vmem:[%s9502_s6 + $0xba8] sm:$0xff]  ;;  %v4512_v61 = vld [vmem:[%s9502_s6 + $0xba0] sm:$0xff]  ;;  %v903_v4 = vld [vmem:[%s9607_s10 + $0x14b8] sm:$0xff]  ;;  %v4027_v42 = vmul.f32 %v13341_v25, %v907_v27 }
 0x7f9   : > { %7924 = vst [vmem:[%s9625_s19 + $0x14c0] sm:$0xff] %v7144_v8  ;;  %v923_v8 = vld [vmem:[%s9607_s10 + $0x1558] sm:$0xff] }
 0x7fa   : > { %7925 = vst [vmem:[%s9625_s19 + $0x14c8] sm:$0xff] %v7145_v21  ;;  %v902_v21 = vld [vmem:[%s9607_s10 + $0x14b0] sm:$0xff] }
 0x7fb   : > { %7904 = vst [vmem:[%s9625_s19 + $0x1420] sm:$0xff] %v7124_v38 }
 0x7fc   : > { %7905 = vst [vmem:[%s9625_s19 + $0x1428] sm:$0xff] %v7125_v7  ;;  %6372 = vperm.xlu2 %8236, %v4508_v22   ;;  %6367 = vperm.xlu1 %8235, %v4507_v48   ;;  %v900_v7 = vld [vmem:[%s9607_s10 + $0x14a0] sm:$0xff]  ;;  %v4043_v22 = vmul.f32 %v13336_v12, %v923_v8  ;;  %v13337_v48 = vld [vmem:[#allocation290_spill] sm:$0xff] }
 0x7fd   : > { %7902 = vst [vmem:[%s9625_s19 + $0x1410] sm:$0xff] %v7122_v55  ;;  %6362 = vperm.xlu0 %8234, %v4506_v54   ;;  %v4042_v55 = vmul.f32 %v13336_v12, %v922_v18  ;;  %v4022_v33 = vmul.f32 %v13337_v48, %v902_v21  ;;  %v4020_v62 = vmul.f32 %v13338_v52, %v900_v7  ;;  %v13342_v18 = vld [vmem:[#allocation295_spill] sm:$0xff]  ;;  %v913_v21 = vld [vmem:[%s9607_s10 + $0x1508] sm:$0xff]  ;;  %v13344_v7 = vld [vmem:[#allocation297_spill] sm:$0xff] }
 0x7fe   : > { %7903 = vst [vmem:[%s9625_s19 + $0x1418] sm:$0xff] %v7123_v47  ;;  %v6208_v15 = vpop.permute.xlu2 %6207  ;;  %v6158_v57 = vpop.permute.xlu1 %6157  ;;  %v4023_v47 = vmul.f32 %v13337_v48, %v903_v4  ;;  %v4033_v11 = vmul.f32 %v13344_v7, %v913_v21  ;;  %v4523_v52 = vld [vmem:[%s9502_s6 + $0xbf8] sm:$0xff] }
 0x7ff   : > { %v7150_v5 = vadd.f32 %v6208_v15, %v4030_v34  ;;  %v7151_v53 = vadd.f32 %v6208_v15, %v4031_v13  ;;  %v7130_v58 = vadd.f32 %v6158_v57, %v4010_v37  ;;  %v6153_v45 = vpop.permute.xlu0 %6152  ;;  %v7131_v35 = vadd.f32 %v6158_v57, %v4011_v6  ;;  %v928_v15 = vld [vmem:[%s9607_s10 + $0x1580] sm:$0xff] }
 0x800   : > { %v7128_v2 = vadd.f32 %v6153_v45, %v4008_v20  ;;  %v7129_v63 = vadd.f32 %v6153_v45, %v4009_v24  ;;  %v4516_v20 = vld [vmem:[%s9502_s6 + $0xbc0] sm:$0xff]  ;;  %v4515_v45 = vld [vmem:[%s9502_s6 + $0xbb8] sm:$0xff]  ;;  %v909_v24 = vld [vmem:[%s9607_s10 + $0x14e8] sm:$0xff] }
 0x801   : > { %7930 = vst [vmem:[%s9625_s19 + $0x14f0] sm:$0xff] %v7150_v5  ;;  %v929_v5 = vld [vmem:[%s9607_s10 + $0x1588] sm:$0xff] }
 0x802   : > { %7931 = vst [vmem:[%s9625_s19 + $0x14f8] sm:$0xff] %v7151_v53  ;;  %v908_v53 = vld [vmem:[%s9607_s10 + $0x14e0] sm:$0xff] }
 0x803   : > { %7910 = vst [vmem:[%s9625_s19 + $0x1450] sm:$0xff] %v7130_v58 }
 0x804   : > { %7911 = vst [vmem:[%s9625_s19 + $0x1458] sm:$0xff] %v7131_v35  ;;  %6387 = vperm.xlu2 %8236, %v4511_v41   ;;  %6382 = vperm.xlu1 %8235, %v4510_v50   ;;  %v906_v35 = vld [vmem:[%s9607_s10 + $0x14d0] sm:$0xff]  ;;  %v4049_v41 = vmul.f32 %v13339_v16, %v929_v5  ;;  %v13340_v50 = vld [vmem:[#allocation293_spill] sm:$0xff] }
 0x805   : > { %7908 = vst [vmem:[%s9625_s19 + $0x1440] sm:$0xff] %v7128_v2  ;;  %6377 = vperm.xlu0 %8234, %v4509_v31   ;;  %v4048_v2 = vmul.f32 %v13339_v16, %v928_v15  ;;  %v4028_v60 = vmul.f32 %v13340_v50, %v908_v53  ;;  %v4026_v0 = vmul.f32 %v13341_v25, %v906_v35  ;;  %v13345_v15 = vld [vmem:[#allocation298_spill] sm:$0xff]  ;;  %v919_v53 = vld [vmem:[%s9607_s10 + $0x1538] sm:$0xff]  ;;  %v4526_v25 = vld [vmem:[%s9502_s6 + $0xc10] sm:$0xff] }
 0x806   : > { %7909 = vst [vmem:[%s9625_s19 + $0x1448] sm:$0xff] %v7129_v63  ;;  %v6223_v32 = vpop.permute.xlu2 %6222  ;;  %v6173_v59 = vpop.permute.xlu1 %6172  ;;  %v4029_v63 = vmul.f32 %v13340_v50, %v909_v24  ;;  %v13347_v35 = vld [vmem:[#allocation300_spill] sm:$0xff] }
 0x807   : > { %v7156_v26 = vadd.f32 %v6223_v32, %v4036_v9  ;;  %v7157_v36 = vadd.f32 %v6223_v32, %v4037_v51  ;;  %v7136_v1 = vadd.f32 %v6173_v59, %v4016_v56  ;;  %v6168_v19 = vpop.permute.xlu0 %6167  ;;  %v7137_v44 = vadd.f32 %v6173_v59, %v4017_v30  ;;  %v934_v32 = vld [vmem:[%s9607_s10 + $0x15b0] sm:$0xff] }
 0x808   : > { %v7134_v29 = vadd.f32 %v6168_v19, %v4014_v10  ;;  %v7135_v38 = vadd.f32 %v6168_v19, %v4015_v3  ;;  %v4519_v10 = vld [vmem:[%s9502_s6 + $0xbd8] sm:$0xff]  ;;  %v4518_v19 = vld [vmem:[%s9502_s6 + $0xbd0] sm:$0xff]  ;;  %v4039_v27 = vmul.f32 %v13347_v35, %v919_v53 }
 0x809   : > { %7936 = vst [vmem:[%s9625_s19 + $0x1520] sm:$0xff] %v7156_v26  ;;  %v935_v26 = vld [vmem:[%s9607_s10 + $0x15b8] sm:$0xff] }
 0x80a   : > { %7937 = vst [vmem:[%s9625_s19 + $0x1528] sm:$0xff] %v7157_v36  ;;  %v914_v36 = vld [vmem:[%s9607_s10 + $0x1510] sm:$0xff]  ;;  %v915_v3 = vld [vmem:[%s9607_s10 + $0x1518] sm:$0xff] }
 0x80b   : > { %7916 = vst [vmem:[%s9625_s19 + $0x1480] sm:$0xff] %v7136_v1 }
 0x80c   : > { %7917 = vst [vmem:[%s9625_s19 + $0x1488] sm:$0xff] %v7137_v44  ;;  %6402 = vperm.xlu2 %8236, %v4514_v43   ;;  %6397 = vperm.xlu1 %8235, %v4513_v14   ;;  %v912_v44 = vld [vmem:[%s9607_s10 + $0x1500] sm:$0xff]  ;;  %v4055_v43 = vmul.f32 %v13342_v18, %v935_v26  ;;  %v13343_v14 = vld [vmem:[#allocation296_spill] sm:$0xff] }
 0x80d   : > { %7914 = vst [vmem:[%s9625_s19 + $0x1470] sm:$0xff] %v7134_v29  ;;  %6392 = vperm.xlu0 %8234, %v4512_v61   ;;  %v4054_v29 = vmul.f32 %v13342_v18, %v934_v32  ;;  %v4034_v8 = vmul.f32 %v13343_v14, %v914_v36  ;;  %v4032_v12 = vmul.f32 %v13344_v7, %v912_v44  ;;  %v13348_v32 = vld [vmem:[#allocation301_spill] sm:$0xff]  ;;  %v925_v36 = vld [vmem:[%s9607_s10 + $0x1568] sm:$0xff]  ;;  %v13350_v44 = vld [vmem:[#allocation303_spill] sm:$0xff] }
 0x80e   : > { %7915 = vst [vmem:[%s9625_s19 + $0x1478] sm:$0xff] %v7135_v38  ;;  %v6238_v54 = vpop.permute.xlu2 %6237  ;;  %v6188_v49 = vpop.permute.xlu1 %6187  ;;  %v4035_v38 = vmul.f32 %v13343_v14, %v915_v3  ;;  %v4045_v21 = vmul.f32 %v13350_v44, %v925_v36  ;;  %v4529_v7 = vld [vmem:[%s9502_s6 + $0xc28] sm:$0xff]  ;;  %v964_v36 = vld [vmem:[%s9607_s10 + $0x16a0] sm:$0xff] }
 0x80f   : > { %v7162_v34 = vadd.f32 %v6238_v54, %v4042_v55  ;;  %v7163_v13 = vadd.f32 %v6238_v54, %v4043_v22  ;;  %v7142_v39 = vadd.f32 %v6188_v49, %v4022_v33  ;;  %v6183_v37 = vpop.permute.xlu0 %6182  ;;  %v7143_v6 = vadd.f32 %v6188_v49, %v4023_v47  ;;  %v940_v54 = vld [vmem:[%s9607_s10 + $0x15e0] sm:$0xff] }
 0x810   : > { %v7140_v57 = vadd.f32 %v6183_v37, %v4020_v62  ;;  %v7141_v58 = vadd.f32 %v6183_v37, %v4021_v46  ;;  %v4522_v62 = vld [vmem:[%s9502_s6 + $0xbf0] sm:$0xff]  ;;  %v4521_v37 = vld [vmem:[%s9502_s6 + $0xbe8] sm:$0xff] }
 0x811   : > { %7942 = vst [vmem:[%s9625_s19 + $0x1550] sm:$0xff] %v7162_v34  ;;  %v941_v34 = vld [vmem:[%s9607_s10 + $0x15e8] sm:$0xff] }
 0x812   : > { %7943 = vst [vmem:[%s9625_s19 + $0x1558] sm:$0xff] %v7163_v13  ;;  %v920_v13 = vld [vmem:[%s9607_s10 + $0x1540] sm:$0xff]  ;;  %v921_v46 = vld [vmem:[%s9607_s10 + $0x1548] sm:$0xff] }
 0x813   : > { %7922 = vst [vmem:[%s9625_s19 + $0x14b0] sm:$0xff] %v7142_v39 }
 0x814   : > { %7923 = vst [vmem:[%s9625_s19 + $0x14b8] sm:$0xff] %v7143_v6  ;;  %6417 = vperm.xlu2 %8236, %v4517_v23   ;;  %6412 = vperm.xlu1 %8235, %v4516_v20   ;;  %v918_v6 = vld [vmem:[%s9607_s10 + $0x1530] sm:$0xff]  ;;  %v4061_v23 = vmul.f32 %v13345_v15, %v941_v34 }
 0x815   : > { %7920 = vst [vmem:[%s9625_s19 + $0x14a0] sm:$0xff] %v7140_v57  ;;  %6407 = vperm.xlu0 %8234, %v4515_v45   ;;  %v4060_v57 = vmul.f32 %v13345_v15, %v940_v54  ;;  %v13346_v20 = vld [vmem:[#allocation299_spill] sm:$0xff]  ;;  %v4038_v16 = vmul.f32 %v13347_v35, %v918_v6  ;;  %v13351_v54 = vld [vmem:[#allocation304_spill] sm:$0xff]  ;;  %v13353_v6 = vld [vmem:[#allocation306_spill] sm:$0xff] }
 0x816   : > { %7921 = vst [vmem:[%s9625_s19 + $0x14a8] sm:$0xff] %v7141_v58  ;;  %v6253_v31 = vpop.permute.xlu2 %6252  ;;  %v6203_v40 = vpop.permute.xlu1 %6202  ;;  %v4040_v5 = vmul.f32 %v13346_v20, %v920_v13  ;;  %v4041_v58 = vmul.f32 %v13346_v20, %v921_v46  ;;  %v931_v13 = vld [vmem:[%s9607_s10 + $0x1598] sm:$0xff] }
 0x817   : > { %v7168_v9 = vadd.f32 %v6253_v31, %v4048_v2  ;;  %v7169_v51 = vadd.f32 %v6253_v31, %v4049_v41  ;;  %v7148_v28 = vadd.f32 %v6203_v40, %v4028_v60  ;;  %v6198_v56 = vpop.permute.xlu0 %6197  ;;  %v7149_v30 = vadd.f32 %v6203_v40, %v4029_v63  ;;  %v946_v31 = vld [vmem:[%s9607_s10 + $0x1610] sm:$0xff]  ;;  %v959_v35 = vld [vmem:[%s9607_s10 + $0x1678] sm:$0xff] }
 0x818   : > { %v7146_v59 = vadd.f32 %v6198_v56, %v4026_v0  ;;  %v7147_v1 = vadd.f32 %v6198_v56, %v4027_v42  ;;  %v4525_v0 = vld [vmem:[%s9502_s6 + $0xc08] sm:$0xff]  ;;  %v4524_v56 = vld [vmem:[%s9502_s6 + $0xc00] sm:$0xff]  ;;  %v927_v42 = vld [vmem:[%s9607_s10 + $0x1578] sm:$0xff]  ;;  %v4051_v53 = vmul.f32 %v13353_v6, %v931_v13 }
 0x819   : > { %7948 = vst [vmem:[%s9625_s19 + $0x1580] sm:$0xff] %v7168_v9  ;;  %v947_v9 = vld [vmem:[%s9607_s10 + $0x1618] sm:$0xff] }
 0x81a   : > { %7949 = vst [vmem:[%s9625_s19 + $0x1588] sm:$0xff] %v7169_v51  ;;  %v926_v51 = vld [vmem:[%s9607_s10 + $0x1570] sm:$0xff] }
 0x81b   : > { %7928 = vst [vmem:[%s9625_s19 + $0x14e0] sm:$0xff] %v7148_v28 }
 0x81c   : > { %7929 = vst [vmem:[%s9625_s19 + $0x14e8] sm:$0xff] %v7149_v30  ;;  %6432 = vperm.xlu2 %8236, %v4520_v17   ;;  %6427 = vperm.xlu1 %8235, %v4519_v10   ;;  %v924_v30 = vld [vmem:[%s9607_s10 + $0x1560] sm:$0xff]  ;;  %v4067_v17 = vmul.f32 %v13348_v32, %v947_v9  ;;  %v13349_v10 = vld [vmem:[#allocation302_spill] sm:$0xff] }
 0x81d   : > { %7926 = vst [vmem:[%s9625_s19 + $0x14d0] sm:$0xff] %v7146_v59  ;;  %6422 = vperm.xlu0 %8234, %v4518_v19   ;;  %v4066_v59 = vmul.f32 %v13348_v32, %v946_v31  ;;  %v4046_v26 = vmul.f32 %v13349_v10, %v926_v51  ;;  %v4044_v18 = vmul.f32 %v13350_v44, %v924_v30  ;;  %v13355_v31 = vld [vmem:[#allocation308_spill] sm:$0xff]  ;;  %v945_v44 = vld [vmem:[%s9607_s10 + $0x1608] sm:$0xff] }
 0x81e   : > { %7927 = vst [vmem:[%s9625_s19 + $0x14d8] sm:$0xff] %v7147_v1  ;;  %v6268_v61 = vpop.permute.xlu2 %6267  ;;  %v6218_v4 = vpop.permute.xlu1 %6217  ;;  %v4047_v1 = vmul.f32 %v13349_v10, %v927_v42 }
 0x81f   : > { %v7174_v55 = vadd.f32 %v6268_v61, %v4054_v29  ;;  %v7175_v22 = vadd.f32 %v6268_v61, %v4055_v43  ;;  %v7154_v48 = vadd.f32 %v6218_v4, %v4034_v8  ;;  %v6213_v33 = vpop.permute.xlu0 %6212  ;;  %v7155_v47 = vadd.f32 %v6218_v4, %v4035_v38  ;;  %v952_v61 = vld [vmem:[%s9607_s10 + $0x1640] sm:$0xff] }
 0x820   : > { %v7152_v49 = vadd.f32 %v6213_v33, %v4032_v12  ;;  %v7153_v39 = vadd.f32 %v6213_v33, %v4033_v11  ;;  %v4528_v12 = vld [vmem:[%s9502_s6 + $0xc20] sm:$0xff]  ;;  %v4527_v33 = vld [vmem:[%s9502_s6 + $0xc18] sm:$0xff]  ;;  %v933_v11 = vld [vmem:[%s9607_s10 + $0x15a8] sm:$0xff] }
 0x821   : > { %7954 = vst [vmem:[%s9625_s19 + $0x15b0] sm:$0xff] %v7174_v55  ;;  %v953_v55 = vld [vmem:[%s9607_s10 + $0x1648] sm:$0xff] }
 0x822   : > { %7955 = vst [vmem:[%s9625_s19 + $0x15b8] sm:$0xff] %v7175_v22  ;;  %v932_v22 = vld [vmem:[%s9607_s10 + $0x15a0] sm:$0xff] }
 0x823   : > { %7934 = vst [vmem:[%s9625_s19 + $0x1510] sm:$0xff] %v7154_v48 }
 0x824   : > { %7935 = vst [vmem:[%s9625_s19 + $0x1518] sm:$0xff] %v7155_v47  ;;  %6447 = vperm.xlu2 %8236, %v4523_v52   ;;  %6442 = vperm.xlu1 %8235, %v4522_v62   ;;  %v930_v47 = vld [vmem:[%s9607_s10 + $0x1590] sm:$0xff]  ;;  %v4073_v52 = vmul.f32 %v13351_v54, %v953_v55  ;;  %v13352_v62 = vld [vmem:[#allocation305_spill] sm:$0xff] }
 0x825   : > { %7932 = vst [vmem:[%s9625_s19 + $0x1500] sm:$0xff] %v7152_v49  ;;  %6437 = vperm.xlu0 %8234, %v4521_v37   ;;  %v4072_v49 = vmul.f32 %v13351_v54, %v952_v61  ;;  %v4052_v34 = vmul.f32 %v13352_v62, %v932_v22  ;;  %v4050_v15 = vmul.f32 %v13353_v6, %v930_v47 }
 0x826   : > { %7933 = vst [vmem:[%s9625_s19 + $0x1508] sm:$0xff] %v7153_v39  ;;  %v6283_v45 = vpop.permute.xlu2 %6282  ;;  %v6233_v24 = vpop.permute.xlu1 %6232  ;;  %v4053_v39 = vmul.f32 %v13352_v62, %v933_v11  ;;  %v971_v62 = vld [vmem:[%s9607_s10 + $0x16d8] sm:$0xff] }
 0x827   : > { %v7180_v2 = vadd.f32 %v6283_v45, %v4060_v57  ;;  %v7181_v41 = vadd.f32 %v6283_v45, %v4061_v23  ;;  %v7160_v50 = vadd.f32 %v6233_v24, %v4040_v5  ;;  %v6228_v60 = vpop.permute.xlu0 %6227  ;;  %v7161_v63 = vadd.f32 %v6233_v24, %v4041_v58  ;;  %v958_v24 = vld [vmem:[%s9607_s10 + $0x1670] sm:$0xff] }
 0x828   : > { %v7158_v40 = vadd.f32 %v6228_v60, %v4038_v16  ;;  %v7159_v28 = vadd.f32 %v6228_v60, %v4039_v27  ;;  %v938_v16 = vld [vmem:[%s9607_s10 + $0x15d0] sm:$0xff] }
 0x829   : > { %7960 = vst [vmem:[%s9625_s19 + $0x15e0] sm:$0xff] %v7180_v2  ;;  %v13354_v60 = vld [vmem:[#allocation307_spill] sm:$0xff] }
 0x82a   : > { %7961 = vst [vmem:[%s9625_s19 + $0x15e8] sm:$0xff] %v7181_v41  ;;  %v939_v41 = vld [vmem:[%s9607_s10 + $0x15d8] sm:$0xff]  ;;  %v4078_v27 = vmul.f32 %v13354_v60, %v958_v24 }
 0x82b   : > { %7940 = vst [vmem:[%s9625_s19 + $0x1540] sm:$0xff] %v7160_v50  ;;  %v936_v50 = vld [vmem:[%s9607_s10 + $0x15c0] sm:$0xff] }
 0x82c   : > { %7941 = vst [vmem:[%s9625_s19 + $0x1548] sm:$0xff] %v7161_v63  ;;  %6462 = vperm.xlu2 %8236, %v4526_v25   ;;  %6457 = vperm.xlu1 %8235, %v4525_v0   ;;  %v4079_v63 = vmul.f32 %v13354_v60, %v959_v35  ;;  %v937_v25 = vld [vmem:[%s9607_s10 + $0x15c8] sm:$0xff]  ;;  %v4059_v0 = vmul.f32 %v13355_v31, %v939_v41 }
 0x82d   : > { %7938 = vst [vmem:[%s9625_s19 + $0x1530] sm:$0xff] %v7158_v40  ;;  %6452 = vperm.xlu0 %8234, %v4524_v56   ;;  %v4058_v40 = vmul.f32 %v13355_v31, %v938_v16  ;;  %v977_v31 = vld [vmem:[%s9607_s10 + $0x1708] sm:$0xff] }
 0x82e   : > { %7939 = vst [vmem:[%s9625_s19 + $0x1538] sm:$0xff] %v7159_v28  ;;  %v6298_v19 = vpop.permute.xlu2 %6297  ;;  %v6248_v3 = vpop.permute.xlu1 %6247  ;;  %v13356_v28 = vld [vmem:[#allocation309_spill] sm:$0xff] }
 0x82f   : > { %v7186_v29 = vadd.f32 %v6298_v19, %v4066_v59  ;;  %v7187_v43 = vadd.f32 %v6298_v19, %v4067_v17  ;;  %v7166_v14 = vadd.f32 %v6248_v3, %v4046_v26  ;;  %v6243_v8 = vpop.permute.xlu0 %6242  ;;  %v7167_v38 = vadd.f32 %v6248_v3, %v4047_v1  ;;  %v965_v1 = vld [vmem:[%s9607_s10 + $0x16a8] sm:$0xff]  ;;  %v944_v19 = vld [vmem:[%s9607_s10 + $0x1600] sm:$0xff] }
 0x830   : > { %v7164_v4 = vadd.f32 %v6243_v8, %v4044_v18  ;;  %v7165_v48 = vadd.f32 %v6243_v8, %v4045_v21  ;;  %v4056_v56 = vmul.f32 %v13356_v28, %v936_v50  ;;  %v4057_v17 = vmul.f32 %v13356_v28, %v937_v25  ;;  %v942_v18 = vld [vmem:[%s9607_s10 + $0x15f0] sm:$0xff] }
 0x831   : > { %7966 = vst [vmem:[%s9625_s19 + $0x1610] sm:$0xff] %v7186_v29  ;;  %v13357_v29 = vld [vmem:[#allocation310_spill] sm:$0xff]  ;;  %v13358_v8 = vld [vmem:[#allocation311_spill] sm:$0xff] }
 0x832   : > { %7967 = vst [vmem:[%s9625_s19 + $0x1618] sm:$0xff] %v7187_v43  ;;  %v4084_v43 = vmul.f32 %v13357_v29, %v964_v36  ;;  %v4064_v21 = vmul.f32 %v13358_v8, %v944_v19  ;;  %v4065_v61 = vmul.f32 %v13358_v8, %v945_v44  ;;  %v983_v8 = vld [vmem:[%s9607_s10 + $0x1738] sm:$0xff] }
 0x833   : > { %7946 = vst [vmem:[%s9625_s19 + $0x1570] sm:$0xff] %v7166_v14  ;;  %v4085_v14 = vmul.f32 %v13357_v29, %v965_v1 }
 0x834   : > { %7947 = vst [vmem:[%s9625_s19 + $0x1578] sm:$0xff] %v7167_v38  ;;  %6477 = vperm.xlu2 %8236, %v4529_v7   ;;  %6472 = vperm.xlu1 %8235, %v4528_v12   ;;  %v943_v38 = vld [vmem:[%s9607_s10 + $0x15f8] sm:$0xff] }
 0x835   : > { %7944 = vst [vmem:[%s9625_s19 + $0x1560] sm:$0xff] %v7164_v4  ;;  %6467 = vperm.xlu0 %8234, %v4527_v33   ;;  %v13359_v12 = vld [vmem:[#allocation312_spill] sm:$0xff] }
 0x836   : > { %7945 = vst [vmem:[%s9625_s19 + $0x1568] sm:$0xff] %v7165_v48  ;;  %v6313_v37 = vpop.permute.xlu2 %6312  ;;  %v6263_v46 = vpop.permute.xlu1 %6262  ;;  %v4062_v55 = vmul.f32 %v13359_v12, %v942_v18  ;;  %v4063_v47 = vmul.f32 %v13359_v12, %v943_v38 }
 0x837   : > { %v7192_v57 = vadd.f32 %v6313_v37, %v4072_v49  ;;  %v7193_v23 = vadd.f32 %v6313_v37, %v4073_v52  ;;  %v7172_v20 = vadd.f32 %v6263_v46, %v4052_v34  ;;  %v6258_v5 = vpop.permute.xlu0 %6257  ;;  %v7173_v58 = vadd.f32 %v6263_v46, %v4053_v39  ;;  %v970_v52 = vld [vmem:[%s9607_s10 + $0x16d0] sm:$0xff]  ;;  %v951_v39 = vld [vmem:[%s9607_s10 + $0x1638] sm:$0xff]  ;;  %v948_v37 = vld [vmem:[%s9607_s10 + $0x1620] sm:$0xff] }
 0x838   : > { %v7170_v45 = vadd.f32 %v6258_v5, %v4050_v15  ;;  %v7171_v2 = vadd.f32 %v6258_v5, %v4051_v53  ;;  %v950_v34 = vld [vmem:[%s9607_s10 + $0x1630] sm:$0xff]  ;;  %v13360_v46 = vld [vmem:[#allocation313_spill] sm:$0xff] }
 0x839   : > { %7972 = vst [vmem:[%s9625_s19 + $0x1640] sm:$0xff] %v7192_v57  ;;  %v4090_v6 = vmul.f32 %v13360_v46, %v970_v52  ;;  %v4091_v15 = vmul.f32 %v13360_v46, %v971_v62  ;;  %v13361_v57 = vld [vmem:[#allocation314_spill] sm:$0xff] }
 0x83a   : > { %7973 = vst [vmem:[%s9625_s19 + $0x1648] sm:$0xff] %v7193_v23  ;;  %v4070_v23 = vmul.f32 %v13361_v57, %v950_v34  ;;  %v4071_v5 = vmul.f32 %v13361_v57, %v951_v39  ;;  %v989_v57 = vld [vmem:[%s9607_s10 + $0x1768] sm:$0xff] }
 0x83b   : > { %7952 = vst [vmem:[%s9625_s19 + $0x15a0] sm:$0xff] %v7172_v20  ;;  %v949_v20 = vld [vmem:[%s9607_s10 + $0x1628] sm:$0xff] }
 0x83c   : > { %7953 = vst [vmem:[%s9625_s19 + $0x15a8] sm:$0xff] %v7173_v58 }
 0x83d   : > { %7950 = vst [vmem:[%s9625_s19 + $0x1590] sm:$0xff] %v7170_v45  ;;  %v13362_v45 = vld [vmem:[#allocation315_spill] sm:$0xff] }
 0x83e   : > { %7951 = vst [vmem:[%s9625_s19 + $0x1598] sm:$0xff] %v7171_v2  ;;  %v6328_v9 = vpop.permute.xlu2 %6327  ;;  %v6278_v51 = vpop.permute.xlu1 %6277  ;;  %v4068_v24 = vmul.f32 %v13362_v45, %v948_v37  ;;  %v4069_v50 = vmul.f32 %v13362_v45, %v949_v20 }
 0x83f   : > { %v7198_v42 = vadd.f32 %v6328_v9, %v4078_v27  ;;  %v7199_v30 = vadd.f32 %v6328_v9, %v4079_v63  ;;  %v7178_v32 = vadd.f32 %v6278_v51, %v4058_v40  ;;  %v6273_v59 = vpop.permute.xlu0 %6272  ;;  %v7179_v10 = vadd.f32 %v6278_v51, %v4059_v0  ;;  %v976_v63 = vld [vmem:[%s9607_s10 + $0x1700] sm:$0xff]  ;;  %v957_v0 = vld [vmem:[%s9607_s10 + $0x1668] sm:$0xff]  ;;  %v954_v9 = vld [vmem:[%s9607_s10 + $0x1650] sm:$0xff] }
 0x840   : > { %v7176_v26 = vadd.f32 %v6273_v59, %v4056_v56  ;;  %v7177_v3 = vadd.f32 %v6273_v59, %v4057_v17  ;;  %v956_v40 = vld [vmem:[%s9607_s10 + $0x1660] sm:$0xff]  ;;  %v13363_v51 = vld [vmem:[#allocation316_spill] sm:$0xff] }
 0x841   : > { %7978 = vst [vmem:[%s9625_s19 + $0x1670] sm:$0xff] %v7198_v42  ;;  %v4096_v28 = vmul.f32 %v13363_v51, %v976_v63  ;;  %v4097_v56 = vmul.f32 %v13363_v51, %v977_v31  ;;  %v13364_v42 = vld [vmem:[#allocation317_spill] sm:$0xff] }
 0x842   : > { %7979 = vst [vmem:[%s9625_s19 + $0x1678] sm:$0xff] %v7199_v30  ;;  %v4076_v30 = vmul.f32 %v13364_v42, %v956_v40  ;;  %v4077_v59 = vmul.f32 %v13364_v42, %v957_v0  ;;  %v995_v42 = vld [vmem:[%s9607_s10 + $0x1798] sm:$0xff] }
 0x843   : > { %7958 = vst [vmem:[%s9625_s19 + $0x15d0] sm:$0xff] %v7178_v32  ;;  %v955_v32 = vld [vmem:[%s9607_s10 + $0x1658] sm:$0xff] }
 0x844   : > { %7959 = vst [vmem:[%s9625_s19 + $0x15d8] sm:$0xff] %v7179_v10 }
 0x845   : > { %7956 = vst [vmem:[%s9625_s19 + $0x15c0] sm:$0xff] %v7176_v26  ;;  %v13365_v26 = vld [vmem:[#allocation318_spill] sm:$0xff] }
 0x846   : > { %7957 = vst [vmem:[%s9625_s19 + $0x15c8] sm:$0xff] %v7177_v3  ;;  %v6343_v4 = vpop.permute.xlu2 %6342  ;;  %v6293_v7 = vpop.permute.xlu1 %6292  ;;  %v4074_v36 = vmul.f32 %v13365_v26, %v954_v9  ;;  %v4075_v18 = vmul.f32 %v13365_v26, %v955_v32 }
 0x847   : > { %v7204_v22 = vadd.f32 %v6343_v4, %v4084_v43  ;;  %v7205_v48 = vadd.f32 %v6343_v4, %v4085_v14  ;;  %v7184_v33 = vadd.f32 %v6293_v7, %v4064_v21  ;;  %v6288_v11 = vpop.permute.xlu0 %6287  ;;  %v7185_v54 = vadd.f32 %v6293_v7, %v4065_v61  ;;  %v982_v14 = vld [vmem:[%s9607_s10 + $0x1730] sm:$0xff]  ;;  %v963_v61 = vld [vmem:[%s9607_s10 + $0x1698] sm:$0xff]  ;;  %v960_v4 = vld [vmem:[%s9607_s10 + $0x1680] sm:$0xff] }
 0x848   : > { %v7182_v49 = vadd.f32 %v6288_v11, %v4062_v55  ;;  %v7183_v13 = vadd.f32 %v6288_v11, %v4063_v47  ;;  %v962_v21 = vld [vmem:[%s9607_s10 + $0x1690] sm:$0xff] }
 0x849   : > { %7984 = vst [vmem:[%s9625_s19 + $0x16a0] sm:$0xff] %v7204_v22  ;;  %v13366_v7 = vld [vmem:[#allocation319_spill] sm:$0xff]  ;;  %v13367_v22 = vld [vmem:[#allocation320_spill] sm:$0xff] }
 0x84a   : > { %7985 = vst [vmem:[%s9625_s19 + $0x16a8] sm:$0xff] %v7205_v48  ;;  %v4102_v12 = vmul.f32 %v13366_v7, %v982_v14  ;;  %v4103_v55 = vmul.f32 %v13366_v7, %v983_v8  ;;  %v4082_v48 = vmul.f32 %v13367_v22, %v962_v21  ;;  %v4083_v11 = vmul.f32 %v13367_v22, %v963_v61  ;;  %v1001_v22 = vld [vmem:[%s9607_s10 + $0x17c8] sm:$0xff] }
 0x84b   : > { %7964 = vst [vmem:[%s9625_s19 + $0x1600] sm:$0xff] %v7184_v33  ;;  %v961_v33 = vld [vmem:[%s9607_s10 + $0x1688] sm:$0xff] }
 0x84c   : > { %7965 = vst [vmem:[%s9625_s19 + $0x1608] sm:$0xff] %v7185_v54 }
 0x84d   : > { %7962 = vst [vmem:[%s9625_s19 + $0x15f0] sm:$0xff] %v7182_v49  ;;  %v13368_v49 = vld [vmem:[#allocation321_spill] sm:$0xff] }
 0x84e   : > { %7963 = vst [vmem:[%s9625_s19 + $0x15f8] sm:$0xff] %v7183_v13  ;;  %v6358_v53 = vpop.permute.xlu2 %6357  ;;  %v6308_v58 = vpop.permute.xlu1 %6307  ;;  %v4080_v52 = vmul.f32 %v13368_v49, %v960_v4  ;;  %v4081_v37 = vmul.f32 %v13368_v49, %v961_v33 }
 0x84f   : > { %v7210_v35 = vadd.f32 %v6358_v53, %v4090_v6  ;;  %v7211_v16 = vadd.f32 %v6358_v53, %v4091_v15  ;;  %v7190_v2 = vadd.f32 %v6308_v58, %v4070_v23  ;;  %v6303_v41 = vpop.permute.xlu0 %6302  ;;  %v7191_v60 = vadd.f32 %v6308_v58, %v4071_v5  ;;  %v988_v15 = vld [vmem:[%s9607_s10 + $0x1760] sm:$0xff]  ;;  %v969_v5 = vld [vmem:[%s9607_s10 + $0x16c8] sm:$0xff]  ;;  %v966_v53 = vld [vmem:[%s9607_s10 + $0x16b0] sm:$0xff] }
 0x850   : > { %v7188_v27 = vadd.f32 %v6303_v41, %v4068_v24  ;;  %v7189_v25 = vadd.f32 %v6303_v41, %v4069_v50  ;;  %v968_v23 = vld [vmem:[%s9607_s10 + $0x16c0] sm:$0xff]  ;;  %v13369_v58 = vld [vmem:[#allocation322_spill] sm:$0xff] }
 0x851   : > { %7990 = vst [vmem:[%s9625_s19 + $0x16d0] sm:$0xff] %v7210_v35  ;;  %v4108_v45 = vmul.f32 %v13369_v58, %v988_v15  ;;  %v4109_v24 = vmul.f32 %v13369_v58, %v989_v57  ;;  %v13370_v35 = vld [vmem:[#allocation323_spill] sm:$0xff] }
 0x852   : > { %7991 = vst [vmem:[%s9625_s19 + $0x16d8] sm:$0xff] %v7211_v16  ;;  %v4088_v16 = vmul.f32 %v13370_v35, %v968_v23  ;;  %v4089_v41 = vmul.f32 %v13370_v35, %v969_v5  ;;  %v1007_v35 = vld [vmem:[%s9607_s10 + $0x17f8] sm:$0xff] }
 0x853   : > { %7970 = vst [vmem:[%s9625_s19 + $0x1630] sm:$0xff] %v7190_v2  ;;  %v967_v2 = vld [vmem:[%s9607_s10 + $0x16b8] sm:$0xff] }
 0x854   : > { %7971 = vst [vmem:[%s9625_s19 + $0x1638] sm:$0xff] %v7191_v60 }
 0x855   : > { %7968 = vst [vmem:[%s9625_s19 + $0x1620] sm:$0xff] %v7188_v27  ;;  %v13371_v27 = vld [vmem:[#allocation324_spill] sm:$0xff] }
 0x856   : > { %7969 = vst [vmem:[%s9625_s19 + $0x1628] sm:$0xff] %v7189_v25  ;;  %v6373_v17 = vpop.permute.xlu2 %6372  ;;  %v6323_v10 = vpop.permute.xlu1 %6322  ;;  %v4086_v63 = vmul.f32 %v13371_v27, %v966_v53  ;;  %v4087_v9 = vmul.f32 %v13371_v27, %v967_v2 }
 0x857   : > { %v7216_v1 = vadd.f32 %v6373_v17, %v4096_v28  ;;  %v7217_v19 = vadd.f32 %v6373_v17, %v4097_v56  ;;  %v7196_v3 = vadd.f32 %v6323_v10, %v4076_v30  ;;  %v6318_v44 = vpop.permute.xlu0 %6317  ;;  %v7197_v29 = vadd.f32 %v6323_v10, %v4077_v59  ;;  %v994_v56 = vld [vmem:[%s9607_s10 + $0x1790] sm:$0xff]  ;;  %v975_v59 = vld [vmem:[%s9607_s10 + $0x16f8] sm:$0xff]  ;;  %v972_v17 = vld [vmem:[%s9607_s10 + $0x16e0] sm:$0xff] }
 0x858   : > { %v7194_v43 = vadd.f32 %v6318_v44, %v4074_v36  ;;  %v7195_v38 = vadd.f32 %v6318_v44, %v4075_v18  ;;  %v974_v30 = vld [vmem:[%s9607_s10 + $0x16f0] sm:$0xff]  ;;  %v13372_v10 = vld [vmem:[#allocation325_spill] sm:$0xff] }
 0x859   : > { %7996 = vst [vmem:[%s9625_s19 + $0x1700] sm:$0xff] %v7216_v1  ;;  %v4114_v26 = vmul.f32 %v13372_v10, %v994_v56  ;;  %v4115_v36 = vmul.f32 %v13372_v10, %v995_v42  ;;  %v13373_v1 = vld [vmem:[#allocation326_spill] sm:$0xff] }
 0x85a   : > { %7997 = vst [vmem:[%s9625_s19 + $0x1708] sm:$0xff] %v7217_v19  ;;  %v4094_v19 = vmul.f32 %v13373_v1, %v974_v30  ;;  %v4095_v44 = vmul.f32 %v13373_v1, %v975_v59  ;;  %v1013_v1 = vld [vmem:[%s9607_s10 + $0x1828] sm:$0xff] }
 0x85b   : > { %7976 = vst [vmem:[%s9625_s19 + $0x1660] sm:$0xff] %v7196_v3  ;;  %v973_v3 = vld [vmem:[%s9607_s10 + $0x16e8] sm:$0xff] }
 0x85c   : > { %7977 = vst [vmem:[%s9625_s19 + $0x1668] sm:$0xff] %v7197_v29 }
 0x85d   : > { %7974 = vst [vmem:[%s9625_s19 + $0x1650] sm:$0xff] %v7194_v43  ;;  %v13374_v43 = vld [vmem:[#allocation327_spill] sm:$0xff] }
 0x85e   : > { %7975 = vst [vmem:[%s9625_s19 + $0x1658] sm:$0xff] %v7195_v38  ;;  %v6388_v47 = vpop.permute.xlu2 %6387  ;;  %v6338_v54 = vpop.permute.xlu1 %6337  ;;  %v4092_v14 = vmul.f32 %v13374_v43, %v972_v17  ;;  %v4093_v4 = vmul.f32 %v13374_v43, %v973_v3 }
 0x85f   : > { %v7222_v62 = vadd.f32 %v6388_v47, %v4102_v12  ;;  %v7223_v34 = vadd.f32 %v6388_v47, %v4103_v55  ;;  %v7202_v13 = vadd.f32 %v6338_v54, %v4082_v48  ;;  %v6333_v39 = vpop.permute.xlu0 %6332  ;;  %v7203_v46 = vadd.f32 %v6338_v54, %v4083_v11  ;;  %v1000_v55 = vld [vmem:[%s9607_s10 + $0x17c0] sm:$0xff]  ;;  %v981_v11 = vld [vmem:[%s9607_s10 + $0x1728] sm:$0xff]  ;;  %v978_v47 = vld [vmem:[%s9607_s10 + $0x1710] sm:$0xff] }
 0x860   : > { %v7200_v6 = vadd.f32 %v6333_v39, %v4080_v52  ;;  %v7201_v20 = vadd.f32 %v6333_v39, %v4081_v37  ;;  %v980_v48 = vld [vmem:[%s9607_s10 + $0x1720] sm:$0xff]  ;;  %v13375_v54 = vld [vmem:[#allocation328_spill] sm:$0xff] }
 0x861   : > { %8002 = vst [vmem:[%s9625_s19 + $0x1730] sm:$0xff] %v7222_v62  ;;  %v4120_v49 = vmul.f32 %v13375_v54, %v1000_v55  ;;  %v4121_v52 = vmul.f32 %v13375_v54, %v1001_v22  ;;  %v13376_v62 = vld [vmem:[#allocation329_spill] sm:$0xff] }
 0x862   : > { %8003 = vst [vmem:[%s9625_s19 + $0x1738] sm:$0xff] %v7223_v34  ;;  %v4100_v34 = vmul.f32 %v13376_v62, %v980_v48  ;;  %v4101_v39 = vmul.f32 %v13376_v62, %v981_v11 }
 0x863   : > { %7982 = vst [vmem:[%s9625_s19 + $0x1690] sm:$0xff] %v7202_v13  ;;  %v979_v13 = vld [vmem:[%s9607_s10 + $0x1718] sm:$0xff] }
 0x864   : > { %7983 = vst [vmem:[%s9625_s19 + $0x1698] sm:$0xff] %v7203_v46 }
 0x865   : > { %7980 = vst [vmem:[%s9625_s19 + $0x1680] sm:$0xff] %v7200_v6  ;;  %v13377_v6 = vld [vmem:[#allocation330_spill] sm:$0xff] }
 0x866   : > { %7981 = vst [vmem:[%s9625_s19 + $0x1688] sm:$0xff] %v7201_v20  ;;  %v6403_v50 = vpop.permute.xlu2 %6402  ;;  %v6353_v60 = vpop.permute.xlu1 %6352  ;;  %v4098_v15 = vmul.f32 %v13377_v6, %v978_v47  ;;  %v4099_v53 = vmul.f32 %v13377_v6, %v979_v13  ;;  %v1019_v13 = vld [vmem:[%s9607_s10 + $0x1858] sm:$0xff] }
 0x867   : > { %v7228_v31 = vadd.f32 %v6403_v50, %v4108_v45  ;;  %v7229_v40 = vadd.f32 %v6403_v50, %v4109_v24  ;;  %v7208_v25 = vadd.f32 %v6353_v60, %v4088_v16  ;;  %v6348_v0 = vpop.permute.xlu0 %6347  ;;  %v7209_v51 = vadd.f32 %v6353_v60, %v4089_v41  ;;  %v1006_v24 = vld [vmem:[%s9607_s10 + $0x17f0] sm:$0xff]  ;;  %v987_v41 = vld [vmem:[%s9607_s10 + $0x1758] sm:$0xff]  ;;  %v984_v50 = vld [vmem:[%s9607_s10 + $0x1740] sm:$0xff] }
 0x868   : > { %v7206_v28 = vadd.f32 %v6348_v0, %v4086_v63  ;;  %v7207_v32 = vadd.f32 %v6348_v0, %v4087_v9  ;;  %v986_v16 = vld [vmem:[%s9607_s10 + $0x1750] sm:$0xff] }
 0x869   : > { %8008 = vst [vmem:[%s9625_s19 + $0x1760] sm:$0xff] %v7228_v31  ;;  %v13378_v60 = vld [vmem:[#allocation331_spill] sm:$0xff]  ;;  %v13379_v31 = vld [vmem:[#allocation332_spill] sm:$0xff] }
 0x86a   : > { %8009 = vst [vmem:[%s9625_s19 + $0x1768] sm:$0xff] %v7229_v40  ;;  %v4126_v27 = vmul.f32 %v13378_v60, %v1006_v24  ;;  %v4127_v63 = vmul.f32 %v13378_v60, %v1007_v35  ;;  %v4106_v40 = vmul.f32 %v13379_v31, %v986_v16  ;;  %v4107_v0 = vmul.f32 %v13379_v31, %v987_v41  ;;  %v1005_v31 = vld [vmem:[%s9607_s10 + $0x17e8] sm:$0xff] }
 0x86b   : > { %7988 = vst [vmem:[%s9625_s19 + $0x16c0] sm:$0xff] %v7208_v25  ;;  %v985_v25 = vld [vmem:[%s9607_s10 + $0x1748] sm:$0xff] }
 0x86c   : > { %7989 = vst [vmem:[%s9625_s19 + $0x16c8] sm:$0xff] %v7209_v51 }
 0x86d   : > { %7986 = vst [vmem:[%s9625_s19 + $0x16b0] sm:$0xff] %v7206_v28  ;;  %v13380_v28 = vld [vmem:[#allocation333_spill] sm:$0xff] }
 0x86e   : > { %7987 = vst [vmem:[%s9625_s19 + $0x16b8] sm:$0xff] %v7207_v32  ;;  %v6418_v18 = vpop.permute.xlu2 %6417  ;;  %v6368_v29 = vpop.permute.xlu1 %6367  ;;  %v4104_v56 = vmul.f32 %v13380_v28, %v984_v50  ;;  %v4105_v17 = vmul.f32 %v13380_v28, %v985_v25  ;;  %v1002_v25 = vld [vmem:[%s9607_s10 + $0x17d0] sm:$0xff] }
 0x86f   : > { %v7234_v8 = vadd.f32 %v6418_v18, %v4114_v26  ;;  %v7235_v21 = vadd.f32 %v6418_v18, %v4115_v36  ;;  %v7214_v38 = vadd.f32 %v6368_v29, %v4094_v19  ;;  %v6363_v61 = vpop.permute.xlu0 %6362  ;;  %v7215_v7 = vadd.f32 %v6368_v29, %v4095_v44  ;;  %v1012_v36 = vld [vmem:[%s9607_s10 + $0x1820] sm:$0xff]  ;;  %v993_v44 = vld [vmem:[%s9607_s10 + $0x1788] sm:$0xff]  ;;  %v990_v18 = vld [vmem:[%s9607_s10 + $0x1770] sm:$0xff] }
 0x870   : > { %v7212_v12 = vadd.f32 %v6363_v61, %v4092_v14  ;;  %v7213_v33 = vadd.f32 %v6363_v61, %v4093_v4  ;;  %v992_v19 = vld [vmem:[%s9607_s10 + $0x1780] sm:$0xff]  ;;  %v13381_v29 = vld [vmem:[#allocation334_spill] sm:$0xff] }
 0x871   : > { %8014 = vst [vmem:[%s9625_s19 + $0x1790] sm:$0xff] %v7234_v8  ;;  %v4132_v43 = vmul.f32 %v13381_v29, %v1012_v36  ;;  %v4133_v14 = vmul.f32 %v13381_v29, %v1013_v1  ;;  %v13382_v8 = vld [vmem:[#allocation335_spill] sm:$0xff] }
 0x872   : > { %8015 = vst [vmem:[%s9625_s19 + $0x1798] sm:$0xff] %v7235_v21  ;;  %v4112_v21 = vmul.f32 %v13382_v8, %v992_v19  ;;  %v4113_v61 = vmul.f32 %v13382_v8, %v993_v44  ;;  %v1010_v1 = vld [vmem:[%s9607_s10 + $0x1810] sm:$0xff]  ;;  %v1011_v19 = vld [vmem:[%s9607_s10 + $0x1818] sm:$0xff]  ;;  %v1009_v44 = vld [vmem:[%s9607_s10 + $0x1808] sm:$0xff] }
 0x873   : > { %7994 = vst [vmem:[%s9625_s19 + $0x16f0] sm:$0xff] %v7214_v38  ;;  %v991_v38 = vld [vmem:[%s9607_s10 + $0x1778] sm:$0xff] }
 0x874   : > { %7995 = vst [vmem:[%s9625_s19 + $0x16f8] sm:$0xff] %v7215_v7 }
 0x875   : > { %7992 = vst [vmem:[%s9625_s19 + $0x16e0] sm:$0xff] %v7212_v12  ;;  %v13383_v12 = vld [vmem:[#allocation336_spill] sm:$0xff] }
 0x876   : > { %7993 = vst [vmem:[%s9625_s19 + $0x16e8] sm:$0xff] %v7213_v33  ;;  %v6433_v37 = vpop.permute.xlu2 %6432  ;;  %v6383_v46 = vpop.permute.xlu1 %6382  ;;  %v4110_v55 = vmul.f32 %v13383_v12, %v990_v18  ;;  %v4111_v47 = vmul.f32 %v13383_v12, %v991_v38  ;;  %v13389_v18 = vld [vmem:[#allocation342_spill] sm:$0xff] }
 0x877   : > { %v7240_v57 = vadd.f32 %v6433_v37, %v4120_v49  ;;  %v7241_v23 = vadd.f32 %v6433_v37, %v4121_v52  ;;  %v7220_v20 = vadd.f32 %v6383_v46, %v4100_v34  ;;  %v6378_v5 = vpop.permute.xlu0 %6377  ;;  %v7221_v58 = vadd.f32 %v6383_v46, %v4101_v39  ;;  %v998_v52 = vld [vmem:[%s9607_s10 + $0x17b0] sm:$0xff]  ;;  %v999_v39 = vld [vmem:[%s9607_s10 + $0x17b8] sm:$0xff]  ;;  %v996_v37 = vld [vmem:[%s9607_s10 + $0x17a0] sm:$0xff] }
 0x878   : > { %v7218_v45 = vadd.f32 %v6378_v5, %v4098_v15  ;;  %v7219_v2 = vadd.f32 %v6378_v5, %v4099_v53  ;;  %v1018_v34 = vld [vmem:[%s9607_s10 + $0x1850] sm:$0xff]  ;;  %v13384_v46 = vld [vmem:[#allocation338_spill] sm:$0xff]  ;;  %v4130_v29 = vmul.f32 %v13389_v18, %v1010_v1 }
 0x879   : > { %8020 = vst [vmem:[%s9625_s19 + $0x17c0] sm:$0xff] %v7240_v57  ;;  %v4118_v6 = vmul.f32 %v13384_v46, %v998_v52  ;;  %v997_v15 = vld [vmem:[%s9607_s10 + $0x17a8] sm:$0xff]  ;;  %v13385_v57 = vld [vmem:[#allocation337_spill] sm:$0xff]  ;;  %v4119_v5 = vmul.f32 %v13384_v46, %v999_v39 }
 0x87a   : > { %8021 = vst [vmem:[%s9625_s19 + $0x17c8] sm:$0xff] %v7241_v23  ;;  %v4138_v23 = vmul.f32 %v13385_v57, %v1018_v34 }
 0x87b   : > { %8000 = vst [vmem:[%s9625_s19 + $0x1720] sm:$0xff] %v7220_v20  ;;  %v4139_v20 = vmul.f32 %v13385_v57, %v1019_v13 }
 0x87c   : > { %8001 = vst [vmem:[%s9625_s19 + $0x1728] sm:$0xff] %v7221_v58 }
 0x87d   : > { %7998 = vst [vmem:[%s9625_s19 + $0x1710] sm:$0xff] %v7218_v45  ;;  %v13386_v45 = vld [vmem:[#allocation339_spill] sm:$0xff] }
 0x87e   : > { %7999 = vst [vmem:[%s9625_s19 + $0x1718] sm:$0xff] %v7219_v2  ;;  %v6448_v9 = vpop.permute.xlu2 %6447  ;;  %v6398_v51 = vpop.permute.xlu1 %6397  ;;  %v4116_v24 = vmul.f32 %v13386_v45, %v996_v37  ;;  %v4117_v50 = vmul.f32 %v13386_v45, %v997_v15 }
 0x87f   : > { %v7246_v42 = vadd.f32 %v6448_v9, %v4126_v27  ;;  %v7247_v30 = vadd.f32 %v6448_v9, %v4127_v63  ;;  %v7226_v32 = vadd.f32 %v6398_v51, %v4106_v40  ;;  %v6393_v59 = vpop.permute.xlu0 %6392  ;;  %v7227_v10 = vadd.f32 %v6398_v51, %v4107_v0  ;;  %v1004_v63 = vld [vmem:[%s9607_s10 + $0x17e0] sm:$0xff]  ;;  %v1003_v0 = vld [vmem:[%s9607_s10 + $0x17d8] sm:$0xff] }
 0x880   : > { %v7224_v26 = vadd.f32 %v6393_v59, %v4104_v56  ;;  %v7225_v3 = vadd.f32 %v6393_v59, %v4105_v17  ;;  %v13387_v9 = vld [vmem:[#allocation340_spill] sm:$0xff]  ;;  %v13388_v56 = vld [vmem:[#allocation341_spill] sm:$0xff] }
 0x881   : > { %8026 = vst [vmem:[%s9625_s19 + $0x17f0] sm:$0xff] %v7246_v42  ;;  %v4124_v51 = vmul.f32 %v13387_v9, %v1004_v63  ;;  %v4125_v28 = vmul.f32 %v13387_v9, %v1005_v31  ;;  %v4122_v42 = vmul.f32 %v13388_v56, %v1002_v25 }
 0x882   : > { %8027 = vst [vmem:[%s9625_s19 + $0x17f8] sm:$0xff] %v7247_v30  ;;  %v4123_v30 = vmul.f32 %v13388_v56, %v1003_v0 }
 0x883   : > { %8006 = vst [vmem:[%s9625_s19 + $0x1750] sm:$0xff] %v7226_v32 }
 0x884   : > { %8007 = vst [vmem:[%s9625_s19 + $0x1758] sm:$0xff] %v7227_v10 }
 0x885   : > { %8004 = vst [vmem:[%s9625_s19 + $0x1740] sm:$0xff] %v7224_v26 }
 0x886   : > { %8005 = vst [vmem:[%s9625_s19 + $0x1748] sm:$0xff] %v7225_v3  ;;  %v6463_v4 = vpop.permute.xlu2 %6462  ;;  %v6413_v7 = vpop.permute.xlu1 %6412  ;;  %v1008_v3 = vld [vmem:[%s9607_s10 + $0x1800] sm:$0xff] }
 0x887   : > { %v7252_v22 = vadd.f32 %v6463_v4, %v4132_v43  ;;  %v7253_v48 = vadd.f32 %v6463_v4, %v4133_v14  ;;  %v7232_v33 = vadd.f32 %v6413_v7, %v4112_v21  ;;  %v6408_v11 = vpop.permute.xlu0 %6407  ;;  %v7233_v54 = vadd.f32 %v6413_v7, %v4113_v61  ;;  %v13390_v14 = vld [vmem:[#allocation343_spill] sm:$0xff] }
 0x888   : > { %v7230_v49 = vadd.f32 %v6408_v11, %v4110_v55  ;;  %v7231_v62 = vadd.f32 %v6408_v11, %v4111_v47  ;;  %v4131_v43 = vmul.f32 %v13389_v18, %v1011_v19  ;;  %v4128_v8 = vmul.f32 %v13390_v14, %v1008_v3  ;;  %v1015_v11 = vld [vmem:[%s9607_s10 + $0x1838] sm:$0xff] }
 0x889   : > { %8032 = vst [vmem:[%s9625_s19 + $0x1820] sm:$0xff] %v7252_v22  ;;  %v4129_v21 = vmul.f32 %v13390_v14, %v1009_v44  ;;  %v1016_v22 = vld [vmem:[%s9607_s10 + $0x1840] sm:$0xff]  ;;  %v13391_v47 = vld [vmem:[#allocation344_spill] sm:$0xff] }
 0x88a   : > { %8033 = vst [vmem:[%s9625_s19 + $0x1828] sm:$0xff] %v7253_v48  ;;  %v1017_v48 = vld [vmem:[%s9607_s10 + $0x1848] sm:$0xff] }
 0x88b   : > { %8012 = vst [vmem:[%s9625_s19 + $0x1780] sm:$0xff] %v7232_v33  ;;  %v1014_v33 = vld [vmem:[%s9607_s10 + $0x1830] sm:$0xff] }
 0x88c   : > { %8013 = vst [vmem:[%s9625_s19 + $0x1788] sm:$0xff] %v7233_v54  ;;  %v4136_v54 = vmul.f32 %v13391_v47, %v1016_v22 }
 0x88d   : > { %8010 = vst [vmem:[%s9625_s19 + $0x1770] sm:$0xff] %v7230_v49  ;;  %v4137_v49 = vmul.f32 %v13391_v47, %v1017_v48 }
 0x88e   : > { %8011 = vst [vmem:[%s9625_s19 + $0x1778] sm:$0xff] %v7231_v62  ;;  %v6478_v53 = vpop.permute.xlu2 %6477  ;;  %v6428_v58 = vpop.permute.xlu1 %6427  ;;  %v13392_v62 = vld [vmem:[#allocation345_spill] sm:$0xff] }
 0x88f   : > { %v7258_v35 = vadd.f32 %v6478_v53, %v4138_v23  ;;  %v7259_v16 = vadd.f32 %v6478_v53, %v4139_v20  ;;  %v7238_v2 = vadd.f32 %v6428_v58, %v4118_v6  ;;  %v6423_v41 = vpop.permute.xlu0 %6422  ;;  %v7239_v60 = vadd.f32 %v6428_v58, %v4119_v5 }
 0x890   : > { %v7236_v27 = vadd.f32 %v6423_v41, %v4116_v24  ;;  %v7237_v40 = vadd.f32 %v6423_v41, %v4117_v50  ;;  %v4134_v34 = vmul.f32 %v13392_v62, %v1014_v33  ;;  %v4135_v13 = vmul.f32 %v13392_v62, %v1015_v11 }
 0x891   : > { %8038 = vst [vmem:[%s9625_s19 + $0x1850] sm:$0xff] %v7258_v35 }
 0x892   : > { %8039 = vst [vmem:[%s9625_s19 + $0x1858] sm:$0xff] %v7259_v16 }
 0x893   : > { %8018 = vst [vmem:[%s9625_s19 + $0x17b0] sm:$0xff] %v7238_v2 }
 0x894   : > { %8019 = vst [vmem:[%s9625_s19 + $0x17b8] sm:$0xff] %v7239_v60 }
 0x895   : > { %8016 = vst [vmem:[%s9625_s19 + $0x17a0] sm:$0xff] %v7236_v27 }
 0x896   : > { %8017 = vst [vmem:[%s9625_s19 + $0x17a8] sm:$0xff] %v7237_v40  ;;  %v6443_v32 = vpop.permute.xlu1 %6442 }
 0x897   : > { %v7244_v59 = vadd.f32 %v6443_v32, %v4124_v51  ;;  %v7245_v17 = vadd.f32 %v6443_v32, %v4125_v28  ;;  %v6438_v10 = vpop.permute.xlu0 %6437 }
 0x898   : > { %v7242_v26 = vadd.f32 %v6438_v10, %v4122_v42  ;;  %v7243_v36 = vadd.f32 %v6438_v10, %v4123_v30 }
 0x899   : > { %8024 = vst [vmem:[%s9625_s19 + $0x17e0] sm:$0xff] %v7244_v59 }
 0x89a   : > { %8025 = vst [vmem:[%s9625_s19 + $0x17e8] sm:$0xff] %v7245_v17 }
 0x89b   : > { %8022 = vst [vmem:[%s9625_s19 + $0x17d0] sm:$0xff] %v7242_v26 }
 0x89c   : > { %8023 = vst [vmem:[%s9625_s19 + $0x17d8] sm:$0xff] %v7243_v36 }
 0x89e   : > { %v6458_v38 = vpop.permute.xlu1 %6457 }
 0x89f   : > { %v7250_v61 = vadd.f32 %v6458_v38, %v4130_v29  ;;  %v7251_v4 = vadd.f32 %v6458_v38, %v4131_v43  ;;  %v6453_v7 = vpop.permute.xlu0 %6452 }
 0x8a0   : > { %v7248_v12 = vadd.f32 %v6453_v7, %v4128_v8  ;;  %v7249_v55 = vadd.f32 %v6453_v7, %v4129_v21 }
 0x8a1   : > { %8030 = vst [vmem:[%s9625_s19 + $0x1810] sm:$0xff] %v7250_v61 }
 0x8a2   : > { %8031 = vst [vmem:[%s9625_s19 + $0x1818] sm:$0xff] %v7251_v4 }
 0x8a3   : > { %8028 = vst [vmem:[%s9625_s19 + $0x1800] sm:$0xff] %v7248_v12 }
 0x8a4   : > { %8029 = vst [vmem:[%s9625_s19 + $0x1808] sm:$0xff] %v7249_v55 }
 0x8a6   : > { %v6473_v52 = vpop.permute.xlu1 %6472 }
 0x8a7   : > { %v7256_v39 = vadd.f32 %v6473_v52, %v4136_v54  ;;  %v7257_v37 = vadd.f32 %v6473_v52, %v4137_v49  ;;  %v6468_v46 = vpop.permute.xlu0 %6467 }
 0x8a8   : > { %v7254_v6 = vadd.f32 %v6468_v46, %v4134_v34  ;;  %v7255_v15 = vadd.f32 %v6468_v46, %v4135_v13 }
 0x8a9   : > { %8036 = vst [vmem:[%s9625_s19 + $0x1840] sm:$0xff] %v7256_v39 }
 0x8aa   : > { %8037 = vst [vmem:[%s9625_s19 + $0x1848] sm:$0xff] %v7257_v37 }
 0x8ab   : > { %8034 = vst [vmem:[%s9625_s19 + $0x1830] sm:$0xff] %v7254_v6 }
 0x8ac   : > { %8035 = vst [vmem:[%s9625_s19 + $0x1838] sm:$0xff] %v7255_v15 }
 0x8ad   : > { %8264 = shalt.err (!%p8261_p5)
}
 0x8ae   : > { %s8318_s10 = smov 256   ;;  %s8319_s11 = smov 16  }
 0x8af   : > { %8176 = dma.vmem_to_hbm [thread:$0]  (%p8380_p4), %s8056_s15, 99840, %s8058_s28, %s8041_s29, %s8318_s10, %s8318_s10, %s8319_s11  }
 0x8b0 PF: > { %p8182_p6 = scmp.ge.s32.totalorder %s8315_s17, 2  ;;  %s8072_s18 = sand.u32 1, %s8295_s12  }
 0x8b1   : > { %s8073_s19 = scalar_lea.sflag [#allocation3], %s8072_s18 }
 0x8b2   : > { %p8179_p7 = pnand %p8182_p6, %p8387_p8 }
 0x8b4   : > { %p8180_p9 = pneg %p8179_p7 }
 0x8b6   : > { %8290 = dma.done.wait (%p8180_p9), %s8073_s19, 99840  }
 0x8b7   : > { %8292 = vsyncadd (%p8180_p9), %s8073_s19, 4294867456  ;;  %s16_s17 = sadd.s32 1, %s8315_s17   ;;  %s13393_s12 = smov %s8299_s13 }
 0x8b8   : > { %p13_p10 = scmp.ge.s32.totalorder %s16_s17, 4   ;;  %s13394_s13 = smov %s8303_s14 }
 0x8b9   : > { %s13395_s14 = smov %s8393_s25  ;;  %s13396_s15 = smov %s8311_s16 }
 0x8ba   : > { %s13397_s16 = smov %s13399_s20  ;;  %15 = sbr.rel (!%p13_p10) target bundleno = 4 (0x4), region = 73 }
 0x8bf   :  { %8079 = vsyncpa [#allocation3], 1 }
 0x8c0   :  { %8081 = vsyncpa [#allocation3 + $0x1], 1 }

</bundles_post_ra>
